<compile_context>
chip_gen: v7x
topology: tpu7x:2x2x1
jax: 0.10.0
libtpu: 0.0.40
codegen_flags: <defaults>
</compile_context>

<pallas_src>
import functools

import jax
import jax.numpy as jnp
from jax import lax
from jax.experimental import pallas as pl
from jax.experimental.pallas import tpu as pltpu

GN_GROUPS = 32
GN_EPS = 1e-5
# MXU operand dtype for the convolutions / residual projection. Accumulation and
# all GroupNorm statistics remain f32.
MATMUL_DTYPE = jnp.bfloat16

# W is the sublane axis of the (H+2, Wp, C) halo scratch; align the interior write to a
# full sublane tile (bf16 packs 16 rows per vreg, f32 packs 8).
_PAD_L = 16 if jnp.dtype(MATMUL_DTYPE).itemsize == 2 else 8
_PAD_R = 1
# Above this channel count K=C already feeds the MXU well; skip the im2col concat.
_KFOLD_MAX_C = 256


# ---------------------------------------------------------------------------
# In-kernel helpers
# ---------------------------------------------------------------------------
def _group_norm_silu(x2d, gamma, beta, agg, scat, n_per_group):
    """GroupNorm(32) + SiLU on a (H*W, C) f32 block.

    Per-channel sum and sum-of-squares are stacked into a single (2, C) operand,
    reduced per-group with a (C, G) membership matmul, and broadcast back to the
    channels with its (G, C) transpose (all f32, tiny MXU work).
    """
    s = jnp.sum(x2d, axis=0, keepdims=True)            # (1, C)
    s2 = jnp.sum(x2d * x2d, axis=0, keepdims=True)     # (1, C)
    stats = jnp.concatenate([s, s2], axis=0)           # (2, C)
    g = jnp.dot(stats, agg, preferred_element_type=jnp.float32)   # (2, G)
    g = jnp.dot(g, scat, preferred_element_type=jnp.float32)      # (2, C)
    inv_n = 1.0 / float(n_per_group)
    mean = g[0:1, :] * inv_n
    ex2 = g[1:2, :] * inv_n
    var = jnp.maximum(ex2 - mean * mean, 0.0)          # clamp f32 cancellation
    inv = lax.rsqrt(var + GN_EPS)
    y = (x2d - mean) * (inv * gamma) + beta
    return y * jax.nn.sigmoid(y)                       # SiLU


def _conv3x3_from_padded(xp_ref, w_ref, bias, H, W, C, Cout, fold):
    """3x3 'same' conv read from a zero-padded (H+2, W+_PAD_L+_PAD_R, C) bf16 scratch.

    fold=True : the dx taps are concatenated into the contraction axis; one matmul
                per dy with K = 3*C (good when C is small).
    fold=False: 9 matmuls with K = C read straight from the sliced views (no im2col
                temporary; preferred when C >= 256 since K=C already fills the MXU).
    w_ref: (3, 3*C, Cout) if fold else (9, C, Cout), MATMUL_DTYPE.  bias: (1, Cout) f32.
    """
    acc = None
    for dy in range(3):
        rows = xp_ref[dy:dy + H, :, :]                                   # (H, Wp, C) bf16
        if fold:
            taps = [rows[:, _PAD_L - 1 + dx:_PAD_L - 1 + dx + W, :].reshape(H * W, C)
                    for dx in range(3)]
            patch = jnp.concatenate(taps, axis=-1)                       # (H*W, 3*C) bf16
            part = jnp.dot(patch, w_ref[dy], preferred_element_type=jnp.float32)
            acc = part if acc is None else acc + part
        else:
            for dx in range(3):
                tap = rows[:, _PAD_L - 1 + dx:_PAD_L - 1 + dx + W, :].reshape(H * W, C)
                part = jnp.dot(tap, w_ref[dy * 3 + dx],
                               preferred_element_type=jnp.float32)
                acc = part if acc is None else acc + part
    return acc + bias


# ---------------------------------------------------------------------------
# Fused kernel
# ---------------------------------------------------------------------------
def _fused_resblock_kernel(has_proj, fold1, fold2, *refs):
    if has_proj:
        (x_ref, g1_ref, be1_ref, a1_ref, s1_ref, w1_ref, b1_ref,
         g2_ref, be2_ref, a2_ref, s2_ref, w2_ref, b2_ref,
         wr_ref, br_ref, o_ref, xp1_ref, xp2_ref) = refs
    else:
        (x_ref, g1_ref, be1_ref, a1_ref, s1_ref, w1_ref, b1_ref,
         g2_ref, be2_ref, a2_ref, s2_ref, w2_ref, b2_ref,
         o_ref, xp1_ref, xp2_ref) = refs

    H, W, Cin = x_ref.shape[1], x_ref.shape[2], x_ref.shape[3]
    Cout = o_ref.shape[3]

    # Zero the halo scratches ONCE; the interior is fully overwritten every step, so
    # the 1-pixel border (the only part the conv taps read outside the interior)
    # stays zero across grid iterations.
    @pl.when(pl.program_id(0) == 0)
    def _init_halo():
        xp1_ref[...] = jnp.zeros(xp1_ref.shape, xp1_ref.dtype)
        xp2_ref[...] = jnp.zeros(xp2_ref.shape, xp2_ref.dtype)

    x2d = x_ref[0].astype(jnp.float32).reshape(H * W, Cin)

    # ---- GroupNorm 1 + SiLU -> sublane-aligned interior of the bf16 halo scratch ----
    h1 = _group_norm_silu(x2d, g1_ref[...], be1_ref[...], a1_ref[...], s1_ref[...],
                          (Cin // GN_GROUPS) * H * W)
    xp1_ref[1:H + 1, _PAD_L:_PAD_L + W, :] = (
        h1.reshape(H, W, Cin).astype(xp1_ref.dtype))

    # ---- Conv 3x3 #1 (intermediate stays in VMEM, f32 accumulation) ----
    c1 = _conv3x3_from_padded(xp1_ref, w1_ref, b1_ref[...], H, W, Cin, Cout, fold1)

    # ---- GroupNorm 2 + SiLU -> second halo scratch ----
    h2 = _group_norm_silu(c1, g2_ref[...], be2_ref[...], a2_ref[...], s2_ref[...],
                          (Cout // GN_GROUPS) * H * W)
    xp2_ref[1:H + 1, _PAD_L:_PAD_L + W, :] = (
        h2.reshape(H, W, Cout).astype(xp2_ref.dtype))

    # ---- Conv 3x3 #2 + residual (x already resident in VMEM) ----
    out = _conv3x3_from_padded(xp2_ref, w2_ref, b2_ref[...], H, W, Cout, Cout, fold2)
    if has_proj:
        out = out + jnp.dot(x2d.astype(MATMUL_DTYPE), wr_ref[...],
                            preferred_element_type=jnp.float32) + br_ref[...]
    else:
        out = out + x2d
    o_ref[0] = out.reshape(H, W, Cout).astype(o_ref.dtype)


# ---------------------------------------------------------------------------
# Wrappers
# ---------------------------------------------------------------------------
def _group_matrices(C):
    gs = C // GN_GROUPS
    grp = jnp.arange(C) // gs
    agg = (grp[:, None] == jnp.arange(GN_GROUPS)[None, :]).astype(jnp.float32)  # (C, G)
    return agg, agg.T                                                            # (C,G), (G,C)


def _vmem_limit_bytes(H, W, Cin, Cout, act_itemsize):
    """Size the scoped-VMEM limit from the actual per-step footprint, capped by HW."""
    Wp = W + _PAD_L + _PAD_R
    blocks = 2 * H * W * (Cin + Cout) * act_itemsize                    # double-buffered x/out
    weights = 2 * 2 * (9 * Cin * Cout + 9 * Cout * Cout + Cin * Cout)   # bf16, double-buffered
    scratch = (H + 2) * Wp * (Cin + Cout) * 2                           # bf16 halo scratches
    temps = 6 * H * W * max(Cin, Cout) * 4                              # f32 GN/conv temporaries
    need = blocks + weights + scratch + temps + (4 << 20)               # headroom
    try:
        cap = int(pltpu.get_tpu_info().vmem_capacity_bytes)
    except Exception:  # pragma: no cover - conservative fallback (v7x per-core VMEM)
        cap = 64 * 1024 * 1024
    return int(max(32 * 1024 * 1024, min(need, int(cap * 0.85))))


@jax.jit
def vae_residual_block_nhwc(x, params):
    """Fused VAE residual block on an NHWC activation (preferred hot-path entry)."""
    N, H, W, Cin = x.shape
    Cout = params["w1"].shape[-1]
    assert Cin % GN_GROUPS == 0 and Cout % GN_GROUPS == 0
    has_proj = Cin != Cout
    fold1 = Cin < _KFOLD_MAX_C    # im2col K-fold only when the contraction is small
    fold2 = Cout < _KFOLD_MAX_C

    agg1, scat1 = _group_matrices(Cin)
    agg2, scat2 = _group_matrices(Cout)

    f32 = jnp.float32
    w1 = params["w1"].astype(MATMUL_DTYPE)                       # HWIO (3,3,Cin,Cout)
    w1 = w1.reshape(3, 3 * Cin, Cout) if fold1 else w1.reshape(9, Cin, Cout)
    w2 = params["w2"].astype(MATMUL_DTYPE)
    w2 = w2.reshape(3, 3 * Cout, Cout) if fold2 else w2.reshape(9, Cout, Cout)
    b1 = params["b1"].reshape(1, Cout).astype(f32)
    b2 = params["b2"].reshape(1, Cout).astype(f32)
    g1 = params["gn1_g"].reshape(1, Cin).astype(f32)
    be1 = params["gn1_b"].reshape(1, Cin).astype(f32)
    g2 = params["gn2_g"].reshape(1, Cout).astype(f32)
    be2 = params["gn2_b"].reshape(1, Cout).astype(f32)

    def full(shape):
        return pl.BlockSpec(shape, lambda n, _s=len(shape): (0,) * _s)

    in_specs = [
        pl.BlockSpec((1, H, W, Cin), lambda n: (n, 0, 0, 0)),        # x
        full((1, Cin)), full((1, Cin)),                              # gn1 gamma/beta
        full((Cin, GN_GROUPS)), full((GN_GROUPS, Cin)),              # gn1 agg / scatter
        full(tuple(w1.shape)), full((1, Cout)),                      # conv1 w / b
        full((1, Cout)), full((1, Cout)),                            # gn2 gamma/beta
        full((Cout, GN_GROUPS)), full((GN_GROUPS, Cout)),            # gn2 agg / scatter
        full(tuple(w2.shape)), full((1, Cout)),                      # conv2 w / b
    ]
    args = [x, g1, be1, agg1, scat1, w1, b1, g2, be2, agg2, scat2, w2, b2]
    if has_proj:
        in_specs += [full((Cin, Cout)), full((1, Cout))]
        args += [params["w_res"].astype(MATMUL_DTYPE),
                 params["b_res"].reshape(1, Cout).astype(f32)]

    Wp = W + _PAD_L + _PAD_R
    return pl.pallas_call(
        functools.partial(_fused_resblock_kernel, has_proj, fold1, fold2),
        out_shape=jax.ShapeDtypeStruct((N, H, W, Cout), x.dtype),
        grid=(N,),
        in_specs=in_specs,
        out_specs=pl.BlockSpec((1, H, W, Cout), lambda n: (n, 0, 0, 0)),
        scratch_shapes=[
            pltpu.VMEM((H + 2, Wp, Cin), MATMUL_DTYPE),   # padded GN1+SiLU output (bf16)
            pltpu.VMEM((H + 2, Wp, Cout), MATMUL_DTYPE),  # padded GN2+SiLU output (bf16)
        ],
        compiler_params=pltpu.CompilerParams(
            dimension_semantics=("parallel",),
            vmem_limit_bytes=_vmem_limit_bytes(H, W, Cin, Cout, x.dtype.itemsize),
        ),
    )(*args)


@jax.jit
def vae_residual_block(x_nchw, params):
    """PyTorch-layout (NCHW) entry point; single transpose in/out around the fused kernel."""
    x = jnp.transpose(x_nchw, (0, 2, 3, 1))
    out = vae_residual_block_nhwc(x, params)
    return jnp.transpose(out, (0, 3, 1, 2))


# ---------------------------------------------------------------------------
# Pure-JAX f32 reference (matches the PyTorch module semantics)
# ---------------------------------------------------------------------------
def reference_forward(x_nchw, params):
    x = jnp.transpose(x_nchw, (0, 2, 3, 1)).astype(jnp.float32)

    def gn(v, g, b):
        N, H, W, C = v.shape
        vg = v.reshape(N, H, W, GN_GROUPS, C // GN_GROUPS)
        mean = vg.mean(axis=(1, 2, 4), keepdims=True)
        var = vg.var(axis=(1, 2, 4), keepdims=True)
        vn = ((vg - mean) / jnp.sqrt(var + GN_EPS)).reshape(N, H, W, C)
        return vn * g + b

    def silu(v):
        return v * jax.nn.sigmoid(v)

    def conv(v, w, b):
        return lax.conv_general_dilated(
            v, w, (1, 1), "SAME",
            dimension_numbers=("NHWC", "HWIO", "NHWC")) + b

    h = silu(gn(x, params["gn1_g"], params["gn1_b"]))
    h = conv(h, params["w1"], params["b1"])
    h = silu(gn(h, params["gn2_g"], params["gn2_b"]))
    h = conv(h, params["w2"], params["b2"])

    Cin, Cout = x.shape[-1], params["w1"].shape[-1]
    if Cin == Cout:
        res = x
    else:
        res = jnp.einsum("nhwc,co->nhwo", x, params["w_res"]) + params["b_res"]
    return jnp.transpose(h + res, (0, 3, 1, 2))


# ---------------------------------------------------------------------------
# Main
# ---------------------------------------------------------------------------
def _make_params(key, Cin, Cout):
    ks = jax.random.split(key, 10)
    p = {
        "gn1_g": 1.0 + 0.1 * jax.random.normal(ks[0], (Cin,), jnp.float32),
        "gn1_b": 0.1 * jax.random.normal(ks[1], (Cin,), jnp.float32),
        "w1":    0.1 * jax.random.normal(ks[2], (3, 3, Cin, Cout), jnp.float32),   # HWIO
        "b1":    0.1 * jax.random.normal(ks[3], (Cout,), jnp.float32),
        "gn2_g": 1.0 + 0.1 * jax.random.normal(ks[4], (Cout,), jnp.float32),
        "gn2_b": 0.1 * jax.random.normal(ks[5], (Cout,), jnp.float32),
        "w2":    0.1 * jax.random.normal(ks[6], (3, 3, Cout, Cout), jnp.float32),
        "b2":    0.1 * jax.random.normal(ks[7], (Cout,), jnp.float32),
    }
    if Cin != Cout:
        p["w_res"] = 0.1 * jax.random.normal(ks[8], (Cin, Cout), jnp.float32)      # 1x1 conv
        p["b_res"] = 0.1 * jax.random.normal(ks[9], (Cout,), jnp.float32)
    return p


if __name__ == "__main__":
    key = jax.random.PRNGKey(0)
    # GroupNorm(32) requires channel counts divisible by 32.
    cases = [
        (2, 32, 64, 16, 16),    # Cin != Cout  -> fused 1x1 residual projection, K-folded convs
        (2, 32, 32, 16, 16),    # Cin == Cout  -> identity residual, K-folded convs
        (1, 256, 256, 8, 8),    # C >= 256     -> unfolded conv path (K = C matmuls)
    ]
    for (N, Cin, Cout, H, W) in cases:
        kp, kx, key = jax.random.split(key, 3)
        params = _make_params(kp, Cin, Cout)
        x = jax.random.normal(kx, (N, Cin, H, W), jnp.float32)        # NCHW like PyTorch

        out = jax.block_until_ready(vae_residual_block(x, params))
        ref = reference_forward(x, params)

        assert out.shape == (N, Cout, H, W), out.shape
        err = float(jnp.max(jnp.abs(out - ref)))
        scale = float(jnp.max(jnp.abs(ref)))
        # Conv/proj matmuls use bf16 operands (f32 accumulation, f32 GroupNorm),
        # so compare relative to the output scale against the pure-f32 reference.
        assert err <= 2.5e-2 * max(scale, 1.0), (
            f"max abs error {err} too large (ref scale {scale})")

    print("KERNEL_OK")
</pallas_src>

<mosaic_0001>
module attributes {stable_mosaic.version = 11 : i64} {
  func.func @_fused_resblock_kernel(%arg0: i32, %arg1: memref<1x16x16x32xf32, #tpu.memory_space<vmem>>, %arg2: memref<1x32xf32, #tpu.memory_space<vmem>>, %arg3: memref<1x32xf32, #tpu.memory_space<vmem>>, %arg4: memref<32x32xf32, #tpu.memory_space<vmem>>, %arg5: memref<32x32xf32, #tpu.memory_space<vmem>>, %arg6: memref<3x96x64xbf16, #tpu.memory_space<vmem>>, %arg7: memref<1x64xf32, #tpu.memory_space<vmem>>, %arg8: memref<1x64xf32, #tpu.memory_space<vmem>>, %arg9: memref<1x64xf32, #tpu.memory_space<vmem>>, %arg10: memref<64x32xf32, #tpu.memory_space<vmem>>, %arg11: memref<32x64xf32, #tpu.memory_space<vmem>>, %arg12: memref<3x192x64xbf16, #tpu.memory_space<vmem>>, %arg13: memref<1x64xf32, #tpu.memory_space<vmem>>, %arg14: memref<32x64xbf16, #tpu.memory_space<vmem>>, %arg15: memref<1x64xf32, #tpu.memory_space<vmem>>, %arg16: memref<1x16x16x64xf32, #tpu.memory_space<vmem>>, %arg17: memref<18x33x32xbf16, #tpu.memory_space<vmem>>, %arg18: memref<18x33x64xbf16, #tpu.memory_space<vmem>>) attributes {dimension_semantics = [#tpu.dimension_semantics<parallel>], iteration_bounds = array<i64: 2>, scalar_prefetch = 0 : i64, scratch_operands = 2 : i64, tpu.core_type = #tpu.core_type<tc>, window_params = [{transform_indices = @transform_0, window_bounds = array<i64: 1, 16, 16, 32>}, {pipeline_mode = #tpu.pipeline_mode<synchronous>, transform_indices = @transform_1, window_bounds = array<i64: 1, 32>}, {pipeline_mode = #tpu.pipeline_mode<synchronous>, transform_indices = @transform_2, window_bounds = array<i64: 1, 32>}, {pipeline_mode = #tpu.pipeline_mode<synchronous>, transform_indices = @transform_3, window_bounds = array<i64: 32, 32>}, {pipeline_mode = #tpu.pipeline_mode<synchronous>, transform_indices = @transform_4, window_bounds = array<i64: 32, 32>}, {pipeline_mode = #tpu.pipeline_mode<synchronous>, transform_indices = @transform_5, window_bounds = array<i64: 3, 96, 64>}, {pipeline_mode = #tpu.pipeline_mode<synchronous>, transform_indices = @transform_6, window_bounds = array<i64: 1, 64>}, {pipeline_mode = #tpu.pipeline_mode<synchronous>, transform_indices = @transform_7, window_bounds = array<i64: 1, 64>}, {pipeline_mode = #tpu.pipeline_mode<synchronous>, transform_indices = @transform_8, window_bounds = array<i64: 1, 64>}, {pipeline_mode = #tpu.pipeline_mode<synchronous>, transform_indices = @transform_9, window_bounds = array<i64: 64, 32>}, {pipeline_mode = #tpu.pipeline_mode<synchronous>, transform_indices = @transform_10, window_bounds = array<i64: 32, 64>}, {pipeline_mode = #tpu.pipeline_mode<synchronous>, transform_indices = @transform_11, window_bounds = array<i64: 3, 192, 64>}, {pipeline_mode = #tpu.pipeline_mode<synchronous>, transform_indices = @transform_12, window_bounds = array<i64: 1, 64>}, {pipeline_mode = #tpu.pipeline_mode<synchronous>, transform_indices = @transform_13, window_bounds = array<i64: 32, 64>}, {pipeline_mode = #tpu.pipeline_mode<synchronous>, transform_indices = @transform_14, window_bounds = array<i64: 1, 64>}, {transform_indices = @transform_15, window_bounds = array<i64: 1, 16, 16, 64>}]} {
    %c0_i32 = arith.constant 0 : i32
    %0 = arith.cmpi eq, %arg0, %c0_i32 : i32
    %1 = arith.extui %0 : i1 to i32
    %c0_i32_0 = arith.constant 0 : i32
    %2 = arith.cmpi ne, %1, %c0_i32_0 : i32
    scf.if %2 {
      %cst_95 = arith.constant 0.000000e+00 : bf16
      %175 = vector.broadcast %cst_95 : bf16 to vector<18x33x32xbf16>
      %c0_96 = arith.constant 0 : index
      %c0_97 = arith.constant 0 : index
      %c0_98 = arith.constant 0 : index
      %176 = vector.load %arg17[%c0_96, %c0_97, %c0_98] : memref<18x33x32xbf16, #tpu.memory_space<vmem>>, vector<18x33x32xbf16>
      tpu.vector_store %arg17[%c0_96, %c0_97, %c0_98], %175 {strides = array<i32>} : memref<18x33x32xbf16, #tpu.memory_space<vmem>>, vector<18x33x32xbf16>,
      %cst_99 = arith.constant 0.000000e+00 : bf16
      %177 = vector.broadcast %cst_99 : bf16 to vector<18x33x64xbf16>
      %c0_100 = arith.constant 0 : index
      %c0_101 = arith.constant 0 : index
      %c0_102 = arith.constant 0 : index
      %178 = vector.load %arg18[%c0_100, %c0_101, %c0_102] : memref<18x33x64xbf16, #tpu.memory_space<vmem>>, vector<18x33x64xbf16>
      tpu.vector_store %arg18[%c0_100, %c0_101, %c0_102], %177 {strides = array<i32>} : memref<18x33x64xbf16, #tpu.memory_space<vmem>>, vector<18x33x64xbf16>,
    } else {
    }
    %c0 = arith.constant 0 : index
    %c0_1 = arith.constant 0 : index
    %c0_2 = arith.constant 0 : index
    %c0_3 = arith.constant 0 : index
    %3 = vector.load %arg1[%c0, %c0_1, %c0_2, %c0_3] : memref<1x16x16x32xf32, #tpu.memory_space<vmem>>, vector<1x16x16x32xf32>
    %4 = vector.shape_cast %3 : vector<1x16x16x32xf32> to vector<16x16x32xf32>
    %5 = vector.shape_cast %4 : vector<16x16x32xf32> to vector<256x32xf32>
    %c0_4 = arith.constant 0 : index
    %c0_5 = arith.constant 0 : index
    %6 = vector.load %arg2[%c0_4, %c0_5] : memref<1x32xf32, #tpu.memory_space<vmem>>, vector<1x32xf32>
    %c0_6 = arith.constant 0 : index
    %c0_7 = arith.constant 0 : index
    %7 = vector.load %arg3[%c0_6, %c0_7] : memref<1x32xf32, #tpu.memory_space<vmem>>, vector<1x32xf32>
    %c0_8 = arith.constant 0 : index
    %c0_9 = arith.constant 0 : index
    %8 = vector.load %arg4[%c0_8, %c0_9] : memref<32x32xf32, #tpu.memory_space<vmem>>, vector<32x32xf32>
    %c0_10 = arith.constant 0 : index
    %c0_11 = arith.constant 0 : index
    %9 = vector.load %arg5[%c0_10, %c0_11] : memref<32x32xf32, #tpu.memory_space<vmem>>, vector<32x32xf32>
    %cst = arith.constant dense<0.000000e+00> : vector<32xf32>
    %10 = vector.multi_reduction <add>, %5, %cst [0] : vector<256x32xf32> to vector<32xf32>
    %11 = vector.shape_cast %10 : vector<32xf32> to vector<1x32xf32>
    %12 = arith.mulf %5, %5 : vector<256x32xf32>
    %cst_12 = arith.constant dense<0.000000e+00> : vector<32xf32>
    %13 = vector.multi_reduction <add>, %12, %cst_12 [0] : vector<256x32xf32> to vector<32xf32>
    %14 = vector.shape_cast %13 : vector<32xf32> to vector<1x32xf32>
    %15 = tpu.concatenate %11, %14 in 0 : vector<1x32xf32>, vector<1x32xf32> -> vector<2x32xf32>
    %cst_13 = arith.constant dense<0.000000e+00> : vector<2x32xf32>
    %16 = tpu.matmul %15, %8, %cst_13 {dimension_numbers = #tpu.dot_dimension_numbers<[1], [0], [0], [1], [0, 0, 1, 1], [], []>} : vector<2x32xf32>, vector<32x32xf32>, vector<2x32xf32> -> vector<2x32xf32>
    %cst_14 = arith.constant dense<0.000000e+00> : vector<2x32xf32>
    %17 = tpu.matmul %16, %9, %cst_14 {dimension_numbers = #tpu.dot_dimension_numbers<[1], [0], [0], [1], [0, 0, 1, 1], [], []>} : vector<2x32xf32>, vector<32x32xf32>, vector<2x32xf32> -> vector<2x32xf32>
    %18 = vector.extract_strided_slice %17 {offsets = [0, 0], sizes = [1, 32], strides = [1, 1]} : vector<2x32xf32> to vector<1x32xf32>
    %cst_15 = arith.constant 3.906250e-03 : f32
    %19 = vector.broadcast %cst_15 : f32 to vector<1x32xf32>
    %20 = arith.mulf %18, %19 : vector<1x32xf32>
    %21 = vector.extract_strided_slice %17 {offsets = [1, 0], sizes = [1, 32], strides = [1, 1]} : vector<2x32xf32> to vector<1x32xf32>
    %cst_16 = arith.constant 3.906250e-03 : f32
    %22 = vector.broadcast %cst_16 : f32 to vector<1x32xf32>
    %23 = arith.mulf %21, %22 : vector<1x32xf32>
    %24 = arith.mulf %20, %20 : vector<1x32xf32>
    %25 = arith.subf %23, %24 : vector<1x32xf32>
    %cst_17 = arith.constant 0.000000e+00 : f32
    %26 = vector.broadcast %cst_17 : f32 to vector<1x32xf32>
    %27 = arith.maximumf %25, %26 : vector<1x32xf32>
    %cst_18 = arith.constant 9.99999974E-6 : f32
    %28 = vector.broadcast %cst_18 : f32 to vector<1x32xf32>
    %29 = arith.addf %27, %28 : vector<1x32xf32>
    %30 = math.rsqrt %29 : vector<1x32xf32>
    %31 = vector.broadcast %20 : vector<1x32xf32> to vector<256x32xf32>
    %32 = arith.subf %5, %31 : vector<256x32xf32>
    %33 = arith.mulf %30, %6 : vector<1x32xf32>
    %34 = vector.broadcast %33 : vector<1x32xf32> to vector<256x32xf32>
    %35 = arith.mulf %32, %34 : vector<256x32xf32>
    %36 = vector.broadcast %7 : vector<1x32xf32> to vector<256x32xf32>
    %37 = arith.addf %35, %36 : vector<256x32xf32>
    %38 = arith.negf %37 : vector<256x32xf32>
    %39 = math.exp %38 : vector<256x32xf32>
    %cst_19 = arith.constant 1.000000e+00 : f32
    %40 = vector.broadcast %cst_19 : f32 to vector<256x32xf32>
    %41 = arith.addf %40, %39 : vector<256x32xf32>
    %42 = arith.divf %40, %41 : vector<256x32xf32>
    %43 = arith.mulf %37, %42 : vector<256x32xf32>
    %44 = vector.shape_cast %43 : vector<256x32xf32> to vector<16x16x32xf32>
    %45 = arith.truncf %44 : vector<16x16x32xf32> to vector<16x16x32xbf16>
    %c1 = arith.constant 1 : index
    %c16 = arith.constant 16 : index
    %c0_20 = arith.constant 0 : index
    %46 = vector.load %arg17[%c1, %c16, %c0_20] : memref<18x33x32xbf16, #tpu.memory_space<vmem>>, vector<16x16x32xbf16>
    tpu.vector_store %arg17[%c1, %c16, %c0_20], %45 {strides = array<i32>} : memref<18x33x32xbf16, #tpu.memory_space<vmem>>, vector<16x16x32xbf16>,
    %c0_21 = arith.constant 0 : index
    %c0_22 = arith.constant 0 : index
    %47 = vector.load %arg7[%c0_21, %c0_22] : memref<1x64xf32, #tpu.memory_space<vmem>>, vector<1x64xf32>
    %c0_23 = arith.constant 0 : index
    %c0_24 = arith.constant 0 : index
    %c0_25 = arith.constant 0 : index
    %48 = vector.load %arg17[%c0_23, %c0_24, %c0_25] : memref<18x33x32xbf16, #tpu.memory_space<vmem>>, vector<16x33x32xbf16>
    %49 = vector.extract_strided_slice %48 {offsets = [0, 15, 0], sizes = [16, 16, 32], strides = [1, 1, 1]} : vector<16x33x32xbf16> to vector<16x16x32xbf16>
    %50 = vector.shape_cast %49 : vector<16x16x32xbf16> to vector<256x32xbf16>
    %51 = vector.extract_strided_slice %48 {offsets = [0, 16, 0], sizes = [16, 16, 32], strides = [1, 1, 1]} : vector<16x33x32xbf16> to vector<16x16x32xbf16>
    %52 = vector.shape_cast %51 : vector<16x16x32xbf16> to vector<256x32xbf16>
    %53 = vector.extract_strided_slice %48 {offsets = [0, 17, 0], sizes = [16, 16, 32], strides = [1, 1, 1]} : vector<16x33x32xbf16> to vector<16x16x32xbf16>
    %54 = vector.shape_cast %53 : vector<16x16x32xbf16> to vector<256x32xbf16>
    %55 = tpu.concatenate %50, %52, %54 in 1 : vector<256x32xbf16>, vector<256x32xbf16>, vector<256x32xbf16> -> vector<256x96xbf16>
    %c0_26 = arith.constant 0 : index
    %c0_27 = arith.constant 0 : index
    %c0_28 = arith.constant 0 : index
    %56 = vector.load %arg6[%c0_26, %c0_27, %c0_28] : memref<3x96x64xbf16, #tpu.memory_space<vmem>>, vector<1x96x64xbf16>
    %57 = vector.shape_cast %56 : vector<1x96x64xbf16> to vector<96x64xbf16>
    %cst_29 = arith.constant dense<0.000000e+00> : vector<256x64xf32>
    %58 = tpu.matmul %55, %57, %cst_29 {dimension_numbers = #tpu.dot_dimension_numbers<[1], [0], [0], [1], [0, 0, 1, 1], [], []>} : vector<256x96xbf16>, vector<96x64xbf16>, vector<256x64xf32> -> vector<256x64xf32>
    %c1_30 = arith.constant 1 : index
    %c0_31 = arith.constant 0 : index
    %c0_32 = arith.constant 0 : index
    %59 = vector.load %arg17[%c1_30, %c0_31, %c0_32] : memref<18x33x32xbf16, #tpu.memory_space<vmem>>, vector<16x33x32xbf16>
    %60 = vector.extract_strided_slice %59 {offsets = [0, 15, 0], sizes = [16, 16, 32], strides = [1, 1, 1]} : vector<16x33x32xbf16> to vector<16x16x32xbf16>
    %61 = vector.shape_cast %60 : vector<16x16x32xbf16> to vector<256x32xbf16>
    %62 = vector.extract_strided_slice %59 {offsets = [0, 16, 0], sizes = [16, 16, 32], strides = [1, 1, 1]} : vector<16x33x32xbf16> to vector<16x16x32xbf16>
    %63 = vector.shape_cast %62 : vector<16x16x32xbf16> to vector<256x32xbf16>
    %64 = vector.extract_strided_slice %59 {offsets = [0, 17, 0], sizes = [16, 16, 32], strides = [1, 1, 1]} : vector<16x33x32xbf16> to vector<16x16x32xbf16>
    %65 = vector.shape_cast %64 : vector<16x16x32xbf16> to vector<256x32xbf16>
    %66 = tpu.concatenate %61, %63, %65 in 1 : vector<256x32xbf16>, vector<256x32xbf16>, vector<256x32xbf16> -> vector<256x96xbf16>
    %c1_33 = arith.constant 1 : index
    %c0_34 = arith.constant 0 : index
    %c0_35 = arith.constant 0 : index
    %67 = vector.load %arg6[%c1_33, %c0_34, %c0_35] : memref<3x96x64xbf16, #tpu.memory_space<vmem>>, vector<1x96x64xbf16>
    %68 = vector.shape_cast %67 : vector<1x96x64xbf16> to vector<96x64xbf16>
    %cst_36 = arith.constant dense<0.000000e+00> : vector<256x64xf32>
    %69 = tpu.matmul %66, %68, %cst_36 {dimension_numbers = #tpu.dot_dimension_numbers<[1], [0], [0], [1], [0, 0, 1, 1], [], []>} : vector<256x96xbf16>, vector<96x64xbf16>, vector<256x64xf32> -> vector<256x64xf32>
    %70 = arith.addf %58, %69 : vector<256x64xf32>
    %c2 = arith.constant 2 : index
    %c0_37 = arith.constant 0 : index
    %c0_38 = arith.constant 0 : index
    %71 = vector.load %arg17[%c2, %c0_37, %c0_38] : memref<18x33x32xbf16, #tpu.memory_space<vmem>>, vector<16x33x32xbf16>
    %72 = vector.extract_strided_slice %71 {offsets = [0, 15, 0], sizes = [16, 16, 32], strides = [1, 1, 1]} : vector<16x33x32xbf16> to vector<16x16x32xbf16>
    %73 = vector.shape_cast %72 : vector<16x16x32xbf16> to vector<256x32xbf16>
    %74 = vector.extract_strided_slice %71 {offsets = [0, 16, 0], sizes = [16, 16, 32], strides = [1, 1, 1]} : vector<16x33x32xbf16> to vector<16x16x32xbf16>
    %75 = vector.shape_cast %74 : vector<16x16x32xbf16> to vector<256x32xbf16>
    %76 = vector.extract_strided_slice %71 {offsets = [0, 17, 0], sizes = [16, 16, 32], strides = [1, 1, 1]} : vector<16x33x32xbf16> to vector<16x16x32xbf16>
    %77 = vector.shape_cast %76 : vector<16x16x32xbf16> to vector<256x32xbf16>
    %78 = tpu.concatenate %73, %75, %77 in 1 : vector<256x32xbf16>, vector<256x32xbf16>, vector<256x32xbf16> -> vector<256x96xbf16>
    %c2_39 = arith.constant 2 : index
    %c0_40 = arith.constant 0 : index
    %c0_41 = arith.constant 0 : index
    %79 = vector.load %arg6[%c2_39, %c0_40, %c0_41] : memref<3x96x64xbf16, #tpu.memory_space<vmem>>, vector<1x96x64xbf16>
    %80 = vector.shape_cast %79 : vector<1x96x64xbf16> to vector<96x64xbf16>
    %cst_42 = arith.constant dense<0.000000e+00> : vector<256x64xf32>
    %81 = tpu.matmul %78, %80, %cst_42 {dimension_numbers = #tpu.dot_dimension_numbers<[1], [0], [0], [1], [0, 0, 1, 1], [], []>} : vector<256x96xbf16>, vector<96x64xbf16>, vector<256x64xf32> -> vector<256x64xf32>
    %82 = arith.addf %70, %81 : vector<256x64xf32>
    %83 = vector.broadcast %47 : vector<1x64xf32> to vector<256x64xf32>
    %84 = arith.addf %82, %83 : vector<256x64xf32>
    %c0_43 = arith.constant 0 : index
    %c0_44 = arith.constant 0 : index
    %85 = vector.load %arg8[%c0_43, %c0_44] : memref<1x64xf32, #tpu.memory_space<vmem>>, vector<1x64xf32>
    %c0_45 = arith.constant 0 : index
    %c0_46 = arith.constant 0 : index
    %86 = vector.load %arg9[%c0_45, %c0_46] : memref<1x64xf32, #tpu.memory_space<vmem>>, vector<1x64xf32>
    %c0_47 = arith.constant 0 : index
    %c0_48 = arith.constant 0 : index
    %87 = vector.load %arg10[%c0_47, %c0_48] : memref<64x32xf32, #tpu.memory_space<vmem>>, vector<64x32xf32>
    %c0_49 = arith.constant 0 : index
    %c0_50 = arith.constant 0 : index
    %88 = vector.load %arg11[%c0_49, %c0_50] : memref<32x64xf32, #tpu.memory_space<vmem>>, vector<32x64xf32>
    %cst_51 = arith.constant dense<0.000000e+00> : vector<64xf32>
    %89 = vector.multi_reduction <add>, %84, %cst_51 [0] : vector<256x64xf32> to vector<64xf32>
    %90 = vector.shape_cast %89 : vector<64xf32> to vector<1x64xf32>
    %91 = arith.mulf %84, %84 : vector<256x64xf32>
    %cst_52 = arith.constant dense<0.000000e+00> : vector<64xf32>
    %92 = vector.multi_reduction <add>, %91, %cst_52 [0] : vector<256x64xf32> to vector<64xf32>
    %93 = vector.shape_cast %92 : vector<64xf32> to vector<1x64xf32>
    %94 = tpu.concatenate %90, %93 in 0 : vector<1x64xf32>, vector<1x64xf32> -> vector<2x64xf32>
    %cst_53 = arith.constant dense<0.000000e+00> : vector<2x32xf32>
    %95 = tpu.matmul %94, %87, %cst_53 {dimension_numbers = #tpu.dot_dimension_numbers<[1], [0], [0], [1], [0, 0, 1, 1], [], []>} : vector<2x64xf32>, vector<64x32xf32>, vector<2x32xf32> -> vector<2x32xf32>
    %cst_54 = arith.constant dense<0.000000e+00> : vector<2x64xf32>
    %96 = tpu.matmul %95, %88, %cst_54 {dimension_numbers = #tpu.dot_dimension_numbers<[1], [0], [0], [1], [0, 0, 1, 1], [], []>} : vector<2x32xf32>, vector<32x64xf32>, vector<2x64xf32> -> vector<2x64xf32>
    %97 = vector.extract_strided_slice %96 {offsets = [0, 0], sizes = [1, 64], strides = [1, 1]} : vector<2x64xf32> to vector<1x64xf32>
    %cst_55 = arith.constant 0.001953125 : f32
    %98 = vector.broadcast %cst_55 : f32 to vector<1x64xf32>
    %99 = arith.mulf %97, %98 : vector<1x64xf32>
    %100 = vector.extract_strided_slice %96 {offsets = [1, 0], sizes = [1, 64], strides = [1, 1]} : vector<2x64xf32> to vector<1x64xf32>
    %cst_56 = arith.constant 0.001953125 : f32
    %101 = vector.broadcast %cst_56 : f32 to vector<1x64xf32>
    %102 = arith.mulf %100, %101 : vector<1x64xf32>
    %103 = arith.mulf %99, %99 : vector<1x64xf32>
    %104 = arith.subf %102, %103 : vector<1x64xf32>
    %cst_57 = arith.constant 0.000000e+00 : f32
    %105 = vector.broadcast %cst_57 : f32 to vector<1x64xf32>
    %106 = arith.maximumf %104, %105 : vector<1x64xf32>
    %cst_58 = arith.constant 9.99999974E-6 : f32
    %107 = vector.broadcast %cst_58 : f32 to vector<1x64xf32>
    %108 = arith.addf %106, %107 : vector<1x64xf32>
    %109 = math.rsqrt %108 : vector<1x64xf32>
    %110 = vector.broadcast %99 : vector<1x64xf32> to vector<256x64xf32>
    %111 = arith.subf %84, %110 : vector<256x64xf32>
    %112 = arith.mulf %109, %85 : vector<1x64xf32>
    %113 = vector.broadcast %112 : vector<1x64xf32> to vector<256x64xf32>
    %114 = arith.mulf %111, %113 : vector<256x64xf32>
    %115 = vector.broadcast %86 : vector<1x64xf32> to vector<256x64xf32>
    %116 = arith.addf %114, %115 : vector<256x64xf32>
    %117 = arith.negf %116 : vector<256x64xf32>
    %118 = math.exp %117 : vector<256x64xf32>
    %cst_59 = arith.constant 1.000000e+00 : f32
    %119 = vector.broadcast %cst_59 : f32 to vector<256x64xf32>
    %120 = arith.addf %119, %118 : vector<256x64xf32>
    %121 = arith.divf %119, %120 : vector<256x64xf32>
    %122 = arith.mulf %116, %121 : vector<256x64xf32>
    %123 = vector.shape_cast %122 : vector<256x64xf32> to vector<16x16x64xf32>
    %124 = arith.truncf %123 : vector<16x16x64xf32> to vector<16x16x64xbf16>
    %c1_60 = arith.constant 1 : index
    %c16_61 = arith.constant 16 : index
    %c0_62 = arith.constant 0 : index
    %125 = vector.load %arg18[%c1_60, %c16_61, %c0_62] : memref<18x33x64xbf16, #tpu.memory_space<vmem>>, vector<16x16x64xbf16>
    tpu.vector_store %arg18[%c1_60, %c16_61, %c0_62], %124 {strides = array<i32>} : memref<18x33x64xbf16, #tpu.memory_space<vmem>>, vector<16x16x64xbf16>,
    %c0_63 = arith.constant 0 : index
    %c0_64 = arith.constant 0 : index
    %126 = vector.load %arg13[%c0_63, %c0_64] : memref<1x64xf32, #tpu.memory_space<vmem>>, vector<1x64xf32>
    %c0_65 = arith.constant 0 : index
    %c0_66 = arith.constant 0 : index
    %c0_67 = arith.constant 0 : index
    %127 = vector.load %arg18[%c0_65, %c0_66, %c0_67] : memref<18x33x64xbf16, #tpu.memory_space<vmem>>, vector<16x33x64xbf16>
    %128 = vector.extract_strided_slice %127 {offsets = [0, 15, 0], sizes = [16, 16, 64], strides = [1, 1, 1]} : vector<16x33x64xbf16> to vector<16x16x64xbf16>
    %129 = vector.shape_cast %128 : vector<16x16x64xbf16> to vector<256x64xbf16>
    %130 = vector.extract_strided_slice %127 {offsets = [0, 16, 0], sizes = [16, 16, 64], strides = [1, 1, 1]} : vector<16x33x64xbf16> to vector<16x16x64xbf16>
    %131 = vector.shape_cast %130 : vector<16x16x64xbf16> to vector<256x64xbf16>
    %132 = vector.extract_strided_slice %127 {offsets = [0, 17, 0], sizes = [16, 16, 64], strides = [1, 1, 1]} : vector<16x33x64xbf16> to vector<16x16x64xbf16>
    %133 = vector.shape_cast %132 : vector<16x16x64xbf16> to vector<256x64xbf16>
    %134 = tpu.concatenate %129, %131, %133 in 1 : vector<256x64xbf16>, vector<256x64xbf16>, vector<256x64xbf16> -> vector<256x192xbf16>
    %c0_68 = arith.constant 0 : index
    %c0_69 = arith.constant 0 : index
    %c0_70 = arith.constant 0 : index
    %135 = vector.load %arg12[%c0_68, %c0_69, %c0_70] : memref<3x192x64xbf16, #tpu.memory_space<vmem>>, vector<1x192x64xbf16>
    %136 = vector.shape_cast %135 : vector<1x192x64xbf16> to vector<192x64xbf16>
    %cst_71 = arith.constant dense<0.000000e+00> : vector<256x64xf32>
    %137 = tpu.matmul %134, %136, %cst_71 {dimension_numbers = #tpu.dot_dimension_numbers<[1], [0], [0], [1], [0, 0, 1, 1], [], []>} : vector<256x192xbf16>, vector<192x64xbf16>, vector<256x64xf32> -> vector<256x64xf32>
    %c1_72 = arith.constant 1 : index
    %c0_73 = arith.constant 0 : index
    %c0_74 = arith.constant 0 : index
    %138 = vector.load %arg18[%c1_72, %c0_73, %c0_74] : memref<18x33x64xbf16, #tpu.memory_space<vmem>>, vector<16x33x64xbf16>
    %139 = vector.extract_strided_slice %138 {offsets = [0, 15, 0], sizes = [16, 16, 64], strides = [1, 1, 1]} : vector<16x33x64xbf16> to vector<16x16x64xbf16>
    %140 = vector.shape_cast %139 : vector<16x16x64xbf16> to vector<256x64xbf16>
    %141 = vector.extract_strided_slice %138 {offsets = [0, 16, 0], sizes = [16, 16, 64], strides = [1, 1, 1]} : vector<16x33x64xbf16> to vector<16x16x64xbf16>
    %142 = vector.shape_cast %141 : vector<16x16x64xbf16> to vector<256x64xbf16>
    %143 = vector.extract_strided_slice %138 {offsets = [0, 17, 0], sizes = [16, 16, 64], strides = [1, 1, 1]} : vector<16x33x64xbf16> to vector<16x16x64xbf16>
    %144 = vector.shape_cast %143 : vector<16x16x64xbf16> to vector<256x64xbf16>
    %145 = tpu.concatenate %140, %142, %144 in 1 : vector<256x64xbf16>, vector<256x64xbf16>, vector<256x64xbf16> -> vector<256x192xbf16>
    %c1_75 = arith.constant 1 : index
    %c0_76 = arith.constant 0 : index
    %c0_77 = arith.constant 0 : index
    %146 = vector.load %arg12[%c1_75, %c0_76, %c0_77] : memref<3x192x64xbf16, #tpu.memory_space<vmem>>, vector<1x192x64xbf16>
    %147 = vector.shape_cast %146 : vector<1x192x64xbf16> to vector<192x64xbf16>
    %cst_78 = arith.constant dense<0.000000e+00> : vector<256x64xf32>
    %148 = tpu.matmul %145, %147, %cst_78 {dimension_numbers = #tpu.dot_dimension_numbers<[1], [0], [0], [1], [0, 0, 1, 1], [], []>} : vector<256x192xbf16>, vector<192x64xbf16>, vector<256x64xf32> -> vector<256x64xf32>
    %149 = arith.addf %137, %148 : vector<256x64xf32>
    %c2_79 = arith.constant 2 : index
    %c0_80 = arith.constant 0 : index
    %c0_81 = arith.constant 0 : index
    %150 = vector.load %arg18[%c2_79, %c0_80, %c0_81] : memref<18x33x64xbf16, #tpu.memory_space<vmem>>, vector<16x33x64xbf16>
    %151 = vector.extract_strided_slice %150 {offsets = [0, 15, 0], sizes = [16, 16, 64], strides = [1, 1, 1]} : vector<16x33x64xbf16> to vector<16x16x64xbf16>
    %152 = vector.shape_cast %151 : vector<16x16x64xbf16> to vector<256x64xbf16>
    %153 = vector.extract_strided_slice %150 {offsets = [0, 16, 0], sizes = [16, 16, 64], strides = [1, 1, 1]} : vector<16x33x64xbf16> to vector<16x16x64xbf16>
    %154 = vector.shape_cast %153 : vector<16x16x64xbf16> to vector<256x64xbf16>
    %155 = vector.extract_strided_slice %150 {offsets = [0, 17, 0], sizes = [16, 16, 64], strides = [1, 1, 1]} : vector<16x33x64xbf16> to vector<16x16x64xbf16>
    %156 = vector.shape_cast %155 : vector<16x16x64xbf16> to vector<256x64xbf16>
    %157 = tpu.concatenate %152, %154, %156 in 1 : vector<256x64xbf16>, vector<256x64xbf16>, vector<256x64xbf16> -> vector<256x192xbf16>
    %c2_82 = arith.constant 2 : index
    %c0_83 = arith.constant 0 : index
    %c0_84 = arith.constant 0 : index
    %158 = vector.load %arg12[%c2_82, %c0_83, %c0_84] : memref<3x192x64xbf16, #tpu.memory_space<vmem>>, vector<1x192x64xbf16>
    %159 = vector.shape_cast %158 : vector<1x192x64xbf16> to vector<192x64xbf16>
    %cst_85 = arith.constant dense<0.000000e+00> : vector<256x64xf32>
    %160 = tpu.matmul %157, %159, %cst_85 {dimension_numbers = #tpu.dot_dimension_numbers<[1], [0], [0], [1], [0, 0, 1, 1], [], []>} : vector<256x192xbf16>, vector<192x64xbf16>, vector<256x64xf32> -> vector<256x64xf32>
    %161 = arith.addf %149, %160 : vector<256x64xf32>
    %162 = vector.broadcast %126 : vector<1x64xf32> to vector<256x64xf32>
    %163 = arith.addf %161, %162 : vector<256x64xf32>
    %164 = arith.truncf %5 : vector<256x32xf32> to vector<256x32xbf16>
    %c0_86 = arith.constant 0 : index
    %c0_87 = arith.constant 0 : index
    %165 = vector.load %arg14[%c0_86, %c0_87] : memref<32x64xbf16, #tpu.memory_space<vmem>>, vector<32x64xbf16>
    %cst_88 = arith.constant dense<0.000000e+00> : vector<256x64xf32>
    %166 = tpu.matmul %164, %165, %cst_88 {dimension_numbers = #tpu.dot_dimension_numbers<[1], [0], [0], [1], [0, 0, 1, 1], [], []>} : vector<256x32xbf16>, vector<32x64xbf16>, vector<256x64xf32> -> vector<256x64xf32>
    %167 = arith.addf %163, %166 : vector<256x64xf32>
    %c0_89 = arith.constant 0 : index
    %c0_90 = arith.constant 0 : index
    %168 = vector.load %arg15[%c0_89, %c0_90] : memref<1x64xf32, #tpu.memory_space<vmem>>, vector<1x64xf32>
    %169 = vector.broadcast %168 : vector<1x64xf32> to vector<256x64xf32>
    %170 = arith.addf %167, %169 : vector<256x64xf32>
    %171 = vector.shape_cast %170 : vector<256x64xf32> to vector<16x16x64xf32>
    %c0_91 = arith.constant 0 : index
    %c0_92 = arith.constant 0 : index
    %c0_93 = arith.constant 0 : index
    %c0_94 = arith.constant 0 : index
    %172 = vector.load %arg16[%c0_91, %c0_92, %c0_93, %c0_94] : memref<1x16x16x64xf32, #tpu.memory_space<vmem>>, vector<1x16x16x64xf32>
    %173 = vector.shape_cast %172 : vector<1x16x16x64xf32> to vector<16x16x64xf32>
    %174 = vector.shape_cast %171 : vector<16x16x64xf32> to vector<1x16x16x64xf32>
    tpu.vector_store %arg16[%c0_91, %c0_92, %c0_93, %c0_94], %174 {strides = array<i32>} : memref<1x16x16x64xf32, #tpu.memory_space<vmem>>, vector<1x16x16x64xf32>,
    return
  }
  func.func @transform_0(%arg0: i32) -> (i32, i32, i32, i32) {
    %c0_i32 = arith.constant 0 : i32
    %c0_i32_0 = arith.constant 0 : i32
    %c0_i32_1 = arith.constant 0 : i32
    %c0_i32_2 = arith.constant 0 : i32
    return %arg0, %c0_i32, %c0_i32_0, %c0_i32_1 : i32, i32, i32, i32
  }
  func.func @transform_1(%arg0: i32) -> (i32, i32) {
    %c0_i32 = arith.constant 0 : i32
    %c0_i32_0 = arith.constant 0 : i32
    %c0_i32_1 = arith.constant 0 : i32
    return %c0_i32, %c0_i32_0 : i32, i32
  }
  func.func @transform_2(%arg0: i32) -> (i32, i32) {
    %c0_i32 = arith.constant 0 : i32
    %c0_i32_0 = arith.constant 0 : i32
    %c0_i32_1 = arith.constant 0 : i32
    return %c0_i32, %c0_i32_0 : i32, i32
  }
  func.func @transform_3(%arg0: i32) -> (i32, i32) {
    %c0_i32 = arith.constant 0 : i32
    %c0_i32_0 = arith.constant 0 : i32
    %c0_i32_1 = arith.constant 0 : i32
    return %c0_i32, %c0_i32_0 : i32, i32
  }
  func.func @transform_4(%arg0: i32) -> (i32, i32) {
    %c0_i32 = arith.constant 0 : i32
    %c0_i32_0 = arith.constant 0 : i32
    %c0_i32_1 = arith.constant 0 : i32
    return %c0_i32, %c0_i32_0 : i32, i32
  }
  func.func @transform_5(%arg0: i32) -> (i32, i32, i32) {
    %c0_i32 = arith.constant 0 : i32
    %c0_i32_0 = arith.constant 0 : i32
    %c0_i32_1 = arith.constant 0 : i32
    %c0_i32_2 = arith.constant 0 : i32
    return %c0_i32, %c0_i32_0, %c0_i32_1 : i32, i32, i32
  }
  func.func @transform_6(%arg0: i32) -> (i32, i32) {
    %c0_i32 = arith.constant 0 : i32
    %c0_i32_0 = arith.constant 0 : i32
    %c0_i32_1 = arith.constant 0 : i32
    return %c0_i32, %c0_i32_0 : i32, i32
  }
  func.func @transform_7(%arg0: i32) -> (i32, i32) {
    %c0_i32 = arith.constant 0 : i32
    %c0_i32_0 = arith.constant 0 : i32
    %c0_i32_1 = arith.constant 0 : i32
    return %c0_i32, %c0_i32_0 : i32, i32
  }
  func.func @transform_8(%arg0: i32) -> (i32, i32) {
    %c0_i32 = arith.constant 0 : i32
    %c0_i32_0 = arith.constant 0 : i32
    %c0_i32_1 = arith.constant 0 : i32
    return %c0_i32, %c0_i32_0 : i32, i32
  }
  func.func @transform_9(%arg0: i32) -> (i32, i32) {
    %c0_i32 = arith.constant 0 : i32
    %c0_i32_0 = arith.constant 0 : i32
    %c0_i32_1 = arith.constant 0 : i32
    return %c0_i32, %c0_i32_0 : i32, i32
  }
  func.func @transform_10(%arg0: i32) -> (i32, i32) {
    %c0_i32 = arith.constant 0 : i32
    %c0_i32_0 = arith.constant 0 : i32
    %c0_i32_1 = arith.constant 0 : i32
    return %c0_i32, %c0_i32_0 : i32, i32
  }
  func.func @transform_11(%arg0: i32) -> (i32, i32, i32) {
    %c0_i32 = arith.constant 0 : i32
    %c0_i32_0 = arith.constant 0 : i32
    %c0_i32_1 = arith.constant 0 : i32
    %c0_i32_2 = arith.constant 0 : i32
    return %c0_i32, %c0_i32_0, %c0_i32_1 : i32, i32, i32
  }
  func.func @transform_12(%arg0: i32) -> (i32, i32) {
    %c0_i32 = arith.constant 0 : i32
    %c0_i32_0 = arith.constant 0 : i32
    %c0_i32_1 = arith.constant 0 : i32
    return %c0_i32, %c0_i32_0 : i32, i32
  }
  func.func @transform_13(%arg0: i32) -> (i32, i32) {
    %c0_i32 = arith.constant 0 : i32
    %c0_i32_0 = arith.constant 0 : i32
    %c0_i32_1 = arith.constant 0 : i32
    return %c0_i32, %c0_i32_0 : i32, i32
  }
  func.func @transform_14(%arg0: i32) -> (i32, i32) {
    %c0_i32 = arith.constant 0 : i32
    %c0_i32_0 = arith.constant 0 : i32
    %c0_i32_1 = arith.constant 0 : i32
    return %c0_i32, %c0_i32_0 : i32, i32
  }
  func.func @transform_15(%arg0: i32) -> (i32, i32, i32, i32) {
    %c0_i32 = arith.constant 0 : i32
    %c0_i32_0 = arith.constant 0 : i32
    %c0_i32_1 = arith.constant 0 : i32
    %c0_i32_2 = arith.constant 0 : i32
    return %arg0, %c0_i32, %c0_i32_0, %c0_i32_1 : i32, i32, i32, i32
  }
}

</mosaic_0001>

<bundles_post_ra>
// kernel: vae_residual_block_nhwc.1
= control target key start
LH: loop header
LB: loop body
LE: loop exit
PB: predicated region body
PF: predicated region fallthrough
CT: control target
= control target key end

     0   :  { %s18892_s0 = inlined_call_operand.vmem [shape: f32[2,16,16,32], index: 0, kind: input, shape index: {}]   ;;  %s18893_s1 = inlined_call_operand.vmem [shape: f32[1,32], index: 1, kind: input, shape index: {}]   ;;  %s18894_s2 = inlined_call_operand.vmem [shape: f32[1,32], index: 2, kind: input, shape index: {}]   ;;  %s18895_s3 = inlined_call_operand.vmem [shape: f32[32,32], index: 3, kind: input, shape index: {}]   ;;  %s18896_s4 = inlined_call_operand.vmem [shape: f32[32,32], index: 4, kind: input, shape index: {}]   ;;  %s18897_s5 = inlined_call_operand.vmem [shape: bf16[3,96,64], index: 5, kind: input, shape index: {}]   ;;  %s18898_s6 = inlined_call_operand.vmem [shape: f32[1,64], index: 6, kind: input, shape index: {}]   ;;  %s18899_s7 = inlined_call_operand.vmem [shape: f32[1,64], index: 7, kind: input, shape index: {}]   ;;  %s18900_s8 = inlined_call_operand.vmem [shape: f32[1,64], index: 8, kind: input, shape index: {}]   ;;  %s18901_s9 = inlined_call_operand.vmem [shape: f32[64,32], index: 9, kind: input, shape index: {}]   ;;  %s18902_s10 = inlined_call_operand.vmem [shape: f32[32,64], index: 10, kind: input, shape index: {}]   ;;  %s18903_s11 = inlined_call_operand.vmem [shape: bf16[3,192,64], index: 11, kind: input, shape index: {}]   ;;  %s18904_s12 = inlined_call_operand.vmem [shape: f32[1,64], index: 12, kind: input, shape index: {}]   ;;  %s18905_s13 = inlined_call_operand.vmem [shape: bf16[32,64], index: 13, kind: input, shape index: {}]   ;;  %s18906_s14 = inlined_call_operand.vmem [shape: f32[1,64], index: 14, kind: input, shape index: {}]   ;;  %s18907_s15 = inlined_call_operand.hbm [shape: f32[2,16,16,64], index: 15, kind: output, shape index: {}]  }
   0x1   :  { %19217 = sst [smem:[#allocation202_spill]] %s18892_s0 }
   0x2   :  { %19218 = sst [smem:[#allocation203_spill]] %s18893_s1 }
   0x3   :  { %20 = vsyncpa [#allocation5], 0 }
   0x4   :  { %22 = vsyncpa [#allocation5 + $0x1], 0  ;;  %s12219_s18 = smov 0   ;;  %s12221_s19 = smov 0  }
   0x5   :  { %s12223_s20 = smov 0   ;;  %s12225_s21 = smov 0  }
   0x6 LB: > { %19219 = sst [smem:[#allocation7_spill]] %s12123_s20  ;;  %s12240_s22 = sadd.s32 4294967295, %s12127_s21   ;;  %s12127_s21 = sphi %s12225_s21, %s20274_s21   ;;  %s12123_s20 = sphi %s12223_s20, %s20276_s20   ;;  %s12119_s19 = sphi %s12221_s19, %s20278_s19   ;;  %s12115_s18 = sphi %s12219_s18, %s20277_s18  }
   0x7   : > { %s10303_s23 = sadd.s32 4294967294, %s12127_s21   ;;  %s12244_s24 = sadd.s32 1, %s12127_s21  }
   0x8   : > { %19220 = sst [smem:[#allocation8_spill]] %s12244_s24  ;;  %s355_s25 = sadd.s32 1, %s12123_s20 }
   0x9   : > { %s352_s26 = ssub.s32 %s12127_s21, %s12244_s24  ;;  %p365_p0 = scmp.ne.s32.totalorder %s12123_s20, %s12119_s19 }
   0xa   : > { %p353_p1 = scmp.eq.s32.totalorder %s352_s26, 0  ;;  %p366_p2 = scmp.eq.s32.totalorder %s12240_s22, 1 }
   0xb   : > { %p371_p3 = scmp.ne.s32.totalorder %s12119_s19, %s12115_s18  ;;  %p372_p4 = scmp.eq.s32.totalorder %s10303_s23, 1 }
   0xc   : > { %s12255_s27 = scalar_select %p353_p1, %s12123_s20, %s355_s25  }
   0xd   : > { %p12257_p5 = por %p366_p2, %p365_p0  ;;  %p12261_p6 = por %p372_p4, %p371_p3 }
   0xe   : > { %19221 = sst [smem:[#allocation9_spill]] %s12255_s27  ;;  %p10306_p7 = scmp.ge.s32.totalorder %s12127_s21, 1 }
   0xf   : > { %p440_p8 = scmp.lt.s32.totalorder %s12127_s21, 3 }
  0x11   : > { %p441_p9 = pnand %p10306_p7, %p440_p8 }
  0x13   : > { %444 = sbr.rel (%p441_p9) target bundleno = 2625 (0xa41), region = 80 }
  0x1a   : > { %s18909_s30 = sand.u32 1, %s12119_s19   ;;  %p488_p10 = scmp.lt.s32.totalorder %s12240_s22, 1 }
  0x1b   : > { %s10307_s16 = sshll.u32 %s18909_s30, 8  ;;  %s19224_s0 = sld [smem:[#allocation202_spill]] }
  0x1c   : > { %s489_s17 = scalar_select %p488_p10, %s12240_s22, 1 }
  0x1d   : > { %s12277_s20 = scalar_lea.vmem [#allocation4], %s10307_s16  ;;  %p10310_p11 = scmp.ne.s32.totalorder %s12240_s22, 0 }
  0x1e   : > { %s11079_s23 = sshll.u32 %s489_s17, 8  ;;  %vm498_vm0 = vcmask (!%p10310_p11), 257024   ;;  %vm503_vm1 = vcmask (!%p10310_p11), 253952   ;;  %vm504_vm2 = vsmask.f32 (!%p10310_p11), 256  ;;  %v12129_v0 = vmov (!%p10310_p11), 0  }
  0x1f   : > { %497 = sbr.rel (%p10310_p11) target bundleno = 104 (0x68), region = 84  ;;  %500 = vst.msk [vmem:[#allocation2 + $0x4] sm:$0xf] (!%p10310_p11), %vm498_vm0, %v12129_v0  ;;  %501 = vst.msk [vmem:[#allocation2 + $0x8] sm:$0xf] (!%p10310_p11), %vm498_vm0, %v12129_v0  ;;  %vm628_vm4 = vcmask (!%p10310_p11), 519168  }
  0x20   : > { %502 = vst.msk [vmem:[#allocation2 + $0xc] sm:$0xf] (!%p10310_p11), %vm498_vm0, %v12129_v0  ;;  %510 = vst.msk [vmem:[#allocation2 + $0x18] sm:$0xf] (!%p10310_p11), %vm498_vm0, %v12129_v0  ;;  %v506_v2 = vld [vmem:[#allocation2 + $0x10] sm:$0x1] (!%p10310_p11) }
  0x21   : > { %s12275_s27 = scalar_lea.vmem %s19224_s0, %s11079_s23  ;;  %511 = vst.msk [vmem:[#allocation2 + $0x1c] sm:$0xf] (!%p10310_p11), %vm498_vm0, %v12129_v0  ;;  %512 = vst.msk [vmem:[#allocation2 + $0x20] sm:$0xf] (!%p10310_p11), %vm498_vm0, %v12129_v0  ;;  %v513_v3 = vld [vmem:[#allocation2 + $0x24] sm:$0x1] (!%p10310_p11) }
  0x22   : > { %517 = vst.msk [vmem:[#allocation2 + $0x2c] sm:$0xf] (!%p10310_p11), %vm498_vm0, %v12129_v0  ;;  %518 = vst.msk [vmem:[#allocation2 + $0x30] sm:$0xf] (!%p10310_p11), %vm498_vm0, %v12129_v0  ;;  %vm633_vm5 = vcmask (!%p10310_p11), 516096  }
  0x23   : > { %519 = vst.msk [vmem:[#allocation2 + $0x34] sm:$0xf] (!%p10310_p11), %vm498_vm0, %v12129_v0  ;;  %524 = vst.msk [vmem:[#allocation2 + $0x40] sm:$0xf] (!%p10310_p11), %vm498_vm0, %v12129_v0  ;;  %v520_v6 = vld [vmem:[#allocation2 + $0x38] sm:$0x1] (!%p10310_p11) }
  0x24   : > { %525 = vst.msk [vmem:[#allocation2 + $0x44] sm:$0xf] (!%p10310_p11), %vm498_vm0, %v12129_v0  ;;  %526 = vst.msk [vmem:[#allocation2 + $0x48] sm:$0xf] (!%p10310_p11), %vm498_vm0, %v12129_v0  ;;  %v527_v7 = vld [vmem:[#allocation2 + $0x4c] sm:$0x1] (!%p10310_p11) }
  0x25   : > { %531 = vst.msk [vmem:[#allocation2 + $0x54] sm:$0xf] (!%p10310_p11), %vm498_vm0, %v12129_v0  ;;  %532 = vst.msk [vmem:[#allocation2 + $0x58] sm:$0xf] (!%p10310_p11), %vm498_vm0, %v12129_v0  ;;  %v534_v10 = vld [vmem:[#allocation2 + $0x60] sm:$0x1] (!%p10310_p11) }
  0x26   : > { %533 = vst.msk [vmem:[#allocation2 + $0x5c] sm:$0xf] %vm498_vm0, %v12129_v0  ;;  %538 = vst.msk [vmem:[#allocation2 + $0x68] sm:$0xf] %vm498_vm0, %v12129_v0  ;;  %v541_v11 = vld [vmem:[#allocation2 + $0x74] sm:$0x1] }
  0x27   : > { %539 = vst.msk [vmem:[#allocation2 + $0x6c] sm:$0xf] %vm498_vm0, %v12129_v0  ;;  %540 = vst.msk [vmem:[#allocation2 + $0x70] sm:$0xf] %vm498_vm0, %v12129_v0  ;;  %v548_v14 = vld [vmem:[#allocation2 + $0x88] sm:$0x1] }
  0x28   : > { %545 = vst.msk [vmem:[#allocation2 + $0x7c] sm:$0xf] %vm498_vm0, %v12129_v0  ;;  %546 = vst.msk [vmem:[#allocation2 + $0x80] sm:$0xf] %vm498_vm0, %v12129_v0  ;;  %v555_v15 = vld [vmem:[#allocation2 + $0x9c] sm:$0x1] }
  0x29   : > { %547 = vst.msk [vmem:[#allocation2 + $0x84] sm:$0xf] %vm498_vm0, %v12129_v0  ;;  %552 = vst.msk [vmem:[#allocation2 + $0x90] sm:$0xf] %vm498_vm0, %v12129_v0  ;;  %v562_v18 = vld [vmem:[#allocation2 + $0xb0] sm:$0x1] }
  0x2a   : > { %553 = vst.msk [vmem:[#allocation2 + $0x94] sm:$0xf] %vm498_vm0, %v12129_v0  ;;  %554 = vst.msk [vmem:[#allocation2 + $0x98] sm:$0xf] %vm498_vm0, %v12129_v0  ;;  %v569_v19 = vld [vmem:[#allocation2 + $0xc4] sm:$0x1] }
  0x2b   : > { %559 = vst.msk [vmem:[#allocation2 + $0xa4] sm:$0xf] %vm498_vm0, %v12129_v0  ;;  %560 = vst.msk [vmem:[#allocation2 + $0xa8] sm:$0xf] %vm498_vm0, %v12129_v0  ;;  %v576_v22 = vld [vmem:[#allocation2 + $0xd8] sm:$0x1] }
  0x2c   : > { %561 = vst.msk [vmem:[#allocation2 + $0xac] sm:$0xf] %vm498_vm0, %v12129_v0  ;;  %566 = vst.msk [vmem:[#allocation2 + $0xb8] sm:$0xf] %vm498_vm0, %v12129_v0  ;;  %v583_v23 = vld [vmem:[#allocation2 + $0xec] sm:$0x1] }
  0x2d   : > { %567 = vst.msk [vmem:[#allocation2 + $0xbc] sm:$0xf] %vm498_vm0, %v12129_v0  ;;  %568 = vst.msk [vmem:[#allocation2 + $0xc0] sm:$0xf] %vm498_vm0, %v12129_v0  ;;  %v590_v26 = vld [vmem:[#allocation2 + $0x100] sm:$0x1] }
  0x2e   : > { %573 = vst.msk [vmem:[#allocation2 + $0xcc] sm:$0xf] %vm498_vm0, %v12129_v0  ;;  %574 = vst.msk [vmem:[#allocation2 + $0xd0] sm:$0xf] %vm498_vm0, %v12129_v0  ;;  %v597_v27 = vld [vmem:[#allocation2 + $0x114] sm:$0x1] }
  0x2f   : > { %575 = vst.msk [vmem:[#allocation2 + $0xd4] sm:$0xf] %vm498_vm0, %v12129_v0  ;;  %580 = vst.msk [vmem:[#allocation2 + $0xe0] sm:$0xf] %vm498_vm0, %v12129_v0  ;;  %v604_v30 = vld [vmem:[#allocation2 + $0x128] sm:$0x1] }
  0x30   : > { %581 = vst.msk [vmem:[#allocation2 + $0xe4] sm:$0xf] %vm498_vm0, %v12129_v0  ;;  %582 = vst.msk [vmem:[#allocation2 + $0xe8] sm:$0xf] %vm498_vm0, %v12129_v0  ;;  %v611_v31 = vld [vmem:[#allocation2 + $0x13c] sm:$0x1] }
  0x31   : > { %587 = vst.msk [vmem:[#allocation2 + $0xf4] sm:$0xf] %vm498_vm0, %v12129_v0  ;;  %588 = vst.msk [vmem:[#allocation2 + $0xf8] sm:$0xf] %vm498_vm0, %v12129_v0  ;;  %v618_v35 = vld [vmem:[#allocation2 + $0x150] sm:$0x1] }
  0x32   : > { %589 = vst.msk [vmem:[#allocation2 + $0xfc] sm:$0xf] %vm498_vm0, %v12129_v0  ;;  %594 = vst.msk [vmem:[#allocation2 + $0x108] sm:$0xf] %vm498_vm0, %v12129_v0  ;;  %v625_v36 = vld [vmem:[#allocation2 + $0x164] sm:$0x1] }
  0x33   : > { %595 = vst.msk [vmem:[#allocation2 + $0x10c] sm:$0xf] %vm498_vm0, %v12129_v0  ;;  %596 = vst.msk [vmem:[#allocation2 + $0x110] sm:$0xf] %vm498_vm0, %v12129_v0  ;;  %v635_v39 = vld [vmem:[#allocation3 + $0x10] sm:$0x1] }
  0x34   : > { %601 = vst.msk [vmem:[#allocation2 + $0x11c] sm:$0xf] %vm498_vm0, %v12129_v0  ;;  %602 = vst.msk [vmem:[#allocation2 + $0x120] sm:$0xf] %vm498_vm0, %v12129_v0  ;;  %v642_v40 = vld [vmem:[#allocation3 + $0x24] sm:$0x1] }
  0x35   : > { %603 = vst.msk [vmem:[#allocation2 + $0x124] sm:$0xf] %vm498_vm0, %v12129_v0  ;;  %608 = vst.msk [vmem:[#allocation2 + $0x130] sm:$0xf] %vm498_vm0, %v12129_v0  ;;  %v649_v43 = vld [vmem:[#allocation3 + $0x38] sm:$0x1] }
  0x36   : > { %609 = vst.msk [vmem:[#allocation2 + $0x134] sm:$0xf] %vm498_vm0, %v12129_v0  ;;  %610 = vst.msk [vmem:[#allocation2 + $0x138] sm:$0xf] %vm498_vm0, %v12129_v0  ;;  %v656_v44 = vld [vmem:[#allocation3 + $0x4c] sm:$0x1] }
  0x37   : > { %615 = vst.msk [vmem:[#allocation2 + $0x144] sm:$0xf] %vm498_vm0, %v12129_v0  ;;  %616 = vst.msk [vmem:[#allocation2 + $0x148] sm:$0xf] %vm498_vm0, %v12129_v0  ;;  %v663_v47 = vld [vmem:[#allocation3 + $0x60] sm:$0x1] }
  0x38   : > { %617 = vst.msk [vmem:[#allocation2 + $0x14c] sm:$0xf] %vm498_vm0, %v12129_v0  ;;  %622 = vst.msk [vmem:[#allocation2 + $0x158] sm:$0xf] %vm498_vm0, %v12129_v0  ;;  %v670_v48 = vld [vmem:[#allocation3 + $0x74] sm:$0x1] }
  0x39   : > { %623 = vst.msk [vmem:[#allocation2 + $0x15c] sm:$0xf] %vm498_vm0, %v12129_v0  ;;  %624 = vst.msk [vmem:[#allocation2 + $0x160] sm:$0xf] %vm498_vm0, %v12129_v0  ;;  %v677_v51 = vld [vmem:[#allocation3 + $0x88] sm:$0x1] }
  0x3a   : > { %vm12390_vm3 = vmand %vm503_vm1, %vm504_vm2  ;;  %630 = vst.msk [vmem:[#allocation3 + $0x4] sm:$0xf] %vm628_vm4, %v12129_v0  ;;  %v684_v52 = vld [vmem:[#allocation3 + $0x9c] sm:$0x1]  ;;  %v691_v55 = vld [vmem:[#allocation3 + $0xb0] sm:$0x1] }
  0x3b   : > { %v507_v4 = vsel %vm12390_vm3, 0, %v506_v2  ;;  %v514_v5 = vsel %vm12390_vm3, 0, %v513_v3  ;;  %631 = vst.msk [vmem:[#allocation3 + $0x8] sm:$0xf] %vm628_vm4, %v12129_v0  ;;  %632 = vst.msk [vmem:[#allocation3 + $0xc] sm:$0xf] %vm628_vm4, %v12129_v0 }
  0x3c   : > { %639 = vst.msk [vmem:[#allocation3 + $0x18] sm:$0xf] %vm628_vm4, %v12129_v0  ;;  %640 = vst.msk [vmem:[#allocation3 + $0x1c] sm:$0xf] %vm628_vm4, %v12129_v0  ;;  %v521_v8 = vsel %vm12390_vm3, 0, %v520_v6  ;;  %v528_v9 = vsel %vm12390_vm3, 0, %v527_v7 }
  0x3d   : > { %641 = vst.msk [vmem:[#allocation3 + $0x20] sm:$0xf] %vm628_vm4, %v12129_v0  ;;  %646 = vst.msk [vmem:[#allocation3 + $0x2c] sm:$0xf] %vm628_vm4, %v12129_v0  ;;  %v535_v12 = vsel %vm12390_vm3, 0, %v534_v10  ;;  %v542_v13 = vsel %vm12390_vm3, 0, %v541_v11 }
  0x3e   : > { %647 = vst.msk [vmem:[#allocation3 + $0x30] sm:$0xf] %vm628_vm4, %v12129_v0  ;;  %648 = vst.msk [vmem:[#allocation3 + $0x34] sm:$0xf] %vm628_vm4, %v12129_v0  ;;  %v549_v16 = vsel %vm12390_vm3, 0, %v548_v14  ;;  %v556_v17 = vsel %vm12390_vm3, 0, %v555_v15 }
  0x3f   : > { %653 = vst.msk [vmem:[#allocation3 + $0x40] sm:$0xf] %vm628_vm4, %v12129_v0  ;;  %654 = vst.msk [vmem:[#allocation3 + $0x44] sm:$0xf] %vm628_vm4, %v12129_v0  ;;  %v563_v20 = vsel %vm12390_vm3, 0, %v562_v18  ;;  %v570_v21 = vsel %vm12390_vm3, 0, %v569_v19 }
  0x40   : > { %655 = vst.msk [vmem:[#allocation3 + $0x48] sm:$0xf] %vm628_vm4, %v12129_v0  ;;  %660 = vst.msk [vmem:[#allocation3 + $0x54] sm:$0xf] %vm628_vm4, %v12129_v0  ;;  %v577_v24 = vsel %vm12390_vm3, 0, %v576_v22  ;;  %v584_v25 = vsel %vm12390_vm3, 0, %v583_v23 }
  0x41   : > { %661 = vst.msk [vmem:[#allocation3 + $0x58] sm:$0xf] %vm628_vm4, %v12129_v0  ;;  %662 = vst.msk [vmem:[#allocation3 + $0x5c] sm:$0xf] %vm628_vm4, %v12129_v0  ;;  %v591_v28 = vsel %vm12390_vm3, 0, %v590_v26  ;;  %v598_v29 = vsel %vm12390_vm3, 0, %v597_v27 }
  0x42   : > { %667 = vst.msk [vmem:[#allocation3 + $0x68] sm:$0xf] %vm628_vm4, %v12129_v0  ;;  %668 = vst.msk [vmem:[#allocation3 + $0x6c] sm:$0xf] %vm628_vm4, %v12129_v0  ;;  %v605_v33 = vsel %vm12390_vm3, 0, %v604_v30  ;;  %v612_v34 = vsel %vm12390_vm3, 0, %v611_v31 }
  0x43   : > { %669 = vst.msk [vmem:[#allocation3 + $0x70] sm:$0xf] %vm628_vm4, %v12129_v0  ;;  %674 = vst.msk [vmem:[#allocation3 + $0x7c] sm:$0xf] %vm628_vm4, %v12129_v0  ;;  %v619_v37 = vsel %vm12390_vm3, 0, %v618_v35  ;;  %v626_v38 = vsel %vm12390_vm3, 0, %v625_v36 }
  0x44   : > { %675 = vst.msk [vmem:[#allocation3 + $0x80] sm:$0xf] %vm628_vm4, %v12129_v0  ;;  %676 = vst.msk [vmem:[#allocation3 + $0x84] sm:$0xf] %vm628_vm4, %v12129_v0  ;;  %v698_v56 = vld [vmem:[#allocation3 + $0xc4] sm:$0x1] }
  0x45   : > { %681 = vst.msk [vmem:[#allocation3 + $0x90] sm:$0xf] %vm628_vm4, %v12129_v0  ;;  %682 = vst.msk [vmem:[#allocation3 + $0x94] sm:$0xf] %vm628_vm4, %v12129_v0  ;;  %v705_v59 = vld [vmem:[#allocation3 + $0xd8] sm:$0x1] }
  0x46   : > { %683 = vst.msk [vmem:[#allocation3 + $0x98] sm:$0xf] %vm628_vm4, %v12129_v0  ;;  %688 = vst.msk [vmem:[#allocation3 + $0xa4] sm:$0xf] %vm628_vm4, %v12129_v0  ;;  %v712_v60 = vld [vmem:[#allocation3 + $0xec] sm:$0x1] }
  0x47   : > { %689 = vst.msk [vmem:[#allocation3 + $0xa8] sm:$0xf] %vm628_vm4, %v12129_v0  ;;  %690 = vst.msk [vmem:[#allocation3 + $0xac] sm:$0xf] %vm628_vm4, %v12129_v0  ;;  %v719_v63 = vld [vmem:[#allocation3 + $0x100] sm:$0x1] }
  0x48   : > { %695 = vst.msk [vmem:[#allocation3 + $0xb8] sm:$0xf] %vm628_vm4, %v12129_v0  ;;  %696 = vst.msk [vmem:[#allocation3 + $0xbc] sm:$0xf] %vm628_vm4, %v12129_v0  ;;  %v733_v3 = vld [vmem:[#allocation3 + $0x128] sm:$0x1] }
  0x49   : > { %697 = vst.msk [vmem:[#allocation3 + $0xc0] sm:$0xf] %vm628_vm4, %v12129_v0  ;;  %702 = vst.msk [vmem:[#allocation3 + $0xcc] sm:$0xf] %vm628_vm4, %v12129_v0  ;;  %v747_v7 = vld [vmem:[#allocation3 + $0x150] sm:$0x1] }
  0x4a   : > { %703 = vst.msk [vmem:[#allocation3 + $0xd0] sm:$0xf] %vm628_vm4, %v12129_v0  ;;  %704 = vst.msk [vmem:[#allocation3 + $0xd4] sm:$0xf] %vm628_vm4, %v12129_v0 }
  0x4b   : > { %709 = vst.msk [vmem:[#allocation3 + $0xe0] sm:$0xf] %vm628_vm4, %v12129_v0  ;;  %710 = vst.msk [vmem:[#allocation3 + $0xe4] sm:$0xf] %vm628_vm4, %v12129_v0 }
  0x4c   : > { %711 = vst.msk [vmem:[#allocation3 + $0xe8] sm:$0xf] %vm628_vm4, %v12129_v0  ;;  %716 = vst.msk [vmem:[#allocation3 + $0xf4] sm:$0xf] %vm628_vm4, %v12129_v0 }
  0x4d   : > { %717 = vst.msk [vmem:[#allocation3 + $0xf8] sm:$0xf] %vm628_vm4, %v12129_v0  ;;  %718 = vst.msk [vmem:[#allocation3 + $0xfc] sm:$0xf] %vm628_vm4, %v12129_v0 }
  0x4e   : > { %723 = vst.msk [vmem:[#allocation3 + $0x108] sm:$0xf] %vm628_vm4, %v12129_v0  ;;  %724 = vst.msk [vmem:[#allocation3 + $0x10c] sm:$0xf] %vm628_vm4, %v12129_v0 }
  0x4f   : > { %725 = vst.msk [vmem:[#allocation3 + $0x110] sm:$0xf] %vm628_vm4, %v12129_v0  ;;  %730 = vst.msk [vmem:[#allocation3 + $0x11c] sm:$0xf] %vm628_vm4, %v12129_v0 }
  0x50   : > { %731 = vst.msk [vmem:[#allocation3 + $0x120] sm:$0xf] %vm628_vm4, %v12129_v0  ;;  %732 = vst.msk [vmem:[#allocation3 + $0x124] sm:$0xf] %vm628_vm4, %v12129_v0 }
  0x51   : > { %737 = vst.msk [vmem:[#allocation3 + $0x130] sm:$0xf] %vm628_vm4, %v12129_v0  ;;  %738 = vst.msk [vmem:[#allocation3 + $0x134] sm:$0xf] %vm628_vm4, %v12129_v0 }
  0x52   : > { %739 = vst.msk [vmem:[#allocation3 + $0x138] sm:$0xf] %vm628_vm4, %v12129_v0  ;;  %744 = vst.msk [vmem:[#allocation3 + $0x144] sm:$0xf] %vm628_vm4, %v12129_v0 }
  0x53   : > { %745 = vst.msk [vmem:[#allocation3 + $0x148] sm:$0xf] %vm628_vm4, %v12129_v0  ;;  %746 = vst.msk [vmem:[#allocation3 + $0x14c] sm:$0xf] %vm628_vm4, %v12129_v0 }
  0x54   : > { %751 = vst.msk [vmem:[#allocation3 + $0x158] sm:$0xf] %vm628_vm4, %v12129_v0  ;;  %752 = vst.msk [vmem:[#allocation3 + $0x15c] sm:$0xf] %vm628_vm4, %v12129_v0 }
  0x55   : > { %753 = vst.msk [vmem:[#allocation3 + $0x160] sm:$0xf] %vm628_vm4, %v12129_v0  ;;  %508 = vst [vmem:[#allocation2 + $0x10] sm:$0x1] %v507_v4  ;;  %v726_v0 = vld [vmem:[#allocation3 + $0x114] sm:$0x1] }
  0x56   : > { %515 = vst [vmem:[#allocation2 + $0x24] sm:$0x1] %v514_v5  ;;  %522 = vst [vmem:[#allocation2 + $0x38] sm:$0x1] %v521_v8  ;;  %v740_v4 = vld [vmem:[#allocation3 + $0x13c] sm:$0x1] }
  0x57   : > { %529 = vst [vmem:[#allocation2 + $0x4c] sm:$0x1] %v528_v9  ;;  %536 = vst [vmem:[#allocation2 + $0x60] sm:$0x1] %v535_v12  ;;  %v754_v8 = vld [vmem:[#allocation3 + $0x164] sm:$0x1] }
  0x58   : > { %543 = vst [vmem:[#allocation2 + $0x74] sm:$0x1] %v542_v13  ;;  %550 = vst [vmem:[#allocation2 + $0x88] sm:$0x1] %v549_v16 }
  0x59   : > { %557 = vst [vmem:[#allocation2 + $0x9c] sm:$0x1] %v556_v17  ;;  %564 = vst [vmem:[#allocation2 + $0xb0] sm:$0x1] %v563_v20 }
  0x5a   : > { %571 = vst [vmem:[#allocation2 + $0xc4] sm:$0x1] %v570_v21  ;;  %578 = vst [vmem:[#allocation2 + $0xd8] sm:$0x1] %v577_v24 }
  0x5b   : > { %585 = vst [vmem:[#allocation2 + $0xec] sm:$0x1] %v584_v25  ;;  %vm12532_vm6 = vmand %vm633_vm5, %vm504_vm2 }
  0x5c   : > { %592 = vst [vmem:[#allocation2 + $0x100] sm:$0x1] %v591_v28  ;;  %599 = vst [vmem:[#allocation2 + $0x114] sm:$0x1] %v598_v29  ;;  %v636_v41 = vsel %vm12532_vm6, 0, %v635_v39  ;;  %v643_v42 = vsel %vm12532_vm6, 0, %v642_v40 }
  0x5d   : > { %606 = vst [vmem:[#allocation2 + $0x128] sm:$0x1] %v605_v33  ;;  %613 = vst [vmem:[#allocation2 + $0x13c] sm:$0x1] %v612_v34  ;;  %v650_v45 = vsel %vm12532_vm6, 0, %v649_v43  ;;  %v657_v46 = vsel %vm12532_vm6, 0, %v656_v44 }
  0x5e   : > { %620 = vst [vmem:[#allocation2 + $0x150] sm:$0x1] %v619_v37  ;;  %627 = vst [vmem:[#allocation2 + $0x164] sm:$0x1] %v626_v38  ;;  %v664_v49 = vsel %vm12532_vm6, 0, %v663_v47  ;;  %v671_v50 = vsel %vm12532_vm6, 0, %v670_v48 }
  0x5f   : > { %637 = vst [vmem:[#allocation3 + $0x10] sm:$0x1] %v636_v41  ;;  %644 = vst [vmem:[#allocation3 + $0x24] sm:$0x1] %v643_v42  ;;  %v678_v53 = vsel %vm12532_vm6, 0, %v677_v51  ;;  %v685_v54 = vsel %vm12532_vm6, 0, %v684_v52 }
  0x60   : > { %651 = vst [vmem:[#allocation3 + $0x38] sm:$0x1] %v650_v45  ;;  %658 = vst [vmem:[#allocation3 + $0x4c] sm:$0x1] %v657_v46  ;;  %v692_v57 = vsel %vm12532_vm6, 0, %v691_v55  ;;  %v699_v58 = vsel %vm12532_vm6, 0, %v698_v56 }
  0x61   : > { %665 = vst [vmem:[#allocation3 + $0x60] sm:$0x1] %v664_v49  ;;  %672 = vst [vmem:[#allocation3 + $0x74] sm:$0x1] %v671_v50  ;;  %v706_v61 = vsel %vm12532_vm6, 0, %v705_v59  ;;  %v713_v62 = vsel %vm12532_vm6, 0, %v712_v60 }
  0x62   : > { %679 = vst [vmem:[#allocation3 + $0x88] sm:$0x1] %v678_v53  ;;  %686 = vst [vmem:[#allocation3 + $0x9c] sm:$0x1] %v685_v54  ;;  %v720_v1 = vsel %vm12532_vm6, 0, %v719_v63  ;;  %v727_v2 = vsel %vm12532_vm6, 0, %v726_v0 }
  0x63   : > { %693 = vst [vmem:[#allocation3 + $0xb0] sm:$0x1] %v692_v57  ;;  %700 = vst [vmem:[#allocation3 + $0xc4] sm:$0x1] %v699_v58  ;;  %v734_v5 = vsel %vm12532_vm6, 0, %v733_v3  ;;  %v741_v6 = vsel %vm12532_vm6, 0, %v740_v4 }
  0x64   : > { %707 = vst [vmem:[#allocation3 + $0xd8] sm:$0x1] %v706_v61  ;;  %714 = vst [vmem:[#allocation3 + $0xec] sm:$0x1] %v713_v62  ;;  %v748_v9 = vsel %vm12532_vm6, 0, %v747_v7  ;;  %v755_v10 = vsel %vm12532_vm6, 0, %v754_v8 }
  0x65   : > { %721 = vst [vmem:[#allocation3 + $0x100] sm:$0x1] %v720_v1  ;;  %728 = vst [vmem:[#allocation3 + $0x114] sm:$0x1] %v727_v2 }
  0x66   : > { %735 = vst [vmem:[#allocation3 + $0x128] sm:$0x1] %v734_v5  ;;  %742 = vst [vmem:[#allocation3 + $0x13c] sm:$0x1] %v741_v6 }
  0x67   : > { %749 = vst [vmem:[#allocation3 + $0x150] sm:$0x1] %v748_v9  ;;  %756 = vst [vmem:[#allocation3 + $0x164] sm:$0x1] %v755_v10 }
  0x68 PF: > { %v791_v11 = vld [vmem:[%s18895_s3] sm:$0xff]  ;;  %v792_v12 = vld [vmem:[%s18895_s3 + $0x8] sm:$0xff]  ;;  %v793_v13 = vld [vmem:[%s18895_s3 + $0x10] sm:$0xff]  ;;  %v18914_v14 = vmov 0.0|0.0   ;;  %vm12131_vm7 = vmmov 0   ;;  %v18912_v17 = vmov 0.0  }
  0x69   : > { %11473 = vmatprep.subr.bf16.mxu0 %v18914_v14  ;;  %v11474_v15 = vpack.c.bf16 %v792_v12, %v791_v11  ;;  %v794_v16 = vld [vmem:[%s18895_s3 + $0x18] sm:$0xff]  ;;  %11261 = vmatprep.mubr.msk.f32.mxu0 %vm12131_vm7, %v18912_v17  ;;  %v12596_v18 = vld [vmem:[%s12275_s27] sm:$0xff]  ;;  %v12599_v19 = vld [vmem:[%s12275_s27 + $0x8] sm:$0xff]  ;;  %vm799_vm8 = vcmask 261120   ;;  %vm970_vm9 = vcmask 1040384   ;;  %s19249_s1 = sld [smem:[#allocation203_spill]] }
  0x6a   : > { %v12602_v20 = vld [vmem:[%s12275_s27 + $0x10] sm:$0xff]  ;;  %v800_v21 = vsel %vm799_vm8, %v12596_v18, 0.0  ;;  %v801_v22 = vsel %vm799_vm8, %v12599_v19, 0.0  ;;  %11479 = vmatprep.subr.bf16.mxu1 %v18914_v14  ;;  %11272 = vmatprep.mubr.msk.f32.mxu1 %vm12131_vm7, %v18912_v17  ;;  %v11477_v23 = vpack.c.bf16 %v794_v16, %v793_v13  ;;  %v12612_v24 = vld [vmem:[%s12275_s27 + $0x18] sm:$0xff]  ;;  %v12618_v27 = vld [vmem:[%s12275_s27 + $0x20] sm:$0xff]  ;;  %vm1597_vm10 = vcmask 257024  }
  0x6b   : > { %11475 = vmatpush3.bf16.msra.mxu0 %v11474_v15  ;;  %v802_v25 = vadd.f32 %v801_v22, %v800_v21  ;;  %v803_v26 = vsel %vm799_vm8, %v12602_v20, 0.0  ;;  %v805_v28 = vsel %vm799_vm8, %v12612_v24, 0.0  ;;  %v12623_v29 = vld [vmem:[%s12275_s27 + $0x28] sm:$0xff]  ;;  %v12626_v30 = vld [vmem:[%s12275_s27 + $0x30] sm:$0xff]  ;;  %v12629_v31 = vld [vmem:[%s12275_s27 + $0x38] sm:$0xff]  ;;  %v807_v33 = vsel %vm799_vm8, %v12618_v27, 0.0 }
  0x6c   : > { %11476 = vmatprep.subr.bf16.mxu0 %v18914_v14  ;;  %19229 = vst [vmem:[#allocation10_spill] sm:$0xff] %v12623_v29  ;;  %19230 = vst [vmem:[#allocation11_spill] sm:$0xff] %v12626_v30  ;;  %v12634_v34 = vld [vmem:[%s12275_s27 + $0x40] sm:$0xff]  ;;  %v12637_v35 = vld [vmem:[%s12275_s27 + $0x48] sm:$0xff]  ;;  %v809_v37 = vsel %vm799_vm8, %v12623_v29, 0.0  ;;  %v811_v38 = vsel %vm799_vm8, %v12626_v30, 0.0 }
  0x6d   : > { %19231 = vst [vmem:[#allocation12_spill] sm:$0xff] %v12629_v31  ;;  %v804_v32 = vadd.f32 %v803_v26, %v802_v25  ;;  %v12640_v36 = vld [vmem:[%s12275_s27 + $0x50] sm:$0xff]  ;;  %v813_v39 = vsel %vm799_vm8, %v12629_v31, 0.0  ;;  %v12649_v40 = vld [vmem:[%s12275_s27 + $0x58] sm:$0xff]  ;;  %v12652_v41 = vld [vmem:[%s12275_s27 + $0x60] sm:$0xff]  ;;  %v815_v44 = vsel %vm799_vm8, %v12634_v34, 0.0  ;;  %v869_v26 = vmul.f32 %v12596_v18, %v12596_v18 }
  0x6e   : > { %19232 = vst [vmem:[#allocation13_spill] sm:$0xff] %v12640_v36  ;;  %19233 = vst [vmem:[#allocation14_spill] sm:$0xff] %v12649_v40  ;;  %v12655_v42 = vld [vmem:[%s12275_s27 + $0x68] sm:$0xff]  ;;  %v817_v45 = vsel %vm799_vm8, %v12637_v35, 0.0  ;;  %v819_v46 = vsel %vm799_vm8, %v12640_v36, 0.0  ;;  %v12664_v47 = vld [vmem:[%s12275_s27 + $0x70] sm:$0xff]  ;;  %v878_v14 = vmul.f32 %v12637_v35, %v12637_v35 }
  0x6f   : > { %11478 = vmatpush3.bf16.msra.mxu0 %v11477_v23  ;;  %19234 = vst [vmem:[#allocation15_spill] sm:$0xff] %v12652_v41  ;;  %19235 = vst [vmem:[#allocation16_spill] sm:$0xff] %v12655_v42  ;;  %v806_v43 = vadd.f32 %v805_v28, %v804_v32  ;;  %v12667_v48 = vld [vmem:[%s12275_s27 + $0x78] sm:$0xff]  ;;  %v12670_v49 = vld [vmem:[%s12275_s27 + $0x80] sm:$0xff]  ;;  %v821_v50 = vsel %vm799_vm8, %v12649_v40, 0.0  ;;  %v823_v51 = vsel %vm799_vm8, %v12652_v41, 0.0  ;;  %v870_v28 = vmul.f32 %v12599_v19, %v12599_v19 }
  0x70   : > { %19236 = vst [vmem:[#allocation17_spill] sm:$0xff] %v12664_v47  ;;  %19237 = vst [vmem:[#allocation18_spill] sm:$0xff] %v12667_v48  ;;  %v12678_v52 = vsel %vm799_vm8, %v12655_v42, 0.0  ;;  %v12681_v53 = vld [vmem:[%s12275_s27 + $0x88] sm:$0xff]  ;;  %v12684_v54 = vld [vmem:[%s12275_s27 + $0x90] sm:$0xff]  ;;  %v12691_v57 = vsel %vm799_vm8, %v12664_v47, 0.0 }
  0x71   : > { %19238 = vst [vmem:[#allocation19_spill] sm:$0xff] %v12670_v49  ;;  %19239 = vst [vmem:[#allocation20_spill] sm:$0xff] %v12681_v53  ;;  %v12687_v55 = vld [vmem:[%s12275_s27 + $0x98] sm:$0xff]  ;;  %v808_v56 = vadd.f32 %v807_v33, %v806_v43  ;;  %v12695_v58 = vsel %vm799_vm8, %v12667_v48, 0.0  ;;  %v12699_v59 = vsel %vm799_vm8, %v12670_v49, 0.0  ;;  %v12702_v60 = vld [vmem:[%s12275_s27 + $0xa0] sm:$0xff]  ;;  %v871_v33 = vmul.f32 %v12602_v20, %v12602_v20 }
  0x72   : > { %19240 = vst [vmem:[#allocation21_spill] sm:$0xff] %v12684_v54  ;;  %19241 = vst [vmem:[#allocation22_spill] sm:$0xff] %v12687_v55  ;;  %v12705_v61 = vld [vmem:[%s12275_s27 + $0xa8] sm:$0xff]  ;;  %v12708_v62 = vld [vmem:[%s12275_s27 + $0xb0] sm:$0xff]  ;;  %v12712_v63 = vsel %vm799_vm8, %v12681_v53, 0.0  ;;  %v12716_v0 = vsel %vm799_vm8, %v12684_v54, 0.0  ;;  %v873_v43 = vmul.f32 %v12618_v27, %v12618_v27 }
  0x73   : > { %v12720_v1 = vsel %vm799_vm8, %v12687_v55, 0.0  ;;  %v12723_v2 = vld [vmem:[%s12275_s27 + $0xb8] sm:$0xff]  ;;  %v12726_v3 = vld [vmem:[%s12275_s27 + $0xc0] sm:$0xff]  ;;  %v12729_v4 = vld [vmem:[%s12275_s27 + $0xc8] sm:$0xff]  ;;  %v810_v5 = vadd.f32 %v809_v37, %v808_v56  ;;  %v12733_v6 = vsel %vm799_vm8, %v12702_v60, 0.0  ;;  %v12737_v7 = vsel %vm799_vm8, %v12705_v61, 0.0 }
  0x74   : > { %v12741_v8 = vsel %vm799_vm8, %v12708_v62, 0.0  ;;  %v12744_v9 = vld [vmem:[%s12275_s27 + $0xd0] sm:$0xff]  ;;  %v12747_v10 = vld [vmem:[%s12275_s27 + $0xd8] sm:$0xff]  ;;  %v12750_v11 = vld [vmem:[%s12275_s27 + $0xe0] sm:$0xff]  ;;  %v12754_v12 = vsel %vm799_vm8, %v12723_v2, 0.0  ;;  %v12758_v13 = vsel %vm799_vm8, %v12726_v3, 0.0  ;;  %v872_v37 = vmul.f32 %v12612_v24, %v12612_v24 }
  0x75   : > { %v12762_v15 = vsel %vm799_vm8, %v12729_v4, 0.0  ;;  %v812_v16 = vadd.f32 %v811_v38, %v810_v5  ;;  %v12766_v21 = vsel %vm799_vm8, %v12744_v9, 0.0  ;;  %v12770_v22 = vsel %vm799_vm8, %v12747_v10, 0.0  ;;  %s12133_s17 = smov 32   ;;  %s18989_s23 = smov 64  }
  0x76   : > { %v12774_v23 = vsel %vm799_vm8, %v12750_v11, 0.0  ;;  %v875_v56 = vmul.f32 %v12626_v30, %v12626_v30  ;;  %v876_v5 = vmul.f32 %v12629_v31, %v12629_v31  ;;  %v904_v17 = vsel %vm799_vm8, %v871_v33, 0.0  ;;  %s19560_s0 = smov 64   ;;  %s11144_s30 = sshll.u32 %s12240_s22, 12 }
  0x77   : > { %v814_v25 = vadd.f32 %v813_v39, %v812_v16  ;;  %v874_v39 = vmul.f32 %v12623_v29, %v12623_v29  ;;  %v902_v16 = vsel %vm799_vm8, %v870_v28, 0.0  ;;  %v879_v30 = vmul.f32 %v12640_v36, %v12640_v36  ;;  %s10241_s16 = sshll.u32 %s12277_s20, 4  ;;  %s20273_s22 = sand.u32 1, %s12119_s19   ;;  %s18840_s16 = int_to_ptr.vmem [resolvable:$true] %s10241_s16 }
  0x78   : > { %v880_v31 = vmul.f32 %v12649_v40, %v12649_v40  ;;  %v882_v28 = vmul.f32 %v12655_v42, %v12655_v42  ;;  %v883_v33 = vmul.f32 %v12664_v47, %v12664_v47  ;;  %v908_v40 = vsel %vm799_vm8, %v873_v43, 0.0  ;;  %s12136_s26 = smov [#allocation4]  }
  0x79   : > { %v816_v32 = vadd.f32 %v815_v44, %v814_v25  ;;  %v901_v44 = vsel %vm799_vm8, %v869_v26, 0.0  ;;  %v906_v26 = vsel %vm799_vm8, %v872_v37, 0.0  ;;  %v914_v47 = vsel %vm799_vm8, %v876_v5, 0.0 }
  0x7a   : > { %vm2050_vm11 = vsmask.f32 3328  ;;  %vm2051_vm12 = vsmask.f32 7440  ;;  %vm1695_vm14 = vsmask.f32 256 }
  0x7b   : > { %v818_v38 = vadd.f32 %v817_v45, %v816_v32  ;;  %v877_v45 = vmul.f32 %v12634_v34, %v12634_v34  ;;  %v903_v32 = vadd.f32 %v902_v16, %v901_v44  ;;  %v884_v44 = vmul.f32 %v12667_v48, %v12667_v48  ;;  %vm13341_vm13 = vmor %vm2050_vm11, %vm2051_vm12 }
  0x7c   : > { %v885_v16 = vmul.f32 %v12670_v49, %v12670_v49  ;;  %v912_v48 = vsel %vm799_vm8, %v875_v56, 0.0  ;;  %v922_v56 = vsel %vm799_vm8, %v880_v31, 0.0  ;;  %vm1696_vm15 = vsmask.f32 4368 }
  0x7d   : > { %v820_v25 = vadd.f32 %v819_v46, %v818_v38  ;;  %v881_v46 = vmul.f32 %v12652_v41, %v12652_v41  ;;  %v905_v38 = vadd.f32 %v904_v17, %v903_v32  ;;  %v888_v17 = vmul.f32 %v12687_v55, %v12687_v55  ;;  %vm14069_vm0 = vmor %vm1695_vm14, %vm1696_vm15 }
  0x7e   : > { %v910_v32 = vsel %vm799_vm8, %v874_v39, 0.0  ;;  %v918_v55 = vsel %vm799_vm8, %v878_v14, 0.0  ;;  %v920_v39 = vsel %vm799_vm8, %v879_v30, 0.0  ;;  %v928_v14 = vsel %vm799_vm8, %v883_v33, 0.0 }
  0x7f   : > { %v822_v29 = vadd.f32 %v821_v50, %v820_v25  ;;  %v886_v50 = vmul.f32 %v12681_v53, %v12681_v53  ;;  %v887_v25 = vmul.f32 %v12684_v54, %v12684_v54  ;;  %v907_v36 = vadd.f32 %v906_v26, %v905_v38  ;;  %v797_v53 = vld [vmem:[%s18896_s4 + $0x10] sm:$0xff] }
  0x80   : > { %v916_v38 = vsel %vm799_vm8, %v877_v45, 0.0  ;;  %v924_v5 = vsel %vm799_vm8, %v881_v46, 0.0  ;;  %v926_v54 = vsel %vm799_vm8, %v882_v28, 0.0  ;;  %v930_v30 = vsel %vm799_vm8, %v884_v44, 0.0 }
  0x81   : > { %v824_v37 = vadd.f32 %v823_v51, %v822_v29  ;;  %v795_v29 = vld [vmem:[%s18896_s4] sm:$0xff]  ;;  %v796_v51 = vld [vmem:[%s18896_s4 + $0x8] sm:$0xff]  ;;  %v909_v26 = vadd.f32 %v908_v40, %v907_v36  ;;  %v798_v36 = vld [vmem:[%s18896_s4 + $0x18] sm:$0xff]  ;;  %v932_v31 = vsel %vm799_vm8, %v885_v16, 0.0  ;;  %v934_v45 = vsel %vm799_vm8, %v886_v50, 0.0 }
  0x82   : > { %v936_v46 = vsel %vm799_vm8, %v887_v25, 0.0  ;;  %v938_v28 = vsel %vm799_vm8, %v888_v17, 0.0  ;;  %v11480_v42 = vpack.c.bf16 %v796_v51, %v795_v29  ;;  %v19242_v33 = vmov 0.0|0.0   ;;  %v12866_v29 = vld [vmem:[%s12275_s27 + $0xe8] sm:$0xff] }
  0x83   : > { %v826_v43 = vadd.f32 %v12678_v52, %v824_v37  ;;  %v911_v52 = vadd.f32 %v910_v32, %v909_v26  ;;  %v11483_v32 = vpack.c.bf16 %v798_v36, %v797_v53  ;;  %vm2565_vm1 = vcmask 523264  }
  0x84   : > { %11481 = vmatpush3.bf16.msra.mxu1 %v11480_v42  ;;  %vm3619_vm2 = vcmask 785408   ;;  %vm6125_vm3 = vcmask 519168  }
  0x85   : > { %v828_v40 = vadd.f32 %v12691_v57, %v826_v43  ;;  %v913_v49 = vadd.f32 %v912_v48, %v911_v52  ;;  %11482 = vmatprep.subr.bf16.mxu1 %v19242_v33  ;;  %v893_v52 = vmul.f32 %v12726_v3, %v12726_v3 }
  0x87   : > { %v830_v37 = vadd.f32 %v12695_v58, %v828_v40  ;;  %v915_v57 = vadd.f32 %v914_v47, %v913_v49 }
  0x88   : > { %11484 = vmatpush3.bf16.msra.mxu1 %v11483_v32  ;;  %v948_v32 = vsel %vm799_vm8, %v893_v52, 0.0 }
  0x89   : > { %v832_v41 = vadd.f32 %v12699_v59, %v830_v37  ;;  %v917_v16 = vadd.f32 %v916_v38, %v915_v57  ;;  %11485 = vmatprep.subr.bf16.mxu1 %v19242_v33  ;;  %v895_v57 = vmul.f32 %v12744_v9, %v12744_v9 }
  0x8b   : > { %v834_v44 = vadd.f32 %v12712_v63, %v832_v41  ;;  %v919_v43 = vadd.f32 %v918_v55, %v917_v16  ;;  %v896_v16 = vmul.f32 %v12747_v10, %v12747_v10 }
  0x8d   : > { %v836_v50 = vadd.f32 %v12716_v0, %v834_v44  ;;  %v921_v58 = vadd.f32 %v920_v39, %v919_v43 }
  0x8f   : > { %v838_v48 = vadd.f32 %v12720_v1, %v836_v50  ;;  %v923_v47 = vadd.f32 %v922_v56, %v921_v58  ;;  %v897_v58 = vmul.f32 %v12750_v11, %v12750_v11 }
  0x91   : > { %v840_v59 = vadd.f32 %v12733_v6, %v838_v48  ;;  %v925_v49 = vadd.f32 %v924_v5, %v923_v47  ;;  %v889_v6 = vmul.f32 %v12702_v60, %v12702_v60  ;;  %v12882_v5 = vld [vmem:[%s12275_s27 + $0xf0] sm:$0xff] }
  0x92   : > { %v859_v40 = vsel %vm799_vm8, %v12882_v5, 0.0 }
  0x93   : > { %v842_v42 = vadd.f32 %v12737_v7, %v840_v59  ;;  %v927_v41 = vadd.f32 %v926_v54, %v925_v49  ;;  %v890_v54 = vmul.f32 %v12705_v61, %v12705_v61  ;;  %v940_v26 = vsel %vm799_vm8, %v889_v6, 0.0 }
  0x94   : > { %v952_v59 = vsel %vm799_vm8, %v895_v57, 0.0  ;;  %v954_v49 = vsel %vm799_vm8, %v896_v16, 0.0 }
  0x95   : > { %v844_v53 = vadd.f32 %v12741_v8, %v842_v42  ;;  %v929_v0 = vadd.f32 %v928_v14, %v927_v41  ;;  %v942_v56 = vsel %vm799_vm8, %v890_v54, 0.0  ;;  %v898_v42 = vmul.f32 %v12866_v29, %v12866_v29 }
  0x97   : > { %v846_v63 = vadd.f32 %v12754_v12, %v844_v53  ;;  %v931_v25 = vadd.f32 %v930_v30, %v929_v0  ;;  %v956_v0 = vsel %vm799_vm8, %v897_v58, 0.0  ;;  %v2621_v58 = vld [vmem:[#allocation2 + $0x4c] sm:$0x1] }
  0x99   : > { %v848_v55 = vadd.f32 %v12758_v13, %v846_v63  ;;  %v933_v1 = vadd.f32 %v932_v31, %v931_v25  ;;  %v857_v13 = vsel %vm799_vm8, %v12866_v29, 0.0  ;;  %v899_v63 = vmul.f32 %v12882_v5, %v12882_v5 }
  0x9b   : > { %v850_v17 = vadd.f32 %v12762_v15, %v848_v55  ;;  %v935_v51 = vadd.f32 %v934_v45, %v933_v1  ;;  %v891_v15 = vmul.f32 %v12708_v62, %v12708_v62  ;;  %v12893_v45 = vld [vmem:[%s12275_s27 + $0xf8] sm:$0xff] }
  0x9c   : > { %v861_v37 = vsel %vm799_vm8, %v12893_v45, 0.0  ;;  %v900_v25 = vmul.f32 %v12893_v45, %v12893_v45 }
  0x9d   : > { %v852_v7 = vadd.f32 %v12766_v21, %v850_v17  ;;  %v937_v12 = vadd.f32 %v936_v46, %v935_v51  ;;  %v892_v21 = vmul.f32 %v12723_v2, %v12723_v2  ;;  %v944_v14 = vsel %vm799_vm8, %v891_v15, 0.0 }
  0x9e   : > { %v958_v17 = vsel %vm799_vm8, %v898_v42, 0.0  ;;  %v962_v54 = vsel %vm799_vm8, %v900_v25, 0.0  ;;  %v2629_v42 = vld [vmem:[#allocation2 + $0x74] sm:$0x1] }
  0x9f   : > { %v854_v8 = vadd.f32 %v12770_v22, %v852_v7  ;;  %v939_v39 = vadd.f32 %v938_v28, %v937_v12  ;;  %v946_v31 = vsel %vm799_vm8, %v892_v21, 0.0  ;;  %v960_v7 = vsel %vm799_vm8, %v899_v63, 0.0 }
  0xa0   : > { %v3092_v25 = vshll.u32 %v2629_v42, 16 }
  0xa1   : > { %v856_v38 = vadd.f32 %v12774_v23, %v854_v8  ;;  %v941_v36 = vadd.f32 %v940_v26, %v939_v39  ;;  %v894_v23 = vmul.f32 %v12729_v4, %v12729_v4 }
  0xa3   : > { %v858_v22 = vadd.f32 %v857_v13, %v856_v38  ;;  %v943_v30 = vadd.f32 %v942_v56, %v941_v36  ;;  %v950_v50 = vsel %vm799_vm8, %v894_v23, 0.0  ;;  %v19243_v23 = vmov 0.0  }
  0xa5   : > { %v860_v46 = vadd.f32 %v859_v40, %v858_v22  ;;  %v945_v28 = vadd.f32 %v944_v14, %v943_v30 }
  0xa7   : > { %v947_v44 = vadd.f32 %v946_v31, %v945_v28  ;;  %v862_v43 = vadd.f32 %v861_v37, %v860_v46  ;;  %v1127_v28 = vlaneseq }
  0xa9   : > { %v949_v48 = vadd.f32 %v948_v32, %v947_v44  ;;  %v863_v53 = vrot.slane %v862_v43, 4  ;;  %v12922_v44 = vshrl.u32 %v1127_v28, 7 }
  0xab   : > { %v951_v47 = vadd.f32 %v950_v50, %v949_v48  ;;  %v864_v1 = vadd.f32 %v863_v53, %v862_v43  ;;  %19244 = vst [vmem:[#allocation23_spill] sm:$0xff] %v12922_v44  ;;  %v18941_v43 = vsub.s32 0, %v12922_v44  ;;  %v2613_v48 = vld [vmem:[#allocation2 + $0x24] sm:$0x1]  ;;  %v2637_v53 = vld [vmem:[#allocation2 + $0x9c] sm:$0x1] }
  0xac   : > { %v3036_v63 = vshll.u32 %v2613_v48, 16  ;;  %v19255_v48 = vld [vmem:[#allocation13_spill] sm:$0xff] }
  0xad   : > { %v953_v41 = vadd.f32 %v952_v59, %v951_v47  ;;  %v865_v8 = vrot.slane %v864_v1, 2  ;;  %v2617_v59 = vld [vmem:[#allocation2 + $0x38] sm:$0x1] }
  0xaf   : > { %v955_v55 = vadd.f32 %v954_v49, %v953_v41  ;;  %v866_v15 = vadd.f32 %v865_v8, %v864_v1  ;;  %v2625_v49 = vld [vmem:[#allocation2 + $0x60] sm:$0x1]  ;;  %v2633_v41 = vld [vmem:[#allocation2 + $0x88] sm:$0x1] }
  0xb1   : > { %v957_v6 = vadd.f32 %v956_v0, %v955_v55  ;;  %v867_v39 = vrot.slane %v866_v15, 1  ;;  %v3064_v0 = vshll.u32 %v2621_v58, 16  ;;  %v3050_v55 = vshll.u32 %v2617_v59, 16 }
  0xb3   : > { %v959_v51 = vadd.f32 %v958_v17, %v957_v6  ;;  %v868_v22 = vadd.f32 %v867_v39, %v866_v15  ;;  %v3078_v17 = vshll.u32 %v2625_v49, 16  ;;  %v3120_v6 = vshll.u32 %v2637_v53, 16  ;;  %v19258_v49 = vld [vmem:[#allocation20_spill] sm:$0xff] }
  0xb4   : > { %v12932_v8 = vrot.slane %v3064_v0, 5  ;;  %v19260_v0 = vld [vmem:[#allocation18_spill] sm:$0xff] }
  0xb5   : > { %v961_v12 = vadd.f32 %v960_v7, %v959_v51  ;;  %v3106_v7 = vshll.u32 %v2633_v41, 16  ;;  %v18940_v51 = vsub.s32 1, %v12922_v44  ;;  %v12938_v15 = vrot.slane %v3078_v17, 5  ;;  %v19259_v41 = vld [vmem:[#allocation17_spill] sm:$0xff] }
  0xb6   : > { %v12944_v39 = vrot.slane %v3120_v6, 5  ;;  %v19262_v6 = vld [vmem:[#allocation22_spill] sm:$0xff] }
  0xb7   : > { %v963_v13 = vadd.f32 %v962_v54, %v961_v12  ;;  %v12930_v54 = vrot.slane %v3036_v63, 5  ;;  %v12934_v12 = vrot.slane %v3050_v55, 5  ;;  %19246 = vst [vmem:[#allocation25_spill] sm:$0xff] %v12938_v15 }
  0xb8   : > { %19247 = vst [vmem:[#allocation26_spill] sm:$0xff] %v12944_v39 }
  0xb9   : > { %v964_v26 = vrot.slane %v963_v13, 4 }
  0xbb   : > { %v965_v38 = vadd.f32 %v964_v26, %v963_v13  ;;  %v12936_v13 = vrot.slane %v3092_v25, 5  ;;  %v19261_v25 = vld [vmem:[#allocation21_spill] sm:$0xff] }
  0xbd   : > { %v966_v21 = vrot.slane %v965_v38, 2  ;;  %19245 = vst [vmem:[#allocation24_spill] sm:$0xff] %v12936_v13 }
  0xbf   : > { %v967_v56 = vadd.f32 %v966_v21, %v965_v38  ;;  %v12946_v21 = vrot.slane %v3106_v7, 5 }
  0xc1   : > { %v968_v36 = vrot.slane %v967_v56, 1  ;;  %19248 = vst [vmem:[#allocation27_spill] sm:$0xff] %v12946_v21 }
  0xc3   : > { %v969_v40 = vadd.f32 %v968_v36, %v967_v56 }
  0xc5   : > { %v971_v52 = vsel %vm970_vm9, %v868_v22, %v969_v40 }
  0xc6   : > { %11262 = vmatmul.mubr.msk.f32.vlgmr.msra.gmra.mrb[0].mxu0 %vm799_vm8, %v971_v52  ;;  %v10313_v52 = vld [vmem:[%s19249_s1] ss:$0 sm:$0xff]  ;;  %s12069_s1 = sshll.u32 %s12136_s26, 4  ;;  %s12070_s1 = int_to_ptr.vmem [resolvable:$false] %s12069_s1 }
  0xc7   : > { %s12071_s24 = scalar_lea.vmem %s12070_s1, 8192  ;;  %p12072_p1 = scmp.lt.s32.totalorder %s18840_s16, %s12070_s1 }
 0x199   : > { %v1041_v14 = vpop.f32.mrb[0].mxu0 }
 0x19a   : > { %v11263_v30 = vpop.f32.mrb[1].mxu0  ;;  %11273 = vmatmul.mubr.msk.f32.vlgmr.msra.gmra.mrb[0].mxu1 %vm799_vm8, %v1041_v14 }
 0x19b   : > { %11423 = vmatprep.mubr.msk.f32.mxu1 %vm12131_vm7, %v19243_v23 }
 0x26d   : > { %v1114_v31 = vpop.f32.mrb[0].mxu1 }
 0x26e   : > { %v1118_v46 = vmul.f32 0.00390625, %v1114_v31  ;;  %v11274_v37 = vpop.f32.mrb[1].mxu1 }
 0x26f   : > { %v19251_v37 = vld [vmem:[#allocation11_spill] sm:$0xff] }
 0x270   : > { %v1119_v57 = vmul.f32 %v1118_v46, %v1118_v46  ;;  %v12927_v1 = vrot.slane %v1118_v46, %v18941_v43 }
 0x272   : > { %v1121_v32 = vrot.slane %v1119_v57, 7  ;;  %v1153_v56 = vsub.f32 %v12708_v62, %v12927_v1  ;;  %v1154_v22 = vsub.f32 %v12723_v2, %v12927_v1  ;;  %v1155_v36 = vsub.f32 %v12726_v3, %v12927_v1 }
 0x273   : > { %v1156_v40 = vsub.f32 %v12729_v4, %v12927_v1  ;;  %v1157_v14 = vsub.f32 %v12744_v9, %v12927_v1  ;;  %v1158_v30 = vsub.f32 %v12747_v10, %v12927_v1  ;;  %v1159_v62 = vsub.f32 %v12750_v11, %v12927_v1 }
 0x274   : > { %v1123_v16 = vsub.f32 %v1118_v46, %v1121_v32  ;;  %v1160_v2 = vsub.f32 %v12866_v29, %v12927_v1  ;;  %v1161_v3 = vsub.f32 %v12882_v5, %v12927_v1  ;;  %v1162_v4 = vsub.f32 %v12893_v45, %v12927_v1  ;;  %v19250_v5 = vld [vmem:[#allocation10_spill] sm:$0xff] }
 0x275   : > { %v1131_v31 = vsub.f32 %v12596_v18, %v12927_v1  ;;  %v1132_v9 = vsub.f32 %v12599_v19, %v12927_v1  ;;  %v1133_v10 = vsub.f32 %v12602_v20, %v12927_v1  ;;  %v1134_v11 = vsub.f32 %v12612_v24, %v12927_v1  ;;  %v19252_v20 = vld [vmem:[#allocation12_spill] sm:$0xff]  ;;  %v19253_v24 = vld [vmem:[#allocation15_spill] sm:$0xff] }
 0x276   : > { %v1124_v50 = vmax.f32 %v1123_v16, 0.0  ;;  %v1135_v29 = vsub.f32 %v12618_v27, %v12927_v1  ;;  %v1136_v28 = vsub.f32 %v19250_v5, %v12927_v1  ;;  %v1139_v18 = vsub.f32 %v12634_v34, %v12927_v1  ;;  %v19254_v27 = vld [vmem:[#allocation16_spill] sm:$0xff] }
 0x277   : > { %v1140_v19 = vsub.f32 %v12637_v35, %v12927_v1  ;;  %v1137_v57 = vsub.f32 %v19251_v37, %v12927_v1  ;;  %v1138_v32 = vsub.f32 %v19252_v20, %v12927_v1  ;;  %v1143_v16 = vsub.f32 %v19253_v24, %v12927_v1  ;;  %v19256_v35 = vld [vmem:[#allocation14_spill] sm:$0xff] }
 0x278   : > { %v1125_v47 = vadd.f32 1e-05, %v1124_v50  ;;  %v19272_v33 = vsub.f32 %v19260_v0, %v12927_v1 }
 0x27a   : > { %11770 = vrsqrt.f32 %v1125_v47  ;;  %v19257_v47 = vld [vmem:[#allocation19_spill] sm:$0xff] }
 0x284   : > { %v11771_v46 = vpop.eup %11770 }
 0x285   : > { %v1169_v45 = vmul.f32 %v11771_v46, %v10313_v52  ;;  %v13018_v52 = vld [vmem:[%s18894_s2] ss:$0 sm:$0xff] }
 0x287   : > { %v12999_v34 = vrot.slane %v1169_v45, %v18940_v51 }
 0x289   : > { %v13021_v46 = vmul.f32 %v12999_v34, %v1153_v56  ;;  %v13024_v5 = vmul.f32 %v12999_v34, %v1154_v22  ;;  %v1198_v45 = vmul.f32 %v12999_v34, %v1155_v36  ;;  %v1199_v37 = vmul.f32 %v12999_v34, %v1156_v40 }
 0x28a   : > { %v1200_v51 = vmul.f32 %v12999_v34, %v1157_v14  ;;  %v1201_v43 = vmul.f32 %v12999_v34, %v1158_v30  ;;  %v1202_v7 = vmul.f32 %v12999_v34, %v1159_v62  ;;  %v1203_v17 = vmul.f32 %v12999_v34, %v1160_v2 }
 0x28b   : > { %v1204_v38 = vmul.f32 %v12999_v34, %v1161_v3  ;;  %v1205_v56 = vmul.f32 %v12999_v34, %v1162_v4  ;;  %v1174_v26 = vmul.f32 %v12999_v34, %v1131_v31  ;;  %v1175_v22 = vmul.f32 %v12999_v34, %v1132_v9 }
 0x28c   : > { %v13037_v36 = vadd.f32 %v13018_v52, %v1198_v45  ;;  %v13040_v40 = vadd.f32 %v13018_v52, %v1199_v37  ;;  %v13043_v14 = vadd.f32 %v13018_v52, %v1200_v51  ;;  %v13046_v30 = vadd.f32 %v13018_v52, %v1201_v43 }
 0x28d   : > { %v13049_v62 = vadd.f32 %v13018_v52, %v1174_v26  ;;  %v13052_v2 = vadd.f32 %v13018_v52, %v1175_v22  ;;  %v13055_v3 = vadd.f32 %v13018_v52, %v1202_v7  ;;  %v13058_v4 = vadd.f32 %v13018_v52, %v1203_v17 }
 0x28e   : > { %v13061_v31 = vadd.f32 %v13018_v52, %v1204_v38  ;;  %v13064_v51 = vadd.f32 %v13018_v52, %v1205_v56  ;;  %v1176_v43 = vmul.f32 %v12999_v34, %v1133_v10  ;;  %v1177_v26 = vmul.f32 %v12999_v34, %v1134_v11 }
 0x28f   : > { %v10315_v9 = vmul.f32 -1.442695, %v13049_v62  ;;  %v10316_v45 = vmul.f32 -1.442695, %v13052_v2  ;;  %v10339_v7 = vmul.f32 -1.442695, %v13037_v36  ;;  %v1178_v37 = vmul.f32 %v12999_v34, %v1135_v29 }
 0x290   : > { %v13073_v17 = vadd.f32 %v13018_v52, %v1176_v43  ;;  %v13076_v38 = vadd.f32 %v13018_v52, %v1177_v26  ;;  %v10340_v56 = vmul.f32 -1.442695, %v13040_v40  ;;  %v10341_v10 = vmul.f32 -1.442695, %v13043_v14 }
 0x291   : > { %11772 = vpow2.f32 %v10315_v9  ;;  %v10342_v11 = vmul.f32 -1.442695, %v13046_v30  ;;  %v10343_v22 = vmul.f32 -1.442695, %v13055_v3  ;;  %v10344_v55 = vmul.f32 -1.442695, %v13058_v4 }
 0x292   : > { %11774 = vpow2.f32 %v10316_v45  ;;  %v10317_v29 = vmul.f32 -1.442695, %v13073_v17  ;;  %v10318_v43 = vmul.f32 -1.442695, %v13076_v38  ;;  %v10345_v63 = vmul.f32 -1.442695, %v13061_v31 }
 0x293   : > { %v10346_v26 = vmul.f32 -1.442695, %v13064_v51  ;;  %v1179_v53 = vmul.f32 %v12999_v34, %v1136_v28  ;;  %v13089_v42 = vadd.f32 %v13018_v52, %v1178_v37  ;;  %11776 = vpow2.f32 %v10339_v7 }
 0x294   : > { %11778 = vpow2.f32 %v10317_v29  ;;  %v1182_v9 = vmul.f32 %v12999_v34, %v1139_v18  ;;  %v1183_v59 = vmul.f32 %v12999_v34, %v1140_v19  ;;  %v1180_v45 = vmul.f32 %v12999_v34, %v1137_v57 }
 0x295   : > { %11780 = vpow2.f32 %v10318_v43  ;;  %v13095_v58 = vadd.f32 %v13018_v52, %v1179_v53  ;;  %v10319_v50 = vmul.f32 -1.442695, %v13089_v42  ;;  %v1181_v28 = vmul.f32 %v12999_v34, %v1138_v32 }
 0x296   : > { %11782 = vpow2.f32 %v10340_v56  ;;  %v13103_v7 = vadd.f32 %v13018_v52, %v1182_v9  ;;  %v13106_v18 = vadd.f32 %v13018_v52, %v1183_v59  ;;  %v13109_v19 = vadd.f32 %v13018_v52, %v1180_v45 }
 0x297   : > { %11784 = vpow2.f32 %v10319_v50  ;;  %v10320_v57 = vmul.f32 -1.442695, %v13095_v58  ;;  %v13113_v53 = vadd.f32 %v13018_v52, %v1181_v28  ;;  %v1186_v20 = vmul.f32 %v12999_v34, %v1143_v16 }
 0x298   : > { %11786 = vpow2.f32 %v10341_v10  ;;  %v13120_v32 = vmul.f32 -1.442695, %v13103_v7  ;;  %v13123_v59 = vmul.f32 -1.442695, %v13106_v18  ;;  %v13126_v37 = vmul.f32 -1.442695, %v13109_v19 }
 0x299   : > { %11788 = vpow2.f32 %v10320_v57  ;;  %v13129_v50 = vmul.f32 -1.442695, %v13113_v53  ;;  %v19263_v56 = vsub.f32 %v19254_v27, %v12927_v1  ;;  %v13136_v16 = vadd.f32 %v13018_v52, %v1186_v20 }
 0x29a   : > { %11790 = vpow2.f32 %v10342_v11  ;;  %v19264_v10 = vsub.f32 %v19255_v48, %v12927_v1  ;;  %v19265_v43 = vsub.f32 %v19256_v35, %v12927_v1  ;;  %v19266_v45 = vsub.f32 %v19257_v47, %v12927_v1 }
 0x29b   : > { %v1187_v24 = vmul.f32 %v12999_v34, %v19263_v56  ;;  %v11773_v28 = vpop.eup %11772  ;;  %11792 = vpow2.f32 %v10343_v22  ;;  %v13154_v11 = vmul.f32 -1.442695, %v13136_v16  ;;  %v19267_v48 = vsub.f32 %v19258_v49, %v12927_v1  ;;  %v2645_v49 = vld [vmem:[#allocation2 + $0xc4] sm:$0x1] }
 0x29c   : > { %v1184_v29 = vmul.f32 %v12999_v34, %v19264_v10  ;;  %v1185_v9 = vmul.f32 %v12999_v34, %v19265_v43  ;;  %v1190_v27 = vmul.f32 %v12999_v34, %v19266_v45  ;;  %v11775_v20 = vpop.eup %11774  ;;  %v1340_v56 = vadd.f32 1.0, %v11773_v28 }
 0x29d   : > { %v13151_v57 = vadd.f32 %v13018_v52, %v1187_v24  ;;  %v1191_v35 = vmul.f32 %v12999_v34, %v19267_v48  ;;  %11794 = vpow2.f32 %v10344_v55  ;;  %v11777_v22 = vpop.eup %11776  ;;  %v1341_v24 = vadd.f32 1.0, %v11775_v20 }
 0x29e   : > { %v13161_v47 = vadd.f32 %v13018_v52, %v1184_v29  ;;  %v13164_v10 = vadd.f32 %v13018_v52, %v1185_v9  ;;  %11796 = vpow2.f32 %v10345_v63  ;;  %v13170_v45 = vadd.f32 %v13018_v52, %v1190_v27  ;;  %v11779_v48 = vpop.eup %11778 }
 0x29f   : > { %v13167_v43 = vmul.f32 -1.442695, %v13151_v57  ;;  %11798 = vrcp.f32 %v1340_v56  ;;  %v1364_v28 = vadd.f32 1.0, %v11777_v22  ;;  %v11781_v9 = vpop.eup %11780  ;;  %v1342_v20 = vadd.f32 1.0, %v11779_v48  ;;  %v2641_v48 = vld [vmem:[#allocation2 + $0xb0] sm:$0x1] }
 0x2a0   : > { %19268 = vst [vmem:[#allocation10_spill] sm:$0xff] %v13164_v10  ;;  %19269 = vst [vmem:[#allocation11_spill] sm:$0xff] %v13170_v45  ;;  %v13173_v55 = vmul.f32 -1.442695, %v13161_v47  ;;  %v13176_v29 = vmul.f32 -1.442695, %v13164_v10  ;;  %11800 = vrcp.f32 %v1341_v24  ;;  %v13179_v63 = vadd.f32 %v13018_v52, %v1191_v35  ;;  %v11783_v27 = vpop.eup %11782 }
 0x2a1   : > { %v13182_v44 = vmul.f32 -1.442695, %v13170_v45  ;;  %v1343_v23 = vadd.f32 1.0, %v11781_v9  ;;  %11802 = vpow2.f32 %v10346_v26  ;;  %v19271_v56 = vsub.f32 %v19259_v41, %v12927_v1  ;;  %v11785_v21 = vpop.eup %11784 }
 0x2a2   : > { %19270 = vst [vmem:[#allocation12_spill] sm:$0xff] %v13179_v63  ;;  %v1189_v24 = vmul.f32 %v12999_v34, %v19272_v33  ;;  %11804 = vrcp.f32 %v1342_v20  ;;  %v1365_v35 = vadd.f32 1.0, %v11783_v27  ;;  %v13193_v39 = vmul.f32 -1.442695, %v13179_v63  ;;  %v11787_v9 = vpop.eup %11786 }
 0x2a3   : > { %v1188_v22 = vmul.f32 %v12999_v34, %v19271_v56  ;;  %v3148_v45 = vshll.u32 %v2645_v49, 16  ;;  %11806 = vrcp.f32 %v1343_v23  ;;  %v1344_v26 = vadd.f32 1.0, %v11785_v21  ;;  %v11789_v0 = vpop.eup %11788 }
 0x2a4   : > { %v13199_v56 = vadd.f32 %v13018_v52, %v1189_v24  ;;  %v1366_v33 = vadd.f32 1.0, %v11787_v9  ;;  %11808 = vrcp.f32 %v1364_v28  ;;  %v3134_v20 = vshll.u32 %v2641_v48, 16  ;;  %v11791_v27 = vpop.eup %11790 }
 0x2a5   : > { %v13196_v41 = vadd.f32 %v13018_v52, %v1188_v22  ;;  %v13201_v15 = vrot.slane %v3148_v45, 5  ;;  %v1345_v63 = vadd.f32 1.0, %v11789_v0  ;;  %11810 = vrcp.f32 %v1344_v26  ;;  %v11793_v21 = vpop.eup %11792 }
 0x2a6   : > { %19274 = vst [vmem:[#allocation16_spill] sm:$0xff] %v13199_v56  ;;  %v13207_v23 = vmul.f32 -1.442695, %v13199_v56  ;;  %v1367_v22 = vadd.f32 1.0, %v11791_v27  ;;  %11812 = vrcp.f32 %v1365_v35  ;;  %v13209_v24 = vrot.slane %v3134_v20, 5 }
 0x2a7   : > { %19273 = vst [vmem:[#allocation15_spill] sm:$0xff] %v13196_v41  ;;  %19275 = vst [vmem:[#allocation13_spill] sm:$0xff] %v13201_v15  ;;  %v13204_v49 = vmul.f32 -1.442695, %v13196_v41  ;;  %v19277_v28 = vsub.f32 %v12702_v60, %v12927_v1  ;;  %v11795_v48 = vpop.eup %11794  ;;  %11814 = vrcp.f32 %v1345_v63  ;;  %v1368_v9 = vadd.f32 1.0, %v11793_v21 }
 0x2a8   : > { %19276 = vst [vmem:[#allocation14_spill] sm:$0xff] %v13209_v24  ;;  %v19278_v26 = vsub.f32 %v12705_v61, %v12927_v1  ;;  %v19279_v15 = vsub.f32 %v19261_v25, %v12927_v1  ;;  %v11797_v20 = vpop.eup %11796  ;;  %v1369_v27 = vadd.f32 1.0, %v11795_v48  ;;  %11816 = vrcp.f32 %v1366_v33 }
 0x2a9   : > { %v1194_v45 = vmul.f32 %v12999_v34, %v19277_v28  ;;  %v19281_v63 = vsub.f32 %v19262_v6, %v12927_v1  ;;  %v11799_v28 = vpop.eup %11798  ;;  %v1370_v61 = vadd.f32 1.0, %v11797_v20  ;;  %11818 = vrcp.f32 %v1367_v22 }
 0x2aa   : > { %v1195_v0 = vmul.f32 %v12999_v34, %v19278_v26  ;;  %v1192_v35 = vmul.f32 %v12999_v34, %v19279_v15  ;;  %v11801_v15 = vpop.eup %11800  ;;  %v1436_v33 = vmul.f32 %v11799_v28, %v13049_v62  ;;  %11820 = vrcp.f32 %v1368_v9 }
 0x2ab   : > { %v13224_v60 = vadd.f32 %v13018_v52, %v1194_v45  ;;  %v1193_v21 = vmul.f32 %v12999_v34, %v19281_v63  ;;  %v2653_v34 = vld [vmem:[#allocation2 + $0xec] sm:$0x1]  ;;  %v11803_v6 = vpop.eup %11802  ;;  %v1437_v22 = vmul.f32 %v11801_v15, %v13052_v2  ;;  %11822 = vrcp.f32 %v1369_v27 }
 0x2ac   : > { %v13231_v26 = vadd.f32 %v13018_v52, %v1195_v0  ;;  %v13234_v25 = vadd.f32 %v13018_v52, %v1192_v35  ;;  %v2649_v35 = vld [vmem:[#allocation2 + $0xd8] sm:$0x1]  ;;  %v11805_v62 = vpop.eup %11804  ;;  %v11080_v9 = vpack.c.bf16 %v1436_v33, %v1436_v33  ;;  %v1371_v20 = vadd.f32 1.0, %v11803_v6 }
 0x2ad   : > { %19280 = vst [vmem:[#allocation19_spill] sm:$0xff] %v13224_v60  ;;  %v13238_v45 = vmul.f32 -1.442695, %v13224_v60  ;;  %v13241_v1 = vadd.f32 %v13018_v52, %v1193_v21  ;;  %11824 = vrcp.f32 %v1370_v61  ;;  %v11807_v21 = vpop.eup %11806  ;;  %v11081_v28 = vpack.c.bf16 %v1437_v22, %v1437_v22 }
 0x2ae   : > { %19282 = vst [vmem:[#allocation20_spill] sm:$0xff] %v13231_v26  ;;  %19283 = vst [vmem:[#allocation17_spill] sm:$0xff] %v13234_v25  ;;  %v13245_v48 = vmul.f32 -1.442695, %v13231_v26  ;;  %v13248_v0 = vmul.f32 -1.442695, %v13234_v25  ;;  %v1438_v24 = vmul.f32 %v11805_v62, %v13073_v17  ;;  %11826 = vpow2.f32 %v13120_v32  ;;  %v11809_v27 = vpop.eup %11808 }
 0x2af   : > { %19284 = vst [vmem:[#allocation18_spill] sm:$0xff] %v13241_v1  ;;  %v13251_v63 = vmul.f32 -1.442695, %v13241_v1  ;;  %v3176_v2 = vshll.u32 %v2653_v34, 16  ;;  %1598 = vst.msk [vmem:[#allocation2 + $0x1c] sm:$0xf] %vm1597_vm10, %v11080_v9  ;;  %v1439_v15 = vmul.f32 %v11807_v21, %v13076_v38  ;;  %11828 = vrcp.f32 %v1371_v20  ;;  %v11811_v33 = vpop.eup %11810 }
 0x2b0   : > { %v3162_v25 = vshll.u32 %v2649_v35, 16  ;;  %v13259_v61 = vadd.f32 %v13018_v52, %v13021_v46  ;;  %1599 = vst.msk [vmem:[#allocation2 + $0x20] sm:$0xf] %vm1597_vm10, %v11081_v28  ;;  %v11082_v6 = vpack.c.bf16 %v1438_v24, %v1438_v24  ;;  %11830 = vpow2.f32 %v13123_v59  ;;  %v11813_v34 = vpop.eup %11812 }
 0x2b1   : > { %v13263_v17 = vrot.slane %v3176_v2, 5  ;;  %v1460_v32 = vmul.f32 %v11809_v27, %v13037_v36  ;;  %v11083_v22 = vpack.c.bf16 %v1439_v15, %v1439_v15  ;;  %v1440_v38 = vmul.f32 %v11811_v33, %v13089_v42  ;;  %v11815_v46 = vpop.eup %11814  ;;  %v13277_v36 = vld [vmem:[#allocation2 + $0x114] sm:$0x1] }
 0x2b2   : > { %19285 = vst [vmem:[#allocation21_spill] sm:$0xff] %v13259_v61  ;;  %11832 = vpow2.f32 %v13126_v37  ;;  %v13268_v35 = vrot.slane %v3162_v25, 5  ;;  %1600 = vst.msk [vmem:[#allocation2 + $0x30] sm:$0xf] %vm1597_vm10, %v11082_v6  ;;  %v1461_v24 = vmul.f32 %v11813_v34, %v13040_v40  ;;  %v13275_v62 = vadd.f32 %v13018_v52, %v13024_v5  ;;  %v11817_v9 = vpop.eup %11816 }
 0x2b3   : > { %19286 = vst [vmem:[#allocation22_spill] sm:$0xff] %v13263_v17  ;;  %11834 = vpow2.f32 %v13129_v50  ;;  %v11104_v59 = vpack.c.bf16 %v1460_v32, %v1460_v32  ;;  %1601 = vst.msk [vmem:[#allocation2 + $0x34] sm:$0xf] %vm1597_vm10, %v11083_v22  ;;  %v1441_v42 = vmul.f32 %v11815_v46, %v13095_v58  ;;  %v11084_v37 = vpack.c.bf16 %v1440_v38, %v1440_v38  ;;  %v13285_v50 = vld [vmem:[#allocation2 + $0x100] sm:$0x1]  ;;  %v11819_v40 = vpop.eup %11818 }
 0x2b4   : > { %19287 = vst [vmem:[#allocation28_spill] sm:$0xff] %v13268_v35  ;;  %19288 = vst [vmem:[#allocation29_spill] sm:$0xff] %v13275_v62  ;;  %11836 = vpow2.f32 %v13154_v11  ;;  %v13283_v25 = vmul.f32 -1.442695, %v13259_v61  ;;  %v1462_v52 = vmul.f32 %v11817_v9, %v13043_v14  ;;  %v11105_v5 = vpack.c.bf16 %v1461_v24, %v1461_v24  ;;  %v11821_v20 = vpop.eup %11820 }
 0x2b5   : > { %11838 = vpow2.f32 %v13167_v43  ;;  %1622 = vst.msk [vmem:[#allocation2 + $0x10c] sm:$0xf] %vm1597_vm10, %v11104_v59  ;;  %v13291_v58 = vmul.f32 -1.442695, %v13275_v62  ;;  %v11085_v11 = vpack.c.bf16 %v1441_v42, %v1441_v42  ;;  %1602 = vst.msk [vmem:[#allocation2 + $0x44] sm:$0xf] %vm1597_vm10, %v11084_v37  ;;  %v1463_v21 = vmul.f32 %v11819_v40, %v13046_v30  ;;  %v11823_v2 = vpop.eup %11822 }
 0x2b6   : > { %11840 = vpow2.f32 %v13173_v55  ;;  %v2611_v14 = vld [vmem:[#allocation2 + $0x1c] sm:$0xf]  ;;  %v13298_v43 = vmul.f32 %v11821_v20, %v13055_v3  ;;  %v11106_v27 = vpack.c.bf16 %v1462_v52, %v1462_v52  ;;  %1623 = vst.msk [vmem:[#allocation2 + $0x110] sm:$0xf] %vm1597_vm10, %v11105_v5  ;;  %v13305_v55 = vmul.f32 %v11823_v2, %v13058_v4 }
 0x2b7   : > { %11842 = vpow2.f32 %v13176_v29  ;;  %v11825_v33 = vpop.eup %11824  ;;  %v2612_v6 = vld [vmem:[#allocation2 + $0x20] sm:$0xf]  ;;  %v2680_v32 = vshrl.u32 %v2611_v14, 16  ;;  %v2683_v30 = vshll.u32 %v2611_v14, 16  ;;  %1603 = vst.msk [vmem:[#allocation2 + $0x48] sm:$0xf] %vm1597_vm10, %v11085_v11  ;;  %v11107_v34 = vpack.c.bf16 %v1463_v21, %v1463_v21 }
 0x2b8   : > { %v11827_v22 = vpop.eup %11826  ;;  %v2689_v3 = vshrl.u32 %v2612_v6, 16  ;;  %v2692_v38 = vshll.u32 %v2612_v6, 16  ;;  %v10475_v46 = vcombine.low %v2611_v14, %v2612_v6  ;;  %v13308_v29 = vmul.f32 %v11825_v33, %v13061_v31  ;;  %1624 = vst.msk [vmem:[#allocation2 + $0x120] sm:$0xf] %vm1597_vm10, %v11106_v27 }
 0x2b9   : > { %v11829_v24 = vpop.eup %11828  ;;  %v13311_v59 = vrot.slane %v2680_v32, 7  ;;  %v3026_v9 = vrot.slane %v2680_v32, 4  ;;  %v3027_v42 = vrot.slane %v2683_v30, 5  ;;  %v2615_v37 = vld [vmem:[#allocation2 + $0x30] sm:$0xf]  ;;  %v13313_v40 = vadd.f32 1.0, %v11827_v22 }
 0x2ba   : > { %1625 = vst.msk [vmem:[#allocation2 + $0x124] sm:$0xf] %vm1597_vm10, %v11107_v34  ;;  %v11831_v4 = vpop.eup %11830  ;;  %v2691_v52 = vrot.slane %v2689_v3, 7  ;;  %v3032_v5 = vrot.slane %v2689_v3, 4  ;;  %3378 = vrot.lane.b32.xlu0 %v10475_v46, %s12133_s17  ;;  %v2616_v31 = vld [vmem:[#allocation2 + $0x34] sm:$0xf] }
 0x2bb   : > { %19289 = vst [vmem:[#allocation30_spill] sm:$0xff] %v13311_v59  ;;  %v2702_v20 = vshrl.u32 %v2615_v37, 16  ;;  %v2705_v11 = vshll.u32 %v2615_v37, 16  ;;  %v13320_v2 = vor.u32 %v2683_v30, %v13311_v59  ;;  %v2711_v27 = vshrl.u32 %v2616_v31, 16 }
 0x2bc   : > { %v13317_v21 = vpop.eup %11832  ;;  %v2714_v33 = vshll.u32 %v2616_v31, 16  ;;  %v13325_v32 = vor.u32 %v2692_v38, %v2691_v52  ;;  %v2619_v46 = vld [vmem:[#allocation2 + $0x44] sm:$0xf]  ;;  %v10476_v17 = vcombine.low %v2615_v37, %v2616_v31  ;;  %v3028_v61 = vor.u32 %v3027_v42, %v3026_v9 }
 0x2bd   : > { %19290 = vst [vmem:[#allocation31_spill] sm:$0xff] %v13320_v2  ;;  %v13323_v6 = vpop.eup %11834  ;;  %v13327_v34 = vrot.slane %v2702_v20, 7  ;;  %v3040_v22 = vrot.slane %v2702_v20, 4  ;;  %v3041_v3 = vrot.slane %v2705_v11, 5  ;;  %v2713_v28 = vrot.slane %v2711_v27, 7 }
 0x2be   : > { %19291 = vst [vmem:[#allocation32_spill] sm:$0xff] %v13325_v32  ;;  %v13329_v15 = vpop.eup %11836  ;;  %v3046_v35 = vrot.slane %v2711_v27, 4  ;;  %v2724_v30 = vshrl.u32 %v2619_v46, 16  ;;  %v2620_v59 = vld [vmem:[#allocation2 + $0x48] sm:$0xf]  ;;  %v2727_v62 = vshll.u32 %v2619_v46, 16  ;;  %3380 = vrot.lane.b32.xlu0 %v10476_v17, %s12133_s17  ;;  %11844 = vrcp.f32 %v13313_v40 }
 0x2bf   : > { %19292 = vst [vmem:[#allocation33_spill] sm:$0xff] %v13327_v34  ;;  %v11839_v2 = vpop.eup %11838  ;;  %v13332_v14 = vor.u32 %v2705_v11, %v13327_v34  ;;  %v3030_v52 = vrot.slane %v2692_v38, 5  ;;  %v13334_v1 = vor.u32 %v2714_v33, %v2713_v28  ;;  %v2733_v26 = vshrl.u32 %v2620_v59, 16  ;;  %v13375_v40 = vld [vmem:[#allocation2 + $0x10c] sm:$0xf] }
 0x2c0   : > { %v11841_v32 = vpop.eup %11840  ;;  %v13337_v20 = vrot.slane %v2724_v30, 7  ;;  %v2736_v60 = vshll.u32 %v2620_v59, 16  ;;  %v3054_v11 = vrot.slane %v2724_v30, 4  ;;  %v3055_v27 = vrot.slane %v2727_v62, 5 }
 0x2c1   : > { %19293 = vst [vmem:[#allocation34_spill] sm:$0xff] %v13332_v14  ;;  %19294 = vst [vmem:[#allocation35_spill] sm:$0xff] %v13334_v1  ;;  %v11843_v31 = vpop.eup %11842  ;;  %v10477_v9 = vcombine.low %v2619_v46, %v2620_v59  ;;  %v3029_v38 = vrot.slane %v3028_v61, 4  ;;  %v2735_v42 = vrot.slane %v2733_v26, 7  ;;  %v3060_v17 = vrot.slane %v2733_v26, 4 }
 0x2c2   : > { %v13346_v28 = vor.u32 %v2727_v62, %v13337_v20  ;;  %v3033_v1 = vor.u32 %v3032_v5, %v3030_v52  ;;  %v3056_v34 = vor.u32 %v3055_v27, %v3054_v11  ;;  %v3058_v56 = vrot.slane %v2736_v60, 5 }
 0x2c3   : > { %v3031_v14 = vsel %vm13341_vm13, %v3029_v38, %v3030_v52  ;;  %v3042_v41 = vor.u32 %v3041_v3, %v3040_v22  ;;  %v13350_v13 = vor.u32 %v2736_v60, %v2735_v42  ;;  %3382 = vrot.lane.b32.xlu0 %v10477_v9, %s12133_s17  ;;  %v3044_v10 = vrot.slane %v2714_v33, 5 }
 0x2c4   : > { %19297 = vst [vmem:[#allocation36_spill] sm:$0xff] %v13346_v28  ;;  %v3034_v30 = vrot.slane %v3033_v1, 4  ;;  %v1467_v61 = vmul.f32 %v11829_v24, %v13064_v51  ;;  %v3057_v59 = vrot.slane %v3056_v34, 4  ;;  %v3061_v62 = vor.u32 %v3060_v17, %v3058_v56 }
 0x2c5   : > { %v3043_v46 = vrot.slane %v3042_v41, 4  ;;  %v1349_v28 = vadd.f32 1.0, %v11831_v4  ;;  %v3047_v5 = vor.u32 %v3046_v35, %v3044_v10  ;;  %v11108_v60 = vpack.c.bf16 %v13298_v43, %v13298_v43 }
 0x2c6   : > { %v3039_v26 = vsel %vm13341_vm13, %v3034_v30, %v12930_v54  ;;  %v3059_v1 = vsel %vm13341_vm13, %v3057_v59, %v3058_v56  ;;  %v3062_v33 = vrot.slane %v3061_v62, 4  ;;  %v11109_v24 = vpack.c.bf16 %v13305_v55, %v13305_v55  ;;  %v13377_v55 = vld [vmem:[#allocation2 + $0x110] sm:$0xf] }
 0x2c7   : > { %v10491_v22 = vcombine.low %v3031_v14, %v3039_v26  ;;  %v3045_v51 = vsel %vm13341_vm13, %v3043_v46, %v3044_v10  ;;  %v3048_v41 = vrot.slane %v3047_v5, 4  ;;  %11846 = vrcp.f32 %v1349_v28  ;;  %1626 = vst.msk [vmem:[#allocation2 + $0x134] sm:$0xf] %vm1597_vm10, %v11108_v60 }
 0x2c8   : > { %v11110_v54 = vpack.c.bf16 %v13308_v29, %v13308_v29  ;;  %v3067_v56 = vsel %vm13341_vm13, %v3062_v33, %v12932_v8  ;;  %v11111_v35 = vpack.c.bf16 %v1467_v61, %v1467_v61  ;;  %v1346_v10 = vadd.f32 1.0, %v13317_v21  ;;  %1627 = vst.msk [vmem:[#allocation2 + $0x138] sm:$0xf] %vm1597_vm10, %v11109_v24  ;;  %v11845_v30 = vpop.eup %11844 }
 0x2c9   : > { %3458 = vrot.lane.b32.xlu1 %v10491_v22, %s18989_s23  ;;  %v1347_v43 = vadd.f32 1.0, %v13323_v6  ;;  %v10493_v4 = vcombine.low %v3059_v1, %v3067_v56  ;;  %v3053_v29 = vsel %vm13341_vm13, %v3048_v41, %v12934_v12  ;;  %v1352_v8 = vadd.f32 1.0, %v13329_v15 }
 0x2ca   : > { %1628 = vst.msk [vmem:[#allocation2 + $0x148] sm:$0xf] %vm1597_vm10, %v11110_v54  ;;  %v1353_v14 = vadd.f32 1.0, %v11839_v2  ;;  %v10492_v34 = vcombine.low %v3045_v51, %v3053_v29  ;;  %11848 = vrcp.f32 %v1346_v10  ;;  %1629 = vst.msk [vmem:[#allocation2 + $0x14c] sm:$0xf] %vm1597_vm10, %v11111_v35  ;;  %v1350_v21 = vadd.f32 1.0, %v11841_v32 }
 0x2cb   : > { %v1351_v6 = vadd.f32 1.0, %v11843_v31  ;;  %3462 = vrot.lane.b32.xlu0 %v10493_v4, %s18989_s23  ;;  %11850 = vrcp.f32 %v1347_v43  ;;  %v2944_v3 = vshrl.u32 %v13375_v40, 16  ;;  %v2947_v12 = vshll.u32 %v13375_v40, 16 }
 0x2cc   : > { %v2953_v52 = vshrl.u32 %v13377_v55, 16  ;;  %11852 = vrcp.f32 %v1352_v8  ;;  %v2956_v15 = vshll.u32 %v13377_v55, 16  ;;  %v19298_v32 = vshll.u32 %v13277_v36, 16 }
 0x2cd   : > { %3460 = vrot.lane.b32.xlu1 %v10492_v34, %s18989_s23  ;;  %11854 = vrcp.f32 %v1353_v14  ;;  %v13396_v11 = vrot.slane %v2944_v3, 7  ;;  %v3194_v9 = vrot.slane %v2944_v3, 4  ;;  %v3195_v38 = vrot.slane %v2947_v12, 5 }
 0x2ce   : > { %v3206_v31 = vrot.slane %v19298_v32, 5  ;;  %v2955_v27 = vrot.slane %v2953_v52, 7  ;;  %11856 = vrcp.f32 %v1350_v21  ;;  %v3200_v28 = vrot.slane %v2953_v52, 4  ;;  %v13398_v17 = vld [vmem:[#allocation2 + $0x134] sm:$0xf] }
 0x2cf   : > { %19299 = vst [vmem:[#allocation37_spill] sm:$0xff] %v13396_v11  ;;  %v3198_v42 = vrot.slane %v2956_v15, 5  ;;  %11858 = vrcp.f32 %v1351_v6  ;;  %v13401_v61 = vor.u32 %v2947_v12, %v13396_v11  ;;  %v19302_v36 = vshll.u32 %v13285_v50, 16  ;;  %v13411_v60 = vld [vmem:[#allocation2 + $0x138] sm:$0xf] }
 0x2d0   : > { %v13403_v59 = vor.u32 %v2956_v15, %v2955_v27  ;;  %v1444_v46 = vmul.f32 %v11845_v30, %v13103_v7  ;;  %11860 = vpow2.f32 %v13182_v44  ;;  %v3196_v26 = vor.u32 %v3195_v38, %v3194_v9  ;;  %v13456_v52 = vld [vmem:[#allocation2 + $0x124] sm:$0xf] }
 0x2d1   : > { %19300 = vst [vmem:[#allocation38_spill] sm:$0xff] %v13401_v61  ;;  %v13407_v62 = vrot.slane %v19302_v36, 5  ;;  %v3201_v5 = vor.u32 %v3200_v28, %v3198_v42  ;;  %v11847_v22 = vpop.eup %11846  ;;  %11862 = vpow2.f32 %v13193_v39  ;;  %v2988_v1 = vshrl.u32 %v13398_v17, 16  ;;  %v19308_v9 = vld [vmem:[#allocation24_spill] sm:$0xff] }
 0x2d2   : > { %19301 = vst [vmem:[#allocation39_spill] sm:$0xff] %v13403_v59  ;;  %v2991_v33 = vshll.u32 %v13398_v17, 16  ;;  %v2997_v51 = vshrl.u32 %v13411_v60, 16  ;;  %v1445_v50 = vmul.f32 %v11847_v22, %v13106_v18  ;;  %v11088_v41 = vpack.c.bf16 %v1444_v46, %v1444_v46 }
 0x2d3   : > { %11864 = vpow2.f32 %v13204_v49  ;;  %v3197_v7 = vrot.slane %v3196_v26, 4  ;;  %v3202_v44 = vrot.slane %v3201_v5, 4  ;;  %v13420_v24 = vrot.slane %v2988_v1, 7 }
 0x2d4   : > { %11866 = vpow2.f32 %v13207_v23  ;;  %v2999_v54 = vrot.slane %v2997_v51, 7  ;;  %v11849_v56 = vpop.eup %11848  ;;  %v11089_v39 = vpack.c.bf16 %v1445_v50, %v1445_v50  ;;  %1606 = vst.msk [vmem:[#allocation2 + $0x6c] sm:$0xf] %vm1597_vm10, %v11088_v41  ;;  %v18958_v18 = vshll.u32 %v13411_v60, 16 }
 0x2d5   : > { %19303 = vst [vmem:[#allocation40_spill] sm:$0xff] %v13420_v24  ;;  %11868 = vpow2.f32 %v13238_v45  ;;  %v3199_v35 = vsel %vm13341_vm13, %v3197_v7, %v3198_v42  ;;  %v11851_v10 = vpop.eup %11850  ;;  %v1442_v49 = vmul.f32 %v11849_v56, %v13109_v19  ;;  %v3207_v23 = vsel %vm13341_vm13, %v3202_v44, %v3206_v31 }
 0x2d6   : > { %11870 = vpow2.f32 %v13245_v48  ;;  %v13432_v43 = vor.u32 %v2991_v33, %v13420_v24  ;;  %v11853_v4 = vpop.eup %11852  ;;  %1607 = vst.msk [vmem:[#allocation2 + $0x70] sm:$0xf] %vm1597_vm10, %v11089_v39  ;;  %v1443_v45 = vmul.f32 %v11851_v10, %v13113_v53  ;;  %v13437_v29 = vcombine.low %v3199_v35, %v3207_v23  ;;  %v11644_v48 = vld [vmem:[%s18897_s5 + $0x30] sm:$0xff]   ;;  %v13450_v53 = vld [vmem:[#allocation2 + $0x120] sm:$0xf] }
 0x2d7   : > { %11872 = vpow2.f32 %v13248_v0  ;;  %v13441_v19 = vor.u32 %v18958_v18, %v2999_v54  ;;  %v11855_v8 = vpop.eup %11854  ;;  %v11086_v14 = vpack.c.bf16 %v1442_v49, %v1442_v49  ;;  %v1448_v34 = vmul.f32 %v11853_v4, %v13136_v16  ;;  %11275 = vmatprep.subr.bf16.mxu0 %v11644_v48  ;;  %v11651_v18 = vld [vmem:[%s18897_s5 + $0x48] sm:$0xff]  }
 0x2d8   : > { %19304 = vst [vmem:[#allocation41_spill] sm:$0xff] %v13432_v43  ;;  %11874 = vpow2.f32 %v13251_v63  ;;  %v13448_v21 = vrot.slane %v2988_v1, 4  ;;  %v11857_v0 = vpop.eup %11856  ;;  %v11087_v6 = vpack.c.bf16 %v1443_v45, %v1443_v45  ;;  %v1449_v3 = vmul.f32 %v11855_v8, %v13151_v57  ;;  %11276 = vmatpush3.bf16.msra.mxu0 %v11644_v48 }
 0x2d9   : > { %19305 = vst [vmem:[#allocation42_spill] sm:$0xff] %v13441_v19  ;;  %11876 = vpow2.f32 %v13283_v25  ;;  %v13454_v12 = vrot.slane %v2991_v33, 5  ;;  %v11859_v15 = vpop.eup %11858  ;;  %1604 = vst.msk [vmem:[#allocation2 + $0x58] sm:$0xf] %vm1597_vm10, %v11086_v14  ;;  %v11092_v16 = vpack.c.bf16 %v1448_v34, %v1448_v34  ;;  %v1446_v63 = vmul.f32 %v11857_v0, %v13161_v47  ;;  %v19306_v25 = vld [vmem:[#allocation10_spill] sm:$0xff]  ;;  %v11647_v47 = vld [vmem:[%s18897_s5 + $0x38] sm:$0xff]  }
 0x2da   : > { %11878 = vpow2.f32 %v13291_v58  ;;  %v13461_v32 = vrot.slane %v2997_v51, 4  ;;  %v11861_v31 = vpop.eup %11860  ;;  %1605 = vst.msk [vmem:[#allocation2 + $0x5c] sm:$0xf] %vm1597_vm10, %v11087_v6  ;;  %v11093_v57 = vpack.c.bf16 %v1449_v3, %v1449_v3  ;;  %v1447_v27 = vmul.f32 %v11859_v15, %v19306_v25  ;;  %11277 = vmatprep.subr.bf16.mxu0 %v11647_v47  ;;  %v11648_v3 = vld [vmem:[%s18897_s5 + $0x40] sm:$0xff]  }
 0x2db   : > { %v18960_v38 = vshrl.u32 %v13450_v53, 16  ;;  %v11863_v28 = vpop.eup %11862  ;;  %v2627_v58 = vld [vmem:[#allocation2 + $0x6c] sm:$0xf]  ;;  %1610 = vst.msk [vmem:[#allocation2 + $0x94] sm:$0xf] %vm1597_vm10, %v11092_v16  ;;  %v11090_v42 = vpack.c.bf16 %v1446_v63, %v1446_v63  ;;  %v1356_v30 = vadd.f32 1.0, %v11861_v31 }
 0x2dc   : > { %v18959_v46 = vshrl.u32 %v13456_v52, 16  ;;  %v2768_v5 = vshrl.u32 %v2627_v58, 16  ;;  %v2771_v22 = vshll.u32 %v2627_v58, 16  ;;  %1611 = vst.msk [vmem:[#allocation2 + $0x98] sm:$0xf] %vm1597_vm10, %v11093_v57  ;;  %v11091_v1 = vpack.c.bf16 %v1447_v27, %v1447_v27  ;;  %11278 = vmatpush3.bf16.msra.mxu0 %v11647_v47 }
 0x2dd   : > { %v11865_v26 = vpop.eup %11864  ;;  %v1357_v33 = vadd.f32 1.0, %v11863_v28  ;;  %v2628_v50 = vld [vmem:[#allocation2 + $0x70] sm:$0xf]  ;;  %1608 = vst.msk [vmem:[#allocation2 + $0x80] sm:$0xf] %vm1597_vm10, %v11090_v42  ;;  %11880 = vrcp.f32 %v1356_v30  ;;  %v13478_v7 = vrot.slane %v18960_v38, 7  ;;  %11279 = vmatprep.subr.bf16.mxu0 %v11648_v3 }
 0x2de   : > { %v11867_v51 = vpop.eup %11866  ;;  %v1354_v41 = vadd.f32 1.0, %v11865_v26  ;;  %v13482_v44 = vrot.slane %v18959_v46, 7  ;;  %v13486_v56 = vrot.slane %v2768_v5, 7  ;;  %v2777_v39 = vshrl.u32 %v2628_v50, 16  ;;  %1609 = vst.msk [vmem:[#allocation2 + $0x84] sm:$0xf] %vm1597_vm10, %v11091_v1 }
 0x2df   : > { %19307 = vst [vmem:[#allocation10_spill] sm:$0xff] %v13478_v7  ;;  %v13484_v54 = vpop.eup %11868  ;;  %v2780_v35 = vshll.u32 %v2628_v50, 16  ;;  %v3082_v10 = vrot.slane %v2768_v5, 4  ;;  %v3083_v23 = vrot.slane %v2771_v22, 5  ;;  %v10479_v4 = vcombine.low %v2627_v58, %v2628_v50  ;;  %v19309_v46 = vld [vmem:[#allocation25_spill] sm:$0xff] }
 0x2e0   : > { %v13489_v49 = vpop.eup %11870  ;;  %11882 = vrcp.f32 %v1357_v33  ;;  %v13491_v45 = vadd.f32 1.0, %v11867_v51  ;;  %v13496_v8 = vor.u32 %v2771_v22, %v13486_v56  ;;  %v2779_v14 = vrot.slane %v2777_v39, 7  ;;  %v2623_v0 = vld [vmem:[#allocation2 + $0x58] sm:$0xf]  ;;  %11280 = vmatpush3.bf16.msra.mxu0 %v11648_v3 }
 0x2e1   : > { %v13493_v48 = vpop.eup %11872  ;;  %v3088_v34 = vrot.slane %v2777_v39, 4  ;;  %v3086_v6 = vrot.slane %v2780_v35, 5  ;;  %3386 = vrot.lane.b32.xlu0 %v10479_v4, %s12133_s17  ;;  %v2624_v16 = vld [vmem:[#allocation2 + $0x5c] sm:$0xf]  ;;  %v2746_v63 = vshrl.u32 %v2623_v0, 16  ;;  %v2749_v31 = vshll.u32 %v2623_v0, 16  ;;  %11281 = vmatprep.subr.bf16.mxu0 %v11651_v18 }
 0x2e2   : > { %v13501_v15 = vpop.eup %11874  ;;  %v3084_v57 = vor.u32 %v3083_v23, %v3082_v10  ;;  %11884 = vrcp.f32 %v1354_v41  ;;  %v13506_v27 = vor.u32 %v2780_v35, %v2779_v14  ;;  %v2755_v47 = vshrl.u32 %v2624_v16, 16  ;;  %v13508_v42 = vld [vmem:[#allocation2 + $0x94] sm:$0xf] }
 0x2e3   : > { %v13504_v25 = vpop.eup %11876  ;;  %v2758_v28 = vshll.u32 %v2624_v16, 16  ;;  %v10478_v58 = vcombine.low %v2623_v0, %v2624_v16  ;;  %v13512_v26 = vrot.slane %v2746_v63, 7  ;;  %v3068_v5 = vrot.slane %v2746_v63, 4  ;;  %v2636_v39 = vld [vmem:[#allocation2 + $0x98] sm:$0xf] }
 0x2e4   : > { %v13510_v30 = vpop.eup %11878  ;;  %v3069_v22 = vrot.slane %v2749_v31, 5  ;;  %v3085_v1 = vrot.slane %v3084_v57, 4  ;;  %v2757_v33 = vrot.slane %v2755_v47, 7  ;;  %v3074_v51 = vrot.slane %v2755_v47, 4  ;;  %11282 = vmatpush3.bf16.msra.mxu0 %v11651_v18 }
 0x2e5   : > { %3384 = vrot.lane.b32.xlu1 %v10478_v58, %s12133_s17  ;;  %v3089_v50 = vor.u32 %v3088_v34, %v3086_v6  ;;  %v3072_v41 = vrot.slane %v2758_v28, 5  ;;  %v13516_v35 = vor.u32 %v2749_v31, %v13512_v26  ;;  %v2812_v4 = vshrl.u32 %v13508_v42, 16  ;;  %v2631_v31 = vld [vmem:[#allocation2 + $0x80] sm:$0xf] }
 0x2e6   : > { %v3087_v10 = vsel %vm13341_vm13, %v3085_v1, %v3086_v6  ;;  %v3070_v23 = vor.u32 %v3069_v22, %v3068_v5  ;;  %v13521_v14 = vor.u32 %v2758_v28, %v2757_v33  ;;  %v2815_v16 = vshll.u32 %v13508_v42, 16  ;;  %v2632_v28 = vld [vmem:[#allocation2 + $0x84] sm:$0xf] }
 0x2e7   : > { %v3090_v0 = vrot.slane %v3089_v50, 4  ;;  %v3075_v3 = vor.u32 %v3074_v51, %v3072_v41  ;;  %v11881_v63 = vpop.eup %11880  ;;  %v13524_v34 = vrot.slane %v2812_v4, 7  ;;  %v2821_v47 = vshrl.u32 %v2636_v39, 16 }
 0x2e8   : > { %v3071_v57 = vrot.slane %v3070_v23, 4  ;;  %v2824_v58 = vshll.u32 %v2636_v39, 16  ;;  %v3110_v22 = vrot.slane %v2812_v4, 4  ;;  %v3111_v1 = vrot.slane %v2815_v16, 5 }
 0x2e9   : > { %v3095_v6 = vsel %vm13341_vm13, %v3090_v0, %v19308_v9  ;;  %v3076_v5 = vrot.slane %v3075_v3, 4  ;;  %v13532_v23 = vor.u32 %v2815_v16, %v13524_v34  ;;  %v2823_v2 = vrot.slane %v2821_v47, 7 }
 0x2ea   : > { %v11883_v33 = vpop.eup %11882  ;;  %v10495_v50 = vcombine.low %v3087_v10, %v3095_v6  ;;  %v3073_v51 = vsel %vm13341_vm13, %v3071_v57, %v3072_v41  ;;  %v3116_v4 = vrot.slane %v2821_v47, 4  ;;  %v10481_v0 = vcombine.low %v13508_v42, %v2636_v39 }
 0x2eb   : > { %v3081_v9 = vsel %vm13341_vm13, %v3076_v5, %v19309_v46  ;;  %v2790_v3 = vshrl.u32 %v2631_v31, 16  ;;  %v13542_v57 = vor.u32 %v2824_v58, %v2823_v2  ;;  %v2793_v16 = vshll.u32 %v2631_v31, 16  ;;  %v11652_v2 = vld [vmem:[%s18897_s5 + $0x50] sm:$0xff]  }
 0x2ec   : > { %v11885_v10 = vpop.eup %11884  ;;  %3466 = vrot.lane.b32.xlu0 %v10495_v50, %s18989_s23  ;;  %v10494_v41 = vcombine.low %v3073_v51, %v3081_v9  ;;  %v2799_v6 = vshrl.u32 %v2632_v28, 16  ;;  %v2802_v36 = vshll.u32 %v2632_v28, 16  ;;  %v10480_v43 = vcombine.low %v2631_v31, %v2632_v28  ;;  %v19310_v9 = vld [vmem:[#allocation11_spill] sm:$0xff]  ;;  %11283 = vmatprep.subr.bf16.mxu0 %v11652_v2 }
 0x2ed   : > { %v13544_v38 = vrot.slane %v2790_v3, 7  ;;  %v3096_v19 = vrot.slane %v2790_v3, 4  ;;  %v3097_v42 = vrot.slane %v2793_v16, 5  ;;  %v3112_v47 = vor.u32 %v3111_v1, %v3110_v22  ;;  %v19311_v3 = vld [vmem:[#allocation12_spill] sm:$0xff]  ;;  %11284 = vmatpush3.bf16.msra.mxu0 %v11652_v2 }
 0x2ee   : > { %3464 = vrot.lane.b32.xlu1 %v10494_v41, %s18989_s23  ;;  %v2801_v46 = vrot.slane %v2799_v6, 7  ;;  %v3102_v39 = vrot.slane %v2799_v6, 4  ;;  %v3114_v50 = vrot.slane %v2824_v58, 5  ;;  %v3100_v51 = vrot.slane %v2802_v36, 5 }
 0x2ef   : > { %v13551_v5 = vor.u32 %v2793_v16, %v13544_v38  ;;  %v1452_v24 = vmul.f32 %v11881_v63, %v19310_v9  ;;  %v3113_v31 = vrot.slane %v3112_v47, 4  ;;  %v3098_v28 = vor.u32 %v3097_v42, %v3096_v19  ;;  %v19314_v47 = vld [vmem:[#allocation27_spill] sm:$0xff] }
 0x2f0   : > { %3390 = vrot.lane.b32.xlu0 %v10481_v0, %s12133_s17  ;;  %v13555_v18 = vor.u32 %v2802_v36, %v2801_v46  ;;  %v1453_v41 = vmul.f32 %v11883_v33, %v19311_v3  ;;  %v3117_v22 = vor.u32 %v3116_v4, %v3114_v50  ;;  %v3103_v1 = vor.u32 %v3102_v39, %v3100_v51  ;;  %v19312_v36 = vld [vmem:[#allocation15_spill] sm:$0xff]  ;;  %v19313_v39 = vld [vmem:[#allocation26_spill] sm:$0xff] }
 0x2f1   : > { %v11096_v6 = vpack.c.bf16 %v1452_v24, %v1452_v24  ;;  %11886 = vrcp.f32 %v13491_v45  ;;  %v3115_v63 = vsel %vm13341_vm13, %v3113_v31, %v3114_v50  ;;  %v3099_v58 = vrot.slane %v3098_v28, 4  ;;  %v11655_v3 = vld [vmem:[%s18897_s5 + $0x58] sm:$0xff]  }
 0x2f2   : > { %3388 = vrot.lane.b32.xlu1 %v10480_v43, %s12133_s17  ;;  %v11097_v0 = vpack.c.bf16 %v1453_v41, %v1453_v41  ;;  %v1450_v16 = vmul.f32 %v11885_v10, %v19312_v36  ;;  %v3118_v46 = vrot.slane %v3117_v22, 4  ;;  %v3104_v19 = vrot.slane %v3103_v1, 4  ;;  %11285 = vmatprep.subr.bf16.mxu0 %v11655_v3 }
 0x2f3   : > { %1614 = vst.msk [vmem:[#allocation2 + $0xbc] sm:$0xf] %vm1597_vm10, %v11096_v6  ;;  %v1360_v33 = vadd.f32 1.0, %v13484_v54  ;;  %v1361_v24 = vadd.f32 1.0, %v13489_v49  ;;  %v3101_v45 = vsel %vm13341_vm13, %v3099_v58, %v3100_v51  ;;  %v1358_v4 = vadd.f32 1.0, %v13493_v48  ;;  %11286 = vmatpush3.bf16.msra.mxu0 %v11655_v3 }
 0x2f4   : > { %1615 = vst.msk [vmem:[#allocation2 + $0xc0] sm:$0xf] %vm1597_vm10, %v11097_v0  ;;  %v11094_v43 = vpack.c.bf16 %v1450_v16, %v1450_v16  ;;  %v1359_v42 = vadd.f32 1.0, %v13501_v15  ;;  %v3123_v10 = vsel %vm13341_vm13, %v3118_v46, %v19313_v39  ;;  %v3109_v54 = vsel %vm13341_vm13, %v3104_v19, %v19314_v47 }
 0x2f5   : > { %11888 = vrcp.f32 %v1360_v33  ;;  %v1362_v49 = vadd.f32 1.0, %v13504_v25  ;;  %v10497_v2 = vcombine.low %v3115_v63, %v3123_v10  ;;  %v10496_v50 = vcombine.low %v3101_v45, %v3109_v54  ;;  %v13590_v25 = vld [vmem:[#allocation2 + $0x13c] sm:$0x1]  ;;  %v19322_v10 = vld [vmem:[#allocation16_spill] sm:$0xff] }
 0x2f6   : > { %1612 = vst.msk [vmem:[#allocation2 + $0xa8] sm:$0xf] %vm1597_vm10, %v11094_v43  ;;  %11890 = vrcp.f32 %v1361_v24  ;;  %v1363_v48 = vadd.f32 1.0, %v13510_v30  ;;  %v19315_v15 = vshll.u32 %v13450_v53, 16  ;;  %v2978_v9 = vshll.u32 %v13456_v52, 16 }
 0x2f7   : > { %11892 = vrcp.f32 %v1358_v4  ;;  %v19317_v31 = vshrl.u32 %v13450_v53, 16  ;;  %3470 = vrot.lane.b32.xlu0 %v10497_v2, %s18989_s23  ;;  %3468 = vrot.lane.b32.xlu1 %v10496_v50, %s18989_s23  ;;  %v19319_v22 = vshrl.u32 %v13456_v52, 16  ;;  %v3224_v58 = vor.u32 %v13454_v12, %v13448_v21 }
 0x2f8   : > { %v13583_v51 = vor.u32 %v19315_v15, %v13478_v7  ;;  %11894 = vrcp.f32 %v1359_v42  ;;  %v19318_v30 = vmov %v19315_v15  ;;  %v13608_v63 = vor.u32 %v2978_v9, %v13482_v44 }
 0x2f9   : > { %v13588_v28 = vrot.slane %v19317_v31, 4  ;;  %v13599_v41 = vrot.slane %v19318_v30, 5  ;;  %v13603_v1 = vrot.slane %v19319_v22, 4  ;;  %11896 = vrcp.f32 %v1362_v49 }
 0x2fa   : > { %19316 = vst [vmem:[#allocation24_spill] sm:$0xff] %v13583_v51  ;;  %19320 = vst [vmem:[#allocation25_spill] sm:$0xff] %v13608_v63  ;;  %v19321_v0 = vshll.u32 %v13411_v60, 16  ;;  %v2643_v16 = vld [vmem:[#allocation2 + $0xbc] sm:$0xf]  ;;  %11898 = vrcp.f32 %v1363_v48  ;;  %v3232_v46 = vshll.u32 %v13590_v25, 16 }
 0x2fb   : > { %v3210_v19 = vor.u32 %v13599_v41, %v13588_v28  ;;  %v13619_v33 = vrot.slane %v2978_v9, 5  ;;  %v11887_v44 = vpop.eup %11886  ;;  %v2644_v24 = vld [vmem:[#allocation2 + $0xc0] sm:$0xf]  ;;  %v2856_v45 = vshrl.u32 %v2643_v16, 16  ;;  %v2859_v43 = vshll.u32 %v2643_v16, 16 }
 0x2fc   : > { %v13614_v36 = vrot.slane %v19321_v0, 5  ;;  %v13621_v21 = vrot.slane %v3224_v58, 4  ;;  %v2865_v4 = vshrl.u32 %v2644_v24, 16  ;;  %v2868_v42 = vshll.u32 %v2644_v24, 16  ;;  %v11656_v28 = vld [vmem:[%s18897_s5] sm:$0xff]  }
 0x2fd   : > { %v10483_v39 = vcombine.low %v2643_v16, %v2644_v24  ;;  %v1451_v47 = vmul.f32 %v11887_v44, %v19322_v10  ;;  %v13626_v54 = vrot.slane %v2856_v45, 7  ;;  %v3138_v49 = vrot.slane %v2856_v45, 4  ;;  %v13628_v50 = vld [vmem:[#allocation2 + $0xa8] sm:$0xf]  ;;  %v19325_v44 = vld [vmem:[#allocation19_spill] sm:$0xff]  ;;  %11319 = vmatprep.subr.bf16.mxu0 %v11656_v28 }
 0x2fe   : > { %v3229_v12 = vor.u32 %v13461_v32, %v13614_v36  ;;  %v3139_v2 = vrot.slane %v2859_v43, 5  ;;  %v3227_v48 = vsel %vm13341_vm13, %v13621_v21, %v13614_v36  ;;  %v2867_v15 = vrot.slane %v2865_v4, 7 }
 0x2ff   : > { %v3144_v9 = vrot.slane %v2865_v4, 4  ;;  %3394 = vrot.lane.b32.xlu0 %v10483_v39, %s12133_s17  ;;  %v11095_v32 = vpack.c.bf16 %v1451_v47, %v1451_v47  ;;  %v2834_v31 = vshrl.u32 %v13628_v50, 16  ;;  %v11889_v25 = vpop.eup %11888  ;;  %v13640_v3 = vor.u32 %v2859_v43, %v13626_v54  ;;  %v19326_v39 = vld [vmem:[#allocation20_spill] sm:$0xff] }
 0x300   : > { %v2837_v30 = vshll.u32 %v13628_v50, 16  ;;  %v3140_v41 = vor.u32 %v3139_v2, %v3138_v49  ;;  %v3142_v22 = vrot.slane %v2868_v42, 5  ;;  %v11891_v58 = vpop.eup %11890  ;;  %v13643_v0 = vor.u32 %v2868_v42, %v2867_v15  ;;  %v19328_v2 = vld [vmem:[#allocation17_spill] sm:$0xff] }
 0x301   : > { %19323 = vst [vmem:[#allocation11_spill] sm:$0xff] %v13640_v3  ;;  %1613 = vst.msk [vmem:[#allocation2 + $0xac] sm:$0xf] %vm1597_vm10, %v11095_v32  ;;  %v13646_v36 = vrot.slane %v2834_v31, 7  ;;  %v3124_v16 = vrot.slane %v2834_v31, 4  ;;  %v1456_v24 = vmul.f32 %v11889_v25, %v19325_v44  ;;  %v11893_v45 = vpop.eup %11892  ;;  %v1457_v10 = vmul.f32 %v11891_v58, %v19326_v39  ;;  %v19330_v39 = vld [vmem:[#allocation21_spill] sm:$0xff] }
 0x302   : > { %19324 = vst [vmem:[#allocation12_spill] sm:$0xff] %v13643_v0  ;;  %v3125_v21 = vrot.slane %v2837_v30, 5  ;;  %v3141_v4 = vrot.slane %v3140_v41, 4  ;;  %v3145_v43 = vor.u32 %v3144_v9, %v3142_v22  ;;  %v11895_v47 = vpop.eup %11894  ;;  %v1454_v15 = vmul.f32 %v11893_v45, %v19328_v2  ;;  %v19329_v9 = vld [vmem:[#allocation18_spill] sm:$0xff] }
 0x303   : > { %v13651_v49 = vor.u32 %v2837_v30, %v13646_v36  ;;  %v11100_v42 = vpack.c.bf16 %v1456_v24, %v1456_v24  ;;  %v3230_v32 = vrot.slane %v3229_v12, 4  ;;  %v11897_v6 = vpop.eup %11896  ;;  %v11101_v44 = vpack.c.bf16 %v1457_v10, %v1457_v10  ;;  %v19331_v24 = vld [vmem:[#allocation13_spill] sm:$0xff] }
 0x304   : > { %v3143_v31 = vsel %vm13341_vm13, %v3141_v4, %v3142_v22  ;;  %v3146_v25 = vrot.slane %v3145_v43, 4  ;;  %v3126_v28 = vor.u32 %v3125_v21, %v3124_v16  ;;  %v11899_v51 = vpop.eup %11898  ;;  %v1455_v41 = vmul.f32 %v11895_v47, %v19329_v9  ;;  %v19332_v22 = vld [vmem:[#allocation29_spill] sm:$0xff] }
 0x305   : > { %19327 = vst [vmem:[#allocation15_spill] sm:$0xff] %v13651_v49  ;;  %1618 = vst.msk [vmem:[#allocation2 + $0xe4] sm:$0xf] %vm1597_vm10, %v11100_v42  ;;  %v11098_v58 = vpack.c.bf16 %v1454_v15, %v1454_v15  ;;  %v1458_v30 = vmul.f32 %v11897_v6, %v19330_v39  ;;  %v3234_v63 = vrot.slane %v3232_v46, 5  ;;  %v1459_v16 = vmul.f32 %v11899_v51, %v19332_v22  ;;  %v2665_v21 = vld [vmem:[#allocation2 + $0x128] sm:$0x1] }
 0x306   : > { %v3151_v12 = vsel %vm13341_vm13, %v3146_v25, %v19331_v24  ;;  %v13662_v45 = vrot.slane %v3126_v28, 4  ;;  %1619 = vst.msk [vmem:[#allocation2 + $0xe8] sm:$0xf] %vm1597_vm10, %v11101_v44  ;;  %v13666_v4 = vrot.slane %v3210_v19, 4  ;;  %v11099_v10 = vpack.c.bf16 %v1455_v41, %v1455_v41  ;;  %v13671_v46 = vld [vmem:[#allocation2 + $0x8] sm:$0xf] }
 0x307   : > { %v10499_v43 = vcombine.low %v3143_v31, %v3151_v12  ;;  %1616 = vst.msk [vmem:[#allocation2 + $0xd0] sm:$0xf] %vm1597_vm10, %v11098_v58  ;;  %v11102_v47 = vpack.c.bf16 %v1458_v30, %v1458_v30  ;;  %v3235_v6 = vsel %vm13341_vm13, %v3230_v32, %v3234_v63  ;;  %v13673_v42 = vld [vmem:[#allocation2 + $0xc] sm:$0xf]  ;;  %v11103_v15 = vpack.c.bf16 %v1459_v16, %v1459_v16 }
 0x308   : > { %v2640_v2 = vld [vmem:[#allocation2 + $0xac] sm:$0xf]  ;;  %v13675_v25 = vcombine.low %v3227_v48, %v3235_v6  ;;  %v3215_v19 = vor.u32 %v13603_v1, %v13619_v33  ;;  %1617 = vst.msk [vmem:[#allocation2 + $0xd4] sm:$0xf] %vm1597_vm10, %v11099_v10  ;;  %v3218_v48 = vshll.u32 %v2665_v21, 16  ;;  %v1704_v44 = vshrl.u32 %v13671_v46, 16 }
 0x309   : > { %v2843_v31 = vshrl.u32 %v2640_v2, 16  ;;  %v2846_v28 = vshll.u32 %v2640_v2, 16  ;;  %v10482_v63 = vcombine.low %v13628_v50, %v2640_v2  ;;  %3474 = vrot.lane.b32.xlu0 %v10499_v43, %s18989_s23  ;;  %1620 = vst.msk [vmem:[#allocation2 + $0xf8] sm:$0xf] %vm1597_vm10, %v11102_v47  ;;  %1621 = vst.msk [vmem:[#allocation2 + $0xfc] sm:$0xf] %vm1597_vm10, %v11103_v15 }
 0x30a   : > { %v13688_v32 = vrot.slane %v3215_v19, 4  ;;  %v18962_v1 = vshrl.u32 %v13673_v42, 16  ;;  %v13694_v39 = vrot.slane %v3218_v48, 5  ;;  %v13696_v24 = vrot.slane %v1704_v44, 7 }
 0x30b   : > { %v2845_v41 = vrot.slane %v2843_v31, 7  ;;  %v3130_v58 = vrot.slane %v2843_v31, 4  ;;  %3392 = vrot.lane.b32.xlu1 %v10482_v63, %s12133_s17  ;;  %v3128_v50 = vrot.slane %v2846_v28, 5  ;;  %v13703_v16 = vrot.slane %v1704_v44, 4 }
 0x30c   : > { %v2651_v30 = vld [vmem:[#allocation2 + $0xe4] sm:$0xf]  ;;  %v13700_v12 = vrot.slane %v18962_v1, 7 }
 0x30d   : > { %v13705_v21 = vor.u32 %v2846_v28, %v2845_v41  ;;  %v3129_v43 = vsel %vm13341_vm13, %v13662_v45, %v3128_v50  ;;  %v3131_v10 = vor.u32 %v3130_v58, %v3128_v50  ;;  %v2652_v47 = vld [vmem:[#allocation2 + $0xe8] sm:$0xf]  ;;  %v2900_v6 = vshrl.u32 %v2651_v30, 16  ;;  %v19335_v58 = vld [vmem:[#allocation14_spill] sm:$0xff] }
 0x30e   : > { %v2903_v2 = vshll.u32 %v2651_v30, 16  ;;  %v2909_v15 = vshrl.u32 %v2652_v47, 16  ;;  %v2912_v19 = vshll.u32 %v2652_v47, 16  ;;  %v10485_v31 = vcombine.low %v2651_v30, %v2652_v47  ;;  %v2647_v63 = vld [vmem:[#allocation2 + $0xd0] sm:$0xf] }
 0x30f   : > { %19333 = vst [vmem:[#allocation26_spill] sm:$0xff] %v13705_v21  ;;  %v3132_v48 = vrot.slane %v3131_v10, 4  ;;  %v13710_v1 = vrot.slane %v2900_v6, 7  ;;  %v3166_v51 = vrot.slane %v2900_v6, 4  ;;  %v2878_v44 = vshrl.u32 %v2647_v63, 16 }
 0x310   : > { %v2911_v22 = vrot.slane %v2909_v15, 7  ;;  %v3167_v28 = vrot.slane %v2903_v2, 5  ;;  %v3172_v41 = vrot.slane %v2909_v15, 4  ;;  %3398 = vrot.lane.b32.xlu0 %v10485_v31, %s12133_s17  ;;  %v2648_v9 = vld [vmem:[#allocation2 + $0xd4] sm:$0xf]  ;;  %v2881_v45 = vshll.u32 %v2647_v63, 16 }
 0x311   : > { %19334 = vst [vmem:[#allocation27_spill] sm:$0xff] %v13710_v1  ;;  %v3137_v50 = vsel %vm13341_vm13, %v3132_v48, %v19335_v58  ;;  %v13717_v7 = vor.u32 %v2903_v2, %v13710_v1  ;;  %v13719_v30 = vrot.slane %v2878_v44, 7  ;;  %v2887_v10 = vshrl.u32 %v2648_v9, 16  ;;  %v13723_v15 = vld [vmem:[#allocation2 + $0xf8] sm:$0xf] }
 0x312   : > { %v10498_v47 = vcombine.low %v3129_v43, %v3137_v50  ;;  %v13721_v6 = vor.u32 %v2912_v19, %v2911_v22  ;;  %v2890_v59 = vshll.u32 %v2648_v9, 16  ;;  %v3152_v61 = vrot.slane %v2878_v44, 4  ;;  %v2656_v48 = vld [vmem:[#allocation2 + $0xfc] sm:$0xf] }
 0x313   : > { %19336 = vst [vmem:[#allocation16_spill] sm:$0xff] %v13717_v7  ;;  %19337 = vst [vmem:[#allocation19_spill] sm:$0xff] %v13719_v30  ;;  %v13726_v31 = vor.u32 %v2881_v45, %v13719_v30  ;;  %v2889_v11 = vrot.slane %v2887_v10, 7  ;;  %v3153_v49 = vrot.slane %v2881_v45, 5  ;;  %v3158_v21 = vrot.slane %v2887_v10, 4 }
 0x314   : > { %19338 = vst [vmem:[#allocation20_spill] sm:$0xff] %v13721_v6  ;;  %3472 = vrot.lane.b32.xlu1 %v10498_v47, %s18989_s23  ;;  %v10484_v2 = vcombine.low %v2647_v63, %v2648_v9  ;;  %v3168_v58 = vor.u32 %v3167_v28, %v3166_v51  ;;  %v3170_v7 = vrot.slane %v2912_v19, 5  ;;  %v3156_v1 = vrot.slane %v2890_v59, 5  ;;  %v19340_v63 = vld [vmem:[#allocation22_spill] sm:$0xff] }
 0x315   : > { %19339 = vst [vmem:[#allocation17_spill] sm:$0xff] %v13726_v31  ;;  %v13729_v43 = vor.u32 %v2890_v59, %v2889_v11  ;;  %v3154_v22 = vor.u32 %v3153_v49, %v3152_v61  ;;  %v2922_v44 = vshrl.u32 %v13723_v15, 16  ;;  %v2925_v50 = vshll.u32 %v13723_v15, 16 }
 0x316   : > { %v3169_v6 = vrot.slane %v3168_v58, 4  ;;  %v3173_v30 = vor.u32 %v3172_v41, %v3170_v7  ;;  %v3159_v31 = vor.u32 %v3158_v21, %v3156_v1  ;;  %v2931_v0 = vshrl.u32 %v2656_v48, 16  ;;  %v19341_v41 = vld [vmem:[#allocation28_spill] sm:$0xff] }
 0x317   : > { %v3155_v45 = vrot.slane %v3154_v22, 4  ;;  %v13733_v10 = vrot.slane %v2922_v44, 7  ;;  %v2934_v3 = vshll.u32 %v2656_v48, 16  ;;  %v3180_v47 = vrot.slane %v2922_v44, 4  ;;  %v13752_v22 = vld [vmem:[#allocation2 + $0x148] sm:$0xf] }
 0x318   : > { %3396 = vrot.lane.b32.xlu1 %v10484_v2, %s12133_s17  ;;  %v3171_v11 = vsel %vm13341_vm13, %v3169_v6, %v3170_v7  ;;  %v3174_v59 = vrot.slane %v3173_v30, 4  ;;  %v3160_v61 = vrot.slane %v3159_v31, 4  ;;  %v2933_v49 = vrot.slane %v2931_v0, 7  ;;  %v13754_v44 = vld [vmem:[#allocation2 + $0x14c] sm:$0xf] }
 0x319   : > { %v3157_v51 = vsel %vm13341_vm13, %v3155_v45, %v3156_v1  ;;  %v13741_v9 = vor.u32 %v2925_v50, %v13733_v10  ;;  %v3181_v21 = vrot.slane %v2925_v50, 5  ;;  %v3186_v19 = vrot.slane %v2931_v0, 4 }
 0x31a   : > { %v3179_v28 = vsel %vm13341_vm13, %v3174_v59, %v19340_v63  ;;  %v3165_v2 = vsel %vm13341_vm13, %v3160_v61, %v19341_v41  ;;  %v13749_v7 = vor.u32 %v2934_v3, %v2933_v49  ;;  %v10486_v30 = vcombine.low %v13723_v15, %v2656_v48  ;;  %v1634_v41 = vld [vmem:[#allocation2 + $0x10] sm:$0x1] }
 0x31b   : > { %v10501_v6 = vcombine.low %v3171_v11, %v3179_v28  ;;  %v10500_v31 = vcombine.low %v3157_v51, %v3165_v2  ;;  %v3182_v1 = vor.u32 %v3181_v21, %v3180_v47  ;;  %v3184_v58 = vrot.slane %v2934_v3, 5 }
 0x31c   : > { %v3221_v0 = vsel %vm13341_vm13, %v13688_v32, %v13694_v39  ;;  %v19342_v50 = vshll.u32 %v13671_v46, 16  ;;  %v19343_v15 = vshll.u32 %v13673_v42, 16  ;;  %v19345_v32 = vsel %vm13341_vm13, %v13666_v4, %v13619_v33 }
 0x31d   : > { %3478 = vrot.lane.b32.xlu0 %v10501_v6, %s18989_s23  ;;  %3476 = vrot.lane.b32.xlu1 %v10500_v31, %s18989_s23  ;;  %v3183_v11 = vrot.slane %v3182_v1, 4  ;;  %v3187_v59 = vor.u32 %v3186_v19, %v3184_v58  ;;  %v13779_v39 = vcombine.low %v19345_v32, %v3221_v0  ;;  %v19346_v61 = vshrl.u32 %v13673_v42, 16  ;;  %v13806_v32 = vld [vmem:[#allocation2 + $0x30] sm:$0xf] }
 0x31e   : > { %v13763_v45 = vor.u32 %v19342_v50, %v13696_v24  ;;  %v13768_v48 = vor.u32 %v19343_v15, %v13700_v12  ;;  %v19344_v3 = vmov %v19342_v50  ;;  %v3010_v51 = vshrl.u32 %v13752_v22, 16 }
 0x31f   : > { %v2054_v47 = vrot.slane %v19344_v3, 5  ;;  %v2059_v12 = vrot.slane %v19346_v61, 4  ;;  %v3013_v21 = vshll.u32 %v13752_v22, 16  ;;  %v3019_v63 = vshrl.u32 %v13754_v44, 16 }
 0x320   : > { %v3185_v19 = vsel %vm13341_vm13, %v3183_v11, %v3184_v58  ;;  %v3188_v28 = vrot.slane %v3187_v59, 4  ;;  %v3022_v33 = vshll.u32 %v13754_v44, 16  ;;  %v13793_v2 = vrot.slane %v3010_v51, 7  ;;  %v2673_v59 = vld [vmem:[#allocation2 + $0x150] sm:$0x1] }
 0x321   : > { %v3021_v6 = vrot.slane %v3019_v63, 7  ;;  %v3236_v31 = vrot.slane %v3010_v51, 4  ;;  %v3237_v1 = vrot.slane %v3013_v21, 5  ;;  %v19347_v0 = vcombine.low %v13375_v40, %v13377_v55  ;;  %3400 = vrot.lane.b32.xlu1 %v10486_v30, %s12133_s17 }
 0x322   : > { %v3193_v58 = vsel %vm13341_vm13, %v3188_v28, %v13407_v62  ;;  %v3242_v50 = vrot.slane %v3019_v63, 4  ;;  %v2055_v15 = vor.u32 %v2054_v47, %v13703_v16  ;;  %v19348_v3 = vshll.u32 %v13673_v42, 16  ;;  %v13813_v63 = vld [vmem:[#allocation2 + $0x34] sm:$0xf] }
 0x323   : > { %3402 = vrot.lane.b32.xlu0 %v19347_v0, %s12133_s17  ;;  %v10502_v61 = vcombine.low %v3185_v19, %v3193_v58  ;;  %v13809_v51 = vor.u32 %v3013_v21, %v13793_v2  ;;  %v13811_v40 = vor.u32 %v3022_v33, %v3021_v6  ;;  %v2063_v55 = vshll.u32 %v1634_v41, 16  ;;  %v13826_v58 = vld [vmem:[#allocation2 + $0x20] sm:$0xf] }
 0x324   : > { %v2057_v11 = vrot.slane %v19348_v3, 5  ;;  %v2056_v30 = vrot.slane %v2055_v15, 4  ;;  %v3238_v4 = vor.u32 %v3237_v1, %v3236_v31  ;;  %v3240_v62 = vrot.slane %v3022_v33, 5 }
 0x325   : > { %v2065_v16 = vrot.slane %v2063_v55, 5  ;;  %v3246_v47 = vshll.u32 %v2673_v59, 16  ;;  %v1748_v28 = vshrl.u32 %v13806_v32, 16  ;;  %v1751_v3 = vshll.u32 %v13806_v32, 16  ;;  %3480 = vrot.lane.b32.xlu1 %v10502_v61, %s18989_s23  ;;  %v13832_v61 = vld [vmem:[#allocation2 + $0x1c] sm:$0xf] }
 0x326   : > { %v2060_v0 = vor.u32 %v2059_v12, %v2057_v11  ;;  %v2058_v21 = vsel %vm13341_vm13, %v2056_v30, %v2057_v11  ;;  %v3239_v12 = vrot.slane %v3238_v4, 4  ;;  %v3243_v41 = vor.u32 %v3242_v50, %v3240_v62 }
 0x327   : > { %3482 = vrot.lane.b32.xlu0 %v13437_v29, %s18989_s23  ;;  %v3248_v33 = vrot.slane %v3246_v47, 5  ;;  %v13822_v6 = vrot.slane %v1748_v28, 7  ;;  %v1757_v31 = vshrl.u32 %v13813_v63, 16  ;;  %v1760_v1 = vshll.u32 %v13813_v63, 16 }
 0x328   : > { %v2061_v19 = vrot.slane %v2060_v0, 4  ;;  %v3241_v15 = vsel %vm13341_vm13, %v3239_v12, %v3240_v62  ;;  %v3244_v59 = vrot.slane %v3243_v41, 4  ;;  %v2081_v11 = vrot.slane %v1748_v28, 4  ;;  %v13859_v28 = vld [vmem:[#allocation2 + $0x58] sm:$0xf] }
 0x329   : > { %19349 = vst [vmem:[#allocation18_spill] sm:$0xff] %v13822_v6  ;;  %v13837_v50 = vor.u32 %v1751_v3, %v13822_v6  ;;  %v1759_v55 = vrot.slane %v1757_v31, 7  ;;  %v2082_v30 = vrot.slane %v1751_v3, 5  ;;  %v19351_v0 = vcombine.low %v13398_v17, %v13411_v60  ;;  %v1642_v3 = vld [vmem:[#allocation2 + $0x38] sm:$0x1] }
 0x32a   : > { %v2066_v29 = vsel %vm13341_vm13, %v2061_v19, %v2065_v16  ;;  %v19352_v62 = vcombine.low %v13450_v53, %v13456_v52  ;;  %v3249_v16 = vsel %vm13341_vm13, %v3244_v59, %v3248_v33  ;;  %v2087_v47 = vrot.slane %v1757_v31, 4  ;;  %v1638_v31 = vld [vmem:[#allocation2 + $0x24] sm:$0x1] }
 0x32b   : > { %v13834_v4 = vcombine.low %v2058_v21, %v2066_v29  ;;  %19350 = vst [vmem:[#allocation21_spill] sm:$0xff] %v13837_v50  ;;  %3406 = vrot.lane.b32.xlu0 %v19351_v0, %s12133_s17  ;;  %v1735_v21 = vshrl.u32 %v13826_v58, 16  ;;  %v10506_v19 = vcombine.low %v3241_v15, %v3249_v16  ;;  %v13852_v12 = vor.u32 %v1760_v1, %v1759_v55 }
 0x32c   : > { %3404 = vrot.lane.b32.xlu1 %v19352_v62, %s12133_s17  ;;  %v1738_v17 = vshll.u32 %v13826_v58, 16  ;;  %v1726_v41 = vshrl.u32 %v13832_v61, 16  ;;  %v1729_v33 = vshll.u32 %v13832_v61, 16  ;;  %v2083_v29 = vor.u32 %v2082_v30, %v2081_v11  ;;  %v13869_v30 = vld [vmem:[#allocation2 + $0x5c] sm:$0xf] }
 0x32d   : > { %19353 = vst [vmem:[#allocation13_spill] sm:$0xff] %v13852_v12  ;;  %v1737_v53 = vrot.slane %v1735_v21, 7  ;;  %v2073_v52 = vrot.slane %v1735_v21, 4  ;;  %v2085_v59 = vrot.slane %v1760_v1, 5  ;;  %v2091_v0 = vshll.u32 %v1642_v3, 16 }
 0x32e   : > { %v2071_v62 = vrot.slane %v1738_v17, 5  ;;  %v13867_v55 = vrot.slane %v1726_v41, 7  ;;  %v2067_v16 = vrot.slane %v1726_v41, 4  ;;  %v2068_v21 = vrot.slane %v1729_v33, 5 }
 0x32f   : > { %3486 = vrot.lane.b32.xlu0 %v13675_v25, %s18989_s23  ;;  %v13865_v15 = vor.u32 %v1738_v17, %v1737_v53  ;;  %v2084_v60 = vrot.slane %v2083_v29, 4  ;;  %v2088_v49 = vor.u32 %v2087_v47, %v2085_v59  ;;  %v2093_v11 = vrot.slane %v2091_v0, 5 }
 0x330   : > { %3484 = vrot.lane.b32.xlu1 %v13779_v39, %s18989_s23  ;;  %19355 = vst [vmem:[#allocation14_spill] sm:$0xff] %v13867_v55  ;;  %v2074_v1 = vor.u32 %v2073_v52, %v2071_v62  ;;  %v13872_v3 = vor.u32 %v1729_v33, %v13867_v55  ;;  %v2069_v12 = vor.u32 %v2068_v21, %v2067_v16  ;;  %v2077_v25 = vshll.u32 %v1638_v31, 16  ;;  %v13894_v16 = vld [vmem:[#allocation2 + $0x48] sm:$0xf] }
 0x331   : > { %19354 = vst [vmem:[#allocation29_spill] sm:$0xff] %v13865_v15  ;;  %v1792_v50 = vshrl.u32 %v13859_v28, 16  ;;  %v2086_v39 = vsel %vm13341_vm13, %v2084_v60, %v2085_v59  ;;  %v2089_v17 = vrot.slane %v2088_v49, 4  ;;  %v1795_v41 = vshll.u32 %v13859_v28, 16  ;;  %v13889_v49 = vld [vmem:[#allocation2 + $0x44] sm:$0xf] }
 0x332   : > { %19356 = vst [vmem:[#allocation22_spill] sm:$0xff] %v13872_v3  ;;  %v2075_v53 = vrot.slane %v2074_v1, 4  ;;  %v19357_v47 = vcombine.low %v13671_v46, %v13673_v42  ;;  %v19358_v52 = vcombine.low %v13752_v22, %v13754_v44  ;;  %v2070_v33 = vrot.slane %v2069_v12, 4 }
 0x333   : > { %v2079_v31 = vrot.slane %v2077_v25, 5  ;;  %v13886_v29 = vrot.slane %v1792_v50, 7  ;;  %v1801_v60 = vshrl.u32 %v13869_v30, 16  ;;  %v2094_v59 = vsel %vm13341_vm13, %v2089_v17, %v2093_v11 }
 0x334   : > { %2405 = vrot.lane.b32.xlu0 %v19357_v47, %s12133_s17  ;;  %3408 = vrot.lane.b32.xlu1 %v19358_v52, %s12133_s17  ;;  %v1804_v0 = vshll.u32 %v13869_v30, 16  ;;  %v2109_v46 = vrot.slane %v1792_v50, 4  ;;  %v2110_v42 = vrot.slane %v1795_v41, 5  ;;  %v10429_v21 = vcombine.low %v2086_v39, %v2094_v59 }
 0x335   : > { %19359 = vst [vmem:[#allocation28_spill] sm:$0xff] %v13886_v29  ;;  %v2072_v22 = vsel %vm13341_vm13, %v2070_v33, %v2071_v62  ;;  %v2080_v44 = vsel %vm13341_vm13, %v2075_v53, %v2079_v31  ;;  %v13901_v12 = vor.u32 %v1795_v41, %v13886_v29  ;;  %v1803_v25 = vrot.slane %v1801_v60, 7  ;;  %v1650_v53 = vld [vmem:[#allocation2 + $0x60] sm:$0x1] }
 0x336   : > { %v10428_v1 = vcombine.low %v2072_v22, %v2080_v44  ;;  %v2115_v47 = vrot.slane %v1801_v60, 4  ;;  %v10415_v11 = vcombine.low %v13859_v28, %v13869_v30  ;;  %v1770_v50 = vshrl.u32 %v13889_v49, 16  ;;  %v1646_v60 = vld [vmem:[#allocation2 + $0x4c] sm:$0x1]  ;;  %v13918_v29 = vld [vmem:[#allocation2 + $0x80] sm:$0xf] }
 0x337   : > { %19360 = vst [vmem:[#allocation43_spill] sm:$0xff] %v13901_v12  ;;  %v1773_v62 = vshll.u32 %v13889_v49, 16  ;;  %v1779_v39 = vshrl.u32 %v13894_v16, 16  ;;  %v1782_v17 = vshll.u32 %v13894_v16, 16  ;;  %v13912_v41 = vor.u32 %v1804_v0, %v1803_v25 }
 0x338   : > { %2485 = vrot.lane.b32.xlu0 %v13834_v4, %s18989_s23  ;;  %3488 = vrot.lane.b32.xlu1 %v10506_v19, %s18989_s23  ;;  %v10414_v52 = vcombine.low %v13889_v49, %v13894_v16  ;;  %v2111_v28 = vor.u32 %v2110_v42, %v2109_v46  ;;  %v2113_v30 = vrot.slane %v1804_v0, 5  ;;  %v13916_v33 = vrot.slane %v1770_v50, 7 }
 0x339   : > { %19361 = vst [vmem:[#allocation44_spill] sm:$0xff] %v13912_v41  ;;  %v1781_v4 = vrot.slane %v1779_v39, 7  ;;  %v2095_v19 = vrot.slane %v1770_v50, 4  ;;  %v2096_v31 = vrot.slane %v1773_v62, 5  ;;  %v2101_v59 = vrot.slane %v1779_v39, 4 }
 0x33a   : > { %19362 = vst [vmem:[#allocation45_spill] sm:$0xff] %v13916_v33  ;;  %v2112_v22 = vrot.slane %v2111_v28, 4  ;;  %v2116_v44 = vor.u32 %v2115_v47, %v2113_v30  ;;  %v2119_v12 = vshll.u32 %v1650_v53, 16  ;;  %v19363_v25 = vcombine.low %v13806_v32, %v13813_v63  ;;  %v13933_v47 = vld [vmem:[#allocation2 + $0x84] sm:$0xf] }
 0x33b   : > { %v19364_v49 = vcombine.low %v13832_v61, %v13826_v58  ;;  %v13929_v0 = vor.u32 %v1773_v62, %v13916_v33  ;;  %v13931_v46 = vor.u32 %v1782_v17, %v1781_v4  ;;  %v2097_v42 = vor.u32 %v2096_v31, %v2095_v19  ;;  %v13943_v31 = vld [vmem:[#allocation2 + $0x6c] sm:$0xf] }
 0x33c   : > { %2409 = vrot.lane.b32.xlu0 %v19363_v25, %s12133_s17  ;;  %v2099_v16 = vrot.slane %v1782_v17, 5  ;;  %v2114_v50 = vsel %vm13341_vm13, %v2112_v22, %v2113_v30  ;;  %v2117_v39 = vrot.slane %v2116_v44, 4  ;;  %v2121_v32 = vrot.slane %v2119_v12, 5  ;;  %v1653_v22 = vld [vmem:[#allocation2 + $0x70] sm:$0xf] }
 0x33d   : > { %2407 = vrot.lane.b32.xlu1 %v19364_v49, %s12133_s17  ;;  %19365 = vst [vmem:[#allocation46_spill] sm:$0xff] %v13929_v0  ;;  %19366 = vst [vmem:[#allocation47_spill] sm:$0xff] %v13931_v46  ;;  %v2105_v63 = vshll.u32 %v1646_v60, 16  ;;  %v2098_v53 = vrot.slane %v2097_v42, 4  ;;  %v1836_v58 = vshrl.u32 %v13918_v29, 16  ;;  %v1839_v61 = vshll.u32 %v13918_v29, 16 }
 0x33e   : > { %v2102_v28 = vor.u32 %v2101_v59, %v2099_v16  ;;  %v2122_v62 = vsel %vm13341_vm13, %v2117_v39, %v2121_v32  ;;  %v1845_v17 = vshrl.u32 %v13933_v47, 16  ;;  %v1848_v19 = vshll.u32 %v13933_v47, 16  ;;  %v1665_v46 = vld [vmem:[#allocation2 + $0xac] sm:$0xf] }
 0x33f   : > { %v2107_v4 = vrot.slane %v2105_v63, 5  ;;  %v10431_v12 = vcombine.low %v2114_v50, %v2122_v62  ;;  %v2100_v30 = vsel %vm13341_vm13, %v2098_v53, %v2099_v16  ;;  %v13949_v59 = vrot.slane %v1836_v58, 7 }
 0x340   : > { %2489 = vrot.lane.b32.xlu0 %v10429_v21, %s18989_s23  ;;  %v2103_v60 = vrot.slane %v2102_v28, 4  ;;  %v1847_v44 = vrot.slane %v1845_v17, 7  ;;  %v2137_v25 = vrot.slane %v1836_v58, 4  ;;  %v2138_v49 = vrot.slane %v1839_v61, 5  ;;  %v1658_v28 = vld [vmem:[#allocation2 + $0x88] sm:$0x1] }
 0x341   : > { %2487 = vrot.lane.b32.xlu1 %v10428_v1, %s18989_s23  ;;  %19367 = vst [vmem:[#allocation48_spill] sm:$0xff] %v13949_v59  ;;  %v2143_v42 = vrot.slane %v1845_v17, 4  ;;  %v13954_v32 = vor.u32 %v1839_v61, %v13949_v59  ;;  %v10417_v21 = vcombine.low %v13918_v29, %v13933_v47  ;;  %v1814_v1 = vshrl.u32 %v13943_v31, 16  ;;  %v1654_v29 = vld [vmem:[#allocation2 + $0x74] sm:$0x1] }
 0x342   : > { %v2108_v39 = vsel %vm13341_vm13, %v2103_v60, %v2107_v4  ;;  %v13959_v50 = vor.u32 %v1848_v19, %v1847_v44  ;;  %v1817_v63 = vshll.u32 %v13943_v31, 16  ;;  %v1823_v53 = vshrl.u32 %v1653_v22, 16  ;;  %v13967_v44 = vld [vmem:[#allocation2 + $0xa8] sm:$0xf] }
 0x343   : > { %19368 = vst [vmem:[#allocation49_spill] sm:$0xff] %v13954_v32  ;;  %v10430_v16 = vcombine.low %v2100_v30, %v2108_v39  ;;  %v13964_v58 = vrot.slane %v1814_v1, 7  ;;  %v1826_v61 = vshll.u32 %v1653_v22, 16  ;;  %v2123_v62 = vrot.slane %v1814_v1, 4 }
 0x344   : > { %19369 = vst [vmem:[#allocation50_spill] sm:$0xff] %v13959_v50  ;;  %2413 = vrot.lane.b32.xlu0 %v10415_v11, %s12133_s17  ;;  %v10416_v4 = vcombine.low %v13943_v31, %v1653_v22  ;;  %v1825_v47 = vrot.slane %v1823_v53, 7  ;;  %v2124_v17 = vrot.slane %v1817_v63, 5  ;;  %v2129_v30 = vrot.slane %v1823_v53, 4 }
 0x345   : > { %2411 = vrot.lane.b32.xlu1 %v10414_v52, %s12133_s17  ;;  %19370 = vst [vmem:[#allocation51_spill] sm:$0xff] %v13964_v58  ;;  %v2139_v60 = vor.u32 %v2138_v49, %v2137_v25  ;;  %v13970_v39 = vor.u32 %v1817_v63, %v13964_v58  ;;  %v2141_v32 = vrot.slane %v1848_v19, 5  ;;  %v2147_v11 = vshll.u32 %v1658_v28, 16 }
 0x346   : > { %v2127_v50 = vrot.slane %v1826_v61, 5  ;;  %v13972_v52 = vor.u32 %v1826_v61, %v1825_v47  ;;  %v2125_v0 = vor.u32 %v2124_v17, %v2123_v62  ;;  %v2133_v1 = vshll.u32 %v1654_v29, 16 }
 0x347   : > { %19371 = vst [vmem:[#allocation52_spill] sm:$0xff] %v13970_v39  ;;  %v2140_v59 = vrot.slane %v2139_v60, 4  ;;  %v2144_v31 = vor.u32 %v2143_v42, %v2141_v32  ;;  %v2149_v22 = vrot.slane %v2147_v11, 5  ;;  %v1880_v49 = vshrl.u32 %v13967_v44, 16  ;;  %v1661_v60 = vld [vmem:[#allocation2 + $0x98] sm:$0xf] }
 0x348   : > { %19372 = vst [vmem:[#allocation53_spill] sm:$0xff] %v13972_v52  ;;  %2493 = vrot.lane.b32.xlu0 %v10431_v12, %s18989_s23  ;;  %v2130_v25 = vor.u32 %v2129_v30, %v2127_v50  ;;  %v2126_v63 = vrot.slane %v2125_v0, 4  ;;  %v2135_v53 = vrot.slane %v2133_v1, 5  ;;  %v1883_v28 = vshll.u32 %v13967_v44, 16  ;;  %v1660_v12 = vld [vmem:[#allocation2 + $0x94] sm:$0xf] }
 0x349   : > { %2491 = vrot.lane.b32.xlu1 %v10430_v16, %s18989_s23  ;;  %v2142_v19 = vsel %vm13341_vm13, %v2140_v59, %v2141_v32  ;;  %v2145_v61 = vrot.slane %v2144_v31, 4  ;;  %v13980_v29 = vrot.slane %v1880_v49, 7  ;;  %v1889_v47 = vshrl.u32 %v1665_v46, 16  ;;  %v1666_v52 = vld [vmem:[#allocation2 + $0xb0] sm:$0x1] }
 0x34a   : > { %v2131_v62 = vrot.slane %v2130_v25, 4  ;;  %v2128_v42 = vsel %vm13341_vm13, %v2126_v63, %v2127_v50  ;;  %v1892_v16 = vshll.u32 %v1665_v46, 16  ;;  %v2165_v17 = vrot.slane %v1880_v49, 4 }
 0x34b   : > { %19373 = vst [vmem:[#allocation54_spill] sm:$0xff] %v13980_v29  ;;  %v2166_v30 = vrot.slane %v1883_v28, 5  ;;  %v2150_v0 = vsel %vm13341_vm13, %v2145_v61, %v2149_v22  ;;  %v13991_v32 = vor.u32 %v1883_v28, %v13980_v29  ;;  %v1891_v11 = vrot.slane %v1889_v47, 7 }
 0x34c   : > { %2417 = vrot.lane.b32.xlu0 %v10417_v21, %s12133_s17  ;;  %v2136_v59 = vsel %vm13341_vm13, %v2131_v62, %v2135_v53  ;;  %v10433_v1 = vcombine.low %v2142_v19, %v2150_v0  ;;  %v2171_v31 = vrot.slane %v1889_v47, 4  ;;  %v10419_v25 = vcombine.low %v13967_v44, %v1665_v46  ;;  %v1662_v46 = vld [vmem:[#allocation2 + $0x9c] sm:$0x1] }
 0x34d   : > { %2415 = vrot.lane.b32.xlu1 %v10416_v4, %s12133_s17  ;;  %19374 = vst [vmem:[#allocation55_spill] sm:$0xff] %v13991_v32  ;;  %v10432_v50 = vcombine.low %v2128_v42, %v2136_v59  ;;  %v13994_v49 = vor.u32 %v1892_v16, %v1891_v11  ;;  %v1858_v21 = vshrl.u32 %v1660_v12, 16  ;;  %v1861_v63 = vshll.u32 %v1660_v12, 16  ;;  %v1672_v59 = vld [vmem:[#allocation2 + $0xd0] sm:$0xf]  ;;  %v14000_v11 = vpop.permute.xlu0 %3378 }
 0x34e   : > { %v1867_v4 = vshrl.u32 %v1661_v60, 16  ;;  %v1870_v39 = vshll.u32 %v1661_v60, 16  ;;  %v10418_v22 = vcombine.low %v1660_v12, %v1661_v60  ;;  %v2167_v61 = vor.u32 %v2166_v30, %v2165_v17  ;;  %v1673_v60 = vld [vmem:[#allocation2 + $0xd4] sm:$0xf] }
 0x34f   : > { %19375 = vst [vmem:[#allocation56_spill] sm:$0xff] %v13994_v49  ;;  %v2169_v58 = vrot.slane %v1892_v16, 5  ;;  %v13998_v53 = vrot.slane %v1858_v21, 7  ;;  %v2151_v28 = vrot.slane %v1858_v21, 4  ;;  %v2152_v62 = vrot.slane %v1861_v63, 5 }
 0x350   : > { %2497 = vrot.lane.b32.xlu0 %v10433_v1, %s18989_s23  ;;  %v1869_v19 = vrot.slane %v1867_v4, 7  ;;  %v2157_v44 = vrot.slane %v1867_v4, 4  ;;  %v2168_v47 = vrot.slane %v2167_v61, 4  ;;  %v2175_v0 = vshll.u32 %v1666_v52, 16 }
 0x351   : > { %2495 = vrot.lane.b32.xlu1 %v10432_v50, %s18989_s23  ;;  %19376 = vst [vmem:[#allocation57_spill] sm:$0xff] %v13998_v53  ;;  %v2172_v42 = vor.u32 %v2171_v31, %v2169_v58  ;;  %v14003_v12 = vor.u32 %v1861_v63, %v13998_v53  ;;  %v2153_v17 = vor.u32 %v2152_v62, %v2151_v28  ;;  %v2155_v30 = vrot.slane %v1870_v39, 5 }
 0x352   : > { %v14005_v16 = vor.u32 %v1870_v39, %v1869_v19  ;;  %v2170_v1 = vsel %vm13341_vm13, %v2168_v47, %v2169_v58  ;;  %v2177_v21 = vrot.slane %v2175_v0, 5  ;;  %v2161_v4 = vshll.u32 %v1662_v46, 16 }
 0x353   : > { %19377 = vst [vmem:[#allocation58_spill] sm:$0xff] %v14003_v12  ;;  %v2173_v50 = vrot.slane %v2172_v42, 4  ;;  %v2154_v52 = vrot.slane %v2153_v17, 4  ;;  %v2158_v31 = vor.u32 %v2157_v44, %v2155_v30  ;;  %v1924_v61 = vshrl.u32 %v1672_v59, 16  ;;  %v1668_v12 = vld [vmem:[#allocation2 + $0xbc] sm:$0xf]  ;;  %v14017_v17 = vpop.permute.xlu0 %3380 }
 0x354   : > { %19378 = vst [vmem:[#allocation59_spill] sm:$0xff] %v14005_v16  ;;  %2421 = vrot.lane.b32.xlu0 %v10419_v25, %s12133_s17  ;;  %v1927_v63 = vshll.u32 %v1672_v59, 16  ;;  %v2163_v28 = vrot.slane %v2161_v4, 5  ;;  %v1933_v39 = vshrl.u32 %v1673_v60, 16  ;;  %v1936_v62 = vshll.u32 %v1673_v60, 16 }
 0x355   : > { %2419 = vrot.lane.b32.xlu1 %v10418_v22, %s12133_s17  ;;  %v2178_v19 = vsel %vm13341_vm13, %v2173_v50, %v2177_v21  ;;  %v2156_v58 = vsel %vm13341_vm13, %v2154_v52, %v2155_v30  ;;  %v2159_v46 = vrot.slane %v2158_v31, 4  ;;  %v14015_v47 = vrot.slane %v1924_v61, 7  ;;  %v1669_v25 = vld [vmem:[#allocation2 + $0xc0] sm:$0xf] }
 0x356   : > { %v10435_v16 = vcombine.low %v2170_v1, %v2178_v19  ;;  %v1935_v22 = vrot.slane %v1933_v39, 7  ;;  %v2193_v42 = vrot.slane %v1924_v61, 4  ;;  %v2194_v44 = vrot.slane %v1927_v63, 5  ;;  %v1674_v61 = vld [vmem:[#allocation2 + $0xd8] sm:$0x1] }
 0x357   : > { %19379 = vst [vmem:[#allocation60_spill] sm:$0xff] %v14015_v47  ;;  %v2199_v0 = vrot.slane %v1933_v39, 4  ;;  %v2164_v50 = vsel %vm13341_vm13, %v2159_v46, %v2163_v28  ;;  %v14023_v1 = vor.u32 %v1927_v63, %v14015_v47  ;;  %v10421_v21 = vcombine.low %v1672_v59, %v1673_v60  ;;  %v14030_v59 = vld [vmem:[#allocation2 + $0xf8] sm:$0xf]  ;;  %v14038_v47 = vpop.permute.xlu0 %3382 }
 0x358   : > { %2501 = vrot.lane.b32.xlu0 %v10435_v16, %s18989_s23  ;;  %v1902_v30 = vshrl.u32 %v1668_v12, 16  ;;  %v10434_v4 = vcombine.low %v2156_v58, %v2164_v50  ;;  %v14025_v52 = vor.u32 %v1936_v62, %v1935_v22  ;;  %v1905_v31 = vshll.u32 %v1668_v12, 16  ;;  %v1670_v16 = vld [vmem:[#allocation2 + $0xc4] sm:$0x1] }
 0x359   : > { %19380 = vst [vmem:[#allocation61_spill] sm:$0xff] %v14023_v1  ;;  %v1911_v19 = vshrl.u32 %v1669_v25, 16  ;;  %v1914_v39 = vshll.u32 %v1669_v25, 16  ;;  %v10420_v53 = vcombine.low %v1668_v12, %v1669_v25  ;;  %v2195_v1 = vor.u32 %v2194_v44, %v2193_v42 }
 0x35a   : > { %19381 = vst [vmem:[#allocation62_spill] sm:$0xff] %v14025_v52  ;;  %v14027_v49 = vrot.slane %v1902_v30, 7  ;;  %v2179_v32 = vrot.slane %v1902_v30, 4  ;;  %2499 = vrot.lane.b32.xlu1 %v10434_v4, %s18989_s23  ;;  %v2180_v46 = vrot.slane %v1905_v31, 5  ;;  %v2197_v58 = vrot.slane %v1936_v62, 5 }
 0x35b   : > { %v1913_v28 = vrot.slane %v1911_v19, 7  ;;  %v2185_v63 = vrot.slane %v1911_v19, 4  ;;  %v2203_v22 = vshll.u32 %v1674_v61, 16  ;;  %v2183_v50 = vrot.slane %v1914_v39, 5  ;;  %v1681_v4 = vld [vmem:[#allocation2 + $0xfc] sm:$0xf] }
 0x35c   : > { %19382 = vst [vmem:[#allocation63_spill] sm:$0xff] %v14027_v49  ;;  %2425 = vrot.lane.b32.xlu0 %v10421_v21, %s12133_s17  ;;  %v14034_v60 = vor.u32 %v1905_v31, %v14027_v49  ;;  %v2196_v12 = vrot.slane %v2195_v1, 4  ;;  %v2181_v25 = vor.u32 %v2180_v46, %v2179_v32  ;;  %v2189_v30 = vshll.u32 %v1670_v16, 16  ;;  %v14045_v1 = vpop.permute.xlu1 %3458 }
 0x35d   : > { %v14036_v52 = vor.u32 %v1914_v39, %v1913_v28  ;;  %v2200_v19 = vor.u32 %v2199_v0, %v2197_v58  ;;  %v2205_v42 = vrot.slane %v2203_v22, 5  ;;  %v2186_v44 = vor.u32 %v2185_v63, %v2183_v50  ;;  %v1676_v28 = vld [vmem:[#allocation2 + $0xe4] sm:$0xf] }
 0x35e   : > { %19383 = vst [vmem:[#allocation64_spill] sm:$0xff] %v14034_v60  ;;  %v1968_v29 = vshrl.u32 %v14030_v59, 16  ;;  %2423 = vrot.lane.b32.xlu1 %v10420_v53, %s12133_s17  ;;  %v2198_v62 = vsel %vm13341_vm13, %v2196_v12, %v2197_v58  ;;  %v2182_v21 = vrot.slane %v2181_v25, 4  ;;  %v2191_v31 = vrot.slane %v2189_v30, 5  ;;  %v1677_v60 = vld [vmem:[#allocation2 + $0xe8] sm:$0xf] }
 0x35f   : > { %19384 = vst [vmem:[#allocation65_spill] sm:$0xff] %v14036_v52  ;;  %v1971_v61 = vshll.u32 %v14030_v59, 16  ;;  %v2201_v32 = vrot.slane %v2200_v19, 4  ;;  %v2187_v39 = vrot.slane %v2186_v44, 4  ;;  %v1977_v0 = vshrl.u32 %v1681_v4, 16 }
 0x360   : > { %v14047_v16 = vrot.slane %v1968_v29, 7  ;;  %v2184_v46 = vsel %vm13341_vm13, %v2182_v21, %v2183_v50  ;;  %v1980_v63 = vshll.u32 %v1681_v4, 16  ;;  %v2221_v53 = vrot.slane %v1968_v29, 4  ;;  %v2610_v50 = vld [vmem:[#allocation2 + $0x18] sm:$0xf]  ;;  %v14059_v21 = vpop.permute.xlu0 %3462 }
 0x361   : > { %v2222_v22 = vrot.slane %v1971_v61, 5  ;;  %v2206_v58 = vsel %vm13341_vm13, %v2201_v32, %v2205_v42  ;;  %v2192_v12 = vsel %vm13341_vm13, %v2187_v39, %v2191_v31  ;;  %v1979_v30 = vrot.slane %v1977_v0, 7  ;;  %v1682_v32 = vld [vmem:[#allocation2 + $0x100] sm:$0x1] }
 0x362   : > { %19385 = vst [vmem:[#allocation66_spill] sm:$0xff] %v14047_v16  ;;  %v14056_v25 = vor.u32 %v1971_v61, %v14047_v16  ;;  %v10437_v19 = vcombine.low %v2198_v62, %v2206_v58  ;;  %v10436_v44 = vcombine.low %v2184_v46, %v2192_v12  ;;  %v2227_v52 = vrot.slane %v1977_v0, 4  ;;  %v14065_v62 = vpop.permute.xlu1 %3460 }
 0x363   : > { %v10423_v49 = vcombine.low %v14030_v59, %v1681_v4  ;;  %v14061_v29 = vor.u32 %v1980_v63, %v1979_v30  ;;  %v1946_v41 = vshrl.u32 %v1676_v28, 16  ;;  %v1949_v33 = vshll.u32 %v1676_v28, 16  ;;  %v19392_v30 = vld [vmem:[#allocation32_spill] sm:$0xff] }
 0x364   : > { %19386 = vst [vmem:[#allocation67_spill] sm:$0xff] %v14056_v25  ;;  %v1955_v42 = vshrl.u32 %v1677_v60, 16  ;;  %2505 = vrot.lane.b32.xlu0 %v10437_v19, %s18989_s23  ;;  %2503 = vrot.lane.b32.xlu1 %v10436_v44, %s18989_s23  ;;  %v1958_v31 = vshll.u32 %v1677_v60, 16  ;;  %v10422_v61 = vcombine.low %v1676_v28, %v1677_v60  ;;  %v19389_v46 = vmov 0  ;;  %v19393_v19 = vld [vmem:[#allocation30_spill] sm:$0xff]  ;;  %v14085_v6 = vpop.permute.xlu0 %3386 }
 0x365   : > { %19387 = vst [vmem:[#allocation68_spill] sm:$0xff] %v14061_v29  ;;  %v14067_v59 = vrot.slane %v1946_v41, 7  ;;  %v2207_v39 = vrot.slane %v1946_v41, 4  ;;  %v2208_v0 = vrot.slane %v1949_v33, 5  ;;  %v19390_v46 = vsel %vm14069_vm0, 4294967295, %v19389_v46 }
 0x366   : > { %v1957_v4 = vrot.slane %v1955_v42, 7  ;;  %19391 = vst [vmem:[#allocation70_spill] sm:$0xff] %v19390_v46  ;;  %v2213_v58 = vrot.slane %v1955_v42, 4  ;;  %v2675_v12 = vshrl.u32 %v2610_v50, 16  ;;  %v19394_v44 = vrot.slane %v19393_v19, 4 }
 0x367   : > { %19388 = vst [vmem:[#allocation69_spill] sm:$0xff] %v14067_v59  ;;  %v2223_v28 = vor.u32 %v2222_v22, %v2221_v53  ;;  %v1678_v25 = vld [vmem:[#allocation2 + $0xec] sm:$0x1]  ;;  %v14079_v16 = vor.u32 %v1949_v33, %v14067_v59  ;;  %v2225_v3 = vrot.slane %v1980_v63, 5  ;;  %v2231_v15 = vshll.u32 %v1682_v32, 16 }
 0x368   : > { %v2695_v60 = vsel %vm14069_vm0, %v19394_v44, %v19392_v30  ;;  %v2614_v29 = vld [vmem:[#allocation2 + $0x2c] sm:$0xf]  ;;  %v14081_v41 = vor.u32 %v1958_v31, %v1957_v4  ;;  %2429 = vrot.lane.b32.xlu0 %v10423_v49, %s12133_s17  ;;  %2427 = vrot.lane.b32.xlu1 %v10422_v61, %s12133_s17  ;;  %v10443_v50 = vrot.slane %v2675_v12, 11  ;;  %v2209_v19 = vor.u32 %v2208_v0, %v2207_v39  ;;  %v1688_v33 = vld [vmem:[#allocation2 + $0x120] sm:$0xf]  ;;  %v14092_v4 = vpop.permute.xlu1 %3384 }
 0x369   : > { %19395 = vst [vmem:[#allocation32_spill] sm:$0xff] %v14079_v16  ;;  %v2224_v42 = vrot.slane %v2223_v28, 4  ;;  %v2211_v55 = vrot.slane %v1958_v31, 5  ;;  %v2228_v53 = vor.u32 %v2227_v52, %v2225_v3  ;;  %v2233_v22 = vrot.slane %v2231_v15, 5  ;;  %v19397_v16 = vld [vmem:[#allocation31_spill] sm:$0xff] }
 0x36a   : > { %19396 = vst [vmem:[#allocation30_spill] sm:$0xff] %v14081_v41  ;;  %v2217_v30 = vshll.u32 %v1678_v25, 16  ;;  %v2697_v44 = vshrl.u32 %v2614_v29, 16  ;;  %v2686_v63 = vsel %vm14069_vm0, %v10443_v50, %v19397_v16  ;;  %v2210_v32 = vrot.slane %v2209_v19, 4  ;;  %v19398_v25 = vld [vmem:[#allocation33_spill] sm:$0xff]  ;;  %v19400_v19 = vld [vmem:[#allocation35_spill] sm:$0xff] }
 0x36b   : > { %v2226_v49 = vsel %vm13341_vm13, %v2224_v42, %v2225_v3  ;;  %v2214_v61 = vor.u32 %v2213_v58, %v2211_v55  ;;  %v10459_v39 = vcombine.low %v2686_v63, %v2695_v60  ;;  %v2229_v31 = vrot.slane %v2228_v53, 4  ;;  %v1689_v28 = vld [vmem:[#allocation2 + $0x124] sm:$0xf]  ;;  %v19399_v58 = vld [vmem:[#allocation34_spill] sm:$0xff] }
 0x36c   : > { %v2219_v0 = vrot.slane %v2217_v30, 5  ;;  %v10444_v12 = vrot.slane %v2697_v44, 11  ;;  %v2212_v15 = vsel %vm13341_vm13, %v2210_v32, %v2211_v55  ;;  %v2709_v29 = vrot.slane %v19398_v25, 4  ;;  %v1684_v44 = vld [vmem:[#allocation2 + $0x10c] sm:$0xf]  ;;  %v14117_v25 = vpop.permute.xlu1 %3464 }
 0x36d   : > { %v2215_v52 = vrot.slane %v2214_v61, 4  ;;  %v2012_v41 = vshrl.u32 %v1688_v33, 16  ;;  %v3492_v16 = vsel %vm799_vm8, %v10459_v39, %v14000_v11  ;;  %v2234_v3 = vsel %vm13341_vm13, %v2229_v31, %v2233_v22  ;;  %v14111_v11 = vpop.permute.xlu0 %3466  ;;  %v1685_v39 = vld [vmem:[#allocation2 + $0x110] sm:$0xf] }
 0x36e   : > { %v2708_v60 = vsel %vm14069_vm0, %v10444_v12, %v19399_v58  ;;  %v2015_v50 = vshll.u32 %v1688_v33, 16  ;;  %v10439_v42 = vcombine.low %v2226_v49, %v2234_v3  ;;  %v2717_v53 = vsel %vm14069_vm0, %v2709_v29, %v19400_v19 }
 0x36f   : > { %v2220_v55 = vsel %vm13341_vm13, %v2215_v52, %v2219_v0  ;;  %v14109_v30 = vrot.slane %v2012_v41, 7  ;;  %v10460_v22 = vcombine.low %v2708_v60, %v2717_v53  ;;  %v2021_v32 = vshrl.u32 %v1689_v28, 16  ;;  %v2618_v52 = vld [vmem:[#allocation2 + $0x40] sm:$0xf] }
 0x370   : > { %v10438_v63 = vcombine.low %v2212_v15, %v2220_v55  ;;  %v2024_v61 = vshll.u32 %v1689_v28, 16  ;;  %2509 = vrot.lane.b32.xlu0 %v10439_v42, %s18989_s23  ;;  %v2249_v31 = vrot.slane %v2012_v41, 4  ;;  %v2250_v0 = vrot.slane %v2015_v50, 5 }
 0x371   : > { %19401 = vst [vmem:[#allocation31_spill] sm:$0xff] %v14109_v30  ;;  %v14115_v49 = vor.u32 %v2015_v50, %v14109_v30  ;;  %v10425_v12 = vcombine.low %v1688_v33, %v1689_v28  ;;  %v3495_v15 = vsel %vm799_vm8, %v10460_v22, %v14017_v17  ;;  %v2023_v29 = vrot.slane %v2021_v32, 7  ;;  %v1690_v22 = vld [vmem:[#allocation2 + $0x128] sm:$0x1] }
 0x372   : > { %2507 = vrot.lane.b32.xlu1 %v10438_v63, %s18989_s23  ;;  %v2255_v3 = vrot.slane %v2021_v32, 4  ;;  %v1990_v58 = vshrl.u32 %v1684_v44, 16  ;;  %v1993_v60 = vshll.u32 %v1684_v44, 16  ;;  %v1999_v55 = vshrl.u32 %v1685_v39, 16  ;;  %v14128_v32 = vpop.permute.xlu0 %3390 }
 0x373   : > { %19402 = vst [vmem:[#allocation33_spill] sm:$0xff] %v14115_v49  ;;  %v2002_v42 = vshll.u32 %v1685_v39, 16  ;;  %v10424_v19 = vcombine.low %v1684_v44, %v1685_v39  ;;  %v14122_v53 = vor.u32 %v2024_v61, %v2023_v29  ;;  %v2719_v28 = vshrl.u32 %v2618_v52, 16 }
 0x374   : > { %v14124_v41 = vrot.slane %v1990_v58, 7  ;;  %v2235_v33 = vrot.slane %v1990_v58, 4  ;;  %2433 = vrot.lane.b32.xlu0 %v10425_v12, %s12133_s17  ;;  %v2001_v50 = vrot.slane %v1999_v55, 7  ;;  %v2236_v63 = vrot.slane %v1993_v60, 5  ;;  %v1686_v58 = vld [vmem:[#allocation2 + $0x114] sm:$0x1] }
 0x375   : > { %19403 = vst [vmem:[#allocation34_spill] sm:$0xff] %v14122_v53  ;;  %v2241_v49 = vrot.slane %v1999_v55, 4  ;;  %v2731_v17 = vrot.slane %v13337_v20, 4  ;;  %v10445_v44 = vrot.slane %v2719_v28, 11  ;;  %v2251_v39 = vor.u32 %v2250_v0, %v2249_v31  ;;  %v14141_v55 = vpop.permute.xlu1 %3388 }
 0x376   : > { %19404 = vst [vmem:[#allocation35_spill] sm:$0xff] %v14124_v41  ;;  %v14131_v30 = vor.u32 %v1993_v60, %v14124_v41  ;;  %2431 = vrot.lane.b32.xlu1 %v10424_v19, %s12133_s17  ;;  %v14134_v29 = vor.u32 %v2002_v42, %v2001_v50  ;;  %v3539_v20 = vsel %vm2565_vm1, %v3492_v16, %v14045_v1  ;;  %v2253_v52 = vrot.slane %v2024_v61, 5  ;;  %v19407_v60 = vld [vmem:[#allocation36_spill] sm:$0xff]  ;;  %v11661_v1 = vld [vmem:[%s18897_s5 + $0x8] sm:$0xff]  }
 0x377   : > { %v2739_v12 = vsel %vm14069_vm0, %v2731_v17, %v13350_v13  ;;  %v2730_v19 = vsel %vm14069_vm0, %v10445_v44, %v19407_v60  ;;  %v2252_v28 = vrot.slane %v2251_v39, 4  ;;  %11287 = vmatprep.mubr.msk.bf16.mxu0 %vm3619_vm2, %v3539_v20  ;;  %v2237_v50 = vor.u32 %v2236_v63, %v2235_v33  ;;  %v14147_v17 = vld [vmem:[#allocation2 + $0x30] sm:$0xf]  ;;  %v14156_v39 = vld [vmem:[#allocation2 + $0x34] sm:$0xf] }
 0x378   : > { %19405 = vst [vmem:[#allocation71_spill] sm:$0xff] %v14131_v30  ;;  %19406 = vst [vmem:[#allocation72_spill] sm:$0xff] %v14134_v29  ;;  %v2259_v30 = vshll.u32 %v1690_v22, 16  ;;  %v10461_v31 = vcombine.low %v2730_v19, %v2739_v12  ;;  %v2256_v0 = vor.u32 %v2255_v3, %v2253_v52  ;;  %v2239_v13 = vrot.slane %v2002_v42, 5  ;;  %v14161_v12 = vpop.permute.xlu0 %3470  ;;  %v1692_v19 = vld [vmem:[#allocation2 + $0x134] sm:$0xf] }
 0x379   : > { %v2254_v16 = vsel %vm13341_vm13, %v2252_v28, %v2253_v52  ;;  %v2245_v44 = vshll.u32 %v1686_v58, 16  ;;  %v3541_v22 = vsel %vm2565_vm1, %v3495_v15, %v14065_v62  ;;  %v2238_v33 = vrot.slane %v2237_v50, 4  ;;  %v12030_v15 = vld [vmem:[%s18897_s5] sm:$0xff]   ;;  %v11664_v28 = vld [vmem:[%s18897_s5 + $0x10] sm:$0xff]  }
 0x37a   : > { %v2261_v61 = vrot.slane %v2259_v30, 5  ;;  %v3498_v3 = vsel %vm799_vm8, %v10461_v31, %v14038_v47  ;;  %v2257_v42 = vrot.slane %v2256_v0, 4  ;;  %v2242_v63 = vor.u32 %v2241_v49, %v2239_v13  ;;  %11288 = vmatmul.mubr.msk.bf16.vlgmr.msra.gmra.mrb[4].mxu0 %vm3619_vm2, %v3541_v22 }
 0x37b   : > { %v2247_v20 = vrot.slane %v2245_v44, 5  ;;  %v3543_v30 = vsel %vm2565_vm1, %v3498_v3, %v14059_v21  ;;  %v4113_v52 = vshrl.u32 %v14147_v17, 16  ;;  %v4116_v62 = vshll.u32 %v14147_v17, 16  ;;  %11320 = vmatpush3.bf16.msra.mxu0 %v12030_v15  ;;  %v14176_v21 = vpop.permute.xlu1 %3468 }
 0x37c   : > { %v2262_v47 = vsel %vm13341_vm13, %v2257_v42, %v2261_v61  ;;  %v2240_v49 = vsel %vm13341_vm13, %v2238_v33, %v2239_v13  ;;  %v2243_v58 = vrot.slane %v2242_v63, 4  ;;  %v4122_v60 = vshrl.u32 %v14156_v39, 16  ;;  %11291 = vmatprep.mubr.msk.bf16.mxu0 %vm3619_vm2, %v3543_v30  ;;  %11321 = vmatprep.subr.bf16.mxu0 %v11661_v1  ;;  %v1693_v13 = vld [vmem:[#allocation2 + $0x138] sm:$0xf]  ;;  %v2626_v33 = vld [vmem:[#allocation2 + $0x68] sm:$0xf]  ;;  %v14194_v53 = vpop.permute.xlu0 %3394 }
 0x37d   : > { %v10441_v31 = vcombine.low %v2254_v16, %v2262_v47  ;;  %v14181_v0 = vrot.slane %v4113_v52, 7  ;;  %v4125_v50 = vshll.u32 %v14156_v39, 16  ;;  %v4459_v61 = vrot.slane %v4113_v52, 4 }
 0x37e   : > { %v2248_v44 = vsel %vm13341_vm13, %v2243_v58, %v2247_v20  ;;  %v4124_v22 = vrot.slane %v4122_v60, 7  ;;  %v4460_v3 = vrot.slane %v4116_v62, 5  ;;  %v4465_v42 = vrot.slane %v4122_v60, 4  ;;  %v2622_v58 = vld [vmem:[#allocation2 + $0x54] sm:$0xf] }
 0x37f   : > { %19408 = vst [vmem:[#allocation36_spill] sm:$0xff] %v14181_v0  ;;  %2513 = vrot.lane.b32.xlu0 %v10441_v31, %s18989_s23  ;;  %v10440_v63 = vcombine.low %v2240_v49, %v2248_v44  ;;  %v14188_v30 = vor.u32 %v4116_v62, %v14181_v0  ;;  %v10595_v16 = vcombine.low %v14147_v17, %v14156_v39  ;;  %v2034_v15 = vshrl.u32 %v1692_v19, 16  ;;  %v11668_v49 = vld [vmem:[%s18897_s5 + $0x18] sm:$0xff]  }
 0x380   : > { %11322 = vmatpush3.bf16.msra.mxu0 %v11661_v1  ;;  %v14192_v52 = vor.u32 %v4125_v50, %v4124_v22  ;;  %v2037_v47 = vshll.u32 %v1692_v19, 16  ;;  %v2043_v29 = vshrl.u32 %v1693_v13, 16  ;;  %v2046_v20 = vshll.u32 %v1693_v13, 16 }
 0x381   : > { %19409 = vst [vmem:[#allocation73_spill] sm:$0xff] %v14188_v30  ;;  %11323 = vmatprep.subr.bf16.mxu0 %v11664_v28  ;;  %2511 = vrot.lane.b32.xlu1 %v10440_v63, %s18989_s23  ;;  %v14200_v62 = vrot.slane %v2034_v15, 7  ;;  %v2263_v17 = vrot.slane %v2034_v15, 4  ;;  %v10426_v39 = vcombine.low %v1692_v19, %v1693_v13  ;;  %v2763_v1 = vshrl.u32 %v2626_v33, 16  ;;  %v4046_v30 = vld [vmem:[#allocation2 + $0x38] sm:$0x1] }
 0x382   : > { %19410 = vst [vmem:[#allocation74_spill] sm:$0xff] %v14192_v52  ;;  %v2045_v60 = vrot.slane %v2043_v29, 7  ;;  %v2264_v31 = vrot.slane %v2037_v47, 5  ;;  %v2269_v44 = vrot.slane %v2043_v29, 4  ;;  %v2775_v22 = vrot.slane %v13486_v56, 4  ;;  %v14203_v52 = vpop.permute.xlu1 %3392 }
 0x383   : > { %4811 = vrot.lane.b32.xlu0 %v10595_v16, %s12133_s17  ;;  %v14207_v0 = vor.u32 %v2037_v47, %v14200_v62  ;;  %v10447_v41 = vrot.slane %v2763_v1, 11  ;;  %v2741_v63 = vshrl.u32 %v2622_v58, 16  ;;  %v2753_v59 = vrot.slane %v13512_v26, 4  ;;  %v1694_v33 = vld [vmem:[#allocation2 + $0x13c] sm:$0x1]  ;;  %v11672_v16 = vld [vmem:[%s18897_s5 + $0x20] sm:$0xff]   ;;  %v14225_v58 = vpop.permute.xlu0 %3474 }
 0x384   : > { %11324 = vmatpush3.bf16.msra.mxu0 %v11664_v28  ;;  %v14210_v19 = vor.u32 %v2046_v20, %v2045_v60  ;;  %v2783_v29 = vsel %vm14069_vm0, %v2775_v22, %v13506_v27  ;;  %v4461_v56 = vor.u32 %v4460_v3, %v4459_v61  ;;  %v4463_v13 = vrot.slane %v4125_v50, 5 }
 0x385   : > { %11325 = vmatprep.subr.bf16.mxu0 %v11668_v49  ;;  %2435 = vrot.lane.b32.xlu1 %v10426_v39, %s12133_s17  ;;  %v2774_v26 = vsel %vm14069_vm0, %v10447_v41, %v13496_v8  ;;  %v10446_v28 = vrot.slane %v2741_v63, 11  ;;  %v2761_v15 = vsel %vm14069_vm0, %v2753_v59, %v13521_v14  ;;  %v4469_v27 = vshll.u32 %v4046_v30, 16  ;;  %v4052_v8 = vld [vmem:[#allocation2 + $0x58] sm:$0xf]  ;;  %v4053_v63 = vld [vmem:[#allocation2 + $0x5c] sm:$0xf] }
 0x386   : > { %v10463_v61 = vcombine.low %v2774_v26, %v2783_v29  ;;  %v4462_v50 = vrot.slane %v4461_v56, 4  ;;  %v4466_v3 = vor.u32 %v4465_v42, %v4463_v13  ;;  %v2265_v47 = vor.u32 %v2264_v31, %v2263_v17  ;;  %v14234_v30 = vpop.permute.xlu1 %3472 }
 0x387   : > { %v2752_v39 = vsel %vm14069_vm0, %v10446_v28, %v13516_v35  ;;  %v4471_v1 = vrot.slane %v4469_v27, 5  ;;  %v2267_v60 = vrot.slane %v2046_v20, 5  ;;  %v2273_v22 = vshll.u32 %v1694_v33, 16  ;;  %v11675_v35 = vld [vmem:[%s18897_s5 + $0x28] sm:$0xff]   ;;  %v4048_v33 = vld [vmem:[#allocation2 + $0x44] sm:$0xf] }
 0x388   : > { %11326 = vmatpush3.bf16.msra.mxu0 %v11668_v49  ;;  %v3504_v41 = vsel %vm799_vm8, %v10463_v61, %v14085_v6  ;;  %v10462_v14 = vcombine.low %v2752_v39, %v2761_v15  ;;  %v4464_v59 = vsel %vm13341_vm13, %v4462_v50, %v4463_v13  ;;  %v4467_v42 = vrot.slane %v4466_v3, 4  ;;  %v4049_v27 = vld [vmem:[#allocation2 + $0x48] sm:$0xf]  ;;  %v14252_v3 = vpop.permute.xlu0 %3398  ;;  %v11678_v39 = vld [vmem:[%s18897_s5 + $0x60] sm:$0xff]  }
 0x389   : > { %11327 = vmatprep.subr.bf16.mxu0 %v11672_v16  ;;  %v2266_v17 = vrot.slane %v2265_v47, 4  ;;  %v2270_v20 = vor.u32 %v2269_v44, %v2267_v60  ;;  %v2275_v31 = vrot.slane %v2273_v22, 5  ;;  %v3547_v49 = vsel %vm2565_vm1, %v3504_v41, %v14111_v11  ;;  %v2634_v22 = vld [vmem:[#allocation2 + $0x90] sm:$0xf] }
 0x38a   : > { %v3501_v6 = vsel %vm799_vm8, %v10462_v14, %v14092_v4  ;;  %v4472_v29 = vsel %vm13341_vm13, %v4467_v42, %v4471_v1  ;;  %v4157_v56 = vshrl.u32 %v4052_v8, 16  ;;  %v4160_v13 = vshll.u32 %v4052_v8, 16  ;;  %v14254_v47 = vpop.permute.xlu1 %3396 }
 0x38b   : > { %v10611_v26 = vcombine.low %v4464_v59, %v4472_v29  ;;  %v2268_v28 = vsel %vm13341_vm13, %v2266_v17, %v2267_v60  ;;  %v2271_v15 = vrot.slane %v2270_v20, 4  ;;  %v3545_v44 = vsel %vm2565_vm1, %v3501_v6, %v14117_v25 }
 0x38c   : > { %11328 = vmatpush3.bf16.msra.mxu0 %v11672_v16  ;;  %v14249_v11 = vrot.slane %v4157_v56, 7  ;;  %v4166_v61 = vshrl.u32 %v4053_v63, 16  ;;  %v4169_v4 = vshll.u32 %v4053_v63, 16  ;;  %v4487_v50 = vrot.slane %v4157_v56, 4  ;;  %v2630_v56 = vld [vmem:[#allocation2 + $0x7c] sm:$0xf] }
 0x38d   : > { %11292 = vmatmul.mubr.msk.bf16.gmra.mrb[8].mxu0 %vm3619_vm2, %v3545_v44  ;;  %11329 = vmatprep.subr.bf16.mxu0 %v11675_v35  ;;  %v2276_v25 = vsel %vm13341_vm13, %v2271_v15, %v2275_v31  ;;  %v4488_v16 = vrot.slane %v4160_v13, 5  ;;  %v10597_v1 = vcombine.low %v4052_v8, %v4053_v63  ;;  %v4135_v60 = vshrl.u32 %v4048_v33, 16 }
 0x38e   : > { %4891 = vrot.lane.b32.xlu0 %v10611_v26, %s18989_s23  ;;  %11295 = vmatprep.mubr.msk.bf16.mxu0 %vm3619_vm2, %v3547_v49  ;;  %v10442_v41 = vcombine.low %v2268_v28, %v2276_v25  ;;  %v14264_v14 = vor.u32 %v4160_v13, %v14249_v11  ;;  %v4168_v59 = vrot.slane %v4166_v61, 7  ;;  %v4493_v42 = vrot.slane %v4166_v61, 4  ;;  %v4054_v26 = vld [vmem:[#allocation2 + $0x60] sm:$0x1] }
 0x38f   : > { %v14266_v17 = vrot.slane %v4135_v60, 7  ;;  %v4138_v20 = vshll.u32 %v4048_v33, 16  ;;  %v4144_v6 = vshrl.u32 %v4049_v27, 16  ;;  %v4147_v29 = vshll.u32 %v4049_v27, 16  ;;  %v14275_v61 = vpop.permute.xlu1 %3476 }
 0x390   : > { %11330 = vmatpush3.bf16.msra.mxu0 %v11675_v35  ;;  %2515 = vrot.lane.b32.xlu1 %v10442_v41, %s18989_s23  ;;  %v14269_v8 = vor.u32 %v4169_v4, %v4168_v59  ;;  %v4473_v31 = vrot.slane %v4135_v60, 4  ;;  %v10596_v63 = vcombine.low %v4048_v33, %v4049_v27  ;;  %v2807_v49 = vshrl.u32 %v2634_v22, 16  ;;  %v14279_v33 = vpop.permute.xlu0 %3478  ;;  %v4050_v59 = vld [vmem:[#allocation2 + $0x4c] sm:$0x1] }
 0x391   : > { %11363 = vmatprep.subr.bf16.mxu0 %v11678_v39  ;;  %v14273_v13 = vor.u32 %v4138_v20, %v14266_v17  ;;  %v4146_v28 = vrot.slane %v4144_v6, 7  ;;  %v4474_v15 = vrot.slane %v4138_v20, 5  ;;  %v4479_v44 = vrot.slane %v4144_v6, 4 }
 0x392   : > { %4815 = vrot.lane.b32.xlu0 %v10597_v1, %s12133_s17  ;;  %v10449_v35 = vrot.slane %v2807_v49, 11  ;;  %v2819_v25 = vrot.slane %v13524_v34, 4  ;;  %v2785_v41 = vshrl.u32 %v2630_v56, 16  ;;  %v2797_v60 = vrot.slane %v13544_v38, 4 }
 0x393   : > { %19411 = vst [vmem:[#allocation75_spill] sm:$0xff] %v14273_v13  ;;  %v14281_v27 = vor.u32 %v4147_v29, %v4146_v28  ;;  %v4489_v39 = vor.u32 %v4488_v16, %v4487_v50  ;;  %v4491_v1 = vrot.slane %v4169_v4, 5  ;;  %v4497_v22 = vshll.u32 %v4054_v26, 16  ;;  %v4060_v28 = vld [vmem:[#allocation2 + $0x80] sm:$0xf] }
 0x394   : > { %4813 = vrot.lane.b32.xlu1 %v10596_v63, %s12133_s17  ;;  %v2818_v20 = vsel %vm14069_vm0, %v10449_v35, %v13532_v23  ;;  %v2827_v34 = vsel %vm14069_vm0, %v2819_v25, %v13542_v57  ;;  %v10448_v6 = vrot.slane %v2785_v41, 11  ;;  %v2805_v38 = vsel %vm14069_vm0, %v2797_v60, %v13555_v18  ;;  %v14296_v35 = vpop.permute.xlu1 %3400 }
 0x395   : > { %v10465_v56 = vcombine.low %v2818_v20, %v2827_v34  ;;  %v4490_v50 = vrot.slane %v4489_v39, 4  ;;  %v4494_v4 = vor.u32 %v4493_v42, %v4491_v1  ;;  %v4499_v16 = vrot.slane %v4497_v22, 5  ;;  %v4056_v20 = vld [vmem:[#allocation2 + $0x6c] sm:$0xf] }
 0x396   : > { %v2796_v63 = vsel %vm14069_vm0, %v10448_v6, %v13551_v5  ;;  %v4475_v49 = vor.u32 %v4474_v15, %v4473_v31  ;;  %v4477_v26 = vrot.slane %v4147_v29, 5  ;;  %v4483_v23 = vshll.u32 %v4050_v59, 16  ;;  %v4061_v31 = vld [vmem:[#allocation2 + $0x84] sm:$0xf]  ;;  %v14304_v29 = vpop.permute.xlu0 %3402 }
 0x397   : > { %v3510_v57 = vsel %vm799_vm8, %v10465_v56, %v14128_v32  ;;  %v10464_v25 = vcombine.low %v2796_v63, %v2805_v38  ;;  %v4492_v18 = vsel %vm13341_vm13, %v4490_v50, %v4491_v1  ;;  %v4495_v41 = vrot.slane %v4494_v4, 4 }
 0x398   : > { %v4476_v42 = vrot.slane %v4475_v49, 4  ;;  %v4480_v60 = vor.u32 %v4479_v44, %v4477_v26  ;;  %v4485_v39 = vrot.slane %v4483_v23, 5  ;;  %v3551_v5 = vsel %vm2565_vm1, %v3510_v57, %v14161_v12 }
 0x399   : > { %v3507_v15 = vsel %vm799_vm8, %v10464_v25, %v14141_v55  ;;  %v4500_v32 = vsel %vm13341_vm13, %v4495_v41, %v4499_v16  ;;  %v4201_v22 = vshrl.u32 %v4060_v28, 16  ;;  %v4204_v59 = vshll.u32 %v4060_v28, 16  ;;  %v4057_v55 = vld [vmem:[#allocation2 + $0x70] sm:$0xf] }
 0x39a   : > { %v10613_v1 = vcombine.low %v4492_v18, %v4500_v32  ;;  %v4478_v44 = vsel %vm13341_vm13, %v4476_v42, %v4477_v26  ;;  %v4481_v34 = vrot.slane %v4480_v60, 4  ;;  %v3549_v12 = vsel %vm2565_vm1, %v3507_v15, %v14176_v21  ;;  %v2642_v26 = vld [vmem:[#allocation2 + $0xb8] sm:$0xf]  ;;  %v14321_v21 = vpop.permute.xlu1 %3480  ;;  %v14328_v32 = vpop.permute.xlu0 %3482 }
 0x39b   : > { %v14314_v6 = vrot.slane %v4201_v22, 7  ;;  %v4210_v38 = vshrl.u32 %v4061_v31, 16  ;;  %v4213_v56 = vshll.u32 %v4061_v31, 16  ;;  %v4515_v50 = vrot.slane %v4201_v22, 4  ;;  %11296 = vmatmul.mubr.msk.bf16.gmra.mrb[12].mxu0 %vm3619_vm2, %v3549_v12 }
 0x39c   : > { %4895 = vrot.lane.b32.xlu0 %v10613_v1, %s18989_s23  ;;  %v4486_v4 = vsel %vm13341_vm13, %v4481_v34, %v4485_v39  ;;  %v4516_v16 = vrot.slane %v4204_v59, 5  ;;  %v10599_v63 = vcombine.low %v4060_v28, %v4061_v31  ;;  %v4179_v49 = vshrl.u32 %v4056_v20, 16  ;;  %11299 = vmatprep.mubr.msk.bf16.mxu0 %vm3619_vm2, %v3551_v5  ;;  %v2638_v39 = vld [vmem:[#allocation2 + $0xa4] sm:$0xf]  ;;  %v4062_v1 = vld [vmem:[#allocation2 + $0x88] sm:$0x1] }
 0x39d   : > { %v10612_v23 = vcombine.low %v4478_v44, %v4486_v4  ;;  %v14324_v57 = vor.u32 %v4204_v59, %v14314_v6  ;;  %v4212_v25 = vrot.slane %v4210_v38, 7  ;;  %v4521_v18 = vrot.slane %v4210_v38, 4 }
 0x39e   : > { %v14326_v41 = vrot.slane %v4179_v49, 7  ;;  %v4182_v42 = vshll.u32 %v4056_v20, 16  ;;  %v4188_v60 = vshrl.u32 %v4057_v55, 16  ;;  %v4191_v15 = vshll.u32 %v4057_v55, 16  ;;  %v14341_v13 = vpop.permute.xlu1 %3404 }
 0x39f   : > { %19412 = vst [vmem:[#allocation76_spill] sm:$0xff] %v14324_v57  ;;  %4893 = vrot.lane.b32.xlu1 %v10612_v23, %s18989_s23  ;;  %v14331_v28 = vor.u32 %v4213_v56, %v4212_v25  ;;  %v4501_v5 = vrot.slane %v4179_v49, 4  ;;  %v10598_v31 = vcombine.low %v4056_v20, %v4057_v55  ;;  %v2851_v22 = vshrl.u32 %v2642_v26, 16  ;;  %v4058_v26 = vld [vmem:[#allocation2 + $0x74] sm:$0x1] }
 0x3a0   : > { %19413 = vst [vmem:[#allocation77_spill] sm:$0xff] %v14326_v41  ;;  %4819 = vrot.lane.b32.xlu0 %v10599_v63, %s12133_s17  ;;  %v14335_v59 = vor.u32 %v4182_v42, %v14326_v41  ;;  %v4190_v44 = vrot.slane %v4188_v60, 7  ;;  %v4502_v34 = vrot.slane %v4182_v42, 5  ;;  %v4507_v12 = vrot.slane %v4188_v60, 4  ;;  %v19416_v63 = vld [vmem:[#allocation11_spill] sm:$0xff]  ;;  %v19417_v60 = vld [vmem:[#allocation12_spill] sm:$0xff] }
 0x3a1   : > { %v10451_v38 = vrot.slane %v2851_v22, 11  ;;  %v2863_v4 = vrot.slane %v13626_v54, 4  ;;  %v2829_v57 = vshrl.u32 %v2638_v39, 16  ;;  %v2841_v23 = vrot.slane %v13646_v36, 4  ;;  %v19418_v36 = vld [vmem:[#allocation26_spill] sm:$0xff] }
 0x3a2   : > { %19414 = vst [vmem:[#allocation78_spill] sm:$0xff] %v14335_v59  ;;  %v14339_v25 = vor.u32 %v4191_v15, %v4190_v44  ;;  %v4517_v49 = vor.u32 %v4516_v16, %v4515_v50  ;;  %v4519_v20 = vrot.slane %v4213_v56, 5  ;;  %v4525_v55 = vshll.u32 %v4062_v1, 16  ;;  %v14353_v44 = vpop.permute.xlu0 %3406  ;;  %v4068_v41 = vld [vmem:[#allocation2 + $0xa8] sm:$0xf] }
 0x3a3   : > { %4817 = vrot.lane.b32.xlu1 %v10598_v31, %s12133_s17  ;;  %v2862_v42 = vsel %vm14069_vm0, %v10451_v38, %v19416_v63  ;;  %v2871_v54 = vsel %vm14069_vm0, %v2863_v4, %v19417_v60  ;;  %v10450_v39 = vrot.slane %v2829_v57, 11  ;;  %v2849_v50 = vsel %vm14069_vm0, %v2841_v23, %v19418_v36  ;;  %v19419_v31 = vld [vmem:[#allocation15_spill] sm:$0xff] }
 0x3a4   : > { %19415 = vst [vmem:[#allocation79_spill] sm:$0xff] %v14339_v25  ;;  %v10467_v56 = vcombine.low %v2862_v42, %v2871_v54  ;;  %v4518_v16 = vrot.slane %v4517_v49, 4  ;;  %v4522_v22 = vor.u32 %v4521_v18, %v4519_v20  ;;  %v4527_v1 = vrot.slane %v4525_v55, 5  ;;  %v4069_v54 = vld [vmem:[#allocation2 + $0xac] sm:$0xf] }
 0x3a5   : > { %v2840_v59 = vsel %vm14069_vm0, %v10450_v39, %v19419_v31  ;;  %v4503_v38 = vor.u32 %v4502_v34, %v4501_v5  ;;  %v4505_v63 = vrot.slane %v4191_v15, 5  ;;  %v4511_v25 = vshll.u32 %v4058_v26, 16  ;;  %v14368_v26 = vpop.permute.xlu1 %3484 }
 0x3a6   : > { %v3516_v57 = vsel %vm799_vm8, %v10467_v56, %v14194_v53  ;;  %v10466_v4 = vcombine.low %v2840_v59, %v2849_v50  ;;  %v4520_v23 = vsel %vm13341_vm13, %v4518_v16, %v4519_v20  ;;  %v4523_v49 = vrot.slane %v4522_v22, 4  ;;  %v4064_v59 = vld [vmem:[#allocation2 + $0x94] sm:$0xf]  ;;  %v4065_v56 = vld [vmem:[#allocation2 + $0x98] sm:$0xf]  ;;  %v14377_v16 = vpop.permute.xlu0 %3486 }
 0x3a7   : > { %v4504_v18 = vrot.slane %v4503_v38, 4  ;;  %v4508_v55 = vor.u32 %v4507_v12, %v4505_v63  ;;  %v4513_v42 = vrot.slane %v4511_v25, 5  ;;  %v3555_v60 = vsel %vm2565_vm1, %v3516_v57, %v14225_v58 }
 0x3a8   : > { %v3513_v15 = vsel %vm799_vm8, %v10466_v4, %v14203_v52  ;;  %v4528_v5 = vsel %vm13341_vm13, %v4523_v49, %v4527_v1  ;;  %v4245_v34 = vshrl.u32 %v4068_v41, 16  ;;  %v4248_v53 = vshll.u32 %v4068_v41, 16 }
 0x3a9   : > { %v10615_v20 = vcombine.low %v4520_v23, %v4528_v5  ;;  %v4506_v12 = vsel %vm13341_vm13, %v4504_v18, %v4505_v63  ;;  %v4509_v25 = vrot.slane %v4508_v55, 4  ;;  %v3553_v58 = vsel %vm2565_vm1, %v3513_v15, %v14234_v30  ;;  %v2650_v63 = vld [vmem:[#allocation2 + $0xe0] sm:$0xf]  ;;  %v2646_v5 = vld [vmem:[#allocation2 + $0xcc] sm:$0xf] }
 0x3aa   : > { %v14374_v39 = vrot.slane %v4245_v34, 7  ;;  %v4254_v36 = vshrl.u32 %v4069_v54, 16  ;;  %v4257_v52 = vshll.u32 %v4069_v54, 16  ;;  %v4543_v50 = vrot.slane %v4245_v34, 4  ;;  %11300 = vmatmul.mubr.msk.bf16.gmra.mrb[16].mxu0 %vm3619_vm2, %v3553_v58 }
 0x3ab   : > { %4899 = vrot.lane.b32.xlu0 %v10615_v20, %s18989_s23  ;;  %v4514_v22 = vsel %vm13341_vm13, %v4509_v25, %v4513_v42  ;;  %v4544_v1 = vrot.slane %v4248_v53, 5  ;;  %v10601_v31 = vcombine.low %v4068_v41, %v4069_v54  ;;  %v4223_v38 = vshrl.u32 %v4064_v59, 16  ;;  %11303 = vmatprep.mubr.msk.bf16.mxu0 %vm3619_vm2, %v3555_v60  ;;  %v4070_v60 = vld [vmem:[#allocation2 + $0xb0] sm:$0x1]  ;;  %v14391_v20 = vpop.permute.xlu1 %3408 }
 0x3ac   : > { %19420 = vst [vmem:[#allocation11_spill] sm:$0xff] %v14374_v39  ;;  %v10614_v30 = vcombine.low %v4506_v12, %v4514_v22  ;;  %v14384_v57 = vor.u32 %v4248_v53, %v14374_v39  ;;  %v4256_v4 = vrot.slane %v4254_v36, 7  ;;  %v4549_v23 = vrot.slane %v4254_v36, 4  ;;  %v19425_v22 = vld [vmem:[#allocation27_spill] sm:$0xff] }
 0x3ad   : > { %v14386_v49 = vrot.slane %v4223_v38, 7  ;;  %v4226_v18 = vshll.u32 %v4064_v59, 16  ;;  %v4232_v55 = vshrl.u32 %v4065_v56, 16  ;;  %v4235_v15 = vshll.u32 %v4065_v56, 16 }
 0x3ae   : > { %19421 = vst [vmem:[#allocation12_spill] sm:$0xff] %v14384_v57  ;;  %4897 = vrot.lane.b32.xlu1 %v10614_v30, %s18989_s23  ;;  %v14389_v42 = vor.u32 %v4257_v52, %v4256_v4  ;;  %v4529_v41 = vrot.slane %v4223_v38, 4  ;;  %v10600_v54 = vcombine.low %v4064_v59, %v4065_v56  ;;  %v2895_v34 = vshrl.u32 %v2650_v63, 16  ;;  %v19426_v4 = vld [vmem:[#allocation19_spill] sm:$0xff]  ;;  %v14399_v38 = vpop.permute.xlu0 %2405 }
 0x3af   : > { %19422 = vst [vmem:[#allocation26_spill] sm:$0xff] %v14386_v49  ;;  %4823 = vrot.lane.b32.xlu0 %v10601_v31, %s12133_s17  ;;  %v14395_v53 = vor.u32 %v4226_v18, %v14386_v49  ;;  %v4234_v12 = vrot.slane %v4232_v55, 7  ;;  %v4530_v25 = vrot.slane %v4226_v18, 5  ;;  %v4535_v58 = vrot.slane %v4232_v55, 4  ;;  %v4066_v31 = vld [vmem:[#allocation2 + $0x9c] sm:$0x1]  ;;  %v14416_v49 = vpop.permute.xlu1 %3488 }
 0x3b0   : > { %19423 = vst [vmem:[#allocation15_spill] sm:$0xff] %v14389_v42  ;;  %v10453_v36 = vrot.slane %v2895_v34, 11  ;;  %v2907_v57 = vrot.slane %v19425_v22, 4  ;;  %v2873_v30 = vshrl.u32 %v2646_v5, 16  ;;  %v2885_v42 = vrot.slane %v19426_v4, 4  ;;  %v19429_v55 = vld [vmem:[#allocation20_spill] sm:$0xff] }
 0x3b1   : > { %19424 = vst [vmem:[#allocation80_spill] sm:$0xff] %v14395_v53  ;;  %v14401_v59 = vor.u32 %v4235_v15, %v4234_v12  ;;  %v4545_v56 = vor.u32 %v4544_v1, %v4543_v50  ;;  %v4547_v63 = vrot.slane %v4257_v52, 5  ;;  %v4553_v39 = vshll.u32 %v4070_v60, 16  ;;  %v19428_v53 = vld [vmem:[#allocation16_spill] sm:$0xff]  ;;  %v19430_v60 = vld [vmem:[#allocation17_spill] sm:$0xff] }
 0x3b2   : > { %4821 = vrot.lane.b32.xlu1 %v10600_v54, %s12133_s17  ;;  %v2906_v18 = vsel %vm14069_vm0, %v10453_v36, %v19428_v53  ;;  %v2915_v5 = vsel %vm14069_vm0, %v2907_v57, %v19429_v55  ;;  %v10452_v34 = vrot.slane %v2873_v30, 11  ;;  %v2893_v12 = vsel %vm14069_vm0, %v2885_v42, %v13729_v43  ;;  %v4076_v36 = vld [vmem:[#allocation2 + $0xd0] sm:$0xf] }
 0x3b3   : > { %19427 = vst [vmem:[#allocation27_spill] sm:$0xff] %v14401_v59  ;;  %v10469_v22 = vcombine.low %v2906_v18, %v2915_v5  ;;  %v4546_v50 = vrot.slane %v4545_v56, 4  ;;  %v4550_v52 = vor.u32 %v4549_v23, %v4547_v63  ;;  %v4555_v1 = vrot.slane %v4553_v39, 5  ;;  %v4072_v5 = vld [vmem:[#allocation2 + $0xbc] sm:$0xf] }
 0x3b4   : > { %v2884_v54 = vsel %vm14069_vm0, %v10452_v34, %v19430_v60  ;;  %v4531_v4 = vor.u32 %v4530_v25, %v4529_v41  ;;  %v4533_v59 = vrot.slane %v4235_v15, 5  ;;  %v4539_v53 = vshll.u32 %v4066_v31, 16  ;;  %v4077_v41 = vld [vmem:[#allocation2 + $0xd4] sm:$0xf]  ;;  %v14424_v15 = vpop.permute.xlu0 %2485 }
 0x3b5   : > { %v3522_v57 = vsel %vm799_vm8, %v10469_v22, %v14252_v3  ;;  %v10468_v30 = vcombine.low %v2884_v54, %v2893_v12  ;;  %v4548_v43 = vsel %vm13341_vm13, %v4546_v50, %v4547_v63  ;;  %v4551_v42 = vrot.slane %v4550_v52, 4 }
 0x3b6   : > { %v4532_v23 = vrot.slane %v4531_v4, 4  ;;  %v4536_v39 = vor.u32 %v4535_v58, %v4533_v59  ;;  %v4541_v56 = vrot.slane %v4539_v53, 5  ;;  %v3559_v18 = vsel %vm2565_vm1, %v3522_v57, %v14279_v33  ;;  %v2658_v4 = vld [vmem:[#allocation2 + $0x108] sm:$0xf] }
 0x3b7   : > { %v3519_v25 = vsel %vm799_vm8, %v10468_v30, %v14254_v47  ;;  %v4556_v3 = vsel %vm13341_vm13, %v4551_v42, %v4555_v1  ;;  %v4289_v31 = vshrl.u32 %v4076_v36, 16  ;;  %v4292_v55 = vshll.u32 %v4076_v36, 16  ;;  %v4073_v47 = vld [vmem:[#allocation2 + $0xc0] sm:$0xf] }
 0x3b8   : > { %v10617_v63 = vcombine.low %v4548_v43, %v4556_v3  ;;  %v4534_v58 = vsel %vm13341_vm13, %v4532_v23, %v4533_v59  ;;  %v4537_v34 = vrot.slane %v4536_v39, 4  ;;  %v3557_v33 = vsel %vm2565_vm1, %v3519_v25, %v14275_v61  ;;  %v14441_v61 = vpop.permute.xlu1 %2407  ;;  %v14448_v3 = vpop.permute.xlu0 %2409 }
 0x3b9   : > { %v14434_v12 = vrot.slane %v4289_v31, 7  ;;  %v4298_v22 = vshrl.u32 %v4077_v41, 16  ;;  %v4301_v50 = vshll.u32 %v4077_v41, 16  ;;  %v4571_v52 = vrot.slane %v4289_v31, 4  ;;  %11304 = vmatmul.mubr.msk.bf16.gmra.mrb[20].mxu0 %vm3619_vm2, %v3557_v33 }
 0x3ba   : > { %4903 = vrot.lane.b32.xlu0 %v10617_v63, %s18989_s23  ;;  %v4542_v1 = vsel %vm13341_vm13, %v4537_v34, %v4541_v56  ;;  %v4572_v60 = vrot.slane %v4292_v55, 5  ;;  %v10603_v54 = vcombine.low %v4076_v36, %v4077_v41  ;;  %v4267_v59 = vshrl.u32 %v4072_v5, 16  ;;  %11307 = vmatprep.mubr.msk.bf16.mxu0 %vm3619_vm2, %v3559_v18  ;;  %v2654_v56 = vld [vmem:[#allocation2 + $0xf4] sm:$0xf]  ;;  %v4078_v63 = vld [vmem:[#allocation2 + $0xd8] sm:$0x1] }
 0x3bb   : > { %19431 = vst [vmem:[#allocation19_spill] sm:$0xff] %v14434_v12  ;;  %v10616_v53 = vcombine.low %v4534_v58, %v4542_v1  ;;  %v14444_v57 = vor.u32 %v4292_v55, %v14434_v12  ;;  %v4300_v30 = vrot.slane %v4298_v22, 7  ;;  %v4577_v43 = vrot.slane %v4298_v22, 4  ;;  %v19435_v1 = vld [vmem:[#allocation37_spill] sm:$0xff] }
 0x3bc   : > { %v14446_v42 = vrot.slane %v4267_v59, 7  ;;  %v4270_v23 = vshll.u32 %v4072_v5, 16  ;;  %v4276_v39 = vshrl.u32 %v4073_v47, 16  ;;  %v4279_v25 = vshll.u32 %v4073_v47, 16 }
 0x3bd   : > { %19432 = vst [vmem:[#allocation16_spill] sm:$0xff] %v14444_v57  ;;  %4901 = vrot.lane.b32.xlu1 %v10616_v53, %s18989_s23  ;;  %v14451_v36 = vor.u32 %v4301_v50, %v4300_v30  ;;  %v4557_v18 = vrot.slane %v4267_v59, 4  ;;  %v10602_v41 = vcombine.low %v4072_v5, %v4073_v47  ;;  %v2939_v31 = vshrl.u32 %v2658_v4, 16  ;;  %v4074_v4 = vld [vmem:[#allocation2 + $0xc4] sm:$0x1] }
 0x3be   : > { %4827 = vrot.lane.b32.xlu0 %v10603_v54, %s12133_s17  ;;  %v14455_v55 = vor.u32 %v4270_v23, %v14446_v42  ;;  %v4278_v58 = vrot.slane %v4276_v39, 7  ;;  %v4558_v34 = vrot.slane %v4270_v23, 5  ;;  %v4563_v33 = vrot.slane %v4276_v39, 4  ;;  %v19437_v54 = vld [vmem:[#allocation38_spill] sm:$0xff]  ;;  %v19438_v39 = vld [vmem:[#allocation39_spill] sm:$0xff] }
 0x3bf   : > { %19433 = vst [vmem:[#allocation20_spill] sm:$0xff] %v14451_v36  ;;  %v10455_v22 = vrot.slane %v2939_v31, 11  ;;  %v2951_v57 = vrot.slane %v19435_v1, 4  ;;  %v2917_v12 = vshrl.u32 %v2654_v56, 16  ;;  %v2929_v53 = vrot.slane %v13733_v10, 4  ;;  %v14461_v36 = vpop.permute.xlu1 %2487 }
 0x3c0   : > { %19434 = vst [vmem:[#allocation17_spill] sm:$0xff] %v14455_v55  ;;  %v14459_v30 = vor.u32 %v4279_v25, %v4278_v58  ;;  %v4573_v59 = vor.u32 %v4572_v60, %v4571_v52  ;;  %v4575_v5 = vrot.slane %v4301_v50, 5  ;;  %v4581_v47 = vshll.u32 %v4078_v63, 16  ;;  %v14473_v58 = vpop.permute.xlu0 %2489  ;;  %v4084_v55 = vld [vmem:[#allocation2 + $0xf8] sm:$0xf] }
 0x3c1   : > { %4825 = vrot.lane.b32.xlu1 %v10602_v41, %s12133_s17  ;;  %v2950_v23 = vsel %vm14069_vm0, %v10455_v22, %v19437_v54  ;;  %v2959_v56 = vsel %vm14069_vm0, %v2951_v57, %v19438_v39  ;;  %v10454_v31 = vrot.slane %v2917_v12, 11  ;;  %v2937_v10 = vsel %vm14069_vm0, %v2929_v53, %v13749_v7  ;;  %v4085_v39 = vld [vmem:[#allocation2 + $0xfc] sm:$0xf] }
 0x3c2   : > { %19436 = vst [vmem:[#allocation37_spill] sm:$0xff] %v14459_v30  ;;  %v10471_v50 = vcombine.low %v2950_v23, %v2959_v56  ;;  %v4574_v52 = vrot.slane %v4573_v59, 4  ;;  %v4578_v60 = vor.u32 %v4577_v43, %v4575_v5  ;;  %v4583_v63 = vrot.slane %v4581_v47, 5 }
 0x3c3   : > { %v2928_v41 = vsel %vm14069_vm0, %v10454_v31, %v13741_v9  ;;  %v4559_v22 = vor.u32 %v4558_v34, %v4557_v18  ;;  %v4561_v1 = vrot.slane %v4279_v25, 5  ;;  %v4567_v54 = vshll.u32 %v4074_v4, 16  ;;  %v4080_v34 = vld [vmem:[#allocation2 + $0xe4] sm:$0xf]  ;;  %v14488_v4 = vpop.permute.xlu1 %2411 }
 0x3c4   : > { %v3528_v12 = vsel %vm799_vm8, %v10471_v50, %v14304_v29  ;;  %v10470_v57 = vcombine.low %v2928_v41, %v2937_v10  ;;  %v4576_v7 = vsel %vm13341_vm13, %v4574_v52, %v4575_v5  ;;  %v4579_v53 = vrot.slane %v4578_v60, 4  ;;  %v4081_v52 = vld [vmem:[#allocation2 + $0xe8] sm:$0xf]  ;;  %v14497_v60 = vpop.permute.xlu0 %2413 }
 0x3c5   : > { %v4560_v43 = vrot.slane %v4559_v22, 4  ;;  %v4564_v59 = vor.u32 %v4563_v33, %v4561_v1  ;;  %v4569_v47 = vrot.slane %v4567_v54, 5  ;;  %v3563_v23 = vsel %vm2565_vm1, %v3528_v12, %v14328_v32  ;;  %v2666_v54 = vld [vmem:[#allocation2 + $0x130] sm:$0xf] }
 0x3c6   : > { %v3525_v9 = vsel %vm799_vm8, %v10470_v57, %v14296_v35  ;;  %v4584_v25 = vsel %vm13341_vm13, %v4579_v53, %v4583_v63  ;;  %v4333_v18 = vshrl.u32 %v4084_v55, 16  ;;  %v4336_v29 = vshll.u32 %v4084_v55, 16 }
 0x3c7   : > { %v10619_v5 = vcombine.low %v4576_v7, %v4584_v25  ;;  %v4562_v33 = vsel %vm13341_vm13, %v4560_v43, %v4561_v1  ;;  %v4565_v56 = vrot.slane %v4564_v59, 4  ;;  %v3561_v32 = vsel %vm2565_vm1, %v3525_v9, %v14321_v21  ;;  %v2662_v25 = vld [vmem:[#allocation2 + $0x11c] sm:$0xf] }
 0x3c8   : > { %v14494_v31 = vrot.slane %v4333_v18, 7  ;;  %v4342_v10 = vshrl.u32 %v4085_v39, 16  ;;  %v4345_v35 = vshll.u32 %v4085_v39, 16  ;;  %v4599_v50 = vrot.slane %v4333_v18, 4  ;;  %11308 = vmatmul.mubr.msk.bf16.gmra.mrb[24].mxu0 %vm3619_vm2, %v3561_v32 }
 0x3c9   : > { %4907 = vrot.lane.b32.xlu0 %v10619_v5, %s18989_s23  ;;  %v4570_v63 = vsel %vm13341_vm13, %v4565_v56, %v4569_v47  ;;  %v4600_v41 = vrot.slane %v4336_v29, 5  ;;  %v10605_v22 = vcombine.low %v4084_v55, %v4085_v39  ;;  %v4311_v1 = vshrl.u32 %v4080_v34, 16  ;;  %11311 = vmatprep.mubr.msk.bf16.mxu0 %vm3619_vm2, %v3563_v23  ;;  %v4086_v23 = vld [vmem:[#allocation2 + $0x100] sm:$0x1]  ;;  %v14511_v5 = vpop.permute.xlu1 %2491 }
 0x3ca   : > { %19439 = vst [vmem:[#allocation38_spill] sm:$0xff] %v14494_v31  ;;  %v10618_v21 = vcombine.low %v4562_v33, %v4570_v63  ;;  %v14504_v12 = vor.u32 %v4336_v29, %v14494_v31  ;;  %v4344_v57 = vrot.slane %v4342_v10, 7  ;;  %v4605_v7 = vrot.slane %v4342_v10, 4  ;;  %v19444_v63 = vld [vmem:[#allocation40_spill] sm:$0xff] }
 0x3cb   : > { %v14506_v53 = vrot.slane %v4311_v1, 7  ;;  %v4314_v43 = vshll.u32 %v4080_v34, 16  ;;  %v4320_v59 = vshrl.u32 %v4081_v52, 16  ;;  %v4323_v9 = vshll.u32 %v4081_v52, 16 }
 0x3cc   : > { %19440 = vst [vmem:[#allocation39_spill] sm:$0xff] %v14504_v12  ;;  %4905 = vrot.lane.b32.xlu1 %v10618_v21, %s18989_s23  ;;  %v14509_v47 = vor.u32 %v4345_v35, %v4344_v57  ;;  %v4585_v55 = vrot.slane %v4311_v1, 4  ;;  %v10604_v39 = vcombine.low %v4080_v34, %v4081_v52  ;;  %v2983_v18 = vshrl.u32 %v2666_v54, 16  ;;  %v19445_v57 = vld [vmem:[#allocation10_spill] sm:$0xff]  ;;  %v14519_v1 = vpop.permute.xlu0 %2493 }
 0x3cd   : > { %19441 = vst [vmem:[#allocation81_spill] sm:$0xff] %v14506_v53  ;;  %4831 = vrot.lane.b32.xlu0 %v10605_v22, %s12133_s17  ;;  %v14515_v29 = vor.u32 %v4314_v43, %v14506_v53  ;;  %v4322_v33 = vrot.slane %v4320_v59, 7  ;;  %v4586_v56 = vrot.slane %v4314_v43, 5  ;;  %v4591_v32 = vrot.slane %v4320_v59, 4  ;;  %v4082_v22 = vld [vmem:[#allocation2 + $0xec] sm:$0x1]  ;;  %v14536_v30 = vpop.permute.xlu1 %2415 }
 0x3ce   : > { %19442 = vst [vmem:[#allocation82_spill] sm:$0xff] %v14509_v47  ;;  %v10457_v10 = vrot.slane %v2983_v18, 11  ;;  %v2995_v12 = vrot.slane %v19444_v63, 4  ;;  %v2961_v21 = vshrl.u32 %v2662_v25, 16  ;;  %v2973_v47 = vrot.slane %v19445_v57, 4  ;;  %v19448_v59 = vld [vmem:[#allocation42_spill] sm:$0xff] }
 0x3cf   : > { %19443 = vst [vmem:[#allocation83_spill] sm:$0xff] %v14515_v29  ;;  %v14521_v34 = vor.u32 %v4323_v9, %v4322_v33  ;;  %v4601_v52 = vor.u32 %v4600_v41, %v4599_v50  ;;  %v4603_v54 = vrot.slane %v4345_v35, 5  ;;  %v4609_v31 = vshll.u32 %v4086_v23, 16  ;;  %v19447_v29 = vld [vmem:[#allocation41_spill] sm:$0xff]  ;;  %v19450_v23 = vld [vmem:[#allocation24_spill] sm:$0xff] }
 0x3d0   : > { %4829 = vrot.lane.b32.xlu1 %v10604_v39, %s12133_s17  ;;  %v2994_v43 = vsel %vm14069_vm0, %v10457_v10, %v19447_v29  ;;  %v3003_v25 = vsel %vm14069_vm0, %v2995_v12, %v19448_v59  ;;  %v10456_v18 = vrot.slane %v2961_v21, 11  ;;  %v19449_v63 = vld [vmem:[#allocation25_spill] sm:$0xff]  ;;  %v4589_v53 = vrot.slane %v4323_v9, 5  ;;  %v4092_v10 = vld [vmem:[#allocation2 + $0x120] sm:$0xf]  ;;  %v14544_v9 = vpop.permute.xlu0 %2417 }
 0x3d1   : > { %19446 = vst [vmem:[#allocation40_spill] sm:$0xff] %v14521_v34  ;;  %v2981_v33 = vsel %vm14069_vm0, %v2973_v47, %v19449_v63  ;;  %v10473_v57 = vcombine.low %v2994_v43, %v3003_v25  ;;  %v4602_v50 = vrot.slane %v4601_v52, 4  ;;  %v4606_v35 = vor.u32 %v4605_v7, %v4603_v54 }
 0x3d2   : > { %v4611_v41 = vrot.slane %v4609_v31, 5  ;;  %v2972_v39 = vsel %vm14069_vm0, %v10456_v18, %v19450_v23  ;;  %v4587_v34 = vor.u32 %v4586_v56, %v4585_v55  ;;  %v4595_v29 = vshll.u32 %v4082_v22, 16  ;;  %v4093_v55 = vld [vmem:[#allocation2 + $0x124] sm:$0xf]  ;;  %v4088_v18 = vld [vmem:[#allocation2 + $0x10c] sm:$0xf] }
 0x3d3   : > { %v3534_v12 = vsel %vm799_vm8, %v10473_v57, %v14353_v44  ;;  %v10472_v21 = vcombine.low %v2972_v39, %v2981_v33  ;;  %v4604_v47 = vsel %vm13341_vm13, %v4602_v50, %v4603_v54  ;;  %v4607_v52 = vrot.slane %v4606_v35, 4  ;;  %v1631_v39 = vld [vmem:[#allocation2 + $0x4] sm:$0xf] }
 0x3d4   : > { %v4588_v7 = vrot.slane %v4587_v34, 4  ;;  %v4592_v31 = vor.u32 %v4591_v32, %v4589_v53  ;;  %v4597_v43 = vrot.slane %v4595_v29, 5  ;;  %v3567_v59 = vsel %vm2565_vm1, %v3534_v12, %v14377_v16 }
 0x3d5   : > { %v3531_v56 = vsel %vm799_vm8, %v10472_v21, %v14341_v13  ;;  %v4612_v44 = vsel %vm13341_vm13, %v4607_v52, %v4611_v41  ;;  %v4377_v22 = vshrl.u32 %v4092_v10, 16  ;;  %v4380_v25 = vshll.u32 %v4092_v10, 16  ;;  %v4089_v13 = vld [vmem:[#allocation2 + $0x110] sm:$0xf] }
 0x3d6   : > { %v10621_v54 = vcombine.low %v4604_v47, %v4612_v44  ;;  %v4590_v32 = vsel %vm13341_vm13, %v4588_v7, %v4589_v53  ;;  %v4593_v34 = vrot.slane %v4592_v31, 4  ;;  %v3565_v16 = vsel %vm2565_vm1, %v3531_v56, %v14368_v26  ;;  %v14561_v26 = vpop.permute.xlu1 %2495  ;;  %v14568_v44 = vpop.permute.xlu0 %2497 }
 0x3d7   : > { %v14554_v63 = vrot.slane %v4377_v22, 7  ;;  %v4386_v33 = vshrl.u32 %v4093_v55, 16  ;;  %v4389_v57 = vshll.u32 %v4093_v55, 16  ;;  %v4627_v50 = vrot.slane %v4377_v22, 4  ;;  %11312 = vmatmul.mubr.msk.bf16.gmra.mrb[28].mxu0 %vm3619_vm2, %v3565_v16 }
 0x3d8   : > { %4911 = vrot.lane.b32.xlu0 %v10621_v54, %s18989_s23  ;;  %v4598_v35 = vsel %vm13341_vm13, %v4593_v34, %v4597_v43  ;;  %v4628_v41 = vrot.slane %v4380_v25, 5  ;;  %v10607_v23 = vcombine.low %v4092_v10, %v4093_v55  ;;  %v4355_v53 = vshrl.u32 %v4088_v18, 16  ;;  %11315 = vmatprep.mubr.msk.bf16.mxu0 %vm3619_vm2, %v3567_v59  ;;  %v2670_v43 = vld [vmem:[#allocation2 + $0x144] sm:$0xf]  ;;  %v4094_v54 = vld [vmem:[#allocation2 + $0x128] sm:$0x1] }
 0x3d9   : > { %v10620_v29 = vcombine.low %v4590_v32, %v4598_v35  ;;  %v14564_v12 = vor.u32 %v4380_v25, %v14554_v63  ;;  %v4388_v21 = vrot.slane %v4386_v33, 7  ;;  %v4633_v47 = vrot.slane %v4386_v33, 4 }
 0x3da   : > { %v14566_v52 = vrot.slane %v4355_v53, 7  ;;  %v4358_v7 = vshll.u32 %v4088_v18, 16  ;;  %v4364_v31 = vshrl.u32 %v4089_v13, 16  ;;  %v4367_v56 = vshll.u32 %v4089_v13, 16 }
 0x3db   : > { %19451 = vst [vmem:[#allocation10_spill] sm:$0xff] %v14564_v12  ;;  %4909 = vrot.lane.b32.xlu1 %v10620_v29, %s18989_s23  ;;  %v14571_v10 = vor.u32 %v4389_v57, %v4388_v21  ;;  %v4613_v59 = vrot.slane %v4355_v53, 4  ;;  %v10606_v55 = vcombine.low %v4088_v18, %v4089_v13  ;;  %v1699_v22 = vshrl.u32 %v1631_v39, 16  ;;  %v4090_v39 = vld [vmem:[#allocation2 + $0x114] sm:$0x1] }
 0x3dc   : > { %4835 = vrot.lane.b32.xlu0 %v10607_v23, %s12133_s17  ;;  %v14575_v25 = vor.u32 %v4358_v7, %v14566_v52  ;;  %v4366_v32 = vrot.slane %v4364_v31, 7  ;;  %v4614_v34 = vrot.slane %v4358_v7, 5  ;;  %v4619_v16 = vrot.slane %v4364_v31, 4 }
 0x3dd   : > { %19452 = vst [vmem:[#allocation41_spill] sm:$0xff] %v14571_v10  ;;  %v10379_v33 = vrot.slane %v1699_v22, 11  ;;  %v1711_v35 = vrot.slane %v13696_v24, 4  ;;  %v3005_v12 = vshrl.u32 %v2670_v43, 16  ;;  %v3017_v29 = vrot.slane %v13793_v2, 4  ;;  %v14581_v10 = vpop.permute.xlu1 %2419  ;;  %v14593_v43 = vpop.permute.xlu0 %2421 }
 0x3de   : > { %19453 = vst [vmem:[#allocation42_spill] sm:$0xff] %v14575_v25  ;;  %v14579_v21 = vor.u32 %v4367_v56, %v4366_v32  ;;  %v4629_v53 = vor.u32 %v4628_v41, %v4627_v50  ;;  %v4631_v18 = vrot.slane %v4389_v57, 5  ;;  %v4637_v13 = vshll.u32 %v4094_v54, 16  ;;  %v4100_v32 = vld [vmem:[#allocation2 + $0x148] sm:$0xf] }
 0x3df   : > { %4833 = vrot.lane.b32.xlu1 %v10606_v55, %s12133_s17  ;;  %v1710_v23 = vsel %vm14069_vm0, %v10379_v33, %v13763_v45  ;;  %v1719_v24 = vsel %vm14069_vm0, %v1711_v35, %v13768_v48  ;;  %v10458_v7 = vrot.slane %v3005_v12, 11  ;;  %v3025_v2 = vsel %vm14069_vm0, %v3017_v29, %v13811_v40 }
 0x3e0   : > { %v10395_v57 = vcombine.low %v1710_v23, %v1719_v24  ;;  %v4630_v50 = vrot.slane %v4629_v53, 4  ;;  %v4634_v41 = vor.u32 %v4633_v47, %v4631_v18  ;;  %v4639_v31 = vrot.slane %v4637_v13, 5  ;;  %v4101_v13 = vld [vmem:[#allocation2 + $0x14c] sm:$0xf] }
 0x3e1   : > { %v3016_v55 = vsel %vm14069_vm0, %v10458_v7, %v13809_v51  ;;  %v4615_v45 = vor.u32 %v4614_v34, %v4613_v59  ;;  %v4617_v22 = vrot.slane %v4367_v56, 5  ;;  %v4623_v54 = vshll.u32 %v4090_v39, 16  ;;  %v4096_v34 = vld [vmem:[#allocation2 + $0x134] sm:$0xf]  ;;  %v14608_v39 = vpop.permute.xlu1 %2499 }
 0x3e2   : > { %v2519_v48 = vsel %vm799_vm8, %v10395_v57, %v14399_v38  ;;  %v10474_v12 = vcombine.low %v3016_v55, %v3025_v2  ;;  %v4632_v40 = vsel %vm13341_vm13, %v4630_v50, %v4631_v18  ;;  %v4635_v33 = vrot.slane %v4634_v41, 4  ;;  %v4097_v57 = vld [vmem:[#allocation2 + $0x138] sm:$0xf]  ;;  %v14617_v50 = vpop.permute.xlu0 %2501 }
 0x3e3   : > { %v4616_v47 = vrot.slane %v4615_v45, 4  ;;  %v4620_v35 = vor.u32 %v4619_v16, %v4617_v22  ;;  %v4625_v29 = vrot.slane %v4623_v54, 5  ;;  %v2567_v53 = vsel %vm2565_vm1, %v2519_v48, %v14424_v15 }
 0x3e4   : > { %v3537_v51 = vsel %vm799_vm8, %v10474_v12, %v14391_v20  ;;  %v4640_v56 = vsel %vm13341_vm13, %v4635_v33, %v4639_v31  ;;  %v4421_v59 = vshrl.u32 %v4100_v32, 16  ;;  %v4424_v38 = vshll.u32 %v4100_v32, 16 }
 0x3e5   : > { %v10623_v18 = vcombine.low %v4632_v40, %v4640_v56  ;;  %v4618_v16 = vsel %vm13341_vm13, %v4616_v47, %v4617_v22  ;;  %v4621_v23 = vrot.slane %v4620_v35, 4  ;;  %v3569_v15 = vsel %vm2565_vm1, %v3537_v51, %v14416_v49  ;;  %v1639_v22 = vld [vmem:[#allocation2 + $0x2c] sm:$0xf]  ;;  %v1635_v51 = vld [vmem:[#allocation2 + $0x18] sm:$0xf] }
 0x3e6   : > { %v14614_v24 = vrot.slane %v4421_v59, 7  ;;  %v4430_v7 = vshrl.u32 %v4101_v13, 16  ;;  %v4433_v20 = vshll.u32 %v4101_v13, 16  ;;  %v4655_v2 = vrot.slane %v4421_v59, 4  ;;  %11316 = vmatmul.mubr.msk.bf16.gmra.mrb[32].mxu0 %vm3619_vm2, %v3569_v15  ;;  %v14631_v59 = vpop.permute.xlu1 %2423 }
 0x3e7   : > { %4915 = vrot.lane.b32.xlu0 %v10623_v18, %s18989_s23  ;;  %v4626_v41 = vsel %vm13341_vm13, %v4621_v23, %v4625_v29  ;;  %v4656_v31 = vrot.slane %v4424_v38, 5  ;;  %v10609_v55 = vcombine.low %v4100_v32, %v4101_v13  ;;  %v4399_v45 = vshrl.u32 %v4096_v34, 16  ;;  %11331 = vmatprep.mubr.msk.bf16.mxu0 %vm3619_vm2, %v2567_v53  ;;  %v4102_v53 = vld [vmem:[#allocation2 + $0x150] sm:$0x1] }
 0x3e8   : > { %v10622_v49 = vcombine.low %v4618_v16, %v4626_v41  ;;  %v14624_v54 = vor.u32 %v4424_v38, %v14614_v24  ;;  %v4432_v48 = vrot.slane %v4430_v7, 7  ;;  %v4661_v12 = vrot.slane %v4430_v7, 4  ;;  %v19458_v7 = vld [vmem:[#allocation18_spill] sm:$0xff] }
 0x3e9   : > { %v14626_v40 = vrot.slane %v4399_v45, 7  ;;  %v4402_v33 = vshll.u32 %v4096_v34, 16  ;;  %v4408_v47 = vshrl.u32 %v4097_v57, 16  ;;  %v4411_v35 = vshll.u32 %v4097_v57, 16 }
 0x3ea   : > { %19454 = vst [vmem:[#allocation25_spill] sm:$0xff] %v14624_v54  ;;  %4913 = vrot.lane.b32.xlu1 %v10622_v49, %s18989_s23  ;;  %v14629_v29 = vor.u32 %v4433_v20, %v4432_v48  ;;  %v4641_v32 = vrot.slane %v4399_v45, 4  ;;  %v10608_v13 = vcombine.low %v4096_v34, %v4097_v57  ;;  %v1743_v56 = vshrl.u32 %v1639_v22, 16  ;;  %v19459_v48 = vld [vmem:[#allocation14_spill] sm:$0xff]  ;;  %v14639_v45 = vpop.permute.xlu0 %2425  ;;  %v14658_v25 = vpop.permute.xlu1 %2503 }
 0x3eb   : > { %19455 = vst [vmem:[#allocation24_spill] sm:$0xff] %v14626_v40  ;;  %4839 = vrot.lane.b32.xlu0 %v10609_v55, %s12133_s17  ;;  %v14635_v38 = vor.u32 %v4402_v33, %v14626_v40  ;;  %v4410_v18 = vrot.slane %v4408_v47, 7  ;;  %v4642_v16 = vrot.slane %v4402_v33, 5  ;;  %v4647_v23 = vrot.slane %v4408_v47, 4  ;;  %v4098_v55 = vld [vmem:[#allocation2 + $0x13c] sm:$0x1] }
 0x3ec   : > { %19456 = vst [vmem:[#allocation84_spill] sm:$0xff] %v14629_v29  ;;  %v10381_v15 = vrot.slane %v1743_v56, 11  ;;  %v1755_v41 = vrot.slane %v19458_v7, 4  ;;  %v1721_v49 = vshrl.u32 %v1635_v51, 16  ;;  %v1733_v29 = vrot.slane %v19459_v48, 4  ;;  %v19462_v47 = vld [vmem:[#allocation13_spill] sm:$0xff] }
 0x3ed   : > { %19457 = vst [vmem:[#allocation85_spill] sm:$0xff] %v14635_v38  ;;  %v14641_v34 = vor.u32 %v4411_v35, %v4410_v18  ;;  %v4657_v57 = vor.u32 %v4656_v31, %v4655_v2  ;;  %v4659_v22 = vrot.slane %v4433_v20, 5  ;;  %v4665_v54 = vshll.u32 %v4102_v53, 16  ;;  %v19461_v38 = vld [vmem:[#allocation21_spill] sm:$0xff]  ;;  %v19464_v53 = vld [vmem:[#allocation22_spill] sm:$0xff] }
 0x3ee   : > { %4837 = vrot.lane.b32.xlu1 %v10608_v13, %s12133_s17  ;;  %v1754_v33 = vsel %vm14069_vm0, %v10381_v15, %v19461_v38  ;;  %v1763_v51 = vsel %vm14069_vm0, %v1755_v41, %v19462_v47  ;;  %v10380_v56 = vrot.slane %v1721_v49, 11  ;;  %v19463_v7 = vld [vmem:[#allocation29_spill] sm:$0xff]  ;;  %v4645_v40 = vrot.slane %v4411_v35, 5  ;;  %v14656_v15 = vld [vmem:[#allocation2 + $0x15c] sm:$0xf] }
 0x3ef   : > { %19460 = vst [vmem:[#allocation18_spill] sm:$0xff] %v14641_v34  ;;  %v1741_v18 = vsel %vm14069_vm0, %v1733_v29, %v19463_v7  ;;  %v10397_v48 = vcombine.low %v1754_v33, %v1763_v51  ;;  %v4658_v2 = vrot.slane %v4657_v57, 4  ;;  %v4662_v20 = vor.u32 %v4661_v12, %v4659_v22  ;;  %v14666_v35 = vld [vmem:[#allocation2 + $0x160] sm:$0xf] }
 0x3f0   : > { %v4667_v31 = vrot.slane %v4665_v54, 5  ;;  %v1732_v13 = vsel %vm14069_vm0, %v10380_v56, %v19464_v53  ;;  %v4643_v34 = vor.u32 %v4642_v16, %v4641_v32  ;;  %v4651_v38 = vshll.u32 %v4098_v55, 16  ;;  %v14668_v16 = vpop.permute.xlu0 %2505 }
 0x3f1   : > { %v2525_v41 = vsel %vm799_vm8, %v10397_v48, %v14448_v3  ;;  %v10396_v49 = vcombine.low %v1732_v13, %v1741_v18  ;;  %v4660_v29 = vsel %vm13341_vm13, %v4658_v2, %v4659_v22  ;;  %v4663_v12 = vrot.slane %v4662_v20, 4  ;;  %v1643_v20 = vld [vmem:[#allocation2 + $0x40] sm:$0xf] }
 0x3f2   : > { %v4644_v54 = vrot.slane %v4643_v34, 4  ;;  %v4648_v57 = vor.u32 %v4647_v23, %v4645_v40  ;;  %v4653_v33 = vrot.slane %v4651_v38, 5  ;;  %v2571_v32 = vsel %vm2565_vm1, %v2525_v41, %v14473_v58  ;;  %v1647_v34 = vld [vmem:[#allocation2 + $0x54] sm:$0xf]  ;;  %v11680_v23 = vld [vmem:[%s18897_s5 + $0x68] sm:$0xff]   ;;  %v14696_v41 = vpop.permute.xlu1 %2427 }
 0x3f3   : > { %v2522_v55 = vsel %vm799_vm8, %v10396_v49, %v14441_v61  ;;  %v4668_v3 = vsel %vm13341_vm13, %v4663_v12, %v4667_v31  ;;  %v4443_v47 = vshrl.u32 %v14656_v15, 16  ;;  %v4446_v22 = vshll.u32 %v14656_v15, 16  ;;  %v4106_v38 = vld [vmem:[#allocation2 + $0x164] sm:$0x1] }
 0x3f4   : > { %v10625_v58 = vcombine.low %v4660_v29, %v4668_v3  ;;  %v4646_v51 = vsel %vm13341_vm13, %v4644_v54, %v4645_v40  ;;  %v4649_v56 = vrot.slane %v4648_v57, 4  ;;  %v2569_v61 = vsel %vm2565_vm1, %v2522_v55, %v14461_v36  ;;  %v12031_v36 = vld [vmem:[%s18897_s5 + $0x60] sm:$0xff]   ;;  %v19466_v3 = vld [vmem:[#allocation45_spill] sm:$0xff] }
 0x3f5   : > { %v14683_v7 = vrot.slane %v4443_v47, 7  ;;  %v4452_v18 = vshrl.u32 %v14666_v35, 16  ;;  %v4455_v48 = vshll.u32 %v14666_v35, 16  ;;  %v4669_v2 = vrot.slane %v4443_v47, 4  ;;  %11332 = vmatmul.mubr.msk.bf16.vlgmr.msra.gmra.mrb[4].mxu0 %vm3619_vm2, %v2569_v61  ;;  %v1651_v61 = vld [vmem:[#allocation2 + $0x68] sm:$0xf] }
 0x3f6   : > { %4919 = vrot.lane.b32.xlu0 %v10625_v58, %s18989_s23  ;;  %v4654_v31 = vsel %vm13341_vm13, %v4649_v56, %v4653_v33  ;;  %v4670_v40 = vrot.slane %v4446_v22, 5  ;;  %v10610_v53 = vcombine.low %v14656_v15, %v14666_v35  ;;  %11364 = vmatpush3.bf16.msra.mxu0 %v12031_v36  ;;  %v1787_v13 = vshrl.u32 %v1647_v34, 16  ;;  %v11681_v15 = vld [vmem:[%s18897_s5 + $0x70] sm:$0xff]   ;;  %v19465_v33 = vld [vmem:[#allocation28_spill] sm:$0xff]  ;;  %v14707_v34 = vpop.permute.xlu0 %2429  ;;  %v1655_v56 = vld [vmem:[#allocation2 + $0x7c] sm:$0xf] }
 0x3f7   : > { %v10624_v49 = vcombine.low %v4646_v51, %v4654_v31  ;;  %v14699_v29 = vor.u32 %v4446_v22, %v14683_v7  ;;  %v4454_v12 = vrot.slane %v4452_v18, 7  ;;  %v4675_v54 = vrot.slane %v4452_v18, 4  ;;  %11335 = vmatprep.mubr.msk.bf16.mxu0 %vm3619_vm2, %v2571_v32  ;;  %11365 = vmatprep.subr.bf16.mxu0 %v11680_v23  ;;  %v19468_v18 = vld [vmem:[#allocation43_spill] sm:$0xff]  ;;  %v19469_v36 = vld [vmem:[#allocation44_spill] sm:$0xff] }
 0x3f8   : > { %v10383_v57 = vrot.slane %v1787_v13, 11  ;;  %v1799_v35 = vrot.slane %v19465_v33, 4  ;;  %v1765_v55 = vshrl.u32 %v1643_v20, 16  ;;  %v1777_v47 = vrot.slane %v19466_v3, 4  ;;  %v19470_v33 = vld [vmem:[#allocation47_spill] sm:$0xff] }
 0x3f9   : > { %4917 = vrot.lane.b32.xlu1 %v10624_v49, %s18989_s23  ;;  %v14710_v22 = vor.u32 %v4455_v48, %v4454_v12  ;;  %v4671_v58 = vor.u32 %v4670_v40, %v4669_v2  ;;  %v4673_v51 = vrot.slane %v4455_v48, 5  ;;  %v4679_v32 = vshll.u32 %v4106_v38, 16  ;;  %v11682_v38 = vld [vmem:[%s18897_s5 + $0x78] sm:$0xff]  }
 0x3fa   : > { %v1798_v31 = vsel %vm14069_vm0, %v10383_v57, %v19468_v18  ;;  %v1807_v20 = vsel %vm14069_vm0, %v1799_v35, %v19469_v36  ;;  %v10382_v13 = vrot.slane %v1765_v55, 11  ;;  %v1785_v49 = vsel %vm14069_vm0, %v1777_v47, %v19470_v33  ;;  %11366 = vmatpush3.bf16.msra.mxu0 %v11680_v23  ;;  %v19471_v57 = vld [vmem:[#allocation46_spill] sm:$0xff]  ;;  %v19472_v55 = vld [vmem:[#allocation48_spill] sm:$0xff]  ;;  %v14728_v47 = vpop.permute.xlu1 %2507  ;;  %v14740_v33 = vpop.permute.xlu0 %2509 }
 0x3fb   : > { %19467 = vst [vmem:[#allocation14_spill] sm:$0xff] %v14710_v22  ;;  %v10399_v12 = vcombine.low %v1798_v31, %v1807_v20  ;;  %v4672_v2 = vrot.slane %v4671_v58, 4  ;;  %v4676_v48 = vor.u32 %v4675_v54, %v4673_v51  ;;  %v4681_v40 = vrot.slane %v4679_v32, 5  ;;  %11367 = vmatprep.subr.bf16.mxu0 %v11681_v15  ;;  %v1663_v22 = vld [vmem:[#allocation2 + $0xa4] sm:$0xf]  ;;  %v19473_v20 = vld [vmem:[#allocation50_spill] sm:$0xff] }
 0x3fc   : > { %v1776_v3 = vsel %vm14069_vm0, %v10382_v13, %v19471_v57  ;;  %v1831_v35 = vshrl.u32 %v1655_v56, 16  ;;  %v1843_v18 = vrot.slane %v19472_v55, 4  ;;  %v1809_v36 = vshrl.u32 %v1651_v61, 16  ;;  %v19477_v55 = vld [vmem:[#allocation53_spill] sm:$0xff] }
 0x3fd   : > { %4841 = vrot.lane.b32.xlu1 %v10610_v53, %s12133_s17  ;;  %v2531_v23 = vsel %vm799_vm8, %v10399_v12, %v14497_v60  ;;  %v10398_v54 = vcombine.low %v1776_v3, %v1785_v49  ;;  %v4674_v58 = vsel %vm13341_vm13, %v4672_v2, %v4673_v51  ;;  %v4677_v32 = vrot.slane %v4676_v48, 4  ;;  %v19474_v51 = vld [vmem:[#allocation51_spill] sm:$0xff]  ;;  %v1659_v2 = vld [vmem:[#allocation2 + $0x90] sm:$0xf]  ;;  %v19475_v3 = vld [vmem:[#allocation49_spill] sm:$0xff] }
 0x3fe   : > { %v2575_v31 = vsel %vm2565_vm1, %v2531_v23, %v14519_v1  ;;  %v10385_v56 = vrot.slane %v1831_v35, 11  ;;  %v1851_v61 = vsel %vm14069_vm0, %v1843_v18, %v19473_v20  ;;  %v10384_v13 = vrot.slane %v1809_v36, 11  ;;  %11368 = vmatpush3.bf16.msra.mxu0 %v11681_v15  ;;  %v1671_v1 = vld [vmem:[#allocation2 + $0xcc] sm:$0xf]  ;;  %v19476_v35 = vld [vmem:[#allocation52_spill] sm:$0xff]  ;;  %v19478_v36 = vld [vmem:[#allocation54_spill] sm:$0xff] }
 0x3ff   : > { %v2528_v60 = vsel %vm799_vm8, %v10398_v54, %v14488_v4  ;;  %v4682_v53 = vsel %vm13341_vm13, %v4677_v32, %v4681_v40  ;;  %v1821_v49 = vrot.slane %v19474_v51, 4  ;;  %v1875_v12 = vshrl.u32 %v1663_v22, 16  ;;  %11369 = vmatprep.subr.bf16.mxu0 %v11682_v38  ;;  %v11683_v40 = vld [vmem:[%s18897_s5 + $0x80] sm:$0xff]   ;;  %v19479_v32 = vld [vmem:[#allocation57_spill] sm:$0xff] }
 0x400   : > { %v10626_v48 = vcombine.low %v4674_v58, %v4682_v53  ;;  %v2573_v57 = vsel %vm2565_vm1, %v2528_v60, %v14511_v5  ;;  %v1842_v15 = vsel %vm14069_vm0, %v10385_v56, %v19475_v3  ;;  %v1820_v4 = vsel %vm14069_vm0, %v10384_v13, %v19476_v35  ;;  %v14766_v13 = vpop.permute.xlu1 %2431  ;;  %v19480_v60 = vld [vmem:[#allocation55_spill] sm:$0xff]  ;;  %v19481_v53 = vld [vmem:[#allocation56_spill] sm:$0xff]  ;;  %v14775_v3 = vpop.permute.xlu0 %2433 }
 0x401   : > { %11336 = vmatmul.mubr.msk.bf16.gmra.mrb[8].mxu0 %vm3619_vm2, %v2573_v57  ;;  %v10401_v22 = vcombine.low %v1842_v15, %v1851_v61  ;;  %v1829_v18 = vsel %vm14069_vm0, %v1821_v49, %v19477_v55  ;;  %v10387_v5 = vrot.slane %v1875_v12, 11  ;;  %v1887_v23 = vrot.slane %v19478_v36, 4  ;;  %v19482_v49 = vld [vmem:[#allocation60_spill] sm:$0xff]  ;;  %v19483_v35 = vld [vmem:[#allocation59_spill] sm:$0xff]  ;;  %v19485_v36 = vld [vmem:[#allocation58_spill] sm:$0xff] }
 0x402   : > { %4921 = vrot.lane.b32.xlu1 %v10626_v48, %s18989_s23  ;;  %11339 = vmatprep.mubr.msk.bf16.mxu0 %vm3619_vm2, %v2575_v31  ;;  %v10400_v54 = vcombine.low %v1820_v4, %v1829_v18  ;;  %v1853_v58 = vshrl.u32 %v1659_v2, 16  ;;  %v1865_v56 = vrot.slane %v19479_v32, 4  ;;  %v1919_v20 = vshrl.u32 %v1671_v1, 16  ;;  %v1667_v48 = vld [vmem:[#allocation2 + $0xb8] sm:$0xf]  ;;  %v11684_v1 = vld [vmem:[%s18897_s5 + $0x88] sm:$0xff]   ;;  %s18838_s23 = scalar_lea.hbm %s18907_s15, %s11144_s30 }
 0x403   : > { %v1886_v61 = vsel %vm14069_vm0, %v10387_v5, %v19480_v60  ;;  %v1895_v51 = vsel %vm14069_vm0, %v1887_v23, %v19481_v53  ;;  %v1931_v12 = vrot.slane %v19482_v49, 4  ;;  %11370 = vmatpush3.bf16.msra.mxu0 %v11682_v38  ;;  %v1679_v2 = vld [vmem:[#allocation2 + $0xf4] sm:$0xf]  ;;  %v19486_v32 = vld [vmem:[#allocation63_spill] sm:$0xff]  ;;  %v19488_v49 = vld [vmem:[#allocation65_spill] sm:$0xff] }
 0x404   : > { %v10403_v31 = vcombine.low %v1886_v61, %v1895_v51  ;;  %v10386_v57 = vrot.slane %v1853_v58, 11  ;;  %11371 = vmatprep.subr.bf16.mxu0 %v11683_v40  ;;  %v2534_v15 = vsel %vm799_vm8, %v10400_v54, %v14536_v30  ;;  %v1873_v4 = vsel %vm14069_vm0, %v1865_v56, %v19483_v35  ;;  %v19484_v18 = vld [vmem:[#allocation62_spill] sm:$0xff]  ;;  %v1675_v30 = vld [vmem:[#allocation2 + $0xe0] sm:$0xf] }
 0x405   : > { %v10389_v55 = vrot.slane %v1919_v20, 11  ;;  %v1939_v38 = vsel %vm14069_vm0, %v1931_v12, %v19484_v18  ;;  %v2577_v5 = vsel %vm2565_vm1, %v2534_v15, %v14561_v26  ;;  %v1897_v58 = vshrl.u32 %v1667_v48, 16  ;;  %v19487_v20 = vld [vmem:[#allocation61_spill] sm:$0xff]  ;;  %v19489_v48 = vld [vmem:[#allocation66_spill] sm:$0xff]  ;;  %v14805_v15 = vpop.permute.xlu1 %2511 }
 0x406   : > { %v1864_v23 = vsel %vm14069_vm0, %v10386_v57, %v19485_v36  ;;  %v1909_v60 = vrot.slane %v19486_v32, 4  ;;  %v2537_v54 = vsel %vm799_vm8, %v10401_v22, %v14544_v9  ;;  %v1963_v53 = vshrl.u32 %v1679_v2, 16 }
 0x407   : > { %v10402_v56 = vcombine.low %v1864_v23, %v1873_v4  ;;  %v1930_v61 = vsel %vm14069_vm0, %v10389_v55, %v19487_v20  ;;  %11372 = vmatpush3.bf16.msra.mxu0 %v11683_v40  ;;  %v10388_v26 = vrot.slane %v1897_v58, 11  ;;  %v1975_v57 = vrot.slane %v19489_v48, 4  ;;  %v19490_v40 = vld [vmem:[#allocation69_spill] sm:$0xff]  ;;  %v1687_v4 = vld [vmem:[#allocation2 + $0x11c] sm:$0xf]  ;;  %v19491_v55 = vld [vmem:[#allocation64_spill] sm:$0xff]  ;;  %v14818_v58 = vpop.permute.xlu0 %2513 }
 0x408   : > { %v14799_v51 = vcombine.low %v1930_v61, %v1939_v38  ;;  %v1917_v12 = vsel %vm14069_vm0, %v1909_v60, %v19488_v49  ;;  %11373 = vmatprep.subr.bf16.mxu0 %v11684_v1  ;;  %v2579_v9 = vsel %vm2565_vm1, %v2537_v54, %v14568_v44  ;;  %v10391_v22 = vrot.slane %v1963_v53, 11  ;;  %v19492_v38 = vld [vmem:[#allocation68_spill] sm:$0xff]  ;;  %v1683_v23 = vld [vmem:[#allocation2 + $0x108] sm:$0xf]  ;;  %v19494_v54 = vld [vmem:[#allocation30_spill] sm:$0xff] }
 0x409   : > { %11340 = vmatmul.mubr.msk.bf16.gmra.mrb[12].mxu0 %vm3619_vm2, %v2577_v5  ;;  %v1941_v2 = vshrl.u32 %v1675_v30, 16  ;;  %v1953_v35 = vrot.slane %v19490_v40, 4  ;;  %v1908_v18 = vsel %vm14069_vm0, %v10388_v26, %v19491_v55  ;;  %v1983_v36 = vsel %vm14069_vm0, %v1975_v57, %v19492_v38  ;;  %v19493_v5 = vld [vmem:[#allocation67_spill] sm:$0xff]  ;;  %v19496_v48 = vld [vmem:[#allocation32_spill] sm:$0xff]  ;;  %v14839_v55 = vpop.permute.xlu1 %2435 }
 0x40a   : > { %11343 = vmatprep.mubr.msk.bf16.mxu0 %vm3619_vm2, %v2579_v9  ;;  %v10404_v44 = vcombine.low %v1908_v18, %v1917_v12  ;;  %v1974_v32 = vsel %vm14069_vm0, %v10391_v22, %v19493_v5  ;;  %v2007_v61 = vshrl.u32 %v1687_v4, 16  ;;  %v19495_v53 = vld [vmem:[#allocation31_spill] sm:$0xff]  ;;  %v2540_v49 = vsel %vm799_vm8, %v10402_v56, %v14581_v10  ;;  %v1691_v4 = vld [vmem:[#allocation2 + $0x130] sm:$0xf]  ;;  %v19499_v38 = vld [vmem:[#allocation72_spill] sm:$0xff] }
 0x40b   : > { %v10390_v60 = vrot.slane %v1941_v2, 11  ;;  %11374 = vmatpush3.bf16.msra.mxu0 %v11684_v1  ;;  %v14823_v30 = vcombine.low %v1974_v32, %v1983_v36  ;;  %v1961_v20 = vsel %vm14069_vm0, %v1953_v35, %v19494_v54  ;;  %v2019_v26 = vrot.slane %v19495_v53, 4  ;;  %v19497_v9 = vld [vmem:[#allocation35_spill] sm:$0xff]  ;;  %v4043_v1 = vld [vmem:[#allocation2 + $0x2c] sm:$0xf]  ;;  %v19498_v18 = vld [vmem:[#allocation34_spill] sm:$0xff] }
 0x40c   : > { %v1985_v57 = vshrl.u32 %v1683_v23, 16  ;;  %v1997_v22 = vrot.slane %v19497_v9, 4  ;;  %v2581_v2 = vsel %vm2565_vm1, %v2540_v49, %v14608_v39  ;;  %v10393_v35 = vrot.slane %v2007_v61, 11  ;;  %v19500_v5 = vld [vmem:[#allocation33_spill] sm:$0xff]  ;;  %v4051_v61 = vld [vmem:[#allocation2 + $0x54] sm:$0xf] }
 0x40d   : > { %v1952_v12 = vsel %vm14069_vm0, %v10390_v60, %v19496_v48  ;;  %v2027_v10 = vsel %vm14069_vm0, %v2019_v26, %v19498_v18  ;;  %v2543_v23 = vsel %vm799_vm8, %v10403_v31, %v14593_v43  ;;  %v4108_v32 = vshrl.u32 %v4043_v1, 16  ;;  %v19501_v60 = vld [vmem:[#allocation36_spill] sm:$0xff]  ;;  %v19502_v49 = vld [vmem:[#allocation71_spill] sm:$0xff] }
 0x40e   : > { %v14837_v40 = vcombine.low %v1952_v12, %v1961_v20  ;;  %v10392_v56 = vrot.slane %v1985_v57, 11  ;;  %v2005_v36 = vsel %vm14069_vm0, %v1997_v22, %v19499_v38  ;;  %v2018_v39 = vsel %vm14069_vm0, %v10393_v35, %v19500_v5  ;;  %v14853_v20 = vpop.permute.xlu0 %4811  ;;  %v19503_v57 = vld [vmem:[#allocation74_spill] sm:$0xff]  ;;  %v4047_v35 = vld [vmem:[#allocation2 + $0x40] sm:$0xf]  ;;  %v14879_v38 = vpop.permute.xlu1 %2515 }
 0x40f   : > { %v4120_v54 = vrot.slane %v19501_v60, 4  ;;  %v2583_v53 = vsel %vm2565_vm1, %v2543_v23, %v14617_v50  ;;  %v14858_v26 = vcombine.low %v2018_v39, %v2027_v10  ;;  %v2029_v31 = vshrl.u32 %v1691_v4, 16  ;;  %v19504_v4 = vld [vmem:[#allocation73_spill] sm:$0xff] }
 0x410   : > { %v1996_v43 = vsel %vm14069_vm0, %v10392_v56, %v19502_v49  ;;  %v10563_v12 = vrot.slane %v4108_v32, 11  ;;  %v2041_v50 = vrot.slane %v14200_v62, 4  ;;  %v4152_v1 = vshrl.u32 %v4051_v61, 16 }
 0x411   : > { %11344 = vmatmul.mubr.msk.bf16.gmra.mrb[16].mxu0 %vm3619_vm2, %v2581_v2  ;;  %v14864_v48 = vcombine.low %v1996_v43, %v2005_v36  ;;  %v4128_v9 = vsel %vm14069_vm0, %v4120_v54, %v19503_v57  ;;  %v10394_v22 = vrot.slane %v2029_v31, 11  ;;  %v4164_v2 = vrot.slane %v14249_v11, 4  ;;  %v4059_v36 = vld [vmem:[#allocation2 + $0x7c] sm:$0xf]  ;;  %v4067_v43 = vld [vmem:[#allocation2 + $0xa4] sm:$0xf] }
 0x412   : > { %11347 = vmatprep.mubr.msk.bf16.mxu0 %vm3619_vm2, %v2583_v53  ;;  %v2546_v18 = vsel %vm799_vm8, %v10404_v44, %v14631_v59  ;;  %v4119_v10 = vsel %vm14069_vm0, %v10563_v12, %v19504_v4  ;;  %v2049_v56 = vsel %vm14069_vm0, %v2041_v50, %v14210_v19  ;;  %v10565_v59 = vrot.slane %v4152_v1, 11  ;;  %v14890_v5 = vpop.permute.xlu0 %4891  ;;  %v14918_v31 = vpop.permute.xlu1 %4813  ;;  %v19506_v12 = vld [vmem:[#allocation77_spill] sm:$0xff] }
 0x413   : > { %v2585_v62 = vsel %vm2565_vm1, %v2546_v18, %v14658_v25  ;;  %v14883_v23 = vcombine.low %v4119_v10, %v4128_v9  ;;  %v2040_v11 = vsel %vm14069_vm0, %v10394_v22, %v14207_v0  ;;  %v4172_v19 = vsel %vm14069_vm0, %v4164_v2, %v14269_v8  ;;  %v4055_v0 = vld [vmem:[#allocation2 + $0x68] sm:$0xf]  ;;  %v4063_v9 = vld [vmem:[#allocation2 + $0x90] sm:$0xf]  ;;  %v19508_v18 = vld [vmem:[#allocation79_spill] sm:$0xff] }
 0x414   : > { %v14888_v44 = vcombine.low %v2040_v11, %v2049_v56  ;;  %v4130_v39 = vshrl.u32 %v4047_v35, 16  ;;  %v4142_v32 = vrot.slane %v14266_v17, 4  ;;  %v4163_v25 = vsel %vm14069_vm0, %v10565_v59, %v14264_v14  ;;  %v19509_v10 = vld [vmem:[#allocation11_spill] sm:$0xff]  ;;  %v19510_v59 = vld [vmem:[#allocation26_spill] sm:$0xff] }
 0x415   : > { %v4196_v60 = vshrl.u32 %v4059_v36, 16  ;;  %v4208_v54 = vrot.slane %v14314_v6, 4  ;;  %v2549_v61 = vsel %vm799_vm8, %v14799_v51, %v14639_v45  ;;  %v14903_v53 = vcombine.low %v4163_v25, %v4172_v19  ;;  %v19505_v45 = vld [vmem:[#allocation75_spill] sm:$0xff] }
 0x416   : > { %v10564_v49 = vrot.slane %v4130_v39, 11  ;;  %v2587_v8 = vsel %vm2565_vm1, %v2549_v61, %v14668_v16  ;;  %v4150_v14 = vsel %vm14069_vm0, %v4142_v32, %v14281_v27  ;;  %v4174_v16 = vshrl.u32 %v4055_v0, 16  ;;  %v19507_v27 = vld [vmem:[#allocation76_spill] sm:$0xff]  ;;  %v4075_v39 = vld [vmem:[#allocation2 + $0xcc] sm:$0xf]  ;;  %v19512_v0 = vld [vmem:[#allocation15_spill] sm:$0xff] }
 0x417   : > { %v10567_v17 = vrot.slane %v4196_v60, 11  ;;  %v4216_v6 = vsel %vm14069_vm0, %v4208_v54, %v14331_v28  ;;  %v4186_v57 = vrot.slane %v19506_v12, 4  ;;  %v4240_v1 = vshrl.u32 %v4067_v43, 16  ;;  %v14926_v28 = vpop.permute.xlu0 %4815  ;;  %v19511_v60 = vld [vmem:[#allocation78_spill] sm:$0xff]  ;;  %v19513_v43 = vld [vmem:[#allocation12_spill] sm:$0xff] }
 0x418   : > { %v4141_v51 = vsel %vm14069_vm0, %v10564_v49, %v19505_v45  ;;  %v10566_v35 = vrot.slane %v4174_v16, 11  ;;  %v4252_v56 = vrot.slane %v19509_v10, 4  ;;  %v2552_v36 = vsel %vm799_vm8, %v14837_v40, %v14696_v41  ;;  %v4071_v40 = vld [vmem:[#allocation2 + $0xb8] sm:$0xf]  ;;  %v4083_v16 = vld [vmem:[#allocation2 + $0xf4] sm:$0xf] }
 0x419   : > { %11348 = vmatmul.mubr.msk.bf16.gmra.mrb[20].mxu0 %vm3619_vm2, %v2585_v62  ;;  %v14921_v50 = vcombine.low %v4141_v51, %v4150_v14  ;;  %v4207_v22 = vsel %vm14069_vm0, %v10567_v17, %v19507_v27  ;;  %v4194_v4 = vsel %vm14069_vm0, %v4186_v57, %v19508_v18  ;;  %v10569_v62 = vrot.slane %v4240_v1, 11  ;;  %v19514_v14 = vld [vmem:[#allocation27_spill] sm:$0xff]  ;;  %v19516_v12 = vld [vmem:[#allocation80_spill] sm:$0xff] }
 0x41a   : > { %11351 = vmatprep.mubr.msk.bf16.mxu0 %vm3619_vm2, %v2587_v8  ;;  %v14928_v2 = vcombine.low %v4207_v22, %v4216_v6  ;;  %v4218_v11 = vshrl.u32 %v4063_v9, 16  ;;  %v4230_v19 = vrot.slane %v19510_v59, 4  ;;  %v2555_v32 = vsel %vm799_vm8, %v14823_v30, %v14707_v34  ;;  %v19515_v45 = vld [vmem:[#allocation19_spill] sm:$0xff]  ;;  %v4079_v22 = vld [vmem:[#allocation2 + $0xe0] sm:$0xf] }
 0x41b   : > { %v2589_v25 = vsel %vm2565_vm1, %v2552_v36, %v14728_v47  ;;  %v4185_v54 = vsel %vm14069_vm0, %v10566_v35, %v19511_v60  ;;  %v4260_v41 = vsel %vm14069_vm0, %v4252_v56, %v19512_v0  ;;  %v2591_v61 = vsel %vm2565_vm1, %v2555_v32, %v14740_v33  ;;  %v14956_v47 = vpop.permute.xlu1 %4893  ;;  %v14978_v18 = vpop.permute.xlu0 %4895  ;;  %v19518_v56 = vld [vmem:[#allocation37_spill] sm:$0xff] }
 0x41c   : > { %v14951_v49 = vcombine.low %v4185_v54, %v4194_v4  ;;  %v4251_v34 = vsel %vm14069_vm0, %v10569_v62, %v19513_v43  ;;  %v10568_v30 = vrot.slane %v4218_v11, 11  ;;  %v4238_v17 = vsel %vm14069_vm0, %v4230_v19, %v19514_v14  ;;  %v19517_v4 = vld [vmem:[#allocation20_spill] sm:$0xff]  ;;  %v4091_v11 = vld [vmem:[#allocation2 + $0x11c] sm:$0xf]  ;;  %v19522_v0 = vld [vmem:[#allocation17_spill] sm:$0xff] }
 0x41d   : > { %v14958_v8 = vcombine.low %v4251_v34, %v4260_v41  ;;  %v4284_v6 = vshrl.u32 %v4075_v39, 16  ;;  %v4296_v51 = vrot.slane %v19515_v45, 4  ;;  %v2561_v33 = vsel %vm799_vm8, %v14858_v26, %v14775_v3  ;;  %v19521_v39 = vld [vmem:[#allocation81_spill] sm:$0xff]  ;;  %v19525_v45 = vld [vmem:[#allocation39_spill] sm:$0xff] }
 0x41e   : > { %v4229_v57 = vsel %vm14069_vm0, %v10568_v30, %v19516_v12  ;;  %v4262_v9 = vshrl.u32 %v4071_v40, 16  ;;  %v4274_v27 = vrot.slane %v14446_v42, 4  ;;  %v2558_v1 = vsel %vm799_vm8, %v14864_v48, %v14766_v13  ;;  %v19519_v13 = vld [vmem:[#allocation16_spill] sm:$0xff]  ;;  %v19520_v48 = vld [vmem:[#allocation38_spill] sm:$0xff] }
 0x41f   : > { %v2595_v35 = vsel %vm2565_vm1, %v2561_v33, %v14818_v58  ;;  %v14980_v3 = vcombine.low %v4229_v57, %v4238_v17  ;;  %v10571_v26 = vrot.slane %v4284_v6, 11  ;;  %v4304_v10 = vsel %vm14069_vm0, %v4296_v51, %v19517_v4  ;;  %v15000_v43 = vpop.permute.xlu1 %4817  ;;  %v19523_v30 = vld [vmem:[#allocation82_spill] sm:$0xff]  ;;  %v19524_v6 = vld [vmem:[#allocation40_spill] sm:$0xff] }
 0x420   : > { %v10570_v42 = vrot.slane %v4262_v9, 11  ;;  %v4282_v36 = vsel %vm14069_vm0, %v4274_v27, %v19518_v56  ;;  %v4328_v62 = vshrl.u32 %v4083_v16, 16  ;;  %v4340_v59 = vrot.slane %v19520_v48, 4  ;;  %v4095_v57 = vld [vmem:[#allocation2 + $0x130] sm:$0xf]  ;;  %v4820_v9 = vpop.permute.xlu0 %4819 }
 0x421   : > { %11352 = vmatmul.mubr.msk.bf16.gmra.mrb[24].mxu0 %vm3619_vm2, %v2589_v25  ;;  %v4295_v58 = vsel %vm14069_vm0, %v10571_v26, %v19519_v13  ;;  %v4306_v19 = vshrl.u32 %v4079_v22, 16  ;;  %v4318_v32 = vrot.slane %v19521_v39, 4  ;;  %v4087_v25 = vld [vmem:[#allocation2 + $0x108] sm:$0xf]  ;;  %v2593_v60 = vsel %vm2565_vm1, %v2558_v1, %v14805_v15  ;;  %v19526_v22 = vld [vmem:[#allocation83_spill] sm:$0xff]  ;;  %v19528_v48 = vld [vmem:[#allocation10_spill] sm:$0xff] }
 0x422   : > { %11355 = vmatprep.mubr.msk.bf16.mxu0 %vm3619_vm2, %v2591_v61  ;;  %v14995_v54 = vcombine.low %v4295_v58, %v4304_v10  ;;  %v4273_v41 = vsel %vm14069_vm0, %v10570_v42, %v19522_v0  ;;  %v10573_v40 = vrot.slane %v4328_v62, 11  ;;  %v4099_v61 = vld [vmem:[#allocation2 + $0x144] sm:$0xf]  ;;  %v4348_v14 = vsel %vm14069_vm0, %v4340_v59, %v19523_v30  ;;  %v4103_v10 = vld [vmem:[#allocation2 + $0x158] sm:$0xf] }
 0x423   : > { %v15002_v34 = vcombine.low %v4273_v41, %v4282_v36  ;;  %v10572_v17 = vrot.slane %v4306_v19, 11  ;;  %v4326_v15 = vsel %vm14069_vm0, %v4318_v32, %v19524_v6  ;;  %v4372_v16 = vshrl.u32 %v4091_v11, 16  ;;  %v19527_v36 = vld [vmem:[#allocation41_spill] sm:$0xff]  ;;  %v19529_v19 = vld [vmem:[#allocation42_spill] sm:$0xff]  ;;  %v19530_v32 = vld [vmem:[#allocation24_spill] sm:$0xff] }
 0x424   : > { %v4339_v51 = vsel %vm14069_vm0, %v10573_v40, %v19525_v45  ;;  %v4384_v33 = vrot.slane %v14554_v63, 4  ;;  %v4350_v12 = vshrl.u32 %v4087_v25, 16  ;;  %v4362_v26 = vrot.slane %v14566_v52, 4  ;;  %v19532_v40 = vld [vmem:[#allocation84_spill] sm:$0xff]  ;;  %v19533_v6 = vld [vmem:[#allocation18_spill] sm:$0xff] }
 0x425   : > { %v15014_v27 = vcombine.low %v4339_v51, %v4348_v14  ;;  %v4317_v1 = vsel %vm14069_vm0, %v10572_v17, %v19526_v22  ;;  %v4416_v4 = vshrl.u32 %v4099_v61, 16  ;;  %v10575_v56 = vrot.slane %v4372_v16, 11  ;;  %v4900_v51 = vpop.permute.xlu0 %4899 }
 0x426   : > { %v15021_v42 = vcombine.low %v4317_v1, %v4326_v15  ;;  %v4392_v63 = vsel %vm14069_vm0, %v4384_v33, %v19527_v36  ;;  %v10574_v62 = vrot.slane %v4350_v12, 11  ;;  %v4370_v11 = vsel %vm14069_vm0, %v4362_v26, %v14579_v21  ;;  %v19531_v21 = vld [vmem:[#allocation25_spill] sm:$0xff]  ;;  %v19535_v1 = vld [vmem:[#allocation14_spill] sm:$0xff] }
 0x427   : > { %v10577_v13 = vrot.slane %v4416_v4, 11  ;;  %v4428_v52 = vrot.slane %v14614_v24, 4  ;;  %v4394_v58 = vshrl.u32 %v4095_v57, 16  ;;  %v4383_v59 = vsel %vm14069_vm0, %v10575_v56, %v19528_v48  ;;  %v19534_v12 = vld [vmem:[#allocation85_spill] sm:$0xff] }
 0x428   : > { %v4361_v39 = vsel %vm14069_vm0, %v10574_v62, %v19529_v19  ;;  %v4406_v25 = vrot.slane %v19530_v32, 4  ;;  %v15038_v0 = vcombine.low %v4383_v59, %v4392_v63  ;;  %v2564_v30 = vsel %vm799_vm8, %v14888_v44, %v14839_v55 }
 0x429   : > { %11356 = vmatmul.mubr.msk.bf16.gmra.mrb[28].mxu0 %vm3619_vm2, %v2593_v60  ;;  %v4438_v60 = vshrl.u32 %v4103_v10, 16  ;;  %v15040_v41 = vcombine.low %v4361_v39, %v4370_v11  ;;  %v4427_v24 = vsel %vm14069_vm0, %v10577_v13, %v19531_v21  ;;  %v4436_v61 = vsel %vm14069_vm0, %v4428_v52, %v19532_v40 }
 0x42a   : > { %11359 = vmatprep.mubr.msk.bf16.mxu0 %vm3619_vm2, %v2595_v35  ;;  %v4898_v35 = vpop.permute.xlu1 %4897  ;;  %v15051_v14 = vcombine.low %v4427_v24, %v4436_v61  ;;  %v10576_v17 = vrot.slane %v4394_v58, 11  ;;  %v4414_v15 = vsel %vm14069_vm0, %v4406_v25, %v19533_v6  ;;  %v2597_v45 = vsel %vm2565_vm1, %v2564_v30, %v14879_v38 }
 0x42b   : > { %v10578_v16 = vrot.slane %v4438_v60, 11  ;;  %v4450_v33 = vrot.slane %v14683_v7, 4  ;;  %v4925_v55 = vsel %vm799_vm8, %v14883_v23, %v14853_v20  ;;  %v4824_v23 = vpop.permute.xlu0 %4823  ;;  %v4928_v4 = vsel %vm799_vm8, %v14921_v50, %v14918_v31 }
 0x42c   : > { %v4405_v57 = vsel %vm14069_vm0, %v10576_v17, %v19534_v12  ;;  %v4972_v7 = vsel %vm2565_vm1, %v4925_v55, %v14890_v5  ;;  %v4931_v10 = vsel %vm799_vm8, %v14903_v53, %v14926_v28  ;;  %v4934_v31 = vsel %vm799_vm8, %v14951_v49, %v15000_v43  ;;  %v5318_v12 = vld [vmem:[%s18901_s9 + $0x8] sm:$0xff] }
 0x42d   : > { %v15065_v44 = vcombine.low %v4405_v57, %v4414_v15  ;;  %v4449_v22 = vsel %vm14069_vm0, %v10578_v16, %v14699_v29  ;;  %v4458_v38 = vsel %vm14069_vm0, %v4450_v33, %v19535_v1  ;;  %v4974_v29 = vsel %vm2565_vm1, %v4928_v4, %v14956_v47  ;;  %v5319_v57 = vld [vmem:[%s18901_s9 + $0x10] sm:$0xff] }
 0x42e   : > { %v15076_v26 = vcombine.low %v4449_v22, %v4458_v38  ;;  %v4822_v20 = vpop.permute.xlu1 %4821  ;;  %v4976_v56 = vsel %vm2565_vm1, %v4931_v10, %v14978_v18  ;;  %v4978_v50 = vsel %vm2565_vm1, %v4934_v31, %v4898_v35  ;;  %v4937_v63 = vsel %vm799_vm8, %v14928_v2, %v4820_v9  ;;  %v5321_v38 = vld [vmem:[%s18901_s9 + $0x20] sm:$0xff] }
 0x42f   : > { %v4904_v36 = vpop.permute.xlu0 %4903  ;;  %v4980_v28 = vsel %vm2565_vm1, %v4937_v63, %v4900_v51  ;;  %v4940_v62 = vsel %vm799_vm8, %v14980_v3, %v4822_v20  ;;  %v4943_v43 = vsel %vm799_vm8, %v14958_v8, %v4824_v23  ;;  %v19536_v1 = vmov 0.0|0.0   ;;  %v5323_v20 = vld [vmem:[%s18901_s9 + $0x30] sm:$0xff]  ;;  %v5324_v23 = vld [vmem:[%s18901_s9 + $0x38] sm:$0xff] }
 0x430   : > { %v4984_v13 = vsel %vm2565_vm1, %v4943_v43, %v4904_v36  ;;  %v11495_v4 = vpack.c.bf16 %v5324_v23, %v5323_v20 }
 0x431   : > { %11360 = vmatmul.mubr.msk.bf16.gmra.mrb[32].mxu0 %vm3619_vm2, %v2597_v45 }
 0x432   : > { %11375 = vmatprep.mubr.msk.bf16.mxu0 %vm3619_vm2, %v4972_v7  ;;  %v4902_v5 = vpop.permute.xlu1 %4901  ;;  %v5322_v7 = vld [vmem:[%s18901_s9 + $0x28] sm:$0xff] }
 0x433   : > { %v4828_v53 = vpop.permute.xlu0 %4827  ;;  %v4982_v11 = vsel %vm2565_vm1, %v4940_v62, %v4902_v5 }
 0x434   : > { %v4949_v3 = vsel %vm799_vm8, %v14995_v54, %v4828_v53 }
 0x436   : > { %v4826_v47 = vpop.permute.xlu1 %4825 }
 0x437   : > { %v4946_v52 = vsel %vm799_vm8, %v15002_v34, %v4826_v47 }
 0x439   : > { %11376 = vmatmul.mubr.msk.bf16.vlgmr.msra.gmra.mrb[4].mxu0 %vm3619_vm2, %v4974_v29  ;;  %v15175_v29 = vld [vmem:[%s18898_s6] ss:$0 sm:$0xff] }
 0x43a   : > { %11379 = vmatprep.mubr.msk.bf16.mxu0 %vm3619_vm2, %v4976_v56 }
 0x43b   : > { %v4908_v49 = vpop.permute.xlu0 %4907 }
 0x43c   : > { %v4988_v59 = vsel %vm2565_vm1, %v4949_v3, %v4908_v49 }
 0x43e   : > { %v4906_v18 = vpop.permute.xlu1 %4905 }
 0x43f   : > { %v4832_v9 = vpop.permute.xlu0 %4831  ;;  %v4986_v58 = vsel %vm2565_vm1, %v4946_v52, %v4906_v18 }
 0x440   : > { %v4955_v34 = vsel %vm799_vm8, %v15014_v27, %v4832_v9 }
 0x441   : > { %11380 = vmatmul.mubr.msk.bf16.gmra.mrb[8].mxu0 %vm3619_vm2, %v4978_v50 }
 0x442   : > { %11383 = vmatprep.mubr.msk.bf16.mxu0 %vm3619_vm2, %v4980_v28  ;;  %v4830_v2 = vpop.permute.xlu1 %4829 }
 0x443   : > { %v4952_v19 = vsel %vm799_vm8, %v15021_v42, %v4830_v2 }
 0x449   : > { %11384 = vmatmul.mubr.msk.bf16.gmra.mrb[12].mxu0 %vm3619_vm2, %v4982_v11 }
 0x44a   : > { %11387 = vmatprep.mubr.msk.bf16.mxu0 %vm3619_vm2, %v4984_v13  ;;  %v4912_v8 = vpop.permute.xlu0 %4911 }
 0x44b   : > { %v4992_v54 = vsel %vm2565_vm1, %v4955_v34, %v4912_v8 }
 0x44d   : > { %v4910_v48 = vpop.permute.xlu1 %4909 }
 0x44e   : > { %v4990_v39 = vsel %vm2565_vm1, %v4952_v19, %v4910_v48  ;;  %v4836_v25 = vpop.permute.xlu0 %4835 }
 0x44f   : > { %v4961_v24 = vsel %vm799_vm8, %v15038_v0, %v4836_v25 }
 0x451   : > { %11388 = vmatmul.mubr.msk.bf16.gmra.mrb[16].mxu0 %vm3619_vm2, %v4986_v58  ;;  %v4834_v32 = vpop.permute.xlu1 %4833 }
 0x452   : > { %11391 = vmatprep.mubr.msk.bf16.mxu0 %vm3619_vm2, %v4988_v59  ;;  %v4958_v35 = vsel %vm799_vm8, %v15040_v41, %v4834_v32 }
 0x459   : > { %11392 = vmatmul.mubr.msk.bf16.gmra.mrb[20].mxu0 %vm3619_vm2, %v4990_v39  ;;  %v4916_v21 = vpop.permute.xlu0 %4915 }
 0x45a   : > { %11395 = vmatprep.mubr.msk.bf16.mxu0 %vm3619_vm2, %v4992_v54  ;;  %v4996_v40 = vsel %vm2565_vm1, %v4961_v24, %v4916_v21 }
 0x45c   : > { %v4914_v60 = vpop.permute.xlu1 %4913 }
 0x45d   : > { %v4994_v42 = vsel %vm2565_vm1, %v4958_v35, %v4914_v60  ;;  %v4840_v27 = vpop.permute.xlu0 %4839 }
 0x45e   : > { %v4967_v41 = vsel %vm799_vm8, %v15051_v14, %v4840_v27  ;;  %v5317_v14 = vld [vmem:[%s18901_s9] sm:$0xff] }
 0x45f   : > { %v11486_v55 = vpack.c.bf16 %v5318_v12, %v5317_v14 }
 0x460   : > { %v4838_v61 = vpop.permute.xlu1 %4837 }
 0x461   : > { %11396 = vmatmul.mubr.msk.bf16.gmra.mrb[24].mxu0 %vm3619_vm2, %v4994_v42  ;;  %v4964_v17 = vsel %vm799_vm8, %v15065_v44, %v4838_v61  ;;  %v5320_v44 = vld [vmem:[%s18901_s9 + $0x18] sm:$0xff]  ;;  %11487 = vmatpush3.bf16.msra.mxu1 %v11486_v55 }
 0x462   : > { %11399 = vmatprep.mubr.msk.bf16.mxu0 %vm3619_vm2, %v4996_v40  ;;  %v11489_v22 = vpack.c.bf16 %v5320_v44, %v5319_v57  ;;  %11488 = vmatprep.subr.bf16.mxu1 %v19536_v1 }
 0x465   : > { %11490 = vmatpush3.bf16.msra.mxu1 %v11489_v22 }
 0x466   : > { %11491 = vmatprep.subr.bf16.mxu1 %v19536_v1 }
 0x468   : > { %v4920_v30 = vpop.permute.xlu0 %4919 }
 0x469   : > { %v5000_v0 = vsel %vm2565_vm1, %v4967_v41, %v4920_v30 }
 0x46b   : > { %v4918_v6 = vpop.permute.xlu1 %4917 }
 0x46c   : > { %v4998_v15 = vsel %vm2565_vm1, %v4964_v17, %v4918_v6 }
 0x46d   : > { %11400 = vmatmul.mubr.msk.bf16.gmra.mrb[28].mxu0 %vm3619_vm2, %v4998_v15 }
 0x46e   : > { %11403 = vmatprep.mubr.msk.bf16.mxu0 %vm3619_vm2, %v5000_v0 }
 0x46f   : > { %v4842_v45 = vpop.permute.xlu1 %4841 }
 0x470   : > { %v4970_v51 = vsel %vm799_vm8, %v15076_v26, %v4842_v45  ;;  %v11492_v26 = vpack.c.bf16 %v5322_v7, %v5321_v38 }
 0x472   : > { %11493 = vmatpush3.bf16.msra.mxu1 %v11492_v26 }
 0x473   : > { %11494 = vmatprep.subr.bf16.mxu1 %v19536_v1 }
 0x474   : > { %v4922_v16 = vpop.permute.xlu1 %4921 }
 0x475   : > { %v5002_v33 = vsel %vm2565_vm1, %v4970_v51, %v4922_v16 }
 0x476   : > { %11404 = vmatmul.mubr.msk.bf16.gmra.mrb[32].mxu0 %vm3619_vm2, %v5002_v33  ;;  %11496 = vmatpush3.bf16.msra.mxu1 %v11495_v4 }
 0x477   : > { %11497 = vmatprep.subr.bf16.mxu1 %v19536_v1 }
 0x50c   : > { %v11377_v10 = vpop.f32.mrb[4].mxu0 }
 0x50d   : > { %v5118_v5 = vpop.f32.mrb[5].mxu0  ;;  %v15178_v56 = vadd.f32 %v11377_v10, %v15175_v29 }
 0x50e   : > { %v15181_v36 = vadd.f32 %v15175_v29, %v5118_v5  ;;  %v11378_v31 = vpop.f32.mrb[6].mxu0 }
 0x50f   : > { %v5121_v50 = vpop.f32.mrb[7].mxu0  ;;  %v15186_v63 = vadd.f32 %v11378_v31, %v15175_v29  ;;  %v5400_v28 = vmul.f32 %v15178_v56, %v15178_v56  ;;  %v5332_v43 = vsel %vm2565_vm1, %v15178_v56, 0.0 }
 0x510   : > { %v5398_v47 = vmul.f32 %v15181_v36, %v15181_v36  ;;  %v15189_v53 = vadd.f32 %v15175_v29, %v5121_v50  ;;  %v5329_v18 = vsel %vm2565_vm1, %v15181_v36, 0.0 }
 0x511   : > { %v5401_v2 = vmul.f32 %v15186_v63, %v15186_v63  ;;  %v5433_v59 = vsel %vm2565_vm1, %v5400_v28, 0.0  ;;  %v5334_v8 = vsel %vm2565_vm1, %v15186_v63, 0.0 }
 0x512   : > { %v5330_v62 = vsel %vm2565_vm1, %v15189_v53, 0.0  ;;  %v5399_v11 = vmul.f32 %v15189_v53, %v15189_v53  ;;  %v5430_v13 = vsel %vm2565_vm1, %v5398_v47, 0.0 }
 0x513   : > { %v5331_v49 = vadd.f32 %v5330_v62, %v5329_v18  ;;  %v5435_v60 = vsel %vm2565_vm1, %v5401_v2, 0.0 }
 0x514   : > { %v5431_v9 = vsel %vm2565_vm1, %v5399_v11, 0.0  ;;  %v11381_v52 = vpop.f32.mrb[8].mxu0 }
 0x515   : > { %v5333_v58 = vadd.f32 %v5332_v43, %v5331_v49  ;;  %v5432_v3 = vadd.f32 %v5431_v9, %v5430_v13  ;;  %v5134_v48 = vpop.f32.mrb[9].mxu0  ;;  %v15212_v34 = vadd.f32 %v11381_v52, %v15175_v29 }
 0x516   : > { %v15209_v19 = vadd.f32 %v15175_v29, %v5134_v48  ;;  %v11382_v39 = vpop.f32.mrb[10].mxu0 }
 0x517   : > { %v5434_v32 = vadd.f32 %v5433_v59, %v5432_v3  ;;  %v5335_v25 = vadd.f32 %v5334_v8, %v5333_v58  ;;  %v5137_v54 = vpop.f32.mrb[11].mxu0  ;;  %v15223_v27 = vadd.f32 %v11382_v39, %v15175_v29  ;;  %v5404_v17 = vmul.f32 %v15212_v34, %v15212_v34 }
 0x518   : > { %v5336_v35 = vsel %vm2565_vm1, %v15209_v19, 0.0  ;;  %v5402_v21 = vmul.f32 %v15209_v19, %v15209_v19  ;;  %v15220_v42 = vadd.f32 %v15175_v29, %v5137_v54  ;;  %v5340_v0 = vsel %vm2565_vm1, %v15212_v34, 0.0 }
 0x519   : > { %v5337_v24 = vadd.f32 %v5336_v35, %v5335_v25  ;;  %v5436_v40 = vadd.f32 %v5435_v60, %v5434_v32  ;;  %v5405_v51 = vmul.f32 %v15223_v27, %v15223_v27  ;;  %v5342_v12 = vsel %vm2565_vm1, %v15223_v27, 0.0 }
 0x51a   : > { %v5437_v61 = vsel %vm2565_vm1, %v5402_v21, 0.0  ;;  %v5338_v30 = vsel %vm2565_vm1, %v15220_v42, 0.0  ;;  %v5403_v15 = vmul.f32 %v15220_v42, %v15220_v42  ;;  %v5441_v22 = vsel %vm2565_vm1, %v5404_v17, 0.0 }
 0x51b   : > { %v5438_v6 = vadd.f32 %v5437_v61, %v5436_v40  ;;  %v5339_v41 = vadd.f32 %v5338_v30, %v5337_v24  ;;  %v5443_v5 = vsel %vm2565_vm1, %v5405_v51, 0.0 }
 0x51c   : > { %v11385_v45 = vpop.f32.mrb[12].mxu0  ;;  %v5439_v33 = vsel %vm2565_vm1, %v5403_v15, 0.0 }
 0x51d   : > { %v5341_v16 = vadd.f32 %v5340_v0, %v5339_v41  ;;  %v5150_v14 = vpop.f32.mrb[13].mxu0  ;;  %v5440_v57 = vadd.f32 %v5439_v33, %v5438_v6  ;;  %v15244_v38 = vadd.f32 %v11385_v45, %v15175_v29 }
 0x51e   : > { %v15240_v55 = vadd.f32 %v15175_v29, %v5150_v14  ;;  %v11386_v44 = vpop.f32.mrb[14].mxu0 }
 0x51f   : > { %v5343_v7 = vadd.f32 %v5342_v12, %v5341_v16  ;;  %v5153_v26 = vpop.f32.mrb[15].mxu0  ;;  %v5442_v20 = vadd.f32 %v5441_v22, %v5440_v57  ;;  %v15255_v50 = vadd.f32 %v11386_v44, %v15175_v29  ;;  %v5408_v11 = vmul.f32 %v15244_v38, %v15244_v38 }
 0x520   : > { %v5344_v23 = vsel %vm2565_vm1, %v15240_v55, 0.0  ;;  %v5406_v4 = vmul.f32 %v15240_v55, %v15240_v55  ;;  %v15251_v10 = vadd.f32 %v15175_v29, %v5153_v26  ;;  %v5348_v43 = vsel %vm2565_vm1, %v15244_v38, 0.0 }
 0x521   : > { %v5345_v31 = vadd.f32 %v5344_v23, %v5343_v7  ;;  %v5444_v47 = vadd.f32 %v5443_v5, %v5442_v20  ;;  %v5409_v52 = vmul.f32 %v15255_v50, %v15255_v50  ;;  %v5350_v48 = vsel %vm2565_vm1, %v15255_v50, 0.0 }
 0x522   : > { %v5445_v28 = vsel %vm2565_vm1, %v5406_v4, 0.0  ;;  %v5346_v18 = vsel %vm2565_vm1, %v15251_v10, 0.0  ;;  %v5407_v62 = vmul.f32 %v15251_v10, %v15251_v10  ;;  %v5449_v32 = vsel %vm2565_vm1, %v5408_v11, 0.0 }
 0x523   : > { %v5347_v49 = vadd.f32 %v5346_v18, %v5345_v31  ;;  %v5446_v13 = vadd.f32 %v5445_v28, %v5444_v47  ;;  %v5451_v61 = vsel %vm2565_vm1, %v5409_v52, 0.0 }
 0x524   : > { %v5447_v2 = vsel %vm2565_vm1, %v5407_v62, 0.0  ;;  %v11389_v9 = vpop.f32.mrb[16].mxu0 }
 0x525   : > { %v5349_v58 = vadd.f32 %v5348_v43, %v5347_v49  ;;  %v5166_v3 = vpop.f32.mrb[17].mxu0  ;;  %v5448_v59 = vadd.f32 %v5447_v2, %v5446_v13  ;;  %v15276_v25 = vadd.f32 %v11389_v9, %v15175_v29 }
 0x526   : > { %v15272_v8 = vadd.f32 %v15175_v29, %v5166_v3  ;;  %v11390_v39 = vpop.f32.mrb[18].mxu0 }
 0x527   : > { %v5351_v54 = vadd.f32 %v5350_v48, %v5349_v58  ;;  %v5169_v60 = vpop.f32.mrb[19].mxu0  ;;  %v5450_v35 = vadd.f32 %v5449_v32, %v5448_v59  ;;  %v15287_v17 = vadd.f32 %v11390_v39, %v15175_v29  ;;  %v5412_v45 = vmul.f32 %v15276_v25, %v15276_v25 }
 0x528   : > { %v5352_v21 = vsel %vm2565_vm1, %v15272_v8, 0.0  ;;  %v5410_v24 = vmul.f32 %v15272_v8, %v15272_v8  ;;  %v15283_v40 = vadd.f32 %v15175_v29, %v5169_v60  ;;  %v5356_v16 = vsel %vm2565_vm1, %v15276_v25, 0.0 }
 0x529   : > { %v5353_v30 = vadd.f32 %v5352_v21, %v5351_v54  ;;  %v5452_v6 = vadd.f32 %v5451_v61, %v5450_v35  ;;  %v5413_v57 = vmul.f32 %v15287_v17, %v15287_v17  ;;  %v5358_v7 = vsel %vm2565_vm1, %v15287_v17, 0.0 }
 0x52a   : > { %v5453_v41 = vsel %vm2565_vm1, %v5410_v24, 0.0  ;;  %v5354_v15 = vsel %vm2565_vm1, %v15283_v40, 0.0  ;;  %v5411_v0 = vmul.f32 %v15283_v40, %v15283_v40  ;;  %v5457_v4 = vsel %vm2565_vm1, %v5412_v45, 0.0 }
 0x52b   : > { %v5355_v51 = vadd.f32 %v5354_v15, %v5353_v30  ;;  %v5454_v33 = vadd.f32 %v5453_v41, %v5452_v6  ;;  %v5459_v49 = vsel %vm2565_vm1, %v5413_v57, 0.0 }
 0x52c   : > { %v5455_v14 = vsel %vm2565_vm1, %v5411_v0, 0.0  ;;  %v11393_v12 = vpop.f32.mrb[20].mxu0 }
 0x52d   : > { %v5357_v44 = vadd.f32 %v5356_v16, %v5355_v51  ;;  %v5182_v22 = vpop.f32.mrb[21].mxu0  ;;  %v5456_v26 = vadd.f32 %v5455_v14, %v5454_v33  ;;  %v15308_v5 = vadd.f32 %v11393_v12, %v15175_v29 }
 0x52e   : > { %v15304_v20 = vadd.f32 %v15175_v29, %v5182_v22  ;;  %v11394_v23 = vpop.f32.mrb[22].mxu0 }
 0x52f   : > { %v5359_v31 = vadd.f32 %v5358_v7, %v5357_v44  ;;  %v5185_v47 = vpop.f32.mrb[23].mxu0  ;;  %v5458_v28 = vadd.f32 %v5457_v4, %v5456_v26  ;;  %v15319_v13 = vadd.f32 %v11394_v23, %v15175_v29  ;;  %v5416_v3 = vmul.f32 %v15308_v5, %v15308_v5 }
 0x530   : > { %v5360_v18 = vsel %vm2565_vm1, %v15304_v20, 0.0  ;;  %v5414_v62 = vmul.f32 %v15304_v20, %v15304_v20  ;;  %v15315_v11 = vadd.f32 %v15175_v29, %v5185_v47  ;;  %v5364_v59 = vsel %vm2565_vm1, %v15308_v5, 0.0 }
 0x531   : > { %v5361_v43 = vadd.f32 %v5360_v18, %v5359_v31  ;;  %v5460_v2 = vadd.f32 %v5459_v49, %v5458_v28  ;;  %v5417_v60 = vmul.f32 %v15319_v13, %v15319_v13  ;;  %v5366_v24 = vsel %vm2565_vm1, %v15319_v13, 0.0 }
 0x532   : > { %v5461_v9 = vsel %vm2565_vm1, %v5414_v62, 0.0  ;;  %v5362_v52 = vsel %vm2565_vm1, %v15315_v11, 0.0  ;;  %v5415_v58 = vmul.f32 %v15315_v11, %v15315_v11  ;;  %v5465_v41 = vsel %vm2565_vm1, %v5416_v3, 0.0 }
 0x533   : > { %v5363_v48 = vadd.f32 %v5362_v52, %v5361_v43  ;;  %v5462_v39 = vadd.f32 %v5461_v9, %v5460_v2  ;;  %v5467_v12 = vsel %vm2565_vm1, %v5417_v60, 0.0 }
 0x534   : > { %v5463_v32 = vsel %vm2565_vm1, %v5415_v58, 0.0  ;;  %v11397_v54 = vpop.f32.mrb[24].mxu0 }
 0x535   : > { %v5365_v35 = vadd.f32 %v5364_v59, %v5363_v48  ;;  %v5198_v21 = vpop.f32.mrb[25].mxu0  ;;  %v5464_v61 = vadd.f32 %v5463_v32, %v5462_v39  ;;  %v15340_v15 = vadd.f32 %v11397_v54, %v15175_v29 }
 0x536   : > { %v15336_v30 = vadd.f32 %v15175_v29, %v5198_v21  ;;  %v11398_v6 = vpop.f32.mrb[26].mxu0 }
 0x537   : > { %v5367_v0 = vadd.f32 %v5366_v24, %v5365_v35  ;;  %v5201_v45 = vpop.f32.mrb[27].mxu0  ;;  %v5466_v51 = vadd.f32 %v5465_v41, %v5464_v61  ;;  %v15351_v44 = vadd.f32 %v11398_v6, %v15175_v29  ;;  %v5420_v4 = vmul.f32 %v15340_v15, %v15340_v15 }
 0x538   : > { %v5368_v16 = vsel %vm2565_vm1, %v15336_v30, 0.0  ;;  %v5418_v33 = vmul.f32 %v15336_v30, %v15336_v30  ;;  %v15347_v14 = vadd.f32 %v15175_v29, %v5201_v45  ;;  %v5372_v47 = vsel %vm2565_vm1, %v15340_v15, 0.0 }
 0x539   : > { %v5369_v57 = vadd.f32 %v5368_v16, %v5367_v0  ;;  %v5468_v22 = vadd.f32 %v5467_v12, %v5466_v51  ;;  %v5421_v49 = vmul.f32 %v15351_v44, %v15351_v44  ;;  %v5473_v2 = vsel %vm2565_vm1, %v5420_v4, 0.0 }
 0x53a   : > { %v5469_v7 = vsel %vm2565_vm1, %v5418_v33, 0.0  ;;  %v5370_v26 = vsel %vm2565_vm1, %v15347_v14, 0.0  ;;  %v5419_v23 = vmul.f32 %v15347_v14, %v15347_v14  ;;  %v5374_v9 = vsel %vm2565_vm1, %v15351_v44, 0.0 }
 0x53b   : > { %v5371_v31 = vadd.f32 %v5370_v26, %v5369_v57  ;;  %v5470_v28 = vadd.f32 %v5469_v7, %v5468_v22  ;;  %v5475_v59 = vsel %vm2565_vm1, %v5421_v49, 0.0 }
 0x53c   : > { %v5471_v18 = vsel %vm2565_vm1, %v5419_v23, 0.0 }
 0x53d   : > { %v5373_v62 = vadd.f32 %v5372_v47, %v5371_v31  ;;  %v5472_v43 = vadd.f32 %v5471_v18, %v5470_v28 }
 0x53f   : > { %v5474_v52 = vadd.f32 %v5473_v2, %v5472_v43  ;;  %v5375_v48 = vadd.f32 %v5374_v9, %v5373_v62 }
 0x540   : > { %v11401_v58 = vpop.f32.mrb[28].mxu0 }
 0x541   : > { %v5214_v3 = vpop.f32.mrb[29].mxu0  ;;  %v15370_v39 = vadd.f32 %v11401_v58, %v15175_v29  ;;  %v5476_v60 = vadd.f32 %v5475_v59, %v5474_v52 }
 0x542   : > { %v15373_v32 = vadd.f32 %v15175_v29, %v5214_v3  ;;  %v11402_v54 = vpop.f32.mrb[30].mxu0 }
 0x543   : > { %v5217_v35 = vpop.f32.mrb[31].mxu0  ;;  %v15380_v61 = vadd.f32 %v11402_v54, %v15175_v29  ;;  %v5424_v0 = vmul.f32 %v15370_v39, %v15370_v39  ;;  %v5380_v57 = vsel %vm2565_vm1, %v15370_v39, 0.0 }
 0x544   : > { %v5376_v21 = vsel %vm2565_vm1, %v15373_v32, 0.0  ;;  %v5422_v24 = vmul.f32 %v15373_v32, %v15373_v32  ;;  %v15383_v6 = vadd.f32 %v15175_v29, %v5217_v35 }
 0x545   : > { %v5377_v41 = vadd.f32 %v5376_v21, %v5375_v48  ;;  %v5425_v22 = vmul.f32 %v15380_v61, %v15380_v61  ;;  %v5481_v31 = vsel %vm2565_vm1, %v5424_v0, 0.0  ;;  %v5382_v47 = vsel %vm2565_vm1, %v15380_v61, 0.0 }
 0x546   : > { %v5477_v45 = vsel %vm2565_vm1, %v5422_v24, 0.0  ;;  %v5378_v51 = vsel %vm2565_vm1, %v15383_v6, 0.0  ;;  %v5423_v16 = vmul.f32 %v15383_v6, %v15383_v6 }
 0x547   : > { %v5478_v33 = vadd.f32 %v5477_v45, %v5476_v60  ;;  %v5379_v12 = vadd.f32 %v5378_v51, %v5377_v41  ;;  %v5483_v9 = vsel %vm2565_vm1, %v5425_v22, 0.0 }
 0x548   : > { %v5479_v7 = vsel %vm2565_vm1, %v5423_v16, 0.0 }
 0x549   : > { %v5381_v26 = vadd.f32 %v5380_v57, %v5379_v12  ;;  %v5480_v23 = vadd.f32 %v5479_v7, %v5478_v33  ;;  %v11405_v4 = vpop.f32.mrb[32].mxu0 }
 0x54a   : > { %v5230_v28 = vpop.f32.mrb[33].mxu0  ;;  %v15401_v62 = vadd.f32 %v11405_v4, %v15175_v29 }
 0x54b   : > { %v5482_v18 = vadd.f32 %v5481_v31, %v5480_v23  ;;  %v15404_v49 = vadd.f32 %v15175_v29, %v5230_v28  ;;  %v5383_v43 = vadd.f32 %v5382_v47, %v5381_v26  ;;  %v11406_v2 = vpop.f32.mrb[34].mxu0 }
 0x54c   : > { %v15408_v52 = vadd.f32 %v11406_v2, %v15175_v29  ;;  %v5233_v58 = vpop.f32.mrb[35].mxu0  ;;  %v5428_v35 = vmul.f32 %v15401_v62, %v15401_v62  ;;  %v5388_v51 = vsel %vm2565_vm1, %v15401_v62, 0.0 }
 0x54d   : > { %v5384_v3 = vsel %vm2565_vm1, %v15404_v49, 0.0  ;;  %v5426_v48 = vmul.f32 %v15404_v49, %v15404_v49  ;;  %v5484_v59 = vadd.f32 %v5483_v9, %v5482_v18  ;;  %v15415_v54 = vadd.f32 %v15175_v29, %v5233_v58 }
 0x54e   : > { %v5385_v60 = vadd.f32 %v5384_v3, %v5383_v43  ;;  %v5429_v29 = vmul.f32 %v15408_v52, %v15408_v52  ;;  %v5489_v57 = vsel %vm2565_vm1, %v5428_v35, 0.0  ;;  %v5390_v22 = vsel %vm2565_vm1, %v15408_v52, 0.0 }
 0x54f   : > { %v5485_v21 = vsel %vm2565_vm1, %v5426_v48, 0.0  ;;  %v5386_v24 = vsel %vm2565_vm1, %v15415_v54, 0.0  ;;  %v5427_v41 = vmul.f32 %v15415_v54, %v15415_v54  ;;  %v5325_v48 = vld [vmem:[%s18902_s10] sm:$0xff] }
 0x550   : > { %v5486_v0 = vadd.f32 %v5485_v21, %v5484_v59  ;;  %v5387_v45 = vadd.f32 %v5386_v24, %v5385_v60  ;;  %v5491_v23 = vsel %vm2565_vm1, %v5429_v29, 0.0  ;;  %v5326_v59 = vld [vmem:[%s18902_s10 + $0x8] sm:$0xff]  ;;  %v19537_v29 = vmov 0.0  }
 0x551   : > { %v5487_v16 = vsel %vm2565_vm1, %v5427_v41, 0.0  ;;  %v11498_v24 = vpack.c.bf16 %v5326_v59, %v5325_v48  ;;  %v5327_v41 = vld [vmem:[%s18902_s10 + $0x10] sm:$0xff] }
 0x552   : > { %v5389_v33 = vadd.f32 %v5388_v51, %v5387_v45  ;;  %v5488_v12 = vadd.f32 %v5487_v16, %v5486_v0  ;;  %v5328_v0 = vld [vmem:[%s18902_s10 + $0x18] sm:$0xff] }
 0x553   : > { %v11501_v51 = vpack.c.bf16 %v5328_v0, %v5327_v41 }
 0x554   : > { %v5391_v7 = vadd.f32 %v5390_v22, %v5389_v33  ;;  %v5490_v26 = vadd.f32 %v5489_v57, %v5488_v12 }
 0x556   : > { %v5392_v4 = vrot.slane %v5391_v7, 4  ;;  %v5492_v31 = vadd.f32 %v5491_v23, %v5490_v26 }
 0x558   : > { %v5393_v47 = vadd.f32 %v5392_v4, %v5391_v7  ;;  %v5493_v28 = vrot.slane %v5492_v31, 4 }
 0x55a   : > { %v5394_v18 = vrot.slane %v5393_v47, 2  ;;  %v5494_v43 = vadd.f32 %v5493_v28, %v5492_v31  ;;  %v8598_v28 = vld [vmem:[#allocation3 + $0x38] sm:$0x1] }
 0x55c   : > { %v5395_v2 = vadd.f32 %v5394_v18, %v5393_v47  ;;  %v5495_v9 = vrot.slane %v5494_v43, 2  ;;  %v7098_v47 = vld [vmem:[#allocation3 + $0x24] sm:$0x1] }
 0x55e   : > { %v5396_v58 = vrot.slane %v5395_v2, 1  ;;  %v5496_v3 = vadd.f32 %v5495_v9, %v5494_v43  ;;  %v7521_v43 = vshll.u32 %v7098_v47, 16  ;;  %v19538_v9 = vld [vmem:[#allocation23_spill] sm:$0xff]  ;;  %v15546_v47 = vld [vmem:[#allocation3 + $0xc] sm:$0xf] }
 0x55f   : > { %19542 = vst [vmem:[#allocation13_spill] sm:$0xff] %v15546_v47 }
 0x560   : > { %v5497_v60 = vrot.slane %v5496_v3, 1  ;;  %v5397_v35 = vadd.f32 %v5396_v58, %v5395_v2  ;;  %v9021_v2 = vshll.u32 %v8598_v28, 16  ;;  %v19539_v58 = vsub.s32 0, %v19538_v9 }
 0x561   : > { %v15458_v59 = vrot.slane %v7521_v43, 5 }
 0x562   : > { %v5498_v21 = vadd.f32 %v5497_v60, %v5496_v3  ;;  %v15460_v60 = vrot.slane %v9021_v2, 5 }
 0x564   : > { %v5499_v45 = vsel %vm970_vm9, %v5397_v35, %v5498_v21  ;;  %v19540_v35 = vsub.s32 1, %v19538_v9 }
 0x565   : > { %11424 = vmatmul.mubr.msk.f32.vlgmr.msra.gmra.mrb[2].mxu1 %vm2565_vm1, %v5499_v45 }
 0x566   : > { %11499 = vmatpush3.bf16.msra.mxu1 %v11498_v24  ;;  %11434 = vmatprep.mubr.msk.f32.mxu1 %vm12131_vm7, %v19537_v29 }
 0x567   : > { %11500 = vmatprep.subr.bf16.mxu1 %v19536_v1  ;;  %v10664_v1 = vld [vmem:[%s18899_s7] ss:$0 sm:$0xff] }
 0x56a   : > { %11502 = vmatpush3.bf16.msra.mxu1 %v11501_v51 }
 0x638   : > { %v5569_v16 = vpop.f32.mrb[2].mxu1 }
 0x639   : > { %v11425_v33 = vpop.f32.mrb[3].mxu1  ;;  %11435 = vmatmul.mubr.msk.f32.vlgmr.msra.gmra.mrb[4].mxu1 %vm799_vm8, %v5569_v16 }
 0x70c   : > { %v5642_v12 = vpop.f32.mrb[4].mxu1 }
 0x70d   : > { %v5646_v57 = vmul.f32 0.001953125, %v5642_v12  ;;  %v11436_v22 = vpop.f32.mrb[5].mxu1 }
 0x70e   : > { %v15531_v22 = vld [vmem:[#allocation3 + $0x8] sm:$0xf] }
 0x70f   : > { %v5647_v7 = vmul.f32 %v5646_v57, %v5646_v57  ;;  %v15456_v3 = vrot.slane %v5646_v57, %v19539_v58  ;;  %19541 = vst [vmem:[#allocation21_spill] sm:$0xff] %v15531_v22  ;;  %v18991_v28 = vshll.u32 %v15531_v22, 16 }
 0x711   : > { %v5649_v26 = vrot.slane %v5647_v7, 7  ;;  %v5659_v24 = vsub.f32 %v15181_v36, %v15456_v3  ;;  %v5660_v41 = vsub.f32 %v15189_v53, %v15456_v3  ;;  %v5661_v0 = vsub.f32 %v15178_v56, %v15456_v3 }
 0x712   : > { %v5662_v45 = vsub.f32 %v15186_v63, %v15456_v3  ;;  %v5663_v51 = vsub.f32 %v15209_v19, %v15456_v3  ;;  %v5664_v29 = vsub.f32 %v15220_v42, %v15456_v3  ;;  %v5665_v16 = vsub.f32 %v15212_v34, %v15456_v3 }
 0x713   : > { %v5651_v23 = vsub.f32 %v5646_v57, %v5649_v26  ;;  %v5666_v36 = vsub.f32 %v15223_v27, %v15456_v3  ;;  %v5667_v53 = vsub.f32 %v15240_v55, %v15456_v3  ;;  %v5668_v56 = vsub.f32 %v15251_v10, %v15456_v3 }
 0x714   : > { %v5669_v63 = vsub.f32 %v15244_v38, %v15456_v3  ;;  %v5670_v19 = vsub.f32 %v15255_v50, %v15456_v3  ;;  %v5671_v42 = vsub.f32 %v15272_v8, %v15456_v3  ;;  %v5672_v34 = vsub.f32 %v15283_v40, %v15456_v3  ;;  %v15505_v50 = vld [vmem:[%s18900_s8] ss:$0 sm:$0xff] }
 0x715   : > { %v5652_v4 = vmax.f32 %v5651_v23, 0.0  ;;  %v5673_v27 = vsub.f32 %v15276_v25, %v15456_v3  ;;  %v5674_v55 = vsub.f32 %v15287_v17, %v15456_v3  ;;  %v5675_v10 = vsub.f32 %v15304_v20, %v15456_v3 }
 0x716   : > { %v5676_v8 = vsub.f32 %v15315_v11, %v15456_v3  ;;  %v5677_v25 = vsub.f32 %v15308_v5, %v15456_v3  ;;  %v5678_v40 = vsub.f32 %v15319_v13, %v15456_v3  ;;  %v5679_v17 = vsub.f32 %v15336_v30, %v15456_v3 }
 0x717   : > { %v5653_v31 = vadd.f32 1e-05, %v5652_v4  ;;  %v5680_v20 = vsub.f32 %v15347_v14, %v15456_v3  ;;  %v5681_v12 = vsub.f32 %v15340_v15, %v15456_v3  ;;  %v5682_v57 = vsub.f32 %v15351_v44, %v15456_v3 }
 0x718   : > { %v5683_v11 = vsub.f32 %v15373_v32, %v15456_v3  ;;  %v5684_v5 = vsub.f32 %v15383_v6, %v15456_v3  ;;  %v5685_v13 = vsub.f32 %v15370_v39, %v15456_v3  ;;  %v5686_v30 = vsub.f32 %v15380_v61, %v15456_v3 }
 0x719   : > { %11900 = vrsqrt.f32 %v5653_v31  ;;  %v5687_v14 = vsub.f32 %v15404_v49, %v15456_v3  ;;  %v5688_v15 = vsub.f32 %v15415_v54, %v15456_v3  ;;  %v18992_v26 = vshrl.u32 %v15531_v22, 16  ;;  %v11718_v54 = vld [vmem:[%s18903_s11 + $0x60] sm:$0xff]  }
 0x71a   : > { %v5689_v23 = vsub.f32 %v15401_v62, %v15456_v3  ;;  %v5690_v9 = vsub.f32 %v15408_v52, %v15456_v3  ;;  %v18994_v52 = vmov 0  }
 0x71b   : > { %8152 = vmatprep.subr.bf16.mxu1 %v18994_v52  ;;  %9652 = vmatprep.subr.bf16.mxu0 %v18994_v52 }
 0x71c   : > { %8153 = vmatpush1.bf16.msra.mxu1 %v11718_v54 }
 0x71d   : > { %8154 = vmatprep.subr.bf16.mxu1 %v18994_v52 }
 0x723   : > { %v11901_v18 = vpop.eup %11900 }
 0x724   : > { %v5697_v48 = vmul.f32 %v11901_v18, %v10664_v1 }
 0x726   : > { %v15464_v21 = vrot.slane %v5697_v48, %v19540_v35  ;;  %v18993_v48 = vshrl.u32 %v15546_v47, 16 }
 0x728   : > { %v5704_v38 = vmul.f32 %v15464_v21, %v5661_v0  ;;  %v5705_v33 = vmul.f32 %v15464_v21, %v5662_v45  ;;  %v5702_v4 = vmul.f32 %v15464_v21, %v5659_v24  ;;  %v5703_v31 = vmul.f32 %v15464_v21, %v5660_v41 }
 0x729   : > { %v5708_v1 = vmul.f32 %v15464_v21, %v5665_v16  ;;  %v5709_v18 = vmul.f32 %v15464_v21, %v5666_v36  ;;  %v5706_v58 = vmul.f32 %v15464_v21, %v5663_v51  ;;  %v5707_v24 = vmul.f32 %v15464_v21, %v5664_v29 }
 0x72a   : > { %v15536_v44 = vadd.f32 %v15505_v50, %v5704_v38  ;;  %v15539_v7 = vadd.f32 %v15505_v50, %v5705_v33  ;;  %v15561_v41 = vrot.slane %v18992_v26, 4  ;;  %v15566_v45 = vadd.f32 %v15505_v50, %v5702_v4 }
 0x72b   : > { %v15569_v51 = vadd.f32 %v15505_v50, %v5703_v31  ;;  %v15573_v16 = vrot.slane %v18991_v28, 5  ;;  %v5710_v29 = vmul.f32 %v15464_v21, %v5667_v53  ;;  %v5711_v36 = vmul.f32 %v15464_v21, %v5668_v56 }
 0x72c   : > { %v10668_v43 = vmul.f32 -1.442695, %v15536_v44  ;;  %v10669_v2 = vmul.f32 -1.442695, %v15539_v7  ;;  %19543 = vst [vmem:[#allocation29_spill] sm:$0xff] %v15561_v41  ;;  %v15578_v38 = vadd.f32 %v15505_v50, %v5708_v1  ;;  %v15581_v33 = vadd.f32 %v15505_v50, %v5709_v18 }
 0x72d   : > { %19544 = vst [vmem:[#allocation22_spill] sm:$0xff] %v15573_v16  ;;  %v5712_v4 = vmul.f32 %v15464_v21, %v5669_v63  ;;  %v5714_v31 = vmul.f32 %v15464_v21, %v5671_v42  ;;  %v5715_v35 = vmul.f32 %v15464_v21, %v5672_v34  ;;  %v5716_v53 = vmul.f32 %v15464_v21, %v5673_v27 }
 0x72e   : > { %11902 = vpow2.f32 %v10668_v43  ;;  %v5713_v43 = vmul.f32 %v15464_v21, %v5670_v19  ;;  %v5717_v56 = vmul.f32 %v15464_v21, %v5674_v55  ;;  %v15593_v1 = vadd.f32 %v15505_v50, %v5707_v24 }
 0x72f   : > { %11904 = vpow2.f32 %v10669_v2  ;;  %v15587_v2 = vadd.f32 %v15505_v50, %v5706_v58  ;;  %v5718_v18 = vmul.f32 %v15464_v21, %v5675_v10  ;;  %v5719_v63 = vmul.f32 %v15464_v21, %v5676_v8 }
 0x730   : > { %v10666_v19 = vmul.f32 -1.442695, %v15566_v45  ;;  %v10667_v42 = vmul.f32 -1.442695, %v15569_v51  ;;  %v5720_v58 = vmul.f32 %v15464_v21, %v5677_v25  ;;  %v5721_v28 = vmul.f32 %v15464_v21, %v5678_v40 }
 0x731   : > { %v10672_v34 = vmul.f32 -1.442695, %v15578_v38  ;;  %v10673_v27 = vmul.f32 -1.442695, %v15581_v33  ;;  %v5722_v55 = vmul.f32 %v15464_v21, %v5679_v17  ;;  %v15605_v24 = vadd.f32 %v15505_v50, %v5710_v29 }
 0x732   : > { %11906 = vpow2.f32 %v10666_v19  ;;  %v10670_v10 = vmul.f32 -1.442695, %v15587_v2  ;;  %v5723_v8 = vmul.f32 %v15464_v21, %v5680_v20  ;;  %v15610_v26 = vadd.f32 %v15505_v50, %v5711_v36 }
 0x733   : > { %11908 = vpow2.f32 %v10667_v42  ;;  %v10671_v25 = vmul.f32 -1.442695, %v15593_v1  ;;  %v5724_v40 = vmul.f32 %v15464_v21, %v5681_v12  ;;  %v5725_v0 = vmul.f32 %v15464_v21, %v5682_v57 }
 0x734   : > { %v15616_v17 = vadd.f32 %v15505_v50, %v5712_v4  ;;  %11910 = vpow2.f32 %v10672_v34  ;;  %v5726_v20 = vmul.f32 %v15464_v21, %v5683_v11  ;;  %v5727_v36 = vmul.f32 %v15464_v21, %v5684_v5 }
 0x735   : > { %v15627_v19 = vadd.f32 %v15505_v50, %v5713_v43  ;;  %11912 = vpow2.f32 %v10673_v27  ;;  %v15630_v4 = vadd.f32 %v15505_v50, %v5714_v31  ;;  %v10674_v42 = vmul.f32 -1.442695, %v15605_v24 }
 0x736   : > { %11914 = vpow2.f32 %v10670_v10  ;;  %v5728_v32 = vmul.f32 %v15464_v21, %v5685_v13  ;;  %v10675_v11 = vmul.f32 -1.442695, %v15610_v26  ;;  %v5729_v5 = vmul.f32 %v15464_v21, %v5686_v30 }
 0x737   : > { %11916 = vpow2.f32 %v10671_v25  ;;  %v5730_v43 = vmul.f32 %v15464_v21, %v5687_v14  ;;  %v10676_v31 = vmul.f32 -1.442695, %v15616_v17  ;;  %v5731_v39 = vmul.f32 %v15464_v21, %v5688_v15 }
 0x738   : > { %v11903_v29 = vpop.eup %11902  ;;  %v15655_v61 = vmul.f32 %v15464_v21, %v5689_v23  ;;  %v10677_v13 = vmul.f32 -1.442695, %v15627_v19  ;;  %v15662_v49 = vmul.f32 %v15464_v21, %v5690_v9  ;;  %v10678_v30 = vmul.f32 -1.442695, %v15630_v4 }
 0x739   : > { %v11905_v12 = vpop.eup %11904  ;;  %v5870_v57 = vadd.f32 1.0, %v11903_v29  ;;  %v15669_v62 = vadd.f32 %v15505_v50, %v5715_v35  ;;  %v15672_v14 = vadd.f32 %v15505_v50, %v5716_v53  ;;  %v15675_v15 = vadd.f32 %v15505_v50, %v5717_v56 }
 0x73a   : > { %v5871_v6 = vadd.f32 1.0, %v11905_v12  ;;  %v15680_v21 = vadd.f32 %v15505_v50, %v5718_v18  ;;  %v15683_v23 = vadd.f32 %v15505_v50, %v5719_v63  ;;  %v15686_v9 = vadd.f32 %v15505_v50, %v5720_v58  ;;  %v11721_v18 = vld [vmem:[%s18903_s11 + $0x68] sm:$0xff]  }
 0x73b   : > { %11918 = vrcp.f32 %v5870_v57  ;;  %v15689_v53 = vadd.f32 %v15505_v50, %v5721_v28  ;;  %v15692_v56 = vadd.f32 %v15505_v50, %v5722_v55  ;;  %v15699_v58 = vadd.f32 %v15505_v50, %v5723_v8  ;;  %8155 = vmatpush1.bf16.msra.mxu1 %v11721_v18 }
 0x73c   : > { %11920 = vrcp.f32 %v5871_v6  ;;  %v11907_v3 = vpop.eup %11906  ;;  %v15702_v27 = vadd.f32 %v15505_v50, %v5724_v40  ;;  %v15705_v55 = vadd.f32 %v15505_v50, %v5725_v0  ;;  %v10679_v25 = vmul.f32 -1.442695, %v15669_v62  ;;  %8156 = vmatprep.subr.bf16.mxu1 %v18994_v52 }
 0x73d   : > { %11922 = vpow2.f32 %v10674_v42  ;;  %v11909_v35 = vpop.eup %11908  ;;  %v5868_v34 = vadd.f32 1.0, %v11907_v3  ;;  %v15711_v57 = vadd.f32 %v15505_v50, %v5726_v20  ;;  %v10680_v8 = vmul.f32 -1.442695, %v15672_v14  ;;  %v11724_v20 = vld [vmem:[%s18903_s11 + $0x70] sm:$0xff]  }
 0x73e   : > { %11924 = vpow2.f32 %v10675_v11  ;;  %v11911_v63 = vpop.eup %11910  ;;  %v5869_v28 = vadd.f32 1.0, %v11909_v35  ;;  %v15717_v6 = vadd.f32 %v15505_v50, %v5727_v36  ;;  %v15720_v0 = vadd.f32 %v15505_v50, %v5728_v32 }
 0x73f   : > { %11926 = vpow2.f32 %v10676_v31  ;;  %v11913_v10 = vpop.eup %11912  ;;  %v5874_v29 = vadd.f32 1.0, %v11911_v63  ;;  %19545 = vst [vmem:[#allocation28_spill] sm:$0xff] %v15711_v57  ;;  %v10681_v11 = vmul.f32 -1.442695, %v15675_v15  ;;  %v10682_v36 = vmul.f32 -1.442695, %v15680_v21  ;;  %8157 = vmatpush1.bf16.msra.mxu1 %v11724_v20 }
 0x740   : > { %11928 = vpow2.f32 %v10677_v13  ;;  %v15708_v12 = vpop.eup %11914  ;;  %v5875_v40 = vadd.f32 1.0, %v11913_v10  ;;  %19546 = vst [vmem:[#allocation45_spill] sm:$0xff] %v15717_v6  ;;  %19547 = vst [vmem:[#allocation43_spill] sm:$0xff] %v15720_v0  ;;  %v15728_v13 = vadd.f32 %v15505_v50, %v5729_v5  ;;  %v15736_v3 = vadd.f32 %v15505_v50, %v5731_v39  ;;  %8158 = vmatprep.subr.bf16.mxu1 %v18994_v52 }
 0x741   : > { %11930 = vpow2.f32 %v10678_v30  ;;  %v15714_v42 = vpop.eup %11916  ;;  %v15731_v30 = vadd.f32 %v15505_v50, %v5730_v43  ;;  %v10683_v35 = vmul.f32 -1.442695, %v15683_v23  ;;  %v15742_v5 = vadd.f32 %v15505_v50, %v15655_v61 }
 0x742   : > { %11932 = vrcp.f32 %v5868_v34  ;;  %19548 = vst [vmem:[#allocation44_spill] sm:$0xff] %v15728_v13  ;;  %19550 = vst [vmem:[#allocation46_spill] sm:$0xff] %v15736_v3  ;;  %v10684_v43 = vmul.f32 -1.442695, %v15686_v9  ;;  %v10685_v39 = vmul.f32 -1.442695, %v15689_v53 }
 0x743   : > { %11934 = vrcp.f32 %v5869_v28  ;;  %19549 = vst [vmem:[#allocation47_spill] sm:$0xff] %v15731_v30  ;;  %19551 = vst [vmem:[#allocation48_spill] sm:$0xff] %v15742_v5  ;;  %v10691_v20 = vmul.f32 -1.442695, %v15717_v6 }
 0x744   : > { %11936 = vrcp.f32 %v5874_v29  ;;  %v10687_v29 = vmul.f32 -1.442695, %v15699_v58 }
 0x745   : > { %v11919_v31 = vpop.eup %11918  ;;  %11938 = vrcp.f32 %v5875_v40  ;;  %v10690_v40 = vmul.f32 -1.442695, %v15711_v57 }
 0x746   : > { %v11921_v32 = vpop.eup %11920  ;;  %v5966_v54 = vmul.f32 %v11919_v31, %v15536_v44  ;;  %11940 = vpow2.f32 %v10679_v25  ;;  %v15747_v44 = vadd.f32 %v15505_v50, %v15662_v49  ;;  %v10686_v25 = vmul.f32 -1.442695, %v15692_v56 }
 0x747   : > { %v11923_v34 = vpop.eup %11922  ;;  %v5967_v18 = vmul.f32 %v11921_v32, %v15539_v7  ;;  %11942 = vpow2.f32 %v10680_v8  ;;  %v11727_v7 = vld [vmem:[%s18903_s11 + $0x78] sm:$0xff]   ;;  %v10688_v50 = vmul.f32 -1.442695, %v15702_v27  ;;  %v10689_v49 = vmul.f32 -1.442695, %v15705_v55 }
 0x748   : > { %v11925_v63 = vpop.eup %11924  ;;  %v11114_v28 = vpack.c.bf16 %v5966_v54, %v5966_v54  ;;  %19552 = vst [vmem:[#allocation50_spill] sm:$0xff] %v15747_v44  ;;  %11944 = vpow2.f32 %v10681_v11  ;;  %v10692_v31 = vmul.f32 -1.442695, %v15720_v0  ;;  %8159 = vmatpush1.bf16.msra.mxu1 %v11727_v7  ;;  %v10694_v54 = vmul.f32 -1.442695, %v15731_v30 }
 0x749   : > { %v11927_v61 = vpop.eup %11926  ;;  %v11115_v10 = vpack.c.bf16 %v5967_v18, %v5967_v18  ;;  %11946 = vpow2.f32 %v10682_v36  ;;  %v10693_v36 = vmul.f32 -1.442695, %v15728_v13  ;;  %v15768_v18 = vmul.f32 -1.442695, %v15736_v3  ;;  %8160 = vmatprep.subr.bf16.mxu1 %v18994_v52 }
 0x74a   : > { %v11929_v8 = vpop.eup %11928  ;;  %6128 = vst.msk [vmem:[#allocation3 + $0x30] sm:$0xf] %vm6125_vm3, %v11114_v28  ;;  %11948 = vpow2.f32 %v10683_v35  ;;  %v15772_v35 = vrot.slane %v18993_v48, 4  ;;  %v11730_v28 = vld [vmem:[%s18903_s11 + $0x80] sm:$0xff]   ;;  %v15780_v7 = vmul.f32 -1.442695, %v15742_v5 }
 0x74b   : > { %v15760_v11 = vpop.eup %11930  ;;  %6129 = vst.msk [vmem:[#allocation3 + $0x34] sm:$0xf] %vm6125_vm3, %v11115_v10  ;;  %11950 = vpow2.f32 %v10684_v43  ;;  %v15783_v16 = vmul.f32 -1.442695, %v15747_v44  ;;  %v15787_v52 = vadd.f32 1.0, %v15708_v12  ;;  %v19554_v12 = vmov 0  }
 0x74c   : > { %v11933_v32 = vpop.eup %11932  ;;  %11952 = vpow2.f32 %v10685_v39  ;;  %19553 = vst [vmem:[#allocation51_spill] sm:$0xff] %v15772_v35  ;;  %v15790_v35 = vadd.f32 1.0, %v15714_v42  ;;  %8161 = vmatpush1.bf16.msra.mxu1 %v11730_v28  ;;  %v11733_v42 = vld [vmem:[%s18903_s11 + $0x88] sm:$0xff]  }
 0x74d   : > { %v11935_v10 = vpop.eup %11934  ;;  %v5964_v43 = vmul.f32 %v11933_v32, %v15566_v45  ;;  %11954 = vpow2.f32 %v10686_v25  ;;  %v15793_v32 = vadd.f32 1.0, %v11923_v34  ;;  %8162 = vmatprep.subr.bf16.mxu1 %v19554_v12  ;;  %v15803_v34 = vadd.f32 1.0, %v11927_v61 }
 0x74e   : > { %v11937_v39 = vpop.eup %11936  ;;  %v5965_v48 = vmul.f32 %v11935_v10, %v15569_v51  ;;  %11956 = vpow2.f32 %v10687_v29  ;;  %v15796_v51 = vadd.f32 1.0, %v11925_v63 }
 0x74f   : > { %v11939_v41 = vpop.eup %11938  ;;  %v11112_v46 = vpack.c.bf16 %v5964_v43, %v5964_v43  ;;  %v5970_v45 = vmul.f32 %v11937_v39, %v15578_v38  ;;  %11958 = vpow2.f32 %v10688_v50 }
 0x750   : > { %v11941_v47 = vpop.eup %11940  ;;  %v11113_v25 = vpack.c.bf16 %v5965_v48, %v5965_v48  ;;  %v5971_v22 = vmul.f32 %v11939_v41, %v15581_v33  ;;  %11960 = vpow2.f32 %v10689_v49  ;;  %v15805_v48 = vadd.f32 1.0, %v11929_v8  ;;  %8163 = vmatpush1.bf16.msra.mxu1 %v11733_v42 }
 0x751   : > { %v11943_v29 = vpop.eup %11942  ;;  %v7100_v10 = vld [vmem:[#allocation3 + $0x30] sm:$0xf]  ;;  %6126 = vst.msk [vmem:[#allocation3 + $0x1c] sm:$0xf] %vm6125_vm3, %v11112_v46  ;;  %v11118_v38 = vpack.c.bf16 %v5970_v45, %v5970_v45  ;;  %11962 = vpow2.f32 %v10690_v40  ;;  %8164 = vmatprep.subr.bf16.mxu1 %v19554_v12 }
 0x752   : > { %v11945_v41 = vpop.eup %11944  ;;  %v7101_v33 = vld [vmem:[#allocation3 + $0x34] sm:$0xf]  ;;  %v7187_v63 = vshrl.u32 %v7100_v10, 16  ;;  %v7190_v50 = vshll.u32 %v7100_v10, 16  ;;  %6127 = vst.msk [vmem:[#allocation3 + $0x20] sm:$0xf] %vm6125_vm3, %v11113_v25  ;;  %v11119_v49 = vpack.c.bf16 %v5971_v22, %v5971_v22  ;;  %11964 = vpow2.f32 %v10691_v20 }
 0x753   : > { %v11947_v28 = vpop.eup %11946  ;;  %v7196_v43 = vshrl.u32 %v7101_v33, 16  ;;  %v7199_v39 = vshll.u32 %v7101_v33, 16  ;;  %v10827_v44 = vcombine.low %v7100_v10, %v7101_v33  ;;  %6132 = vst.msk [vmem:[#allocation3 + $0x58] sm:$0xf] %vm6125_vm3, %v11118_v38  ;;  %11966 = vpow2.f32 %v10692_v31  ;;  %v11736_v22 = vld [vmem:[%s18903_s11 + $0x90] sm:$0xff]  }
 0x754   : > { %v11949_v46 = vpop.eup %11948  ;;  %v15809_v61 = vrot.slane %v7187_v63, 7  ;;  %v15811_v8 = vrot.slane %v7187_v63, 4  ;;  %v15813_v40 = vrot.slane %v7190_v50, 5  ;;  %6133 = vst.msk [vmem:[#allocation3 + $0x5c] sm:$0xf] %vm6125_vm3, %v11119_v49  ;;  %11968 = vpow2.f32 %v10693_v36  ;;  %8165 = vmatpush1.bf16.msra.mxu1 %v11736_v22 }
 0x755   : > { %v11951_v20 = vpop.eup %11950  ;;  %v7198_v45 = vrot.slane %v7196_v43, 7  ;;  %v15820_v31 = vrot.slane %v7199_v39, 5  ;;  %v15822_v25 = vrot.slane %v7196_v43, 4  ;;  %7865 = vrot.lane.b32.xlu1 %v10827_v44, %s19560_s0  ;;  %11970 = vpow2.f32 %v10694_v54  ;;  %8166 = vmatprep.subr.bf16.mxu1 %v19554_v12 }
 0x756   : > { %19555 = vst [vmem:[#allocation49_spill] sm:$0xff] %v15809_v61  ;;  %19556 = vst [vmem:[#allocation52_spill] sm:$0xff] %v15811_v8  ;;  %v11953_v42 = vpop.eup %11952  ;;  %v15826_v10 = vor.u32 %v7190_v50, %v15809_v61  ;;  %11972 = vpow2.f32 %v15768_v18  ;;  %v15830_v36 = vadd.f32 1.0, %v15760_v11  ;;  %v15832_v38 = vadd.f32 1.0, %v11941_v47 }
 0x757   : > { %19557 = vst [vmem:[#allocation53_spill] sm:$0xff] %v15813_v40  ;;  %19558 = vst [vmem:[#allocation54_spill] sm:$0xff] %v15820_v31  ;;  %v11955_v33 = vpop.eup %11954  ;;  %v15834_v63 = vor.u32 %v7199_v39, %v7198_v45  ;;  %11974 = vpow2.f32 %v15780_v7  ;;  %v15839_v44 = vadd.f32 1.0, %v11943_v29  ;;  %v15844_v47 = vadd.f32 1.0, %v11945_v41  ;;  %v11738_v7 = vld [vmem:[%s18903_s11 + $0x98] sm:$0xff]  }
 0x758   : > { %19559 = vst [vmem:[#allocation57_spill] sm:$0xff] %v15822_v25  ;;  %19561 = vst [vmem:[#allocation55_spill] sm:$0xff] %v15826_v10  ;;  %v11957_v54 = vpop.eup %11956  ;;  %v7096_v50 = vld [vmem:[#allocation3 + $0x1c] sm:$0xf]  ;;  %11976 = vpow2.f32 %v15783_v16  ;;  %v15846_v11 = vadd.f32 1.0, %v11947_v28  ;;  %v15853_v45 = vadd.f32 1.0, %v11949_v46  ;;  %8167 = vmatpush1.bf16.msra.mxu1 %v11738_v7 }
 0x759   : > { %19562 = vst [vmem:[#allocation56_spill] sm:$0xff] %v15834_v63  ;;  %v11959_v29 = vpop.eup %11958  ;;  %v7097_v43 = vld [vmem:[#allocation3 + $0x20] sm:$0xf]  ;;  %v7165_v39 = vshrl.u32 %v7096_v50, 16  ;;  %v7168_v22 = vshll.u32 %v7096_v50, 16  ;;  %11978 = vrcp.f32 %v15787_v52  ;;  %v11739_v10 = vld [vmem:[%s18903_s11 + $0xa0] sm:$0xff]   ;;  %8168 = vmatprep.subr.bf16.mxu1 %v19554_v12 }
 0x75a   : > { %v11961_v18 = vpop.eup %11960  ;;  %v7174_v16 = vshrl.u32 %v7097_v43, 16  ;;  %v7177_v41 = vshll.u32 %v7097_v43, 16  ;;  %v10826_v49 = vcombine.low %v7096_v50, %v7097_v43  ;;  %v15855_v28 = vld [vmem:[#allocation3 + $0x58] sm:$0xf]  ;;  %11980 = vrcp.f32 %v15790_v35 }
 0x75b   : > { %19563 = vst [vmem:[#allocation60_spill] sm:$0xff] %v15855_v28  ;;  %v11963_v63 = vpop.eup %11962  ;;  %v15861_v61 = vrot.slane %v7165_v39, 7  ;;  %v7511_v31 = vrot.slane %v7165_v39, 4  ;;  %v7512_v25 = vrot.slane %v7168_v22, 5  ;;  %v15863_v52 = vld [vmem:[#allocation3 + $0x5c] sm:$0xf]  ;;  %11982 = vrcp.f32 %v15803_v34 }
 0x75c   : > { %19564 = vst [vmem:[#allocation59_spill] sm:$0xff] %v15863_v52  ;;  %v11965_v8 = vpop.eup %11964  ;;  %v7176_v50 = vrot.slane %v7174_v16, 7  ;;  %v7515_v43 = vrot.slane %v7177_v41, 5  ;;  %v7517_v40 = vrot.slane %v7174_v16, 4  ;;  %7863 = vrot.lane.b32.xlu0 %v10826_v49, %s19560_s0  ;;  %v19016_v39 = vshrl.u32 %v15863_v52, 16  ;;  %8169 = vmatpush1.bf16.msra.mxu1 %v11739_v10  ;;  %v11742_v34 = vld [vmem:[%s18903_s11 + $0xb0] sm:$0xff]  }
 0x75d   : > { %v11967_v5 = vpop.eup %11966  ;;  %v15870_v3 = vor.u32 %v7168_v22, %v15861_v61  ;;  %v15873_v30 = vadd.f32 1.0, %v11951_v20  ;;  %v15875_v46 = vadd.f32 1.0, %v11953_v42  ;;  %v7513_v0 = vor.u32 %v7512_v25, %v7511_v31  ;;  %8170 = vmatprep.subr.bf16.mxu1 %v19554_v12 }
 0x75e   : > { %v11969_v7 = vpop.eup %11968  ;;  %v15877_v13 = vor.u32 %v7177_v41, %v7176_v50  ;;  %v7518_v16 = vor.u32 %v7517_v40, %v7515_v43  ;;  %v19566_v6 = vshrl.u32 %v15855_v28, 16  ;;  %v19567_v22 = vshll.u32 %v15855_v28, 16  ;;  %v11740_v40 = vld [vmem:[%s18903_s11 + $0xa8] sm:$0xff]  }
 0x75f   : > { %19565 = vst [vmem:[#allocation62_spill] sm:$0xff] %v15870_v3  ;;  %v11971_v35 = vpop.eup %11970  ;;  %v15890_v20 = vrot.slane %v19016_v39, 4  ;;  %v10829_v42 = vcombine.low %v15855_v28, %v15863_v52  ;;  %v15900_v25 = vadd.f32 1.0, %v11955_v33  ;;  %v15902_v41 = vadd.f32 1.0, %v11957_v54  ;;  %v15908_v39 = vld [vmem:[#allocation3 + $0x30] sm:$0xf] }
 0x760   : > { %v15882_v57 = vrot.slane %v19566_v6, 4  ;;  %v15886_v3 = vrot.slane %v19567_v22, 5  ;;  %v11741_v6 = vld [vmem:[%s18903_s11 + $0xc0] sm:$0xff]   ;;  %v11973_v31 = vpop.eup %11972  ;;  %v15904_v50 = vadd.f32 1.0, %v11959_v29  ;;  %v15906_v22 = vadd.f32 1.0, %v11961_v18  ;;  %v11743_v54 = vld [vmem:[%s18903_s11 + $0xc8] sm:$0xff]   ;;  %8171 = vmatpush1.bf16.msra.mxu1 %v11740_v40 }
 0x761   : > { %19568 = vst [vmem:[#allocation58_spill] sm:$0xff] %v15890_v20  ;;  %v11975_v10 = vpop.eup %11974  ;;  %7869 = vrot.lane.b32.xlu1 %v10829_v42, %s19560_s0  ;;  %v15912_v49 = vadd.f32 1.0, %v11963_v63  ;;  %v15914_v28 = vadd.f32 1.0, %v11965_v8  ;;  %v15916_v20 = vadd.f32 1.0, %v11967_v5  ;;  %v15918_v33 = vadd.f32 1.0, %v11969_v7  ;;  %9653 = vmatpush1.bf16.msra.mxu0 %v11741_v6 }
 0x762   : > { %v11977_v18 = vpop.eup %11976  ;;  %v15923_v29 = vadd.f32 1.0, %v11971_v35  ;;  %v7514_v52 = vrot.slane %v7513_v0, 4  ;;  %v7519_v42 = vrot.slane %v7518_v16, 4  ;;  %v15926_v63 = vld [vmem:[#allocation3 + $0x34] sm:$0xf]  ;;  %9654 = vmatprep.subr.bf16.mxu0 %v19554_v12  ;;  %v15929_v8 = vadd.f32 1.0, %v11973_v31  ;;  %8172 = vmatprep.subr.bf16.mxu1 %v19554_v12 }
 0x763   : > { %v11979_v5 = vpop.eup %11978  ;;  %11984 = vrcp.f32 %v15805_v48  ;;  %v19029_v6 = vshrl.u32 %v15926_v63, 16  ;;  %v15948_v7 = vld [vmem:[#allocation3 + $0x20] sm:$0xf] }
 0x764   : > { %v11981_v0 = vpop.eup %11980  ;;  %v5968_v35 = vmul.f32 %v11979_v5, %v15587_v2  ;;  %11986 = vrcp.f32 %v15793_v32  ;;  %v7516_v16 = vsel %vm13341_vm13, %v7514_v52, %v7515_v43  ;;  %v7524_v48 = vsel %vm13341_vm13, %v7519_v42, %v15458_v59  ;;  %19569 = vst [vmem:[#allocation63_spill] sm:$0xff] %v15948_v7  ;;  %v11745_v2 = vld [vmem:[%s18903_s11 + $0xd0] sm:$0xff]   ;;  %v15957_v43 = vld [vmem:[#allocation3 + $0x1c] sm:$0xf]  ;;  %8173 = vmatpush1.bf16.msra.mxu1 %v11742_v34  ;;  %v11744_v5 = vld [vmem:[%s18903_s11 + $0xb8] sm:$0xff]  }
 0x765   : > { %v5969_v40 = vmul.f32 %v11981_v0, %v15593_v1  ;;  %11988 = vrcp.f32 %v15796_v51  ;;  %v10842_v31 = vcombine.low %v7516_v16, %v7524_v48  ;;  %9655 = vmatpush1.bf16.msra.mxu0 %v11743_v54  ;;  %v19028_v59 = vshll.u32 %v15926_v63, 16  ;;  %19571 = vst [vmem:[#allocation61_spill] sm:$0xff] %v15957_v43  ;;  %8174 = vmatprep.subr.bf16.mxu1 %v19554_v12 }
 0x766   : > { %v11116_v32 = vpack.c.bf16 %v5968_v35, %v5968_v35  ;;  %11990 = vrcp.f32 %v15830_v36  ;;  %v19570_v52 = vshrl.u32 %v15908_v39, 16  ;;  %9656 = vmatprep.subr.bf16.mxu0 %v19554_v12  ;;  %v19572_v54 = vshll.u32 %v15908_v39, 16 }
 0x767   : > { %v11117_v51 = vpack.c.bf16 %v5969_v40, %v5969_v40  ;;  %11992 = vrcp.f32 %v15832_v38  ;;  %10894 = vmatprep.mubr.msk.bf16.mxu1 %vm2565_vm1, %v10842_v31  ;;  %v9017_v36 = vrot.slane %v19029_v6, 4  ;;  %v15970_v0 = vadd.f32 1.0, %v11975_v10  ;;  %v15982_v10 = vld [vmem:[#allocation3 + $0x30] sm:$0xf] }
 0x768   : > { %v9011_v1 = vrot.slane %v19570_v52, 4  ;;  %v9012_v42 = vrot.slane %v19572_v54, 5  ;;  %6130 = vst.msk [vmem:[#allocation3 + $0x44] sm:$0xf] %vm6125_vm3, %v11116_v32  ;;  %11994 = vrcp.f32 %v15839_v44  ;;  %v9015_v38 = vrot.slane %v19028_v59, 5  ;;  %19573 = vst [vmem:[#allocation65_spill] sm:$0xff] %v15982_v10  ;;  %8175 = vmatpush1.bf16.msra.mxu1 %v11744_v5 }
 0x769   : > { %v19021_v35 = vshrl.u32 %v15948_v7, 16  ;;  %6131 = vst.msk [vmem:[#allocation3 + $0x48] sm:$0xf] %vm6125_vm3, %v11117_v51  ;;  %v15978_v34 = vadd.f32 1.0, %v11977_v18  ;;  %11996 = vrcp.f32 %v15844_v47  ;;  %v19023_v48 = vshrl.u32 %v15957_v43, 16  ;;  %9657 = vmatpush1.bf16.msra.mxu0 %v11745_v2  ;;  %v11747_v44 = vld [vmem:[%s18903_s11 + $0xd8] sm:$0xff]   ;;  %8433 = vmatprep.subr.bf16.mxu1 %v19554_v12 }
 0x76a   : > { %v9013_v16 = vor.u32 %v9012_v42, %v9011_v1  ;;  %11998 = vrcp.f32 %v15846_v11  ;;  %v9018_v40 = vor.u32 %v9017_v36, %v9015_v38  ;;  %v19022_v18 = vshll.u32 %v15957_v43, 16  ;;  %9658 = vmatprep.subr.bf16.mxu0 %v19554_v12  ;;  %v16000_v52 = vld [vmem:[#allocation3 + $0x34] sm:$0xf]  ;;  %v11983_v11 = vpop.eup %11982  ;;  %v19586_v59 = vld [vmem:[#allocation46_spill] sm:$0xff] }
 0x76b   : > { %12000 = vrcp.f32 %v15853_v45  ;;  %v15994_v32 = vrot.slane %v19021_v35, 4  ;;  %v15998_v2 = vrot.slane %v19023_v48, 4  ;;  %19576 = vst [vmem:[#allocation64_spill] sm:$0xff] %v16000_v52  ;;  %v19024_v45 = vshrl.u32 %v15982_v10, 16 }
 0x76c   : > { %v9014_v47 = vrot.slane %v9013_v16, 4  ;;  %12002 = vrcp.f32 %v15873_v30  ;;  %v9019_v1 = vrot.slane %v9018_v40, 4  ;;  %v16005_v51 = vrot.slane %v19022_v18, 5  ;;  %v11748_v30 = vld [vmem:[%s18903_s11 + $0xe0] sm:$0xff]  }
 0x76d   : > { %19574 = vst [vmem:[#allocation66_spill] sm:$0xff] %v15994_v32  ;;  %19575 = vst [vmem:[#allocation69_spill] sm:$0xff] %v15998_v2  ;;  %v11985_v54 = vpop.eup %11984  ;;  %v5974_v42 = vmul.f32 %v11983_v11, %v15616_v17  ;;  %12004 = vrcp.f32 %v15875_v46  ;;  %9659 = vmatpush1.bf16.msra.mxu0 %v11747_v44 }
 0x76e   : > { %19577 = vst [vmem:[#allocation68_spill] sm:$0xff] %v16005_v51  ;;  %v9016_v36 = vsel %vm13341_vm13, %v9014_v47, %v9015_v38  ;;  %v11987_v16 = vpop.eup %11986  ;;  %v5975_v40 = vmul.f32 %v11985_v54, %v15627_v19  ;;  %12006 = vrcp.f32 %v15900_v25  ;;  %v9024_v17 = vsel %vm13341_vm13, %v9019_v1, %v15460_v60  ;;  %9660 = vmatprep.subr.bf16.mxu0 %v19554_v12 }
 0x76f   : > { %v11989_v38 = vpop.eup %11988  ;;  %v16024_v47 = vld [vmem:[#allocation3 + $0x44] sm:$0xf]  ;;  %v11122_v44 = vpack.c.bf16 %v5974_v42, %v5974_v42  ;;  %12008 = vrcp.f32 %v15902_v41  ;;  %v5972_v11 = vmul.f32 %v11987_v16, %v15605_v24  ;;  %v10986_v35 = vcombine.low %v9016_v36, %v9024_v17 }
 0x770   : > { %v11991_v19 = vpop.eup %11990  ;;  %v16028_v54 = vld [vmem:[#allocation3 + $0x48] sm:$0xf]  ;;  %v19041_v25 = vshrl.u32 %v16024_v47, 16  ;;  %v19039_v60 = vshll.u32 %v16024_v47, 16  ;;  %v11123_v1 = vpack.c.bf16 %v5975_v40, %v5975_v40  ;;  %12010 = vrcp.f32 %v15904_v50 }
 0x771   : > { %v11993_v18 = vpop.eup %11992  ;;  %v19040_v48 = vshrl.u32 %v16028_v54, 16  ;;  %v10828_v42 = vcombine.low %v16024_v47, %v16028_v54  ;;  %6136 = vst.msk [vmem:[#allocation3 + $0x80] sm:$0xf] %vm6125_vm3, %v11122_v44  ;;  %12012 = vrcp.f32 %v15906_v22  ;;  %11038 = vmatprep.mubr.msk.bf16.mxu0 %vm2565_vm1, %v10986_v35  ;;  %9661 = vmatpush1.bf16.msra.mxu0 %v11748_v30  ;;  %v5973_v16 = vmul.f32 %v11989_v38, %v15610_v26 }
 0x772   : > { %v11995_v41 = vpop.eup %11994  ;;  %v16043_v50 = vrot.slane %v19041_v25, 4  ;;  %6137 = vst.msk [vmem:[#allocation3 + $0x84] sm:$0xf] %vm6125_vm3, %v11123_v1  ;;  %12014 = vrcp.f32 %v15912_v49  ;;  %9662 = vmatprep.subr.bf16.mxu0 %v19554_v12  ;;  %v16051_v35 = vrot.slane %v19039_v60, 5  ;;  %v11120_v30 = vpack.c.bf16 %v5972_v11, %v5972_v11  ;;  %v11749_v49 = vld [vmem:[%s18903_s11 + $0xe8] sm:$0xff]  }
 0x773   : > { %v11997_v22 = vpop.eup %11996  ;;  %7867 = vrot.lane.b32.xlu0 %v10828_v42, %s19560_s0  ;;  %12016 = vrcp.f32 %v15914_v28  ;;  %v5976_v40 = vmul.f32 %v11991_v19, %v15630_v4  ;;  %v11121_v26 = vpack.c.bf16 %v5973_v16, %v5973_v16  ;;  %v5977_v38 = vmul.f32 %v11993_v18, %v15669_v62 }
 0x774   : > { %v11999_v17 = vpop.eup %11998  ;;  %12018 = vrcp.f32 %v15916_v20  ;;  %v5978_v44 = vmul.f32 %v11995_v41, %v15672_v14  ;;  %6134 = vst.msk [vmem:[#allocation3 + $0x6c] sm:$0xf] %vm6125_vm3, %v11120_v30  ;;  %v5979_v28 = vmul.f32 %v11997_v22, %v15675_v15 }
 0x775   : > { %v12001_v1 = vpop.eup %12000  ;;  %12020 = vrcp.f32 %v15918_v33  ;;  %v5980_v4 = vmul.f32 %v11999_v17, %v15680_v21  ;;  %v11124_v11 = vpack.c.bf16 %v5976_v40, %v5976_v40  ;;  %9663 = vmatpush1.bf16.msra.mxu0 %v11749_v49  ;;  %6135 = vst.msk [vmem:[#allocation3 + $0x70] sm:$0xf] %vm6125_vm3, %v11121_v26  ;;  %v11125_v20 = vpack.c.bf16 %v5977_v38, %v5977_v38 }
 0x776   : > { %v12003_v19 = vpop.eup %12002  ;;  %12022 = vrcp.f32 %v15923_v29  ;;  %v5981_v62 = vmul.f32 %v12001_v1, %v15683_v23  ;;  %v11126_v14 = vpack.c.bf16 %v5978_v44, %v5978_v44  ;;  %9664 = vmatprep.subr.bf16.mxu0 %v19554_v12  ;;  %v11127_v18 = vpack.c.bf16 %v5979_v28, %v5979_v28 }
 0x777   : > { %v12005_v33 = vpop.eup %12004  ;;  %12024 = vrcp.f32 %v15929_v8  ;;  %v5982_v15 = vmul.f32 %v12003_v19, %v15686_v9  ;;  %v11128_v21 = vpack.c.bf16 %v5980_v4, %v5980_v4  ;;  %6138 = vst.msk [vmem:[#allocation3 + $0x94] sm:$0xf] %vm6125_vm3, %v11124_v11  ;;  %v16075_v29 = vrot.slane %v19040_v48, 4  ;;  %6139 = vst.msk [vmem:[#allocation3 + $0x98] sm:$0xf] %vm6125_vm3, %v11125_v20 }
 0x778   : > { %v12007_v42 = vpop.eup %12006  ;;  %v16077_v41 = vld [vmem:[#allocation3 + $0x80] sm:$0xf]  ;;  %12026 = vrcp.f32 %v15970_v0  ;;  %v5983_v23 = vmul.f32 %v12005_v33, %v15689_v53  ;;  %v11129_v16 = vpack.c.bf16 %v5981_v62, %v5981_v62  ;;  %6140 = vst.msk [vmem:[#allocation3 + $0xa8] sm:$0xf] %vm6125_vm3, %v11126_v14  ;;  %6141 = vst.msk [vmem:[#allocation3 + $0xac] sm:$0xf] %vm6125_vm3, %v11127_v18 }
 0x779   : > { %v12009_v9 = vpop.eup %12008  ;;  %v16083_v8 = vld [vmem:[#allocation3 + $0x84] sm:$0xf]  ;;  %v19027_v22 = vshrl.u32 %v16077_v41, 16  ;;  %v19026_v30 = vshll.u32 %v16077_v41, 16  ;;  %12028 = vrcp.f32 %v15978_v34  ;;  %v5984_v40 = vmul.f32 %v12007_v42, %v15692_v56  ;;  %6142 = vst.msk [vmem:[#allocation3 + $0xbc] sm:$0xf] %vm6125_vm3, %v11128_v21 }
 0x77a   : > { %v12011_v53 = vpop.eup %12010  ;;  %v19025_v0 = vshrl.u32 %v16083_v8, 16  ;;  %v10831_v49 = vcombine.low %v16077_v41, %v16083_v8  ;;  %v5985_v17 = vmul.f32 %v12009_v9, %v15699_v58  ;;  %6143 = vst.msk [vmem:[#allocation3 + $0xc0] sm:$0xf] %vm6125_vm3, %v11129_v16  ;;  %v16098_v26 = vrot.slane %v19024_v45, 4  ;;  %v11751_v58 = vld [vmem:[%s18903_s11 + $0xf0] sm:$0xff]   ;;  %v19579_v18 = vld [vmem:[#allocation28_spill] sm:$0xff] }
 0x77b   : > { %v12013_v34 = vpop.eup %12012  ;;  %v16103_v38 = vrot.slane %v19027_v22, 4  ;;  %v5986_v44 = vmul.f32 %v12011_v53, %v15702_v27  ;;  %v11130_v1 = vpack.c.bf16 %v5982_v15, %v5982_v15  ;;  %v16111_v4 = vrot.slane %v19026_v30, 5  ;;  %v16114_v11 = vld [vmem:[#allocation3 + $0x6c] sm:$0xf]  ;;  %9665 = vmatpush1.bf16.msra.mxu0 %v11751_v58 }
 0x77c   : > { %19578 = vst [vmem:[#allocation67_spill] sm:$0xff] %v16098_v26  ;;  %v12015_v28 = vpop.eup %12014  ;;  %7873 = vrot.lane.b32.xlu1 %v10831_v49, %s19560_s0  ;;  %v5987_v19 = vmul.f32 %v12013_v34, %v15705_v55  ;;  %v11131_v62 = vpack.c.bf16 %v5983_v23, %v5983_v23  ;;  %v11132_v20 = vpack.c.bf16 %v5984_v40, %v5984_v40  ;;  %v16117_v27 = vld [vmem:[#allocation3 + $0x70] sm:$0xf]  ;;  %v19038_v33 = vshrl.u32 %v16114_v11, 16  ;;  %v19580_v40 = vld [vmem:[#allocation45_spill] sm:$0xff] }
 0x77d   : > { %v12017_v14 = vpop.eup %12016  ;;  %v19034_v15 = vshll.u32 %v16114_v11, 16  ;;  %v5988_v21 = vmul.f32 %v12015_v28, %v19579_v18  ;;  %v11133_v42 = vpack.c.bf16 %v5985_v17, %v5985_v17  ;;  %6144 = vst.msk [vmem:[#allocation3 + $0xd0] sm:$0xf] %vm6125_vm3, %v11130_v1  ;;  %v16125_v9 = vrot.slane %v19025_v0, 4  ;;  %9666 = vmatprep.subr.bf16.mxu0 %v19554_v12  ;;  %v19581_v1 = vld [vmem:[#allocation43_spill] sm:$0xff] }
 0x77e   : > { %v12019_v16 = vpop.eup %12018  ;;  %v19037_v55 = vshrl.u32 %v16117_v27, 16  ;;  %v10830_v23 = vcombine.low %v16114_v11, %v16117_v27  ;;  %v5989_v53 = vmul.f32 %v12017_v14, %v19580_v40  ;;  %6145 = vst.msk [vmem:[#allocation3 + $0xd4] sm:$0xf] %vm6125_vm3, %v11131_v62  ;;  %6146 = vst.msk [vmem:[#allocation3 + $0xe4] sm:$0xf] %vm6125_vm3, %v11132_v20  ;;  %v16137_v34 = vrot.slane %v19038_v33, 4 }
 0x77f   : > { %v12021_v49 = vpop.eup %12020  ;;  %v5990_v58 = vmul.f32 %v12019_v16, %v19581_v1  ;;  %v11134_v28 = vpack.c.bf16 %v5986_v44, %v5986_v44  ;;  %6147 = vst.msk [vmem:[#allocation3 + $0xe8] sm:$0xf] %vm6125_vm3, %v11133_v42  ;;  %v16141_v18 = vld [vmem:[#allocation3 + $0xa8] sm:$0xf]  ;;  %v16145_v62 = vrot.slane %v19034_v15, 5  ;;  %v19583_v20 = vld [vmem:[#allocation44_spill] sm:$0xff]  ;;  %v11135_v45 = vpack.c.bf16 %v5987_v19, %v5987_v19 }
 0x780   : > { %19582 = vst [vmem:[#allocation30_spill] sm:$0xff] %v16141_v18  ;;  %v12023_v14 = vpop.eup %12022  ;;  %7871 = vrot.lane.b32.xlu0 %v10830_v23, %s19560_s0  ;;  %v5991_v40 = vmul.f32 %v12021_v49, %v19583_v20  ;;  %v11136_v24 = vpack.c.bf16 %v5988_v21, %v5988_v21  ;;  %v16149_v31 = vld [vmem:[#allocation3 + $0xac] sm:$0xf]  ;;  %v11752_v44 = vld [vmem:[%s18903_s11 + $0xf8] sm:$0xff]   ;;  %v11137_v0 = vpack.c.bf16 %v5989_v53, %v5989_v53  ;;  %v19031_v22 = vshrl.u32 %v16141_v18, 16 }
 0x781   : > { %19584 = vst [vmem:[#allocation31_spill] sm:$0xff] %v16149_v31  ;;  %v12025_v42 = vpop.eup %12024  ;;  %v19585_v16 = vld [vmem:[#allocation47_spill] sm:$0xff]  ;;  %v11138_v30 = vpack.c.bf16 %v5990_v58, %v5990_v58  ;;  %6148 = vst.msk [vmem:[#allocation3 + $0xf8] sm:$0xf] %vm6125_vm3, %v11134_v28  ;;  %v19030_v21 = vshll.u32 %v16141_v18, 16  ;;  %v19032_v20 = vshrl.u32 %v16149_v31, 16  ;;  %9667 = vmatpush1.bf16.msra.mxu0 %v11752_v44 }
 0x782   : > { %v5992_v1 = vmul.f32 %v12023_v14, %v19585_v16  ;;  %v12027_v23 = vpop.eup %12026  ;;  %v5993_v49 = vmul.f32 %v12025_v42, %v19586_v59  ;;  %v11139_v19 = vpack.c.bf16 %v5991_v40, %v5991_v40  ;;  %6149 = vst.msk [vmem:[#allocation3 + $0xfc] sm:$0xf] %vm6125_vm3, %v11135_v45  ;;  %6150 = vst.msk [vmem:[#allocation3 + $0x10c] sm:$0xf] %vm6125_vm3, %v11136_v24  ;;  %v16162_v6 = vld [vmem:[#allocation3 + $0x94] sm:$0xf]  ;;  %9668 = vmatprep.subr.bf16.mxu0 %v19554_v12 }
 0x783   : > { %v12029_v53 = vpop.eup %12028  ;;  %v16166_v58 = vrot.slane %v19037_v55, 4  ;;  %v19587_v28 = vld [vmem:[#allocation48_spill] sm:$0xff]  ;;  %6151 = vst.msk [vmem:[#allocation3 + $0x110] sm:$0xf] %vm6125_vm3, %v11137_v0  ;;  %6152 = vst.msk [vmem:[#allocation3 + $0x120] sm:$0xf] %vm6125_vm3, %v11138_v30 }
 0x784   : > { %v5994_v14 = vmul.f32 %v12027_v23, %v19587_v28  ;;  %v11140_v59 = vpack.c.bf16 %v5992_v1, %v5992_v1  ;;  %v16172_v24 = vld [vmem:[#allocation3 + $0x98] sm:$0xf]  ;;  %v19588_v40 = vld [vmem:[#allocation50_spill] sm:$0xff]  ;;  %v11141_v42 = vpack.c.bf16 %v5993_v49, %v5993_v49  ;;  %6153 = vst.msk [vmem:[#allocation3 + $0x124] sm:$0xf] %vm6125_vm3, %v11139_v19  ;;  %v16179_v16 = vrot.slane %v19031_v22, 4 }
 0x785   : > { %v5995_v44 = vmul.f32 %v12029_v53, %v19588_v40  ;;  %v16183_v0 = vrot.slane %v19030_v21, 5  ;;  %v16185_v30 = vld [vmem:[#allocation3 + $0xd0] sm:$0xf]  ;;  %v10833_v23 = vcombine.low %v16141_v18, %v16149_v31  ;;  %v19033_v49 = vshrl.u32 %v16162_v6, 16  ;;  %v16192_v53 = vld [vmem:[#allocation3 + $0xd4] sm:$0xf] }
 0x786   : > { %19589 = vst [vmem:[#allocation32_spill] sm:$0xff] %v16179_v16  ;;  %19591 = vst [vmem:[#allocation34_spill] sm:$0xff] %v16185_v30  ;;  %v11142_v1 = vpack.c.bf16 %v5994_v14, %v5994_v14  ;;  %v19035_v19 = vshll.u32 %v16162_v6, 16  ;;  %v16197_v40 = vrot.slane %v19032_v20, 4  ;;  %v19036_v14 = vshrl.u32 %v16172_v24, 16  ;;  %v11756_v15 = vld [vmem:[%s18903_s11 + $0x110] sm:$0xff]  }
 0x787   : > { %19590 = vst [vmem:[#allocation35_spill] sm:$0xff] %v16183_v0  ;;  %6154 = vst.msk [vmem:[#allocation3 + $0x134] sm:$0xf] %vm6125_vm3, %v11140_v59  ;;  %v11143_v28 = vpack.c.bf16 %v5995_v44, %v5995_v44  ;;  %v10832_v59 = vcombine.low %v16162_v6, %v16172_v24  ;;  %v16202_v21 = vld [vmem:[#allocation3 + $0xbc] sm:$0xf]  ;;  %7877 = vrot.lane.b32.xlu1 %v10833_v23, %s19560_s0  ;;  %v16209_v44 = vrot.slane %v19033_v49, 4 }
 0x788   : > { %19592 = vst [vmem:[#allocation72_spill] sm:$0xff] %v16192_v53  ;;  %6155 = vst.msk [vmem:[#allocation3 + $0x138] sm:$0xf] %vm6125_vm3, %v11141_v42  ;;  %v19042_v42 = vshrl.u32 %v16185_v30, 16  ;;  %v19043_v20 = vshll.u32 %v16185_v30, 16  ;;  %v16218_v56 = vrot.slane %v19035_v19, 5 }
 0x789   : > { %19593 = vst [vmem:[#allocation33_spill] sm:$0xff] %v16197_v40  ;;  %19594 = vst [vmem:[#allocation36_spill] sm:$0xff] %v16202_v21  ;;  %v16213_v45 = vld [vmem:[#allocation3 + $0xc0] sm:$0xf]  ;;  %7875 = vrot.lane.b32.xlu0 %v10832_v59, %s19560_s0  ;;  %v19044_v23 = vshrl.u32 %v16192_v53, 16  ;;  %v19045_v59 = vshrl.u32 %v16202_v21, 16 }
 0x78a   : > { %6156 = vst.msk [vmem:[#allocation3 + $0x148] sm:$0xf] %vm6125_vm3, %v11142_v1  ;;  %19595 = vst [vmem:[#allocation71_spill] sm:$0xff] %v16213_v45  ;;  %v16222_v1 = vrot.slane %v19036_v14, 4  ;;  %v16226_v49 = vld [vmem:[#allocation3 + $0xf8] sm:$0xf]  ;;  %v10835_v14 = vcombine.low %v16185_v30, %v16192_v53  ;;  %v10834_v19 = vcombine.low %v16202_v21, %v16213_v45 }
 0x78b   : > { %6157 = vst.msk [vmem:[#allocation3 + $0x14c] sm:$0xf] %vm6125_vm3, %v11143_v28  ;;  %19596 = vst [vmem:[#allocation74_spill] sm:$0xff] %v16226_v49  ;;  %v16228_v22 = vld [vmem:[#allocation3 + $0xe4] sm:$0xf]  ;;  %v11753_v28 = vld [vmem:[%s18903_s11 + $0x100] sm:$0xff]  }
 0x78c   : > { %19597 = vst [vmem:[#allocation73_spill] sm:$0xff] %v16228_v22  ;;  %v19046_v55 = vshll.u32 %v16202_v21, 16  ;;  %v16240_v33 = vld [vmem:[#allocation3 + $0xfc] sm:$0xf]  ;;  %v16244_v17 = vrot.slane %v19042_v42, 4  ;;  %v16248_v60 = vrot.slane %v19043_v20, 5  ;;  %9669 = vmatpush1.bf16.msra.mxu0 %v11753_v28  ;;  %7881 = vrot.lane.b32.xlu1 %v10835_v14, %s19560_s0 }
 0x78d   : > { %19598 = vst [vmem:[#allocation75_spill] sm:$0xff] %v16240_v33  ;;  %v19047_v48 = vshrl.u32 %v16213_v45, 16  ;;  %v16253_v25 = vld [vmem:[#allocation3 + $0xe8] sm:$0xf]  ;;  %v16257_v36 = vrot.slane %v19044_v23, 4  ;;  %9670 = vmatprep.subr.bf16.mxu0 %v19554_v12  ;;  %v16268_v5 = vrot.slane %v19045_v59, 4  ;;  %7879 = vrot.lane.b32.xlu0 %v10834_v19, %s19560_s0  ;;  %v10837_v59 = vcombine.low %v16226_v49, %v16240_v33 }
 0x78e   : > { %19599 = vst [vmem:[#allocation77_spill] sm:$0xff] %v16244_v17  ;;  %19600 = vst [vmem:[#allocation76_spill] sm:$0xff] %v16248_v60  ;;  %v16263_v46 = vld [vmem:[#allocation3 + $0x120] sm:$0xf]  ;;  %v16272_v28 = vrot.slane %v19046_v55, 5  ;;  %v19610_v23 = vshll.u32 %v16226_v49, 16  ;;  %v10836_v20 = vcombine.low %v16228_v22, %v16253_v25 }
 0x78f   : > { %19601 = vst [vmem:[#allocation79_spill] sm:$0xff] %v16253_v25  ;;  %19602 = vst [vmem:[#allocation11_spill] sm:$0xff] %v16257_v36  ;;  %v16276_v14 = vrot.slane %v19047_v48, 4  ;;  %v11755_v42 = vld [vmem:[%s18903_s11 + $0x108] sm:$0xff]   ;;  %v19608_v48 = vshrl.u32 %v16226_v49, 16  ;;  %v19613_v55 = vshrl.u32 %v16240_v33, 16 }
 0x790   : > { %19603 = vst [vmem:[#allocation26_spill] sm:$0xff] %v16263_v46  ;;  %19604 = vst [vmem:[#allocation78_spill] sm:$0xff] %v16268_v5  ;;  %v16288_v26 = vld [vmem:[#allocation3 + $0x124] sm:$0xf]  ;;  %v16296_v32 = vrot.slane %v19610_v23, 5  ;;  %9671 = vmatpush1.bf16.msra.mxu0 %v11755_v42  ;;  %7885 = vrot.lane.b32.xlu1 %v10837_v59, %s19560_s0  ;;  %v19616_v42 = vshrl.u32 %v16228_v22, 16 }
 0x791   : > { %19605 = vst [vmem:[#allocation15_spill] sm:$0xff] %v16272_v28  ;;  %19606 = vst [vmem:[#allocation12_spill] sm:$0xff] %v16276_v14  ;;  %v16292_v19 = vrot.slane %v19608_v48, 4  ;;  %v16301_v2 = vld [vmem:[#allocation3 + $0x10c] sm:$0xf]  ;;  %v16308_v48 = vrot.slane %v19613_v55, 4  ;;  %9672 = vmatprep.subr.bf16.mxu0 %v19554_v12  ;;  %7883 = vrot.lane.b32.xlu0 %v10836_v20, %s19560_s0 }
 0x792   : > { %19607 = vst [vmem:[#allocation27_spill] sm:$0xff] %v16288_v26  ;;  %19611 = vst [vmem:[#allocation80_spill] sm:$0xff] %v16296_v32  ;;  %v16314_v32 = vld [vmem:[#allocation3 + $0x110] sm:$0xf]  ;;  %v19618_v33 = vshll.u32 %v16228_v22, 16  ;;  %v19620_v59 = vshrl.u32 %v16253_v25, 16 }
 0x793   : > { %19609 = vst [vmem:[#allocation19_spill] sm:$0xff] %v16292_v19  ;;  %19612 = vst [vmem:[#allocation20_spill] sm:$0xff] %v16301_v2  ;;  %v16319_v19 = vrot.slane %v19616_v42, 4  ;;  %v16331_v49 = vld [vmem:[#allocation3 + $0x148] sm:$0xf]  ;;  %v10839_v42 = vcombine.low %v16263_v46, %v16288_v26  ;;  %v19626_v20 = vshll.u32 %v16263_v46, 16  ;;  %v10838_v51 = vcombine.low %v16301_v2, %v16314_v32 }
 0x794   : > { %19614 = vst [vmem:[#allocation37_spill] sm:$0xff] %v16308_v48  ;;  %19615 = vst [vmem:[#allocation16_spill] sm:$0xff] %v16314_v32  ;;  %v16323_v55 = vrot.slane %v19618_v33, 5  ;;  %v16327_v48 = vrot.slane %v19620_v59, 4  ;;  %v16338_v22 = vld [vmem:[#allocation3 + $0x14c] sm:$0xf]  ;;  %9673 = vmatpush1.bf16.msra.mxu0 %v11756_v15 }
 0x795   : > { %19617 = vst [vmem:[#allocation38_spill] sm:$0xff] %v16319_v19  ;;  %19622 = vst [vmem:[#allocation82_spill] sm:$0xff] %v16331_v49  ;;  %v19624_v59 = vshrl.u32 %v16263_v46, 16  ;;  %v16346_v23 = vrot.slane %v19626_v20, 5  ;;  %v11758_v33 = vld [vmem:[%s18903_s11 + $0x118] sm:$0xff]   ;;  %v19629_v19 = vshrl.u32 %v16288_v26, 16  ;;  %7889 = vrot.lane.b32.xlu1 %v10839_v42, %s19560_s0  ;;  %9674 = vmatprep.subr.bf16.mxu0 %v19554_v12 }
 0x796   : > { %19619 = vst [vmem:[#allocation81_spill] sm:$0xff] %v16323_v55  ;;  %19621 = vst [vmem:[#allocation17_spill] sm:$0xff] %v16327_v48  ;;  %v16351_v55 = vld [vmem:[#allocation3 + $0x134] sm:$0xf]  ;;  %v19632_v15 = vshrl.u32 %v16301_v2, 16  ;;  %v19634_v26 = vshll.u32 %v16301_v2, 16  ;;  %7887 = vrot.lane.b32.xlu0 %v10838_v51, %s19560_s0 }
 0x797   : > { %19623 = vst [vmem:[#allocation40_spill] sm:$0xff] %v16338_v22  ;;  %v16342_v48 = vrot.slane %v19624_v59, 4  ;;  %19627 = vst [vmem:[#allocation83_spill] sm:$0xff] %v16346_v23  ;;  %v16358_v59 = vrot.slane %v19629_v19, 4  ;;  %v16364_v23 = vld [vmem:[#allocation3 + $0x138] sm:$0xf] }
 0x798   : > { %19628 = vst [vmem:[#allocation41_spill] sm:$0xff] %v16351_v55  ;;  %19631 = vst [vmem:[#allocation42_spill] sm:$0xff] %v16364_v23  ;;  %v16373_v19 = vrot.slane %v19634_v26, 5  ;;  %v19636_v42 = vshrl.u32 %v16314_v32, 16  ;;  %v16381_v46 = vld [vmem:[#allocation3 + $0x44] sm:$0xf]  ;;  %v10840_v25 = vcombine.low %v16351_v55, %v16364_v23  ;;  %9675 = vmatpush1.bf16.msra.mxu0 %v11758_v33 }
 0x799   : > { %19625 = vst [vmem:[#allocation39_spill] sm:$0xff] %v16342_v48  ;;  %19630 = vst [vmem:[#allocation10_spill] sm:$0xff] %v16358_v59  ;;  %v16369_v48 = vrot.slane %v19632_v15, 4  ;;  %v10841_v15 = vcombine.low %v16331_v49, %v16338_v22  ;;  %v16388_v2 = vld [vmem:[#allocation3 + $0x44] sm:$0xf]  ;;  %v19641_v51 = vshll.u32 %v16331_v49, 16 }
 0x79a   : > { %19635 = vst [vmem:[#allocation25_spill] sm:$0xff] %v16373_v19  ;;  %v16377_v59 = vrot.slane %v19636_v42, 4  ;;  %19638 = vst [vmem:[#allocation18_spill] sm:$0xff] %v16381_v46  ;;  %v19639_v42 = vshrl.u32 %v16331_v49, 16  ;;  %v16401_v19 = vld [vmem:[#allocation3 + $0x48] sm:$0xf]  ;;  %7891 = vrot.lane.b32.xlu0 %v10840_v25, %s19560_s0 }
 0x79b   : > { %19633 = vst [vmem:[#allocation24_spill] sm:$0xff] %v16369_v48  ;;  %v16396_v20 = vrot.slane %v19641_v51, 5  ;;  %19643 = vst [vmem:[#allocation23_spill] sm:$0xff] %v16401_v19  ;;  %v19644_v26 = vshrl.u32 %v16338_v22, 16  ;;  %7893 = vrot.lane.b32.xlu1 %v10841_v15, %s19560_s0  ;;  %v19646_v49 = vshrl.u32 %v16351_v55, 16  ;;  %v19648_v32 = vshll.u32 %v16351_v55, 16 }
 0x79c   : > { %19637 = vst [vmem:[#allocation84_spill] sm:$0xff] %v16377_v59  ;;  %v16392_v59 = vrot.slane %v19639_v42, 4  ;;  %v19650_v33 = vshrl.u32 %v16364_v23, 16  ;;  %v19652_v15 = vshll.u32 %v15982_v10, 16  ;;  %v19654_v42 = vshrl.u32 %v16000_v52, 16 }
 0x79d   : > { %19642 = vst [vmem:[#allocation14_spill] sm:$0xff] %v16396_v20  ;;  %v16405_v48 = vrot.slane %v19644_v26, 4  ;;  %v16411_v51 = vrot.slane %v19646_v49, 4  ;;  %v16415_v20 = vrot.slane %v19648_v32, 5  ;;  %v10764_v32 = vcombine.low %v15982_v10, %v16000_v52  ;;  %v16439_v55 = vld [vmem:[#allocation3 + $0x58] sm:$0xf] }
 0x79e   : > { %19640 = vst [vmem:[#allocation85_spill] sm:$0xff] %v16392_v59  ;;  %v16417_v59 = vld [vmem:[#allocation3 + $0x48] sm:$0xf]  ;;  %v16421_v30 = vrot.slane %v19650_v33, 4  ;;  %v16426_v26 = vrot.slane %v19652_v15, 5  ;;  %v16430_v49 = vrot.slane %v19654_v42, 4  ;;  %v10970_v22 = vcombine.low %v15908_v39, %v15926_v63 }
 0x79f   : > { %19645 = vst [vmem:[#allocation28_spill] sm:$0xff] %v16405_v48  ;;  %19647 = vst [vmem:[#allocation45_spill] sm:$0xff] %v16411_v51  ;;  %v16441_v15 = vld [vmem:[#allocation3 + $0x5c] sm:$0xf]  ;;  %v16447_v10 = vld [vmem:[#allocation3 + $0x58] sm:$0xf]  ;;  %v19659_v33 = vcombine.low %v15957_v43, %v15948_v7 }
 0x7a0   : > { %19649 = vst [vmem:[#allocation43_spill] sm:$0xff] %v16415_v20  ;;  %19651 = vst [vmem:[#allocation44_spill] sm:$0xff] %v16421_v30  ;;  %v19660_v25 = vshrl.u32 %v16381_v46, 16  ;;  %v19662_v30 = vshll.u32 %v16381_v46, 16  ;;  %v19664_v42 = vshrl.u32 %v16401_v19, 16  ;;  %v19666_v43 = vld [vmem:[#allocation21_spill] sm:$0xff]  ;;  %v10766_v53 = vcombine.low %v16439_v55, %v16441_v15 }
 0x7a1   : > { %19653 = vst [vmem:[#allocation47_spill] sm:$0xff] %v16426_v26  ;;  %19655 = vst [vmem:[#allocation46_spill] sm:$0xff] %v16430_v49  ;;  %6929 = vrot.lane.b32.xlu1 %v19659_v33, %s19560_s0  ;;  %v10765_v49 = vcombine.low %v16381_v46, %v16401_v19  ;;  %v16467_v23 = vld [vmem:[#allocation3 + $0x5c] sm:$0xf]  ;;  %v19667_v33 = vld [vmem:[#allocation13_spill] sm:$0xff]  ;;  %v19671_v46 = vshll.u32 %v16388_v2, 16 }
 0x7a2   : > { %19656 = vst [vmem:[#allocation48_spill] sm:$0xff] %v16439_v55  ;;  %19657 = vst [vmem:[#allocation50_spill] sm:$0xff] %v16441_v15  ;;  %v16455_v52 = vrot.slane %v19660_v25, 4  ;;  %v16459_v26 = vrot.slane %v19662_v30, 5  ;;  %v16463_v48 = vrot.slane %v19664_v42, 4  ;;  %v19668_v7 = vcombine.low %v19666_v43, %v19667_v33 }
 0x7a3   : > { %19658 = vst [vmem:[#allocation86_spill] sm:$0xff] %v16447_v10  ;;  %v10971_v42 = vcombine.low %v16388_v2, %v16417_v59  ;;  %v16485_v19 = vrot.slane %v19671_v46, 5  ;;  %v19672_v20 = vshrl.u32 %v16417_v59, 16  ;;  %v19090_v25 = vshll.u32 %v16439_v55, 16  ;;  %v16493_v51 = vld [vmem:[#allocation3 + $0x70] sm:$0xf] }
 0x7a4   : > { %19661 = vst [vmem:[#allocation87_spill] sm:$0xff] %v16455_v52  ;;  %19663 = vst [vmem:[#allocation88_spill] sm:$0xff] %v16459_v26  ;;  %6927 = vrot.lane.b32.xlu0 %v19668_v7, %s19560_s0  ;;  %v19669_v52 = vshrl.u32 %v16388_v2, 16  ;;  %v16481_v26 = vld [vmem:[#allocation3 + $0x6c] sm:$0xf]  ;;  %v19678_v36 = vshrl.u32 %v16441_v15, 16 }
 0x7a5   : > { %19665 = vst [vmem:[#allocation89_spill] sm:$0xff] %v16463_v48  ;;  %19670 = vst [vmem:[#allocation21_spill] sm:$0xff] %v16481_v26  ;;  %v16489_v7 = vrot.slane %v19672_v20, 4  ;;  %v19095_v48 = vshrl.u32 %v16447_v10, 16  ;;  %v16499_v46 = vld [vmem:[#allocation3 + $0x6c] sm:$0xf]  ;;  %9363 = vrot.lane.b32.xlu1 %v10970_v22, %s19560_s0  ;;  %v10767_v45 = vcombine.low %v16481_v26, %v16493_v51 }
 0x7a6   : > { %v16476_v30 = vrot.slane %v19669_v52, 4  ;;  %19673 = vst [vmem:[#allocation13_spill] sm:$0xff] %v16493_v51  ;;  %19674 = vst [vmem:[#allocation90_spill] sm:$0xff] %v16499_v46  ;;  %v19675_v20 = vshrl.u32 %v16439_v55, 16  ;;  %v16508_v52 = vrot.slane %v19090_v25, 5  ;;  %v16512_v21 = vrot.slane %v19678_v36, 4 }
 0x7a7   : > { %v16516_v60 = vld [vmem:[#allocation3 + $0x70] sm:$0xf]  ;;  %v10972_v25 = vcombine.low %v16447_v10, %v16467_v23  ;;  %v16527_v36 = vld [vmem:[#allocation3 + $0x80] sm:$0xf]  ;;  %v19683_v15 = vshrl.u32 %v16467_v23, 16  ;;  %v19100_v22 = vshll.u32 %v16481_v26, 16 }
 0x7a8   : > { %v16504_v17 = vrot.slane %v19675_v20, 4  ;;  %19677 = vst [vmem:[#allocation92_spill] sm:$0xff] %v16508_v52  ;;  %19679 = vst [vmem:[#allocation93_spill] sm:$0xff] %v16512_v21  ;;  %6931 = vrot.lane.b32.xlu0 %v10764_v32, %s19560_s0  ;;  %v16522_v20 = vrot.slane %v19095_v48, 4  ;;  %v19682_v21 = vshll.u32 %v16447_v10, 16  ;;  %v19105_v52 = vshrl.u32 %v16499_v46, 16 }
 0x7a9   : > { %19680 = vst [vmem:[#allocation94_spill] sm:$0xff] %v16516_v60  ;;  %19681 = vst [vmem:[#allocation95_spill] sm:$0xff] %v16527_v36  ;;  %v16535_v32 = vrot.slane %v19683_v15, 4  ;;  %9365 = vrot.lane.b32.xlu1 %v10971_v42, %s19560_s0  ;;  %v19686_v15 = vshrl.u32 %v16481_v26, 16  ;;  %v16554_v48 = vrot.slane %v19100_v22, 5  ;;  %v19689_v14 = vshrl.u32 %v16493_v51, 16 }
 0x7aa   : > { %19676 = vst [vmem:[#allocation91_spill] sm:$0xff] %v16504_v17  ;;  %v16531_v55 = vrot.slane %v19682_v21, 5  ;;  %v16539_v17 = vld [vmem:[#allocation3 + $0x84] sm:$0xf]  ;;  %v16545_v21 = vld [vmem:[#allocation3 + $0x80] sm:$0xf]  ;;  %v10973_v22 = vcombine.low %v16499_v46, %v16516_v60 }
 0x7ab   : > { %19684 = vst [vmem:[#allocation96_spill] sm:$0xff] %v16539_v17  ;;  %19685 = vst [vmem:[#allocation97_spill] sm:$0xff] %v16545_v21  ;;  %v16550_v5 = vrot.slane %v19686_v15, 4  ;;  %v16558_v18 = vrot.slane %v19689_v14, 4  ;;  %v16562_v28 = vld [vmem:[#allocation3 + $0x84] sm:$0xf]  ;;  %v10768_v40 = vcombine.low %v16527_v36, %v16539_v17 }
 0x7ac   : > { %19688 = vst [vmem:[#allocation99_spill] sm:$0xff] %v16554_v48  ;;  %19691 = vst [vmem:[#allocation101_spill] sm:$0xff] %v16562_v28  ;;  %6933 = vrot.lane.b32.xlu0 %v10765_v49, %s19560_s0  ;;  %v16568_v15 = vrot.slane %v19105_v52, 4  ;;  %v16573_v14 = vld [vmem:[#allocation3 + $0x94] sm:$0xf]  ;;  %v19696_v51 = vshrl.u32 %v16516_v60, 16 }
 0x7ad   : > { %19687 = vst [vmem:[#allocation98_spill] sm:$0xff] %v16550_v5  ;;  %19690 = vst [vmem:[#allocation100_spill] sm:$0xff] %v16558_v18  ;;  %v19694_v18 = vshll.u32 %v16499_v46, 16  ;;  %v19110_v42 = vshll.u32 %v16527_v36, 16  ;;  %v16585_v5 = vld [vmem:[#allocation3 + $0x98] sm:$0xf]  ;;  %9367 = vrot.lane.b32.xlu1 %v10972_v25, %s19560_s0 }
 0x7ae   : > { %19692 = vst [vmem:[#allocation102_spill] sm:$0xff] %v16568_v15  ;;  %19693 = vst [vmem:[#allocation103_spill] sm:$0xff] %v16573_v14  ;;  %v16581_v49 = vrot.slane %v19696_v51, 4  ;;  %v19115_v48 = vshrl.u32 %v16545_v21, 16  ;;  %v19700_v51 = vshrl.u32 %v16527_v36, 16  ;;  %v19703_v15 = vshrl.u32 %v16539_v17, 16 }
 0x7af   : > { %v16577_v26 = vrot.slane %v19694_v18, 5  ;;  %19698 = vst [vmem:[#allocation106_spill] sm:$0xff] %v16585_v5  ;;  %v16591_v18 = vld [vmem:[#allocation3 + $0x94] sm:$0xf]  ;;  %v16600_v52 = vrot.slane %v19110_v42, 5  ;;  %v10974_v42 = vcombine.low %v16545_v21, %v16562_v28  ;;  %v19710_v17 = vshrl.u32 %v16562_v28, 16 }
 0x7b0   : > { %19697 = vst [vmem:[#allocation105_spill] sm:$0xff] %v16581_v49  ;;  %19699 = vst [vmem:[#allocation107_spill] sm:$0xff] %v16591_v18  ;;  %v16596_v49 = vrot.slane %v19700_v51, 4  ;;  %v16604_v60 = vrot.slane %v19703_v15, 4  ;;  %v16608_v46 = vld [vmem:[#allocation3 + $0x98] sm:$0xf]  ;;  %6935 = vrot.lane.b32.xlu0 %v10766_v53, %s19560_s0 }
 0x7b1   : > { %19695 = vst [vmem:[#allocation104_spill] sm:$0xff] %v16577_v26  ;;  %19702 = vst [vmem:[#allocation109_spill] sm:$0xff] %v16600_v52  ;;  %v16614_v51 = vrot.slane %v19115_v48, 4  ;;  %v16619_v15 = vld [vmem:[#allocation3 + $0xa8] sm:$0xf]  ;;  %v16627_v53 = vrot.slane %v19710_v17, 4  ;;  %9369 = vrot.lane.b32.xlu1 %v10973_v22, %s19560_s0  ;;  %v10769_v26 = vcombine.low %v16573_v14, %v16585_v5 }
 0x7b2   : > { %19701 = vst [vmem:[#allocation108_spill] sm:$0xff] %v16596_v49  ;;  %19704 = vst [vmem:[#allocation110_spill] sm:$0xff] %v16604_v60  ;;  %v19708_v60 = vshll.u32 %v16545_v21, 16  ;;  %v19120_v25 = vshll.u32 %v16573_v14, 16  ;;  %v16631_v49 = vld [vmem:[#allocation3 + $0xac] sm:$0xf] }
 0x7b3   : > { %19705 = vst [vmem:[#allocation111_spill] sm:$0xff] %v16608_v46  ;;  %19706 = vst [vmem:[#allocation112_spill] sm:$0xff] %v16614_v51  ;;  %v19125_v52 = vshrl.u32 %v16591_v18, 16  ;;  %v19714_v17 = vshrl.u32 %v16573_v14, 16  ;;  %v19717_v51 = vshrl.u32 %v16585_v5, 16  ;;  %v19724_v5 = vshrl.u32 %v16608_v46, 16 }
 0x7b4   : > { %19707 = vst [vmem:[#allocation113_spill] sm:$0xff] %v16619_v15  ;;  %v16623_v36 = vrot.slane %v19708_v60, 5  ;;  %19711 = vst [vmem:[#allocation115_spill] sm:$0xff] %v16627_v53  ;;  %v16637_v60 = vld [vmem:[#allocation3 + $0xa8] sm:$0xf]  ;;  %v16646_v48 = vrot.slane %v19120_v25, 5  ;;  %6937 = vrot.lane.b32.xlu0 %v10767_v45, %s19560_s0  ;;  %v10975_v25 = vcombine.low %v16591_v18, %v16608_v46 }
 0x7b5   : > { %19712 = vst [vmem:[#allocation116_spill] sm:$0xff] %v16631_v49  ;;  %19713 = vst [vmem:[#allocation117_spill] sm:$0xff] %v16637_v60  ;;  %v16642_v53 = vrot.slane %v19714_v17, 4  ;;  %v16650_v28 = vrot.slane %v19717_v51, 4  ;;  %v16654_v21 = vld [vmem:[#allocation3 + $0xac] sm:$0xf]  ;;  %9371 = vrot.lane.b32.xlu1 %v10974_v42, %s19560_s0 }
 0x7b6   : > { %19709 = vst [vmem:[#allocation114_spill] sm:$0xff] %v16623_v36  ;;  %19716 = vst [vmem:[#allocation119_spill] sm:$0xff] %v16646_v48  ;;  %v16660_v17 = vrot.slane %v19125_v52, 4  ;;  %v16665_v51 = vld [vmem:[#allocation3 + $0xbc] sm:$0xf]  ;;  %v16673_v45 = vrot.slane %v19724_v5, 4  ;;  %v10770_v36 = vcombine.low %v16619_v15, %v16631_v49 }
 0x7b7   : > { %19715 = vst [vmem:[#allocation118_spill] sm:$0xff] %v16642_v53  ;;  %19718 = vst [vmem:[#allocation120_spill] sm:$0xff] %v16650_v28  ;;  %v19722_v28 = vshll.u32 %v16591_v18, 16  ;;  %v19130_v22 = vshll.u32 %v16619_v15, 16  ;;  %v16677_v53 = vld [vmem:[#allocation3 + $0xc0] sm:$0xf] }
 0x7b8   : > { %19719 = vst [vmem:[#allocation121_spill] sm:$0xff] %v16654_v21  ;;  %19720 = vst [vmem:[#allocation122_spill] sm:$0xff] %v16660_v17  ;;  %v19135_v48 = vshrl.u32 %v16637_v60, 16  ;;  %v19728_v5 = vshrl.u32 %v16619_v15, 16  ;;  %v19731_v17 = vshrl.u32 %v16631_v49, 16  ;;  %6939 = vrot.lane.b32.xlu0 %v10768_v40, %s19560_s0  ;;  %v19738_v49 = vshrl.u32 %v16654_v21, 16 }
 0x7b9   : > { %19721 = vst [vmem:[#allocation123_spill] sm:$0xff] %v16665_v51  ;;  %v16669_v14 = vrot.slane %v19722_v28, 5  ;;  %19725 = vst [vmem:[#allocation125_spill] sm:$0xff] %v16673_v45  ;;  %v16683_v28 = vld [vmem:[#allocation3 + $0xbc] sm:$0xf]  ;;  %v16692_v52 = vrot.slane %v19130_v22, 5  ;;  %v10976_v22 = vcombine.low %v16637_v60, %v16654_v21  ;;  %9373 = vrot.lane.b32.xlu1 %v10975_v25, %s19560_s0 }
 0x7ba   : > { %19726 = vst [vmem:[#allocation126_spill] sm:$0xff] %v16677_v53  ;;  %19727 = vst [vmem:[#allocation127_spill] sm:$0xff] %v16683_v28  ;;  %v16688_v45 = vrot.slane %v19728_v5, 4  ;;  %v16696_v46 = vrot.slane %v19731_v17, 4  ;;  %v16700_v18 = vld [vmem:[#allocation3 + $0xc0] sm:$0xf] }
 0x7bb   : > { %19723 = vst [vmem:[#allocation124_spill] sm:$0xff] %v16669_v14  ;;  %19730 = vst [vmem:[#allocation129_spill] sm:$0xff] %v16692_v52  ;;  %v16706_v5 = vrot.slane %v19135_v48, 4  ;;  %v16711_v17 = vld [vmem:[#allocation3 + $0xd0] sm:$0xf]  ;;  %v16719_v40 = vrot.slane %v19738_v49, 4  ;;  %v10771_v14 = vcombine.low %v16665_v51, %v16677_v53 }
 0x7bc   : > { %19729 = vst [vmem:[#allocation128_spill] sm:$0xff] %v16688_v45  ;;  %19732 = vst [vmem:[#allocation130_spill] sm:$0xff] %v16696_v46  ;;  %v19736_v46 = vshll.u32 %v16637_v60, 16  ;;  %v19140_v42 = vshll.u32 %v16665_v51, 16  ;;  %v16723_v45 = vld [vmem:[#allocation3 + $0xd4] sm:$0xf]  ;;  %6941 = vrot.lane.b32.xlu0 %v10769_v26, %s19560_s0 }
 0x7bd   : > { %19733 = vst [vmem:[#allocation131_spill] sm:$0xff] %v16700_v18  ;;  %19734 = vst [vmem:[#allocation132_spill] sm:$0xff] %v16706_v5  ;;  %v19145_v52 = vshrl.u32 %v16683_v28, 16  ;;  %v19742_v49 = vshrl.u32 %v16665_v51, 16  ;;  %v19745_v5 = vshrl.u32 %v16677_v53, 16  ;;  %v19752_v53 = vshrl.u32 %v16700_v18, 16  ;;  %9375 = vrot.lane.b32.xlu1 %v10976_v22, %s19560_s0 }
 0x7be   : > { %19735 = vst [vmem:[#allocation133_spill] sm:$0xff] %v16711_v17  ;;  %v16715_v15 = vrot.slane %v19736_v46, 5  ;;  %19739 = vst [vmem:[#allocation135_spill] sm:$0xff] %v16719_v40  ;;  %v16729_v46 = vld [vmem:[#allocation3 + $0xd0] sm:$0xf]  ;;  %v16738_v48 = vrot.slane %v19140_v42, 5  ;;  %v10977_v42 = vcombine.low %v16683_v28, %v16700_v18 }
 0x7bf   : > { %19740 = vst [vmem:[#allocation136_spill] sm:$0xff] %v16723_v45  ;;  %19741 = vst [vmem:[#allocation137_spill] sm:$0xff] %v16729_v46  ;;  %v16734_v40 = vrot.slane %v19742_v49, 4  ;;  %v16742_v21 = vrot.slane %v19745_v5, 4  ;;  %v16746_v60 = vld [vmem:[#allocation3 + $0xd4] sm:$0xf] }
 0x7c0   : > { %19737 = vst [vmem:[#allocation134_spill] sm:$0xff] %v16715_v15  ;;  %19744 = vst [vmem:[#allocation139_spill] sm:$0xff] %v16738_v48  ;;  %v16752_v49 = vrot.slane %v19145_v52, 4  ;;  %v16757_v5 = vld [vmem:[#allocation3 + $0xe4] sm:$0xf]  ;;  %v16765_v26 = vrot.slane %v19752_v53, 4  ;;  %v10772_v15 = vcombine.low %v16711_v17, %v16723_v45  ;;  %6943 = vrot.lane.b32.xlu0 %v10770_v36, %s19560_s0 }
 0x7c1   : > { %19743 = vst [vmem:[#allocation138_spill] sm:$0xff] %v16734_v40  ;;  %19746 = vst [vmem:[#allocation140_spill] sm:$0xff] %v16742_v21  ;;  %v19750_v21 = vshll.u32 %v16683_v28, 16  ;;  %v19150_v25 = vshll.u32 %v16711_v17, 16  ;;  %v16769_v40 = vld [vmem:[#allocation3 + $0xe8] sm:$0xf]  ;;  %9377 = vrot.lane.b32.xlu1 %v10977_v42, %s19560_s0 }
 0x7c2   : > { %19747 = vst [vmem:[#allocation141_spill] sm:$0xff] %v16746_v60  ;;  %19748 = vst [vmem:[#allocation142_spill] sm:$0xff] %v16752_v49  ;;  %v19155_v48 = vshrl.u32 %v16729_v46, 16  ;;  %v19756_v53 = vshrl.u32 %v16711_v17, 16  ;;  %v19759_v49 = vshrl.u32 %v16723_v45, 16  ;;  %v19766_v45 = vshrl.u32 %v16746_v60, 16 }
 0x7c3   : > { %19749 = vst [vmem:[#allocation143_spill] sm:$0xff] %v16757_v5  ;;  %v16761_v51 = vrot.slane %v19750_v21, 5  ;;  %19753 = vst [vmem:[#allocation145_spill] sm:$0xff] %v16765_v26  ;;  %v16775_v21 = vld [vmem:[#allocation3 + $0xe4] sm:$0xf]  ;;  %v16784_v52 = vrot.slane %v19150_v25, 5  ;;  %v10978_v25 = vcombine.low %v16729_v46, %v16746_v60 }
 0x7c4   : > { %19754 = vst [vmem:[#allocation146_spill] sm:$0xff] %v16769_v40  ;;  %19755 = vst [vmem:[#allocation147_spill] sm:$0xff] %v16775_v21  ;;  %v16780_v26 = vrot.slane %v19756_v53, 4  ;;  %v16788_v18 = vrot.slane %v19759_v49, 4  ;;  %v16792_v28 = vld [vmem:[#allocation3 + $0xe8] sm:$0xf]  ;;  %6945 = vrot.lane.b32.xlu0 %v10771_v14, %s19560_s0 }
 0x7c5   : > { %19751 = vst [vmem:[#allocation144_spill] sm:$0xff] %v16761_v51  ;;  %19758 = vst [vmem:[#allocation149_spill] sm:$0xff] %v16784_v52  ;;  %v16798_v53 = vrot.slane %v19155_v48, 4  ;;  %v16803_v49 = vld [vmem:[#allocation3 + $0xf8] sm:$0xf]  ;;  %v16811_v36 = vrot.slane %v19766_v45, 4  ;;  %v10773_v51 = vcombine.low %v16757_v5, %v16769_v40  ;;  %9379 = vrot.lane.b32.xlu1 %v10978_v25, %s19560_s0 }
 0x7c6   : > { %19757 = vst [vmem:[#allocation148_spill] sm:$0xff] %v16780_v26  ;;  %19760 = vst [vmem:[#allocation150_spill] sm:$0xff] %v16788_v18  ;;  %v19764_v18 = vshll.u32 %v16729_v46, 16  ;;  %v19160_v22 = vshll.u32 %v16757_v5, 16  ;;  %v16815_v26 = vld [vmem:[#allocation3 + $0xfc] sm:$0xf] }
 0x7c7   : > { %19761 = vst [vmem:[#allocation151_spill] sm:$0xff] %v16792_v28  ;;  %19762 = vst [vmem:[#allocation152_spill] sm:$0xff] %v16798_v53  ;;  %v19165_v52 = vshrl.u32 %v16775_v21, 16  ;;  %v19770_v45 = vshrl.u32 %v16757_v5, 16  ;;  %v19773_v53 = vshrl.u32 %v16769_v40, 16  ;;  %v19780_v40 = vshrl.u32 %v16792_v28, 16 }
 0x7c8   : > { %19763 = vst [vmem:[#allocation153_spill] sm:$0xff] %v16803_v49  ;;  %v16807_v17 = vrot.slane %v19764_v18, 5  ;;  %19767 = vst [vmem:[#allocation155_spill] sm:$0xff] %v16811_v36  ;;  %v16821_v18 = vld [vmem:[#allocation3 + $0xf8] sm:$0xf]  ;;  %v16830_v48 = vrot.slane %v19160_v22, 5  ;;  %v10979_v22 = vcombine.low %v16775_v21, %v16792_v28  ;;  %6947 = vrot.lane.b32.xlu0 %v10772_v15, %s19560_s0 }
 0x7c9   : > { %19768 = vst [vmem:[#allocation156_spill] sm:$0xff] %v16815_v26  ;;  %19769 = vst [vmem:[#allocation157_spill] sm:$0xff] %v16821_v18  ;;  %v16826_v36 = vrot.slane %v19770_v45, 4  ;;  %v16834_v60 = vrot.slane %v19773_v53, 4  ;;  %v16838_v46 = vld [vmem:[#allocation3 + $0xfc] sm:$0xf] }
 0x7ca   : > { %19765 = vst [vmem:[#allocation154_spill] sm:$0xff] %v16807_v17  ;;  %19772 = vst [vmem:[#allocation159_spill] sm:$0xff] %v16830_v48  ;;  %v16844_v45 = vrot.slane %v19165_v52, 4  ;;  %v16849_v53 = vld [vmem:[#allocation3 + $0x10c] sm:$0xf]  ;;  %v16857_v14 = vrot.slane %v19780_v40, 4  ;;  %v10774_v17 = vcombine.low %v16803_v49, %v16815_v26  ;;  %9381 = vrot.lane.b32.xlu1 %v10979_v22, %s19560_s0 }
 0x7cb   : > { %19771 = vst [vmem:[#allocation158_spill] sm:$0xff] %v16826_v36  ;;  %19774 = vst [vmem:[#allocation160_spill] sm:$0xff] %v16834_v60  ;;  %v19778_v60 = vshll.u32 %v16775_v21, 16  ;;  %v19170_v42 = vshll.u32 %v16803_v49, 16  ;;  %v16861_v36 = vld [vmem:[#allocation3 + $0x110] sm:$0xf] }
 0x7cc   : > { %19775 = vst [vmem:[#allocation161_spill] sm:$0xff] %v16838_v46  ;;  %19776 = vst [vmem:[#allocation162_spill] sm:$0xff] %v16844_v45  ;;  %v19175_v48 = vshrl.u32 %v16821_v18, 16  ;;  %v19784_v40 = vshrl.u32 %v16803_v49, 16  ;;  %v19787_v45 = vshrl.u32 %v16815_v26, 16  ;;  %v19794_v26 = vshrl.u32 %v16838_v46, 16  ;;  %6949 = vrot.lane.b32.xlu0 %v10773_v51, %s19560_s0 }
 0x7cd   : > { %19777 = vst [vmem:[#allocation163_spill] sm:$0xff] %v16849_v53  ;;  %v16853_v5 = vrot.slane %v19778_v60, 5  ;;  %19781 = vst [vmem:[#allocation165_spill] sm:$0xff] %v16857_v14  ;;  %v16867_v60 = vld [vmem:[#allocation3 + $0x10c] sm:$0xf]  ;;  %v16876_v52 = vrot.slane %v19170_v42, 5  ;;  %v10980_v42 = vcombine.low %v16821_v18, %v16838_v46 }
 0x7ce   : > { %19782 = vst [vmem:[#allocation166_spill] sm:$0xff] %v16861_v36  ;;  %19783 = vst [vmem:[#allocation167_spill] sm:$0xff] %v16867_v60  ;;  %v16872_v14 = vrot.slane %v19784_v40, 4  ;;  %v16880_v28 = vrot.slane %v19787_v45, 4  ;;  %v16884_v21 = vld [vmem:[#allocation3 + $0x110] sm:$0xf] }
 0x7cf   : > { %19779 = vst [vmem:[#allocation164_spill] sm:$0xff] %v16853_v5  ;;  %19786 = vst [vmem:[#allocation169_spill] sm:$0xff] %v16876_v52  ;;  %v16890_v40 = vrot.slane %v19175_v48, 4  ;;  %v16895_v45 = vld [vmem:[#allocation3 + $0x120] sm:$0xf]  ;;  %v16903_v15 = vrot.slane %v19794_v26, 4  ;;  %v10775_v5 = vcombine.low %v16849_v53, %v16861_v36  ;;  %9383 = vrot.lane.b32.xlu1 %v10980_v42, %s19560_s0 }
 0x7d0   : > { %19785 = vst [vmem:[#allocation168_spill] sm:$0xff] %v16872_v14  ;;  %19788 = vst [vmem:[#allocation170_spill] sm:$0xff] %v16880_v28  ;;  %v19792_v28 = vshll.u32 %v16821_v18, 16  ;;  %v19180_v25 = vshll.u32 %v16849_v53, 16  ;;  %v16907_v14 = vld [vmem:[#allocation3 + $0x124] sm:$0xf]  ;;  %6951 = vrot.lane.b32.xlu0 %v10774_v17, %s19560_s0 }
 0x7d1   : > { %19789 = vst [vmem:[#allocation171_spill] sm:$0xff] %v16884_v21  ;;  %19790 = vst [vmem:[#allocation172_spill] sm:$0xff] %v16890_v40  ;;  %v19185_v52 = vshrl.u32 %v16867_v60, 16  ;;  %v19798_v26 = vshrl.u32 %v16849_v53, 16  ;;  %v19801_v40 = vshrl.u32 %v16861_v36, 16  ;;  %v19808_v36 = vshrl.u32 %v16884_v21, 16 }
 0x7d2   : > { %19791 = vst [vmem:[#allocation173_spill] sm:$0xff] %v16895_v45  ;;  %v16899_v49 = vrot.slane %v19792_v28, 5  ;;  %19795 = vst [vmem:[#allocation175_spill] sm:$0xff] %v16903_v15  ;;  %v16913_v28 = vld [vmem:[#allocation3 + $0x120] sm:$0xf]  ;;  %v16922_v48 = vrot.slane %v19180_v25, 5  ;;  %v10981_v25 = vcombine.low %v16867_v60, %v16884_v21 }
 0x7d3   : > { %19796 = vst [vmem:[#allocation176_spill] sm:$0xff] %v16907_v14  ;;  %19797 = vst [vmem:[#allocation177_spill] sm:$0xff] %v16913_v28  ;;  %v16918_v15 = vrot.slane %v19798_v26, 4  ;;  %v16926_v46 = vrot.slane %v19801_v40, 4  ;;  %v16930_v18 = vld [vmem:[#allocation3 + $0x124] sm:$0xf] }
 0x7d4   : > { %19793 = vst [vmem:[#allocation174_spill] sm:$0xff] %v16899_v49  ;;  %19800 = vst [vmem:[#allocation179_spill] sm:$0xff] %v16922_v48  ;;  %v16936_v26 = vrot.slane %v19185_v52, 4  ;;  %v16941_v40 = vld [vmem:[#allocation3 + $0x134] sm:$0xf]  ;;  %v16949_v51 = vrot.slane %v19808_v36, 4  ;;  %v10776_v49 = vcombine.low %v16895_v45, %v16907_v14  ;;  %9385 = vrot.lane.b32.xlu1 %v10981_v25, %s19560_s0  ;;  %6953 = vrot.lane.b32.xlu0 %v10775_v5, %s19560_s0 }
 0x7d5   : > { %19799 = vst [vmem:[#allocation178_spill] sm:$0xff] %v16918_v15  ;;  %19802 = vst [vmem:[#allocation180_spill] sm:$0xff] %v16926_v46  ;;  %v19806_v46 = vshll.u32 %v16867_v60, 16  ;;  %v19190_v22 = vshll.u32 %v16895_v45, 16  ;;  %v16953_v15 = vld [vmem:[#allocation3 + $0x138] sm:$0xf] }
 0x7d6   : > { %19803 = vst [vmem:[#allocation181_spill] sm:$0xff] %v16930_v18  ;;  %19804 = vst [vmem:[#allocation182_spill] sm:$0xff] %v16936_v26  ;;  %v19195_v48 = vshrl.u32 %v16913_v28, 16  ;;  %v19812_v36 = vshrl.u32 %v16895_v45, 16  ;;  %v19815_v26 = vshrl.u32 %v16907_v14, 16  ;;  %v19821_v45 = vshrl.u32 %v16930_v18, 16 }
 0x7d7   : > { %19805 = vst [vmem:[#allocation183_spill] sm:$0xff] %v16941_v40  ;;  %v16945_v53 = vrot.slane %v19806_v46, 5  ;;  %19809 = vst [vmem:[#allocation185_spill] sm:$0xff] %v16949_v51  ;;  %v16959_v46 = vld [vmem:[#allocation3 + $0x134] sm:$0xf]  ;;  %v16968_v52 = vrot.slane %v19190_v22, 5  ;;  %v10982_v22 = vcombine.low %v16913_v28, %v16930_v18  ;;  %v10777_v42 = vcombine.low %v16941_v40, %v16953_v15 }
 0x7d8   : > { %19810 = vst [vmem:[#allocation186_spill] sm:$0xff] %v16953_v15  ;;  %19811 = vst [vmem:[#allocation187_spill] sm:$0xff] %v16959_v46  ;;  %v16964_v51 = vrot.slane %v19812_v36, 4  ;;  %v16972_v21 = vrot.slane %v19815_v26, 4  ;;  %v16976_v60 = vld [vmem:[#allocation3 + $0x138] sm:$0xf]  ;;  %6955 = vrot.lane.b32.xlu0 %v10776_v49, %s19560_s0  ;;  %v7864_v49 = vpop.permute.xlu0 %7863 }
 0x7d9   : > { %19807 = vst [vmem:[#allocation184_spill] sm:$0xff] %v16945_v53  ;;  %19814 = vst [vmem:[#allocation189_spill] sm:$0xff] %v16968_v52  ;;  %v16982_v36 = vrot.slane %v19195_v48, 4  ;;  %v19819_v26 = vshll.u32 %v16913_v28, 16  ;;  %v16993_v14 = vrot.slane %v19821_v45, 4  ;;  %v19825_v45 = vshrl.u32 %v16941_v40, 16  ;;  %9387 = vrot.lane.b32.xlu1 %v10982_v22, %s19560_s0 }
 0x7da   : > { %19813 = vst [vmem:[#allocation188_spill] sm:$0xff] %v16964_v51  ;;  %19816 = vst [vmem:[#allocation190_spill] sm:$0xff] %v16972_v21  ;;  %v16997_v51 = vld [vmem:[#allocation3 + $0x148] sm:$0xf]  ;;  %v10983_v48 = vcombine.low %v16959_v46, %v16976_v60  ;;  %v19827_v28 = vshrl.u32 %v16959_v46, 16  ;;  %v19829_v25 = vshll.u32 %v16959_v46, 16 }
 0x7db   : > { %19817 = vst [vmem:[#allocation191_spill] sm:$0xff] %v16976_v60  ;;  %19818 = vst [vmem:[#allocation192_spill] sm:$0xff] %v16982_v36  ;;  %v16989_v21 = vrot.slane %v19819_v26, 5  ;;  %v17003_v26 = vld [vmem:[#allocation3 + $0x14c] sm:$0xf]  ;;  %v19212_v17 = vshrl.u32 %v16997_v51, 16 }
 0x7dc   : > { %19822 = vst [vmem:[#allocation194_spill] sm:$0xff] %v16993_v14  ;;  %19823 = vst [vmem:[#allocation195_spill] sm:$0xff] %v16997_v51  ;;  %v17008_v14 = vrot.slane %v19825_v45, 4  ;;  %v7095_v36 = vld [vmem:[#allocation3 + $0x18] sm:$0xf]  ;;  %v17018_v52 = vrot.slane %v19827_v28, 4  ;;  %v10984_v28 = vcombine.low %v16997_v51, %v17003_v26  ;;  %6957 = vrot.lane.b32.xlu0 %v10777_v42, %s19560_s0 }
 0x7dd   : > { %19820 = vst [vmem:[#allocation193_spill] sm:$0xff] %v16989_v21  ;;  %19824 = vst [vmem:[#allocation196_spill] sm:$0xff] %v17003_v26  ;;  %v17022_v18 = vrot.slane %v19829_v25, 5  ;;  %v19831_v45 = vshrl.u32 %v16976_v60, 16  ;;  %v7102_v15 = vld [vmem:[#allocation3 + $0x38] sm:$0x1]  ;;  %9389 = vrot.lane.b32.xlu1 %v10983_v48, %s19560_s0 }
 0x7de   : > { %19826 = vst [vmem:[#allocation197_spill] sm:$0xff] %v17008_v14  ;;  %19828 = vst [vmem:[#allocation198_spill] sm:$0xff] %v17018_v52  ;;  %v7099_v52 = vld [vmem:[#allocation3 + $0x2c] sm:$0xf]  ;;  %v17036_v25 = vrot.slane %v19212_v17, 4  ;;  %v7160_v46 = vshrl.u32 %v7095_v36, 16 }
 0x7df   : > { %19830 = vst [vmem:[#allocation199_spill] sm:$0xff] %v17022_v18  ;;  %v17026_v14 = vrot.slane %v19831_v45, 4  ;;  %v7172_v45 = vrot.slane %v15861_v61, 4  ;;  %v19835_v60 = vld [vmem:[#allocation52_spill] sm:$0xff]  ;;  %v7106_v40 = vld [vmem:[#allocation3 + $0x4c] sm:$0x1] }
 0x7e0   : > { %19833 = vst [vmem:[#allocation201_spill] sm:$0xff] %v17036_v25  ;;  %v19837_v5 = vshll.u32 %v16997_v51, 16  ;;  %v19839_v10 = vshrl.u32 %v17003_v26, 16  ;;  %v19841_v17 = vld [vmem:[#allocation57_spill] sm:$0xff]  ;;  %v19842_v25 = vld [vmem:[#allocation54_spill] sm:$0xff]  ;;  %v7535_v61 = vshll.u32 %v7102_v15, 16  ;;  %9391 = vrot.lane.b32.xlu0 %v10984_v28, %s19560_s0 }
 0x7e1   : > { %19832 = vst [vmem:[#allocation200_spill] sm:$0xff] %v17026_v14  ;;  %v19834_v14 = vld [vmem:[#allocation53_spill] sm:$0xff]  ;;  %v19843_v36 = vor.u32 %v19841_v17, %v19842_v25  ;;  %v7541_v17 = vor.u32 %v16051_v35, %v16043_v50  ;;  %v19846_v15 = vshll.u32 %v16028_v54, 16  ;;  %v19848_v35 = vld [vmem:[#allocation56_spill] sm:$0xff] }
 0x7e2   : > { %v19836_v18 = vor.u32 %v19834_v14, %v19835_v60  ;;  %v17045_v21 = vrot.slane %v19837_v5, 5  ;;  %v17049_v31 = vrot.slane %v19839_v10, 4  ;;  %v7103_v16 = vld [vmem:[#allocation3 + $0x40] sm:$0xf]  ;;  %v7180_v60 = vsel %vm14069_vm0, %v7172_v45, %v15877_v13 }
 0x7e3   : > { %v7533_v0 = vrot.slane %v19843_v36, 4  ;;  %v7182_v5 = vshrl.u32 %v7099_v52, 16  ;;  %v7537_v10 = vrot.slane %v7535_v61, 5  ;;  %v19845_v51 = vld [vmem:[#allocation49_spill] sm:$0xff]  ;;  %v7543_v36 = vrot.slane %v19846_v15, 5  ;;  %v7866_v61 = vpop.permute.xlu1 %7865 }
 0x7e4   : > { %v7528_v53 = vrot.slane %v19836_v18, 4  ;;  %19838 = vst [vmem:[#allocation53_spill] sm:$0xff] %v17045_v21  ;;  %19840 = vst [vmem:[#allocation52_spill] sm:$0xff] %v17049_v31  ;;  %v10794_v18 = vrot.slane %v7160_v46, 11  ;;  %v7194_v31 = vrot.slane %v19845_v51, 4  ;;  %v19847_v46 = vld [vmem:[#allocation62_spill] sm:$0xff] }
 0x7e5   : > { %v10795_v13 = vrot.slane %v7182_v5, 11  ;;  %v7549_v45 = vshll.u32 %v7106_v40, 16  ;;  %v7204_v21 = vshrl.u32 %v7103_v16, 16  ;;  %v7538_v50 = vsel %vm13341_vm13, %v7533_v0, %v7537_v10  ;;  %v19849_v16 = vld [vmem:[#allocation55_spill] sm:$0xff] }
 0x7e6   : > { %v7530_v22 = vsel %vm13341_vm13, %v7528_v53, %v19842_v25  ;;  %v7171_v26 = vsel %vm14069_vm0, %v10794_v18, %v19847_v46  ;;  %v11746_v53 = vld [vmem:[%s18903_s11] sm:$0xff]   ;;  %v7202_v51 = vsel %vm14069_vm0, %v7194_v31, %v19848_v35  ;;  %v7542_v25 = vrot.slane %v7541_v17, 4  ;;  %v7107_v5 = vld [vmem:[#allocation3 + $0x54] sm:$0xf] }
 0x7e7   : > { %v10810_v52 = vcombine.low %v7171_v26, %v7180_v60  ;;  %v10843_v40 = vcombine.low %v7530_v22, %v7538_v50  ;;  %v7193_v48 = vsel %vm14069_vm0, %v10795_v13, %v19849_v16  ;;  %v7546_v26 = vor.u32 %v16075_v29, %v7543_v36  ;;  %v7110_v60 = vld [vmem:[#allocation3 + $0x60] sm:$0x1] }
 0x7e8   : > { %v7551_v18 = vrot.slane %v7549_v45, 5  ;;  %v10811_v10 = vcombine.low %v7193_v48, %v7202_v51  ;;  %v7544_v31 = vsel %vm13341_vm13, %v7542_v25, %v7543_v36  ;;  %v10796_v17 = vrot.slane %v7204_v21, 11  ;;  %v11750_v21 = vld [vmem:[%s18903_s11 + $0x8] sm:$0xff]   ;;  %v19852_v36 = vld [vmem:[#allocation59_spill] sm:$0xff]  ;;  %v19856_v48 = vld [vmem:[#allocation58_spill] sm:$0xff] }
 0x7e9   : > { %v7945_v0 = vsel %vm2565_vm1, %v10810_v52, %v7864_v49  ;;  %v7547_v42 = vrot.slane %v7546_v26, 4  ;;  %v19850_v22 = vshrl.u32 %v16024_v47, 16  ;;  %v19851_v46 = vshrl.u32 %v16028_v54, 16 }
 0x7ea   : > { %8185 = vmatmul.mubr.bf16.vlgmr.msra.gmra.mrb[8].mxu1 %v7945_v0  ;;  %v7555_v29 = vor.u32 %v15886_v3, %v15882_v57  ;;  %v7949_v49 = vsel %vm2565_vm1, %v10811_v10, %v7866_v61  ;;  %v19853_v45 = vshll.u32 %v19852_v36, 16  ;;  %v7563_v50 = vshll.u32 %v7110_v60, 16  ;;  %v19857_v0 = vld [vmem:[#allocation60_spill] sm:$0xff] }
 0x7eb   : > { %v7211_v15 = vrot.slane %v19850_v22, 7  ;;  %v7220_v13 = vrot.slane %v19851_v46, 7  ;;  %8434 = vmatpush1.bf16.msra.mxu1 %v11746_v53  ;;  %10895 = vmatprep.mubr.msk.bf16.mxu1 %vm2565_vm1, %v10843_v40  ;;  %v7226_v35 = vshrl.u32 %v7107_v5, 16  ;;  %v7552_v51 = vsel %vm13341_vm13, %v7547_v42, %v7551_v18  ;;  %v7114_v42 = vld [vmem:[#allocation3 + $0x74] sm:$0x1]  ;;  %v11754_v46 = vld [vmem:[%s18903_s11 + $0x10] sm:$0xff]  }
 0x7ec   : > { %v7557_v52 = vrot.slane %v19853_v45, 5  ;;  %8435 = vmatprep.subr.bf16.mxu1 %v19554_v12  ;;  %v19854_v57 = vshll.u32 %v16024_v47, 16  ;;  %v19855_v25 = vshll.u32 %v16028_v54, 16  ;;  %v10844_v40 = vcombine.low %v7544_v31, %v7552_v51  ;;  %v6159_v22 = vld [vmem:[#allocation3 + $0x4] sm:$0xf] }
 0x7ed   : > { %v7216_v53 = vrot.slane %v7211_v15, 4  ;;  %v7556_v16 = vrot.slane %v7555_v29, 4  ;;  %v7565_v60 = vrot.slane %v7563_v50, 5  ;;  %v10797_v5 = vrot.slane %v7226_v35, 11 }
 0x7ee   : > { %v7214_v3 = vor.u32 %v19854_v57, %v7211_v15  ;;  %v7223_v61 = vor.u32 %v19855_v25, %v7220_v13  ;;  %v7560_v26 = vor.u32 %v19856_v48, %v7557_v52  ;;  %v19858_v10 = vshrl.u32 %v19857_v0, 16 }
 0x7ef   : > { %8436 = vmatpush1.bf16.msra.mxu1 %v11750_v21  ;;  %v7558_v31 = vsel %vm13341_vm13, %v7556_v16, %v7557_v52  ;;  %v19860_v29 = vshll.u32 %v19857_v0, 16  ;;  %v7569_v21 = vor.u32 %v16145_v62, %v16137_v34  ;;  %v19861_v35 = vshll.u32 %v16117_v27, 16  ;;  %v7111_v34 = vld [vmem:[#allocation3 + $0x68] sm:$0xf]  ;;  %v7870_v62 = vpop.permute.xlu1 %7869 }
 0x7f0   : > { %v7215_v28 = vsel %vm14069_vm0, %v10796_v17, %v7214_v3  ;;  %v7224_v18 = vsel %vm14069_vm0, %v7216_v53, %v7223_v61  ;;  %v7233_v47 = vrot.slane %v19858_v10, 7  ;;  %v7561_v15 = vrot.slane %v7560_v26, 4  ;;  %8437 = vmatprep.subr.bf16.mxu1 %v19554_v12 }
 0x7f1   : > { %v10812_v54 = vcombine.low %v7215_v28, %v7224_v18  ;;  %v19859_v17 = vshrl.u32 %v19852_v36, 16  ;;  %v7571_v52 = vrot.slane %v19861_v35, 5  ;;  %v19862_v57 = vshll.u32 %v19852_v36, 16 }
 0x7f2   : > { %v7236_v45 = vor.u32 %v19860_v29, %v7233_v47  ;;  %v7238_v50 = vrot.slane %v7233_v47, 4  ;;  %v7566_v51 = vsel %vm13341_vm13, %v7561_v15, %v7565_v60  ;;  %v7577_v53 = vshll.u32 %v7114_v42, 16  ;;  %8193 = vmatmul.mubr.bf16.gmra.mrb[12].mxu1 %v7949_v49 }
 0x7f3   : > { %v7242_v13 = vrot.slane %v19859_v17, 7  ;;  %v6224_v25 = vshrl.u32 %v6159_v22, 16  ;;  %v10845_v61 = vcombine.low %v7558_v31, %v7566_v51  ;;  %v7570_v48 = vrot.slane %v7569_v21, 4  ;;  %10896 = vmatprep.mubr.msk.bf16.mxu1 %vm2565_vm1, %v10844_v40  ;;  %8438 = vmatpush1.bf16.msra.mxu1 %v11754_v46 }
 0x7f4   : > { %v7237_v16 = vsel %vm14069_vm0, %v10797_v5, %v7236_v45  ;;  %v7574_v26 = vor.u32 %v16166_v58, %v7571_v52  ;;  %v7579_v36 = vrot.slane %v7577_v53, 5  ;;  %v19863_v18 = vshrl.u32 %v19666_v43, 16  ;;  %v11757_v5 = vld [vmem:[%s18903_s11 + $0x18] sm:$0xff]   ;;  %8439 = vmatprep.subr.bf16.mxu1 %v19554_v12 }
 0x7f5   : > { %v7245_v3 = vor.u32 %v19862_v57, %v7242_v13  ;;  %v10730_v28 = vrot.slane %v6224_v25, 11  ;;  %v7572_v58 = vsel %vm13341_vm13, %v7570_v48, %v7571_v52  ;;  %v19864_v40 = vshrl.u32 %v19667_v33, 16  ;;  %v7118_v52 = vld [vmem:[#allocation3 + $0x88] sm:$0x1]  ;;  %v8595_v25 = vld [vmem:[#allocation3 + $0x2c] sm:$0xf] }
 0x7f6   : > { %v6231_v49 = vrot.slane %v19863_v18, 7  ;;  %v7575_v10 = vrot.slane %v7574_v26, 4  ;;  %v19865_v42 = vshll.u32 %v19666_v43, 16  ;;  %v7248_v15 = vshrl.u32 %v7111_v34, 16 }
 0x7f7   : > { %v7246_v60 = vsel %vm14069_vm0, %v7238_v50, %v7245_v3  ;;  %v6240_v47 = vrot.slane %v19864_v40, 7  ;;  %v19866_v46 = vshrl.u32 %v16114_v11, 16  ;;  %v19867_v45 = vshll.u32 %v19667_v33, 16  ;;  %8440 = vmatpush1.bf16.msra.mxu1 %v11757_v5 }
 0x7f8   : > { %v10813_v0 = vcombine.low %v7237_v16, %v7246_v60  ;;  %v6234_v22 = vor.u32 %v19865_v42, %v6231_v49  ;;  %v6236_v31 = vrot.slane %v6231_v49, 4  ;;  %v7580_v29 = vsel %vm13341_vm13, %v7575_v10, %v7579_v36  ;;  %8441 = vmatprep.subr.bf16.mxu1 %v19554_v12  ;;  %v11760_v60 = vld [vmem:[%s18903_s11 + $0x20] sm:$0xff]  }
 0x7f9   : > { %v7255_v17 = vrot.slane %v19866_v46, 7  ;;  %v6243_v50 = vor.u32 %v19867_v45, %v6240_v47  ;;  %v19868_v21 = vshrl.u32 %v16117_v27, 16  ;;  %v17161_v43 = vcombine.low %v7572_v58, %v7580_v29 }
 0x7fa   : > { %v17153_v13 = vsel %vm2565_vm1, %v10813_v0, %v7870_v62  ;;  %v6235_v51 = vsel %vm14069_vm0, %v10730_v28, %v6234_v22  ;;  %v10798_v57 = vrot.slane %v7248_v15, 11  ;;  %v19869_v3 = vshll.u32 %v16114_v11, 16  ;;  %v7868_v11 = vpop.permute.xlu0 %7867  ;;  %v8602_v22 = vld [vmem:[#allocation3 + $0x4c] sm:$0x1] }
 0x7fb   : > { %v7264_v35 = vrot.slane %v19868_v21, 7  ;;  %v6244_v16 = vsel %vm14069_vm0, %v6236_v31, %v6243_v50  ;;  %v7260_v48 = vrot.slane %v7255_v17, 4  ;;  %v19870_v26 = vshll.u32 %v16117_v27, 16  ;;  %v7115_v31 = vld [vmem:[#allocation3 + $0x7c] sm:$0xf]  ;;  %8442 = vmatpush1.bf16.msra.mxu1 %v11760_v60  ;;  %v11762_v60 = vld [vmem:[%s18903_s11 + $0x30] sm:$0xff]  }
 0x7fc   : > { %v7258_v53 = vor.u32 %v19869_v3, %v7255_v17  ;;  %v7583_v62 = vor.u32 %v16111_v4, %v16103_v38  ;;  %v17177_v36 = vcombine.low %v6235_v51, %v6244_v16  ;;  %v19871_v18 = vshll.u32 %v16083_v8, 16  ;;  %8443 = vmatprep.subr.bf16.mxu1 %v19554_v12 }
 0x7fd   : > { %v7267_v34 = vor.u32 %v19870_v26, %v7264_v35  ;;  %v7591_v27 = vshll.u32 %v7118_v52, 16  ;;  %v7953_v5 = vsel %vm2565_vm1, %v10812_v54, %v7868_v11  ;;  %v8660_v0 = vshrl.u32 %v8595_v25, 16 }
 0x7fe   : > { %v7259_v28 = vsel %vm14069_vm0, %v10798_v57, %v7258_v53  ;;  %v7585_v49 = vrot.slane %v19871_v18, 5  ;;  %v7584_v4 = vrot.slane %v7583_v62, 4  ;;  %8201 = vmatmul.mubr.bf16.gmra.mrb[16].mxu1 %v7953_v5  ;;  %v19872_v47 = vshrl.u32 %v15908_v39, 16  ;;  %v17233_v5 = vld [vmem:[#allocation3 + $0x15c] sm:$0xf] }
 0x7ff   : > { %v7268_v38 = vsel %vm14069_vm0, %v7260_v48, %v7267_v34  ;;  %v7593_v40 = vrot.slane %v7591_v27, 5  ;;  %10897 = vmatprep.mubr.msk.bf16.mxu1 %vm2565_vm1, %v10845_v61  ;;  %v10938_v15 = vrot.slane %v8660_v0, 11  ;;  %v19873_v46 = vshrl.u32 %v15926_v63, 16 }
 0x800   : > { %v17186_v58 = vcombine.low %v7259_v28, %v7268_v38  ;;  %v7588_v10 = vor.u32 %v16125_v9, %v7585_v49  ;;  %v8667_v42 = vrot.slane %v19872_v47, 7  ;;  %v7586_v54 = vsel %vm13341_vm13, %v7584_v4, %v7585_v49  ;;  %v11761_v9 = vld [vmem:[%s18903_s11 + $0x28] sm:$0xff]  }
 0x801   : > { %v8676_v17 = vrot.slane %v19873_v46, 7  ;;  %v9027_v29 = vor.u32 %v16485_v19, %v16476_v30  ;;  %v19874_v50 = vshll.u32 %v15908_v39, 16  ;;  %v19875_v35 = vshll.u32 %v16417_v59, 16  ;;  %8444 = vmatpush1.bf16.msra.mxu1 %v11761_v9 }
 0x802   : > { %v7589_v45 = vrot.slane %v7588_v10, 4  ;;  %v8672_v61 = vrot.slane %v8667_v42, 4  ;;  %v19876_v51 = vshll.u32 %v15926_v63, 16  ;;  %v9035_v19 = vshll.u32 %v8602_v22, 16  ;;  %8445 = vmatprep.subr.bf16.mxu1 %v19554_v12  ;;  %v17238_v10 = vld [vmem:[#allocation3 + $0x160] sm:$0xf] }
 0x803   : > { %v8670_v21 = vor.u32 %v19874_v50, %v8667_v42  ;;  %v9029_v52 = vrot.slane %v19875_v35, 5  ;;  %v9028_v3 = vrot.slane %v9027_v29, 4  ;;  %v7270_v30 = vshrl.u32 %v7115_v31, 16  ;;  %v7874_v35 = vpop.permute.xlu1 %7873 }
 0x804   : > { %v8679_v57 = vor.u32 %v19876_v51, %v8676_v17  ;;  %v7594_v53 = vsel %vm13341_vm13, %v7589_v45, %v7593_v40  ;;  %v19877_v16 = vshrl.u32 %v16077_v41, 16  ;;  %v9037_v62 = vrot.slane %v9035_v19, 5  ;;  %v11763_v45 = vld [vmem:[%s18903_s11 + $0x38] sm:$0xff]  }
 0x805   : > { %v8671_v25 = vsel %vm14069_vm0, %v10938_v15, %v8670_v21  ;;  %v9032_v39 = vor.u32 %v16489_v7, %v9029_v52  ;;  %v17215_v26 = vcombine.low %v7586_v54, %v7594_v53  ;;  %v9030_v34 = vsel %vm13341_vm13, %v9028_v3, %v9029_v52  ;;  %v17227_v7 = vld [vmem:[%s18905_s13] sm:$0xff]   ;;  %v8599_v15 = vld [vmem:[#allocation3 + $0x40] sm:$0xf]  ;;  %8446 = vmatpush1.bf16.msra.mxu1 %v11762_v60  ;;  %v7872_v52 = vpop.permute.xlu0 %7871  ;;  %v7119_v60 = vld [vmem:[#allocation3 + $0x90] sm:$0xf] }
 0x806   : > { %v7277_v48 = vrot.slane %v19877_v16, 7  ;;  %v8680_v63 = vsel %vm14069_vm0, %v8672_v61, %v8679_v57  ;;  %v10799_v18 = vrot.slane %v7270_v30, 11  ;;  %v19878_v49 = vshll.u32 %v16077_v41, 16  ;;  %11437 = vmatprep.subr.bf16.mxu0 %v17227_v7  ;;  %8209 = vmatmul.mubr.bf16.gmra.mrb[20].mxu1 %v17153_v13  ;;  %v7122_v54 = vld [vmem:[#allocation3 + $0x9c] sm:$0x1] }
 0x807   : > { %v17229_v11 = vcombine.low %v8671_v25, %v8680_v63  ;;  %v9033_v28 = vrot.slane %v9032_v39, 4  ;;  %v19879_v4 = vshrl.u32 %v16083_v8, 16  ;;  %v8995_v40 = vshrl.u32 %v17233_v5, 16  ;;  %10898 = vmatprep.mubr.msk.bf16.mxu1 %vm2565_vm1, %v17161_v43  ;;  %8447 = vmatprep.subr.bf16.mxu1 %v19554_v12  ;;  %v8606_v39 = vld [vmem:[#allocation3 + $0x60] sm:$0x1] }
 0x808   : > { %v7280_v27 = vor.u32 %v19878_v49, %v7277_v48  ;;  %v7282_v38 = vrot.slane %v7277_v48, 4  ;;  %v8998_v47 = vshll.u32 %v17233_v5, 16  ;;  %v9004_v22 = vshrl.u32 %v17238_v10, 16 }
 0x809   : > { %v7286_v0 = vrot.slane %v19879_v4, 7  ;;  %v9038_v41 = vsel %vm13341_vm13, %v9033_v28, %v9037_v62  ;;  %v9007_v31 = vshll.u32 %v17238_v10, 16  ;;  %v19880_v17 = vshll.u32 %v16083_v8, 16  ;;  %8448 = vmatpush1.bf16.msra.mxu1 %v11763_v45  ;;  %v11764_v28 = vld [vmem:[%s18903_s11 + $0x40] sm:$0xff]  }
 0x80a   : > { %v7281_v42 = vsel %vm14069_vm0, %v10799_v18, %v7280_v27  ;;  %v17252_v46 = vcombine.low %v9030_v34, %v9038_v41  ;;  %v17258_v29 = vrot.slane %v8995_v40, 4  ;;  %v17262_v9 = vrot.slane %v8998_v47, 5  ;;  %8449 = vmatprep.subr.bf16.mxu1 %v19554_v12 }
 0x80b   : > { %v7289_v13 = vor.u32 %v19880_v17, %v7286_v0  ;;  %v17269_v43 = vrot.slane %v9004_v22, 4  ;;  %v10985_v8 = vcombine.low %v17233_v5, %v17238_v10  ;;  %v7597_v50 = vor.u32 %v16218_v56, %v16209_v44 }
 0x80c   : > { %v19881_v21 = vshll.u32 %v16172_v24, 16  ;;  %v7605_v57 = vshll.u32 %v7122_v54, 16  ;;  %v8682_v3 = vshrl.u32 %v8599_v15, 16  ;;  %v19882_v19 = vshrl.u32 %v16388_v2, 16 }
 0x80d   : > { %v7290_v51 = vsel %vm14069_vm0, %v7282_v38, %v7289_v13  ;;  %v7961_v53 = vsel %vm2565_vm1, %v17186_v58, %v7872_v52  ;;  %9393 = vrot.lane.b32.xlu1 %v10985_v8, %s19560_s0  ;;  %v7598_v56 = vrot.slane %v7597_v50, 4  ;;  %v19883_v63 = vshll.u32 %v16388_v2, 16  ;;  %8450 = vmatpush1.bf16.msra.mxu1 %v11764_v28  ;;  %s18851_s0 = scalar_lea.sflag [#allocation5], %s20273_s22 }
 0x80e   : > { %v7599_v61 = vrot.slane %v19881_v21, 5  ;;  %v8689_v30 = vrot.slane %v19882_v19, 7  ;;  %v10815_v25 = vcombine.low %v7281_v42, %v7290_v51  ;;  %v7607_v16 = vrot.slane %v7605_v57, 5  ;;  %8217 = vmatmul.mubr.bf16.gmra.mrb[24].mxu1 %v7961_v53  ;;  %v7126_v21 = vld [vmem:[#allocation3 + $0xb0] sm:$0x1]  ;;  %8451 = vmatprep.subr.bf16.mxu1 %v19554_v12 }
 0x80f   : > { %v10939_v48 = vrot.slane %v8682_v3, 11  ;;  %v9041_v38 = vor.u32 %v16531_v55, %v16522_v20  ;;  %v19885_v4 = vshll.u32 %v16467_v23, 16  ;;  %v9049_v41 = vshll.u32 %v8606_v39, 16  ;;  %10899 = vmatprep.mubr.msk.bf16.mxu1 %vm2565_vm1, %v17215_v26  ;;  %v8603_v3 = vld [vmem:[#allocation3 + $0x54] sm:$0xf]  ;;  %v19890_v39 = vld [vmem:[#allocation32_spill] sm:$0xff] }
 0x810   : > { %v7602_v44 = vor.u32 %v16222_v1, %v7599_v61  ;;  %v8692_v34 = vor.u32 %v19883_v63, %v8689_v30  ;;  %v8694_v62 = vrot.slane %v8689_v30, 4  ;;  %v7965_v58 = vsel %vm2565_vm1, %v10815_v25, %v7874_v35 }
 0x811   : > { %v7600_v18 = vsel %vm13341_vm13, %v7598_v56, %v7599_v61  ;;  %v19884_v1 = vshrl.u32 %v16417_v59, 16  ;;  %v9043_v0 = vrot.slane %v19885_v4, 5  ;;  %v19886_v54 = vshll.u32 %v16417_v59, 16  ;;  %v11765_v61 = vld [vmem:[%s18903_s11 + $0x48] sm:$0xff]   ;;  %v17315_v59 = vpop.permute.xlu1 %7877 }
 0x812   : > { %v7603_v49 = vrot.slane %v7602_v44, 4  ;;  %v8693_v2 = vsel %vm14069_vm0, %v10939_v48, %v8692_v34  ;;  %v7292_v17 = vshrl.u32 %v7119_v60, 16  ;;  %v19887_v13 = vshrl.u32 %v16162_v6, 16  ;;  %v19892_v48 = vld [vmem:[#allocation31_spill] sm:$0xff]  ;;  %8452 = vmatpush1.bf16.msra.mxu1 %v11765_v61 }
 0x813   : > { %v8698_v27 = vrot.slane %v19884_v1, 7  ;;  %v9042_v55 = vrot.slane %v9041_v38, 4  ;;  %v9046_v20 = vor.u32 %v16535_v32, %v9043_v0  ;;  %v9051_v50 = vrot.slane %v9049_v41, 5  ;;  %v7876_v32 = vpop.permute.xlu0 %7875  ;;  %v19895_v1 = vld [vmem:[#allocation86_spill] sm:$0xff]  ;;  %8453 = vmatprep.subr.bf16.mxu1 %v19554_v12 }
 0x814   : > { %v7608_v42 = vsel %vm13341_vm13, %v7603_v49, %v7607_v16  ;;  %v7299_v45 = vrot.slane %v19887_v13, 7  ;;  %v10800_v52 = vrot.slane %v7292_v17, 11  ;;  %v19888_v51 = vshll.u32 %v16162_v6, 16  ;;  %v19891_v6 = vld [vmem:[#allocation35_spill] sm:$0xff]  ;;  %v11766_v38 = vld [vmem:[%s18903_s11 + $0x50] sm:$0xff]  }
 0x815   : > { %v8701_v15 = vor.u32 %v19886_v54, %v8698_v27  ;;  %v10848_v8 = vcombine.low %v7600_v18, %v7608_v42  ;;  %v9044_v30 = vsel %vm13341_vm13, %v9042_v55, %v9043_v0  ;;  %v9047_v53 = vrot.slane %v9046_v20, 4  ;;  %v17343_v4 = vpop.permute.xlu1 %7881  ;;  %v19897_v42 = vld [vmem:[#allocation33_spill] sm:$0xff]  ;;  %v8610_v17 = vld [vmem:[#allocation3 + $0x74] sm:$0x1] }
 0x816   : > { %v7302_v26 = vor.u32 %v19888_v51, %v7299_v45  ;;  %v7304_v57 = vrot.slane %v7299_v45, 4  ;;  %v19889_v25 = vshrl.u32 %v16172_v24, 16  ;;  %v7611_v16 = vor.u32 %v19891_v6, %v19890_v39  ;;  %8225 = vmatmul.mubr.bf16.gmra.mrb[28].mxu1 %v7965_v58 }
 0x817   : > { %v8702_v35 = vsel %vm14069_vm0, %v8694_v62, %v8701_v15  ;;  %v19893_v63 = vshll.u32 %v19892_v48, 16  ;;  %v7619_v62 = vshll.u32 %v7126_v21, 16  ;;  %v9052_v60 = vsel %vm13341_vm13, %v9047_v53, %v9051_v50  ;;  %v7123_v21 = vld [vmem:[#allocation3 + $0xa4] sm:$0xf]  ;;  %10900 = vmatprep.mubr.msk.bf16.mxu1 %vm2565_vm1, %v10848_v8  ;;  %8454 = vmatpush1.bf16.msra.mxu1 %v11766_v38 }
 0x818   : > { %v17322_v19 = vcombine.low %v8693_v2, %v8702_v35  ;;  %v7308_v56 = vrot.slane %v19889_v25, 7  ;;  %v7303_v44 = vsel %vm14069_vm0, %v10800_v52, %v7302_v26  ;;  %v19894_v28 = vshll.u32 %v16172_v24, 16  ;;  %v17349_v24 = vpop.permute.xlu0 %7879  ;;  %v19902_v25 = vld [vmem:[#allocation94_spill] sm:$0xff]  ;;  %8455 = vmatprep.subr.bf16.mxu1 %v19554_v12 }
 0x819   : > { %v7613_v34 = vrot.slane %v19893_v63, 5  ;;  %v8704_v49 = vshrl.u32 %v8603_v3, 16  ;;  %v19896_v27 = vshrl.u32 %v19895_v1, 16  ;;  %v17345_v0 = vcombine.low %v9044_v30, %v9052_v60  ;;  %v19900_v3 = vld [vmem:[#allocation102_spill] sm:$0xff]  ;;  %v19901_v30 = vld [vmem:[#allocation104_spill] sm:$0xff]  ;;  %v17369_v6 = vpop.permute.xlu1 %7885 }
 0x81a   : > { %v7311_v18 = vor.u32 %v19894_v28, %v7308_v56  ;;  %v7612_v41 = vrot.slane %v7611_v16, 4  ;;  %v7621_v15 = vrot.slane %v7619_v62, 5  ;;  %v19898_v55 = vshll.u32 %v19895_v1, 16 }
 0x81b   : > { %v8711_v2 = vrot.slane %v19896_v27, 7  ;;  %v7616_v54 = vor.u32 %v19897_v42, %v7613_v34  ;;  %v10940_v45 = vrot.slane %v8704_v49, 11  ;;  %v19899_v51 = vshrl.u32 %v16467_v23, 16  ;;  %v19905_v49 = vld [vmem:[#allocation105_spill] sm:$0xff] }
 0x81c   : > { %v7312_v13 = vsel %vm14069_vm0, %v7304_v57, %v7311_v18  ;;  %v7614_v35 = vsel %vm13341_vm13, %v7612_v41, %v7613_v34  ;;  %v9055_v53 = vor.u32 %v19901_v30, %v19900_v3  ;;  %v19903_v56 = vshll.u32 %v19902_v25, 16  ;;  %v17377_v60 = vpop.permute.xlu0 %7883  ;;  %v19906_v41 = vld [vmem:[#allocation30_spill] sm:$0xff]  ;;  %v19913_v3 = vld [vmem:[#allocation71_spill] sm:$0xff] }
 0x81d   : > { %v8714_v20 = vor.u32 %v19898_v55, %v8711_v2  ;;  %v8716_v50 = vrot.slane %v8711_v2, 4  ;;  %v10816_v61 = vcombine.low %v7303_v44, %v7312_v13  ;;  %v7617_v52 = vrot.slane %v7616_v54, 4  ;;  %v11767_v44 = vld [vmem:[%s18903_s11 + $0x58] sm:$0xff]   ;;  %v7130_v2 = vld [vmem:[#allocation3 + $0xc4] sm:$0x1]  ;;  %v19909_v55 = vld [vmem:[#allocation78_spill] sm:$0xff] }
 0x81e   : > { %v8720_v26 = vrot.slane %v19899_v51, 7  ;;  %v9057_v39 = vrot.slane %v19903_v56, 5  ;;  %v9063_v58 = vshll.u32 %v8610_v17, 16  ;;  %v19904_v63 = vshll.u32 %v16467_v23, 16  ;;  %v8607_v17 = vld [vmem:[#allocation3 + $0x68] sm:$0xf]  ;;  %8456 = vmatpush1.bf16.msra.mxu1 %v11767_v44 }
 0x81f   : > { %v8715_v57 = vsel %vm14069_vm0, %v10940_v45, %v8714_v20  ;;  %v7969_v16 = vsel %vm2565_vm1, %v10816_v61, %v7876_v32  ;;  %v7622_v8 = vsel %vm13341_vm13, %v7617_v52, %v7621_v15  ;;  %v7314_v62 = vshrl.u32 %v7123_v21, 16  ;;  %v19910_v20 = vld [vmem:[#allocation15_spill] sm:$0xff]  ;;  %v17392_v61 = vpop.permute.xlu1 %7889  ;;  %11503 = vmatprep.subr.bf16.mxu1 %v17227_v7 }
 0x820   : > { %v8723_v34 = vor.u32 %v19904_v63, %v8720_v26  ;;  %v10849_v28 = vcombine.low %v7614_v35, %v7622_v8  ;;  %v9056_v18 = vrot.slane %v9055_v53, 4  ;;  %v9060_v1 = vor.u32 %v19905_v49, %v9057_v39  ;;  %v17401_v53 = vpop.permute.xlu0 %7887  ;;  %8233 = vmatmul.mubr.bf16.gmra.mrb[32].mxu1 %v7969_v16  ;;  %v7127_v49 = vld [vmem:[#allocation3 + $0xb8] sm:$0xf] }
 0x821   : > { %v9065_v27 = vrot.slane %v9063_v58, 5  ;;  %v10801_v38 = vrot.slane %v7314_v62, 11  ;;  %v19907_v42 = vshrl.u32 %v19906_v41, 16  ;;  %v19908_v23 = vshrl.u32 %v19892_v48, 16 }
 0x822   : > { %v8724_v32 = vsel %vm14069_vm0, %v8716_v50, %v8723_v34  ;;  %v9058_v13 = vsel %vm13341_vm13, %v9056_v18, %v9057_v39  ;;  %v9061_v45 = vrot.slane %v9060_v1, 4  ;;  %v7625_v21 = vor.u32 %v19910_v20, %v19909_v55  ;;  %v19915_v34 = vld [vmem:[#allocation12_spill] sm:$0xff]  ;;  %v8614_v18 = vld [vmem:[#allocation3 + $0x88] sm:$0x1]  ;;  %10901 = vmatprep.mubr.msk.bf16.mxu1 %vm2565_vm1, %v10849_v28  ;;  %v19921_v20 = vld [vmem:[#allocation101_spill] sm:$0xff] }
 0x823   : > { %v7321_v54 = vrot.slane %v19907_v42, 7  ;;  %v7330_v15 = vrot.slane %v19908_v23, 7  ;;  %v17386_v12 = vcombine.low %v8715_v57, %v8724_v32  ;;  %v19911_v50 = vshll.u32 %v19906_v41, 16  ;;  %v17415_v32 = vpop.permute.xlu1 %7893  ;;  %v19916_v42 = vld [vmem:[#allocation90_spill] sm:$0xff] }
 0x824   : > { %v19912_v51 = vshll.u32 %v19892_v48, 16  ;;  %v19914_v57 = vshll.u32 %v19913_v3, 16  ;;  %v9066_v56 = vsel %vm13341_vm13, %v9061_v45, %v9065_v27  ;;  %v7626_v39 = vrot.slane %v7625_v21, 4  ;;  %v17423_v55 = vpop.permute.xlu0 %7891 }
 0x825   : > { %v7324_v35 = vor.u32 %v19911_v50, %v7321_v54  ;;  %v7326_v52 = vrot.slane %v7321_v54, 4  ;;  %v7633_v58 = vshll.u32 %v7130_v2, 16  ;;  %v8726_v44 = vshrl.u32 %v8607_v17, 16  ;;  %v19919_v17 = vld [vmem:[#allocation112_spill] sm:$0xff] }
 0x826   : > { %v7333_v26 = vor.u32 %v19912_v51, %v7330_v15  ;;  %v7627_v30 = vrot.slane %v19914_v57, 5  ;;  %v17405_v8 = vcombine.low %v9058_v13, %v9066_v56  ;;  %v19918_v23 = vshrl.u32 %v19902_v25, 16  ;;  %v19920_v13 = vld [vmem:[#allocation114_spill] sm:$0xff] }
 0x827   : > { %v7325_v48 = vsel %vm14069_vm0, %v10801_v38, %v7324_v35  ;;  %v7635_v2 = vrot.slane %v7633_v58, 5  ;;  %v10941_v16 = vrot.slane %v8726_v44, 11  ;;  %v19917_v38 = vshrl.u32 %v19916_v42, 16 }
 0x828   : > { %v7334_v63 = vsel %vm14069_vm0, %v7326_v52, %v7333_v26  ;;  %v7630_v62 = vor.u32 %v19915_v34, %v7627_v30  ;;  %v7628_v27 = vsel %vm13341_vm13, %v7626_v39, %v7627_v30  ;;  %v8742_v15 = vrot.slane %v19918_v23, 7  ;;  %v17436_v34 = vpop.permute.xlu1 %6929 }
 0x829   : > { %v10817_v1 = vcombine.low %v7325_v48, %v7334_v63  ;;  %v8733_v54 = vrot.slane %v19917_v38, 7  ;;  %v9069_v45 = vor.u32 %v19920_v13, %v19919_v17  ;;  %v19922_v21 = vshll.u32 %v19921_v20, 16  ;;  %v19925_v48 = vld [vmem:[#allocation115_spill] sm:$0xff]  ;;  %v8611_v17 = vld [vmem:[#allocation3 + $0x7c] sm:$0xf] }
 0x82a   : > { %v7631_v41 = vrot.slane %v7630_v62, 4  ;;  %v9077_v35 = vshll.u32 %v8614_v18, 16  ;;  %v7336_v52 = vshrl.u32 %v7127_v49, 16  ;;  %v19923_v26 = vshll.u32 %v19916_v42, 16  ;;  %v7134_v42 = vld [vmem:[#allocation3 + $0xd8] sm:$0x1] }
 0x82b   : > { %v7973_v28 = vsel %vm2565_vm1, %v10817_v1, %v17315_v59  ;;  %v9071_v50 = vrot.slane %v19922_v21, 5  ;;  %v8738_v30 = vrot.slane %v8733_v54, 4  ;;  %v19924_v56 = vshll.u32 %v19902_v25, 16  ;;  %v19926_v1 = vld [vmem:[#allocation36_spill] sm:$0xff]  ;;  %v6928_v25 = vpop.permute.xlu0 %6927 }
 0x82c   : > { %v7636_v51 = vsel %vm13341_vm13, %v7631_v41, %v7635_v2  ;;  %v8736_v57 = vor.u32 %v19923_v26, %v8733_v54  ;;  %v9070_v44 = vrot.slane %v9069_v45, 4  ;;  %v9079_v59 = vrot.slane %v9077_v35, 5  ;;  %8241 = vmatmul.mubr.bf16.gmra.mrb[36].mxu1 %v7973_v28  ;;  %v19930_v35 = vld [vmem:[#allocation77_spill] sm:$0xff]  ;;  %v9364_v28 = vpop.permute.xlu1 %9363 }
 0x82d   : > { %v8745_v39 = vor.u32 %v19924_v56, %v8742_v15  ;;  %v10850_v58 = vcombine.low %v7628_v27, %v7636_v51  ;;  %v9074_v63 = vor.u32 %v19925_v48, %v9071_v50  ;;  %v10802_v49 = vrot.slane %v7336_v52, 11  ;;  %v19931_v52 = vld [vmem:[#allocation76_spill] sm:$0xff] }
 0x82e   : > { %v8737_v62 = vsel %vm14069_vm0, %v10941_v16, %v8736_v57  ;;  %v19927_v2 = vshrl.u32 %v19926_v1, 16  ;;  %v9072_v27 = vsel %vm13341_vm13, %v9070_v44, %v9071_v50  ;;  %v19928_v23 = vshrl.u32 %v19913_v3, 16 }
 0x82f   : > { %v8746_v18 = vsel %vm14069_vm0, %v8738_v30, %v8745_v39  ;;  %v9075_v54 = vrot.slane %v9074_v63, 4  ;;  %v17452_v16 = vsel %vm2565_vm1, %v17177_v36, %v6928_v25  ;;  %v19929_v13 = vshll.u32 %v19926_v1, 16  ;;  %10902 = vmatprep.mubr.msk.bf16.mxu1 %vm2565_vm1, %v10850_v58  ;;  %v19933_v30 = vld [vmem:[#allocation72_spill] sm:$0xff]  ;;  %v17472_v58 = vld [vmem:[%s18905_s13 + $0x8] sm:$0xff]  }
 0x830   : > { %v7343_v41 = vrot.slane %v19927_v2, 7  ;;  %v17444_v38 = vcombine.low %v8737_v62, %v8746_v18  ;;  %v7352_v15 = vrot.slane %v19928_v23, 7  ;;  %v7639_v51 = vor.u32 %v19931_v52, %v19930_v35  ;;  %v19935_v18 = vld [vmem:[#allocation11_spill] sm:$0xff] }
 0x831   : > { %v9080_v50 = vsel %vm13341_vm13, %v9075_v54, %v9079_v59  ;;  %v19932_v26 = vshll.u32 %v19913_v3, 16  ;;  %v19934_v56 = vshll.u32 %v19933_v30, 16  ;;  %v7647_v39 = vshll.u32 %v7134_v42, 16  ;;  %v19941_v35 = vld [vmem:[#allocation111_spill] sm:$0xff] }
 0x832   : > { %v7346_v45 = vor.u32 %v19929_v13, %v7343_v41  ;;  %v7348_v21 = vrot.slane %v7343_v41, 4  ;;  %v17465_v44 = vcombine.low %v9072_v27, %v9080_v50  ;;  %v7640_v63 = vrot.slane %v7639_v51, 4  ;;  %v8618_v41 = vld [vmem:[#allocation3 + $0x9c] sm:$0x1]  ;;  %v19936_v27 = vld [vmem:[#allocation97_spill] sm:$0xff]  ;;  %v19939_v13 = vld [vmem:[#allocation122_spill] sm:$0xff]  ;;  %v9366_v50 = vpop.permute.xlu1 %9365 }
 0x833   : > { %v7355_v57 = vor.u32 %v19932_v26, %v7352_v15  ;;  %v7641_v36 = vrot.slane %v19934_v56, 5  ;;  %v8748_v62 = vshrl.u32 %v8611_v17, 16  ;;  %v9445_v3 = vsel %vm2565_vm1, %v17229_v11, %v9364_v28 }
 0x834   : > { %v7347_v48 = vsel %vm14069_vm0, %v10802_v49, %v7346_v45  ;;  %v7649_v2 = vrot.slane %v7647_v39, 5  ;;  %9685 = vmatmul.mubr.bf16.vlgmr.msra.gmra.mrb[36].mxu0 %v9445_v3  ;;  %v19937_v54 = vshrl.u32 %v19936_v27, 16  ;;  %v19938_v15 = vshrl.u32 %v19921_v20, 16  ;;  %v19940_v45 = vld [vmem:[#allocation124_spill] sm:$0xff]  ;;  %v7131_v39 = vld [vmem:[#allocation3 + $0xcc] sm:$0xf] }
 0x835   : > { %v7356_v59 = vsel %vm14069_vm0, %v7348_v21, %v7355_v57  ;;  %v7644_v1 = vor.u32 %v19935_v18, %v7641_v36  ;;  %v7642_v49 = vsel %vm13341_vm13, %v7640_v63, %v7641_v36  ;;  %v10942_v25 = vrot.slane %v8748_v62, 11  ;;  %11039 = vmatprep.mubr.msk.bf16.mxu0 %vm2565_vm1, %v17252_v46  ;;  %11438 = vmatpush3.bf16.msra.mxu0 %v17227_v7 }
 0x836   : > { %v10818_v42 = vcombine.low %v7347_v48, %v7356_v59  ;;  %v8755_v23 = vrot.slane %v19937_v54, 7  ;;  %v8764_v17 = vrot.slane %v19938_v15, 7  ;;  %v9083_v21 = vor.u32 %v19940_v45, %v19939_v13  ;;  %11439 = vmatprep.subr.bf16.mxu0 %v17472_v58  ;;  %v19945_v59 = vld [vmem:[#allocation125_spill] sm:$0xff]  ;;  %v9368_v54 = vpop.permute.xlu1 %9367  ;;  %v7138_v15 = vld [vmem:[#allocation3 + $0xec] sm:$0x1] }
 0x837   : > { %v7645_v11 = vrot.slane %v7644_v1, 4  ;;  %v19942_v52 = vshll.u32 %v19941_v35, 16  ;;  %v19943_v57 = vshll.u32 %v19936_v27, 16  ;;  %v9091_v36 = vshll.u32 %v8618_v41, 16  ;;  %v19950_v13 = vld [vmem:[#allocation81_spill] sm:$0xff] }
 0x838   : > { %v7977_v26 = vsel %vm2565_vm1, %v10818_v42, %v17349_v24  ;;  %v8760_v46 = vrot.slane %v8755_v23, 4  ;;  %v9449_v28 = vsel %vm2565_vm1, %v17322_v19, %v9366_v50  ;;  %v19944_v7 = vshll.u32 %v19921_v20, 16 }
 0x839   : > { %v9085_v51 = vrot.slane %v19942_v52, 5  ;;  %v8758_v56 = vor.u32 %v19943_v57, %v8755_v23  ;;  %v7650_v48 = vsel %vm13341_vm13, %v7645_v11, %v7649_v2  ;;  %v9084_v62 = vrot.slane %v9083_v21, 4  ;;  %8249 = vmatmul.mubr.bf16.gmra.mrb[40].mxu1 %v7977_v26  ;;  %v19946_v2 = vld [vmem:[#allocation34_spill] sm:$0xff]  ;;  %11440 = vmatpush3.bf16.msra.mxu0 %v17472_v58  ;;  %v8615_v21 = vld [vmem:[#allocation3 + $0x90] sm:$0xf] }
 0x83a   : > { %v8767_v63 = vor.u32 %v19944_v7, %v8764_v17  ;;  %v10851_v24 = vcombine.low %v7642_v49, %v7650_v48  ;;  %v9093_v1 = vrot.slane %v9091_v36, 5  ;;  %v7358_v42 = vshrl.u32 %v7131_v39, 16  ;;  %v19949_v17 = vld [vmem:[#allocation38_spill] sm:$0xff]  ;;  %v19953_v48 = vld [vmem:[#allocation79_spill] sm:$0xff] }
 0x83b   : > { %v8759_v3 = vsel %vm14069_vm0, %v10942_v25, %v8758_v56  ;;  %v9088_v18 = vor.u32 %v19945_v59, %v9085_v51  ;;  %v9086_v19 = vsel %vm13341_vm13, %v9084_v62, %v9085_v51  ;;  %v19947_v27 = vshrl.u32 %v19946_v2, 16 }
 0x83c   : > { %v8768_v41 = vsel %vm14069_vm0, %v8760_v46, %v8767_v63  ;;  %10903 = vmatprep.mubr.msk.bf16.mxu1 %vm2565_vm1, %v10851_v24  ;;  %v19948_v23 = vshrl.u32 %v19933_v30, 16  ;;  %v7653_v45 = vor.u32 %v19950_v13, %v19949_v17  ;;  %v9453_v52 = vsel %vm2565_vm1, %v17386_v12, %v9368_v54  ;;  %9693 = vmatmul.mubr.bf16.gmra.mrb[40].mxu0 %v9449_v28 }
 0x83d   : > { %v7365_v20 = vrot.slane %v19947_v27, 7  ;;  %v10958_v49 = vcombine.low %v8759_v3, %v8768_v41  ;;  %v9089_v25 = vrot.slane %v9088_v18, 4  ;;  %v10803_v51 = vrot.slane %v7358_v42, 11  ;;  %11040 = vmatprep.mubr.msk.bf16.mxu0 %vm2565_vm1, %v17345_v0  ;;  %v9370_v3 = vpop.permute.xlu1 %9369  ;;  %v19955_v18 = vld [vmem:[#allocation17_spill] sm:$0xff]  ;;  %v19956_v41 = vld [vmem:[#allocation107_spill] sm:$0xff] }
 0x83e   : > { %v7374_v11 = vrot.slane %v19948_v23, 7  ;;  %v19951_v50 = vshll.u32 %v19946_v2, 16  ;;  %v19952_v46 = vshll.u32 %v19933_v30, 16  ;;  %v7654_v39 = vrot.slane %v7653_v45, 4  ;;  %v8622_v0 = vld [vmem:[#allocation3 + $0xb0] sm:$0x1] }
 0x83f   : > { %v7370_v57 = vrot.slane %v7365_v20, 4  ;;  %v9094_v56 = vsel %vm13341_vm13, %v9089_v25, %v9093_v1  ;;  %v19954_v7 = vshll.u32 %v19953_v48, 16  ;;  %v7661_v24 = vshll.u32 %v7138_v15, 16  ;;  %v7135_v25 = vld [vmem:[#allocation3 + $0xe0] sm:$0xf] }
 0x840   : > { %v7368_v26 = vor.u32 %v19951_v50, %v7365_v20  ;;  %v7377_v36 = vor.u32 %v19952_v46, %v7374_v11  ;;  %v17530_v12 = vcombine.low %v9086_v19, %v9094_v56  ;;  %v8770_v28 = vshrl.u32 %v8615_v21, 16  ;;  %v19961_v50 = vld [vmem:[#allocation134_spill] sm:$0xff] }
 0x841   : > { %v7655_v63 = vrot.slane %v19954_v7, 5  ;;  %v19957_v42 = vshrl.u32 %v19956_v41, 16  ;;  %v17543_v19 = vsel %vm2565_vm1, %v17444_v38, %v9370_v3  ;;  %v7663_v20 = vrot.slane %v7661_v24, 5  ;;  %v19962_v38 = vld [vmem:[#allocation121_spill] sm:$0xff] }
 0x842   : > { %v7369_v62 = vsel %vm14069_vm0, %v10803_v51, %v7368_v26  ;;  %v7378_v59 = vsel %vm14069_vm0, %v7370_v57, %v7377_v36  ;;  %v10943_v54 = vrot.slane %v8770_v28, 11  ;;  %v19958_v11 = vshll.u32 %v19956_v41, 16  ;;  %v19960_v51 = vld [vmem:[#allocation132_spill] sm:$0xff]  ;;  %v9372_v36 = vpop.permute.xlu1 %9371 }
 0x843   : > { %v7656_v30 = vsel %vm13341_vm13, %v7654_v39, %v7655_v63  ;;  %v7658_v1 = vor.u32 %v19955_v18, %v7655_v63  ;;  %v8777_v2 = vrot.slane %v19957_v42, 7  ;;  %v10819_v27 = vcombine.low %v7369_v62, %v7378_v59  ;;  %v19965_v59 = vld [vmem:[#allocation135_spill] sm:$0xff] }
 0x844   : > { %v19959_v13 = vshrl.u32 %v19941_v35, 16  ;;  %v9097_v26 = vor.u32 %v19961_v50, %v19960_v51  ;;  %v19963_v57 = vshll.u32 %v19962_v38, 16  ;;  %v9105_v46 = vshll.u32 %v8622_v0, 16  ;;  %9701 = vmatmul.mubr.bf16.gmra.mrb[44].mxu0 %v9453_v52  ;;  %v8619_v50 = vld [vmem:[#allocation3 + $0xa4] sm:$0xf] }
 0x845   : > { %v7659_v23 = vrot.slane %v7658_v1, 4  ;;  %v8780_v15 = vor.u32 %v19958_v11, %v8777_v2  ;;  %v8782_v17 = vrot.slane %v8777_v2, 4  ;;  %v7981_v21 = vsel %vm2565_vm1, %v10819_v27, %v17343_v4  ;;  %v19966_v2 = vld [vmem:[#allocation73_spill] sm:$0xff]  ;;  %11041 = vmatprep.mubr.msk.bf16.mxu0 %vm2565_vm1, %v17405_v8 }
 0x846   : > { %v8786_v45 = vrot.slane %v19959_v13, 7  ;;  %v9099_v56 = vrot.slane %v19963_v57, 5  ;;  %8257 = vmatmul.mubr.bf16.gmra.mrb[44].mxu1 %v7981_v21  ;;  %v19964_v63 = vshll.u32 %v19941_v35, 16  ;;  %v7380_v24 = vshrl.u32 %v7135_v25, 16  ;;  %v9374_v25 = vpop.permute.xlu1 %9373  ;;  %v19971_v13 = vld [vmem:[#allocation80_spill] sm:$0xff]  ;;  %v19972_v21 = vld [vmem:[#allocation75_spill] sm:$0xff] }
 0x847   : > { %v7664_v39 = vsel %vm13341_vm13, %v7659_v23, %v7663_v20  ;;  %v8781_v7 = vsel %vm14069_vm0, %v10943_v54, %v8780_v15  ;;  %v17562_v4 = vsel %vm2565_vm1, %v10958_v49, %v9372_v36  ;;  %v9098_v3 = vrot.slane %v9097_v26, 4  ;;  %v7142_v20 = vld [vmem:[#allocation3 + $0x100] sm:$0x1] }
 0x848   : > { %v8789_v62 = vor.u32 %v19964_v63, %v8786_v45  ;;  %v10852_v28 = vcombine.low %v7656_v30, %v7664_v39  ;;  %v9102_v18 = vor.u32 %v19965_v59, %v9099_v56  ;;  %v9107_v41 = vrot.slane %v9105_v46, 5 }
 0x849   : > { %v10804_v42 = vrot.slane %v7380_v24, 11  ;;  %v19967_v0 = vshrl.u32 %v19966_v2, 16  ;;  %v9100_v49 = vsel %vm13341_vm13, %v9098_v3, %v9099_v56  ;;  %v19968_v52 = vshrl.u32 %v19953_v48, 16 }
 0x84a   : > { %v8790_v1 = vsel %vm14069_vm0, %v8782_v17, %v8789_v62  ;;  %10904 = vmatprep.mubr.msk.bf16.mxu1 %vm2565_vm1, %v10852_v28  ;;  %v9103_v30 = vrot.slane %v9102_v18, 4  ;;  %v19969_v23 = vshll.u32 %v19966_v2, 16  ;;  %v19970_v17 = vld [vmem:[#allocation19_spill] sm:$0xff]  ;;  %v19973_v8 = vshll.u32 %v19972_v21, 16  ;;  %v19975_v62 = vld [vmem:[#allocation37_spill] sm:$0xff] }
 0x84b   : > { %v7387_v27 = vrot.slane %v19967_v0, 7  ;;  %v10959_v35 = vcombine.low %v8781_v7, %v8790_v1  ;;  %v7396_v54 = vrot.slane %v19968_v52, 7  ;;  %v7667_v45 = vor.u32 %v19971_v13, %v19970_v17  ;;  %v19976_v18 = vld [vmem:[#allocation117_spill] sm:$0xff] }
 0x84c   : > { %v7669_v51 = vrot.slane %v19973_v8, 5  ;;  %v9108_v57 = vsel %vm13341_vm13, %v9103_v30, %v9107_v41  ;;  %v19974_v56 = vshll.u32 %v19953_v48, 16  ;;  %v7675_v36 = vshll.u32 %v7142_v20, 16  ;;  %9709 = vmatmul.mubr.bf16.gmra.mrb[48].mxu0 %v17543_v19 }
 0x84d   : > { %v7390_v11 = vor.u32 %v19969_v23, %v7387_v27  ;;  %v7392_v15 = vrot.slane %v7387_v27, 4  ;;  %v17583_v26 = vsel %vm2565_vm1, %v10959_v35, %v9374_v25  ;;  %v17589_v39 = vcombine.low %v9100_v49, %v9108_v57  ;;  %v17602_v35 = vpop.permute.xlu0 %6931  ;;  %v19980_v25 = vld [vmem:[#allocation142_spill] sm:$0xff]  ;;  %v19981_v23 = vld [vmem:[#allocation144_spill] sm:$0xff]  ;;  %11042 = vmatprep.mubr.msk.bf16.mxu0 %vm2565_vm1, %v17465_v44 }
 0x84e   : > { %v7399_v46 = vor.u32 %v19974_v56, %v7396_v54  ;;  %v7668_v63 = vrot.slane %v7667_v45, 4  ;;  %v7672_v24 = vor.u32 %v19975_v62, %v7669_v51  ;;  %v7677_v3 = vrot.slane %v7675_v36, 5 }
 0x84f   : > { %v7391_v7 = vsel %vm14069_vm0, %v10804_v42, %v7390_v11  ;;  %v8792_v59 = vshrl.u32 %v8619_v50, 16  ;;  %v19977_v1 = vshrl.u32 %v19976_v18, 16  ;;  %v19978_v27 = vshrl.u32 %v19962_v38, 16  ;;  %v8626_v42 = vld [vmem:[#allocation3 + $0xc4] sm:$0x1] }
 0x850   : > { %v7400_v28 = vsel %vm14069_vm0, %v7392_v15, %v7399_v46  ;;  %v7670_v48 = vsel %vm13341_vm13, %v7668_v63, %v7669_v51  ;;  %v7673_v0 = vrot.slane %v7672_v24, 4  ;;  %v19979_v30 = vshll.u32 %v19976_v18, 16  ;;  %v7139_v15 = vld [vmem:[#allocation3 + $0xf4] sm:$0xf]  ;;  %v19985_v63 = vld [vmem:[#allocation145_spill] sm:$0xff]  ;;  %v19986_v24 = vld [vmem:[#allocation74_spill] sm:$0xff] }
 0x851   : > { %v8799_v41 = vrot.slane %v19977_v1, 7  ;;  %v10820_v2 = vcombine.low %v7391_v7, %v7400_v28  ;;  %v8808_v20 = vrot.slane %v19978_v27, 7  ;;  %v10944_v49 = vrot.slane %v8792_v59, 11  ;;  %v19983_v51 = vld [vmem:[#allocation131_spill] sm:$0xff] }
 0x852   : > { %v9111_v11 = vor.u32 %v19981_v23, %v19980_v25  ;;  %v7678_v13 = vsel %vm13341_vm13, %v7673_v0, %v7677_v3  ;;  %v19982_v45 = vshll.u32 %v19962_v38, 16  ;;  %v19984_v50 = vshll.u32 %v19983_v51, 16  ;;  %v19991_v23 = vld [vmem:[#allocation24_spill] sm:$0xff] }
 0x853   : > { %v8802_v52 = vor.u32 %v19979_v30, %v8799_v41  ;;  %v8804_v54 = vrot.slane %v8799_v41, 4  ;;  %v7985_v17 = vsel %vm2565_vm1, %v10820_v2, %v17377_v60  ;;  %v10853_v56 = vcombine.low %v7670_v48, %v7678_v13  ;;  %v9376_v60 = vpop.permute.xlu1 %9375  ;;  %v7146_v2 = vld [vmem:[#allocation3 + $0x114] sm:$0x1]  ;;  %v8623_v48 = vld [vmem:[#allocation3 + $0xb8] sm:$0xf]  ;;  %v17633_v30 = vpop.permute.xlu0 %6933 }
 0x854   : > { %v8811_v8 = vor.u32 %v19982_v45, %v8808_v20  ;;  %v9113_v57 = vrot.slane %v19984_v50, 5  ;;  %8265 = vmatmul.mubr.bf16.gmra.mrb[48].mxu1 %v7985_v17  ;;  %v9112_v46 = vrot.slane %v9111_v11, 4  ;;  %v9119_v36 = vshll.u32 %v8626_v42, 16  ;;  %v19992_v11 = vld [vmem:[#allocation25_spill] sm:$0xff]  ;;  %v19993_v17 = vld [vmem:[#allocation16_spill] sm:$0xff]  ;;  %9717 = vmatmul.mubr.bf16.gmra.mrb[52].mxu0 %v17562_v4 }
 0x855   : > { %v8803_v19 = vsel %vm14069_vm0, %v10944_v49, %v8802_v52  ;;  %v7402_v62 = vshrl.u32 %v7139_v15, 16  ;;  %v19987_v28 = vshrl.u32 %v19986_v24, 16  ;;  %10905 = vmatprep.mubr.msk.bf16.mxu1 %vm2565_vm1, %v10853_v56  ;;  %v19988_v1 = vshrl.u32 %v19972_v21, 16  ;;  %11043 = vmatprep.mubr.msk.bf16.mxu0 %vm2565_vm1, %v17530_v12 }
 0x856   : > { %v8812_v7 = vsel %vm14069_vm0, %v8804_v54, %v8811_v8  ;;  %v9116_v38 = vor.u32 %v19985_v63, %v9113_v57  ;;  %v9114_v59 = vsel %vm13341_vm13, %v9112_v46, %v9113_v57  ;;  %v9121_v18 = vrot.slane %v9119_v36, 5  ;;  %v19995_v36 = vld [vmem:[#allocation84_spill] sm:$0xff] }
 0x857   : > { %v7409_v3 = vrot.slane %v19987_v28, 7  ;;  %v10960_v44 = vcombine.low %v8803_v19, %v8812_v7  ;;  %v7418_v41 = vrot.slane %v19988_v1, 7  ;;  %v10805_v27 = vrot.slane %v7402_v62, 11  ;;  %v19996_v62 = vld [vmem:[#allocation127_spill] sm:$0xff] }
 0x858   : > { %v9117_v0 = vrot.slane %v9116_v38, 4  ;;  %v19989_v20 = vshll.u32 %v19986_v24, 16  ;;  %v19990_v54 = vshll.u32 %v19972_v21, 16  ;;  %v7681_v15 = vor.u32 %v19992_v11, %v19991_v23 }
 0x859   : > { %v7414_v49 = vrot.slane %v7409_v3, 4  ;;  %v17636_v52 = vsel %vm2565_vm1, %v10960_v44, %v9376_v60  ;;  %v19994_v13 = vshll.u32 %v19993_v17, 16  ;;  %v7689_v57 = vshll.u32 %v7146_v2, 16  ;;  %v20000_v2 = vld [vmem:[#allocation154_spill] sm:$0xff] }
 0x85a   : > { %v7412_v42 = vor.u32 %v19989_v20, %v7409_v3  ;;  %v7421_v25 = vor.u32 %v19990_v54, %v7418_v41  ;;  %v9122_v8 = vsel %vm13341_vm13, %v9117_v0, %v9121_v18  ;;  %v8814_v56 = vshrl.u32 %v8623_v48, 16  ;;  %v8630_v3 = vld [vmem:[#allocation3 + $0xd8] sm:$0x1]  ;;  %v7143_v48 = vld [vmem:[#allocation3 + $0x108] sm:$0xf] }
 0x85b   : > { %v7683_v45 = vrot.slane %v19994_v13, 5  ;;  %v17648_v19 = vcombine.low %v9114_v59, %v9122_v8  ;;  %v7682_v46 = vrot.slane %v7681_v15, 4  ;;  %v7691_v63 = vrot.slane %v7689_v57, 5  ;;  %v19999_v41 = vld [vmem:[#allocation152_spill] sm:$0xff] }
 0x85c   : > { %v7413_v50 = vsel %vm14069_vm0, %v10805_v27, %v7412_v42  ;;  %v7422_v21 = vsel %vm14069_vm0, %v7414_v49, %v7421_v25  ;;  %v10945_v38 = vrot.slane %v8814_v56, 11  ;;  %v19997_v24 = vshrl.u32 %v19996_v62, 16  ;;  %v20002_v49 = vld [vmem:[#allocation141_spill] sm:$0xff]  ;;  %v17670_v25 = vpop.permute.xlu0 %6935  ;;  %9725 = vmatmul.mubr.bf16.gmra.mrb[56].mxu0 %v17583_v26 }
 0x85d   : > { %v7686_v60 = vor.u32 %v19995_v36, %v7683_v45  ;;  %v10821_v7 = vcombine.low %v7413_v50, %v7422_v21  ;;  %v7684_v44 = vsel %vm13341_vm13, %v7682_v46, %v7683_v45  ;;  %v19998_v18 = vshrl.u32 %v19983_v51, 16  ;;  %v20005_v50 = vld [vmem:[#allocation155_spill] sm:$0xff]  ;;  %v9378_v21 = vpop.permute.xlu1 %9377  ;;  %11044 = vmatprep.mubr.msk.bf16.mxu0 %vm2565_vm1, %v17589_v39 }
 0x85e   : > { %v8821_v28 = vrot.slane %v19997_v24, 7  ;;  %v9125_v4 = vor.u32 %v20000_v2, %v19999_v41  ;;  %v20001_v27 = vshll.u32 %v19996_v62, 16  ;;  %v20003_v12 = vshll.u32 %v20002_v49, 16  ;;  %v7150_v62 = vld [vmem:[#allocation3 + $0x128] sm:$0x1]  ;;  %v20010_v41 = vld [vmem:[#allocation39_spill] sm:$0xff] }
 0x85f   : > { %v7687_v59 = vrot.slane %v7686_v60, 4  ;;  %v8830_v1 = vrot.slane %v19998_v18, 7  ;;  %v7989_v0 = vsel %vm2565_vm1, %v10821_v7, %v17369_v6  ;;  %v20004_v11 = vshll.u32 %v19983_v51, 16  ;;  %v20006_v7 = vld [vmem:[#allocation20_spill] sm:$0xff]  ;;  %v20011_v2 = vld [vmem:[#allocation83_spill] sm:$0xff] }
 0x860   : > { %v8824_v20 = vor.u32 %v20001_v27, %v8821_v28  ;;  %v8826_v42 = vrot.slane %v8821_v28, 4  ;;  %v9127_v54 = vrot.slane %v20003_v12, 5  ;;  %8273 = vmatmul.mubr.bf16.gmra.mrb[52].mxu1 %v7989_v0  ;;  %v9126_v13 = vrot.slane %v9125_v4, 4 }
 0x861   : > { %v7692_v23 = vsel %vm13341_vm13, %v7687_v59, %v7691_v63  ;;  %v8833_v15 = vor.u32 %v20004_v11, %v8830_v1  ;;  %v9133_v45 = vshll.u32 %v8630_v3, 16  ;;  %v7424_v56 = vshrl.u32 %v7143_v48, 16  ;;  %v20012_v48 = vld [vmem:[#allocation27_spill] sm:$0xff] }
 0x862   : > { %v10854_v8 = vcombine.low %v7684_v44, %v7692_v23  ;;  %v8825_v6 = vsel %vm14069_vm0, %v10945_v38, %v8824_v20  ;;  %v9130_v57 = vor.u32 %v20005_v50, %v9127_v54  ;;  %v9128_v36 = vsel %vm13341_vm13, %v9126_v13, %v9127_v54  ;;  %v8627_v20 = vld [vmem:[#allocation3 + $0xcc] sm:$0xf] }
 0x863   : > { %v8834_v46 = vsel %vm14069_vm0, %v8826_v42, %v8833_v15  ;;  %v9135_v60 = vrot.slane %v9133_v45, 5  ;;  %v20007_v51 = vshrl.u32 %v20006_v7, 16  ;;  %v10806_v38 = vrot.slane %v7424_v56, 11  ;;  %v17702_v15 = vpop.permute.xlu0 %6937  ;;  %v20016_v56 = vld [vmem:[#allocation137_spill] sm:$0xff] }
 0x864   : > { %10906 = vmatprep.mubr.msk.bf16.mxu1 %vm2565_vm1, %v10854_v8  ;;  %v10961_v24 = vcombine.low %v8825_v6, %v8834_v46  ;;  %v9131_v28 = vrot.slane %v9130_v57, 4  ;;  %v20008_v3 = vshrl.u32 %v19993_v17, 16  ;;  %v20009_v59 = vshll.u32 %v20006_v7, 16  ;;  %v20015_v8 = vld [vmem:[#allocation10_spill] sm:$0xff]  ;;  %9733 = vmatmul.mubr.bf16.gmra.mrb[60].mxu0 %v17636_v52 }
 0x865   : > { %v7431_v63 = vrot.slane %v20007_v51, 7  ;;  %v7695_v4 = vor.u32 %v20011_v2, %v20010_v41  ;;  %v20013_v0 = vshll.u32 %v20012_v48, 16  ;;  %v20014_v54 = vshll.u32 %v19993_v17, 16  ;;  %11045 = vmatprep.mubr.msk.bf16.mxu0 %vm2565_vm1, %v17648_v19 }
 0x866   : > { %v7440_v44 = vrot.slane %v20008_v3, 7  ;;  %v17696_v42 = vsel %vm2565_vm1, %v10961_v24, %v9378_v21  ;;  %v9136_v12 = vsel %vm13341_vm13, %v9131_v28, %v9135_v60  ;;  %v7703_v11 = vshll.u32 %v7150_v62, 16  ;;  %v20020_v3 = vld [vmem:[#allocation162_spill] sm:$0xff] }
 0x867   : > { %v7434_v18 = vor.u32 %v20009_v59, %v7431_v63  ;;  %v7436_v1 = vrot.slane %v7431_v63, 4  ;;  %v7697_v27 = vrot.slane %v20013_v0, 5  ;;  %v17706_v13 = vcombine.low %v9128_v36, %v9136_v12  ;;  %v8634_v63 = vld [vmem:[#allocation3 + $0xec] sm:$0x1]  ;;  %v20023_v0 = vld [vmem:[#allocation151_spill] sm:$0xff] }
 0x868   : > { %v7443_v23 = vor.u32 %v20014_v54, %v7440_v44  ;;  %v7696_v45 = vrot.slane %v7695_v4, 4  ;;  %v7705_v57 = vrot.slane %v7703_v11, 5  ;;  %v8836_v17 = vshrl.u32 %v8627_v20, 16  ;;  %v20021_v44 = vld [vmem:[#allocation164_spill] sm:$0xff] }
 0x869   : > { %v7435_v26 = vsel %vm14069_vm0, %v10806_v38, %v7434_v18  ;;  %v7700_v6 = vor.u32 %v20015_v8, %v7697_v27  ;;  %v20017_v21 = vshrl.u32 %v20016_v56, 16  ;;  %v20018_v7 = vshrl.u32 %v20002_v49, 16  ;;  %v7147_v18 = vld [vmem:[#allocation3 + $0x11c] sm:$0xf]  ;;  %v20025_v8 = vld [vmem:[#allocation165_spill] sm:$0xff] }
 0x86a   : > { %v7444_v50 = vsel %vm14069_vm0, %v7436_v1, %v7443_v23  ;;  %v7698_v39 = vsel %vm13341_vm13, %v7696_v45, %v7697_v27  ;;  %v10946_v62 = vrot.slane %v8836_v17, 11  ;;  %v20019_v24 = vshll.u32 %v20016_v56, 16  ;;  %v9380_v45 = vpop.permute.xlu1 %9379 }
 0x86b   : > { %v8843_v46 = vrot.slane %v20017_v21, 7  ;;  %v10822_v60 = vcombine.low %v7435_v26, %v7444_v50  ;;  %v7701_v36 = vrot.slane %v7700_v6, 4  ;;  %v8852_v51 = vrot.slane %v20018_v7, 7  ;;  %v17733_v26 = vpop.permute.xlu0 %6939  ;;  %v20026_v50 = vld [vmem:[#allocation26_spill] sm:$0xff]  ;;  %v8631_v7 = vld [vmem:[#allocation3 + $0xe0] sm:$0xf] }
 0x86c   : > { %v9139_v59 = vor.u32 %v20021_v44, %v20020_v3  ;;  %v20022_v2 = vshll.u32 %v20002_v49, 16  ;;  %v20024_v27 = vshll.u32 %v20023_v0, 16  ;;  %v9147_v11 = vshll.u32 %v8634_v63, 16  ;;  %v20031_v44 = vld [vmem:[#allocation45_spill] sm:$0xff]  ;;  %9741 = vmatmul.mubr.bf16.gmra.mrb[64].mxu0 %v17696_v42 }
 0x86d   : > { %v8846_v28 = vor.u32 %v20019_v24, %v8843_v46  ;;  %v8848_v38 = vrot.slane %v8843_v46, 4  ;;  %v7993_v1 = vsel %vm2565_vm1, %v10822_v60, %v17401_v53  ;;  %v7706_v41 = vsel %vm13341_vm13, %v7701_v36, %v7705_v57  ;;  %v7154_v36 = vld [vmem:[#allocation3 + $0x13c] sm:$0x1]  ;;  %11046 = vmatprep.mubr.msk.bf16.mxu0 %vm2565_vm1, %v17706_v13 }
 0x86e   : > { %v8855_v4 = vor.u32 %v20022_v2, %v8852_v51  ;;  %v9141_v20 = vrot.slane %v20024_v27, 5  ;;  %8281 = vmatmul.mubr.bf16.gmra.mrb[56].mxu1 %v7993_v1  ;;  %v10855_v12 = vcombine.low %v7698_v39, %v7706_v41  ;;  %v9140_v23 = vrot.slane %v9139_v59, 4  ;;  %v20032_v59 = vld [vmem:[#allocation43_spill] sm:$0xff]  ;;  %v20033_v1 = vld [vmem:[#allocation42_spill] sm:$0xff]  ;;  %v9382_v42 = vpop.permute.xlu1 %9381 }
 0x86f   : > { %v8847_v54 = vsel %vm14069_vm0, %v10946_v62, %v8846_v28  ;;  %v7446_v49 = vshrl.u32 %v7147_v18, 16  ;;  %v20027_v57 = vshrl.u32 %v20026_v50, 16  ;;  %v9149_v46 = vrot.slane %v9147_v11, 5 }
 0x870   : > { %v8856_v53 = vsel %vm14069_vm0, %v8848_v38, %v8855_v4  ;;  %v9144_v6 = vor.u32 %v20025_v8, %v9141_v20  ;;  %10907 = vmatprep.mubr.msk.bf16.mxu1 %vm2565_vm1, %v10855_v12  ;;  %v9142_v21 = vsel %vm13341_vm13, %v9140_v23, %v9141_v20  ;;  %v20028_v60 = vshrl.u32 %v20012_v48, 16  ;;  %v20035_v23 = vld [vmem:[#allocation44_spill] sm:$0xff] }
 0x871   : > { %v7453_v17 = vrot.slane %v20027_v57, 7  ;;  %v10962_v56 = vcombine.low %v8847_v54, %v8856_v53  ;;  %v10807_v63 = vrot.slane %v7446_v49, 11  ;;  %v20029_v62 = vshll.u32 %v20026_v50, 16  ;;  %v20036_v49 = vld [vmem:[#allocation147_spill] sm:$0xff] }
 0x872   : > { %v7462_v39 = vrot.slane %v20028_v60, 7  ;;  %v9145_v51 = vrot.slane %v9144_v6, 4  ;;  %v20030_v38 = vshll.u32 %v20012_v48, 16  ;;  %v7709_v18 = vor.u32 %v20032_v59, %v20031_v44 }
 0x873   : > { %v7456_v52 = vor.u32 %v20029_v62, %v7453_v17  ;;  %v7458_v24 = vrot.slane %v7453_v17, 4  ;;  %v17751_v28 = vsel %vm2565_vm1, %v10962_v56, %v9380_v45  ;;  %v20034_v41 = vshll.u32 %v20033_v1, 16  ;;  %v17768_v45 = vpop.permute.xlu0 %6941  ;;  %v8638_v17 = vld [vmem:[#allocation3 + $0x100] sm:$0x1] }
 0x874   : > { %v7465_v3 = vor.u32 %v20030_v38, %v7462_v39  ;;  %v9150_v19 = vsel %vm13341_vm13, %v9145_v51, %v9149_v46  ;;  %v7717_v27 = vshll.u32 %v7154_v36, 16  ;;  %v8858_v20 = vshrl.u32 %v8631_v7, 16  ;;  %v20039_v39 = vld [vmem:[#allocation172_spill] sm:$0xff]  ;;  %v20040_v36 = vld [vmem:[#allocation174_spill] sm:$0xff]  ;;  %v7151_v51 = vld [vmem:[#allocation3 + $0x130] sm:$0xf]  ;;  %9749 = vmatmul.mubr.bf16.gmra.mrb[68].mxu0 %v17751_v28 }
 0x875   : > { %v7711_v2 = vrot.slane %v20034_v41, 5  ;;  %v7457_v4 = vsel %vm14069_vm0, %v10807_v63, %v7456_v52  ;;  %v17763_v12 = vcombine.low %v9142_v21, %v9150_v19  ;;  %v7710_v54 = vrot.slane %v7709_v18, 4  ;;  %v20042_v38 = vld [vmem:[#allocation161_spill] sm:$0xff]  ;;  %v20060_v28 = vld [vmem:[#allocation182_spill] sm:$0xff] }
 0x876   : > { %v7466_v48 = vsel %vm14069_vm0, %v7458_v24, %v7465_v3  ;;  %v7719_v8 = vrot.slane %v7717_v27, 5  ;;  %v10947_v6 = vrot.slane %v8858_v20, 11  ;;  %v20037_v50 = vshrl.u32 %v20036_v49, 16  ;;  %v20045_v27 = vld [vmem:[#allocation175_spill] sm:$0xff] }
 0x877   : > { %v7714_v11 = vor.u32 %v20035_v23, %v7711_v2  ;;  %v10823_v53 = vcombine.low %v7457_v4, %v7466_v48  ;;  %v7712_v56 = vsel %vm13341_vm13, %v7710_v54, %v7711_v2  ;;  %v20038_v46 = vshrl.u32 %v20023_v0, 16  ;;  %v17800_v13 = vpop.permute.xlu0 %6943  ;;  %11047 = vmatprep.mubr.msk.bf16.mxu0 %vm2565_vm1, %v17763_v12 }
 0x878   : > { %v8865_v57 = vrot.slane %v20037_v50, 7  ;;  %v9153_v7 = vor.u32 %v20040_v36, %v20039_v39  ;;  %v20041_v62 = vshll.u32 %v20036_v49, 16  ;;  %v20043_v3 = vshll.u32 %v20042_v38, 16  ;;  %v7158_v49 = vld [vmem:[#allocation3 + $0x150] sm:$0x1]  ;;  %v20050_v39 = vld [vmem:[#allocation85_spill] sm:$0xff] }
 0x879   : > { %v7715_v21 = vrot.slane %v7714_v11, 4  ;;  %v8874_v60 = vrot.slane %v20038_v46, 7  ;;  %v7997_v63 = vsel %vm2565_vm1, %v10823_v53, %v17392_v61  ;;  %v20044_v18 = vshll.u32 %v20023_v0, 16  ;;  %v20046_v11 = vld [vmem:[#allocation41_spill] sm:$0xff]  ;;  %v20051_v36 = vld [vmem:[#allocation14_spill] sm:$0xff] }
 0x87a   : > { %v8868_v52 = vor.u32 %v20041_v62, %v8865_v57  ;;  %v8870_v24 = vrot.slane %v8865_v57, 4  ;;  %v9155_v44 = vrot.slane %v20043_v3, 5  ;;  %8289 = vmatmul.mubr.bf16.gmra.mrb[60].mxu1 %v7997_v63  ;;  %v9154_v2 = vrot.slane %v9153_v7, 4 }
 0x87b   : > { %v7720_v59 = vsel %vm13341_vm13, %v7715_v21, %v7719_v8  ;;  %v8877_v41 = vor.u32 %v20044_v18, %v8874_v60  ;;  %v9161_v19 = vshll.u32 %v8638_v17, 16  ;;  %v7468_v48 = vshrl.u32 %v7151_v51, 16  ;;  %v20052_v51 = vld [vmem:[#allocation40_spill] sm:$0xff] }
 0x87c   : > { %v10856_v61 = vcombine.low %v7712_v56, %v7720_v59  ;;  %v8869_v4 = vsel %vm14069_vm0, %v10947_v6, %v8868_v52  ;;  %v9158_v20 = vor.u32 %v20045_v27, %v9155_v44  ;;  %v9156_v0 = vsel %vm13341_vm13, %v9154_v2, %v9155_v44  ;;  %v8635_v52 = vld [vmem:[#allocation3 + $0xf4] sm:$0xf] }
 0x87d   : > { %v8878_v54 = vsel %vm14069_vm0, %v8870_v24, %v8877_v41  ;;  %v9163_v23 = vrot.slane %v9161_v19, 5  ;;  %v20047_v53 = vshrl.u32 %v20046_v11, 16  ;;  %v10808_v57 = vrot.slane %v7468_v48, 11 }
 0x87e   : > { %10908 = vmatprep.mubr.msk.bf16.mxu1 %vm2565_vm1, %v10856_v61  ;;  %v10963_v6 = vcombine.low %v8869_v4, %v8878_v54  ;;  %v9159_v50 = vrot.slane %v9158_v20, 4  ;;  %v20048_v17 = vshrl.u32 %v20033_v1, 16  ;;  %v20049_v21 = vshll.u32 %v20046_v11, 16  ;;  %v20055_v61 = vld [vmem:[#allocation28_spill] sm:$0xff] }
 0x87f   : > { %v7475_v8 = vrot.slane %v20047_v53, 7  ;;  %v7723_v7 = vor.u32 %v20051_v36, %v20050_v39  ;;  %v20053_v63 = vshll.u32 %v20052_v51, 16  ;;  %v20054_v44 = vshll.u32 %v20033_v1, 16 }
 0x880   : > { %v7484_v56 = vrot.slane %v20048_v17, 7  ;;  %v9481_v24 = vsel %vm2565_vm1, %v10963_v6, %v9382_v42  ;;  %v9164_v3 = vsel %vm13341_vm13, %v9159_v50, %v9163_v23  ;;  %v7731_v18 = vshll.u32 %v7158_v49, 16  ;;  %v20056_v42 = vld [vmem:[#allocation157_spill] sm:$0xff]  ;;  %v8642_v49 = vld [vmem:[#allocation3 + $0x114] sm:$0x1]  ;;  %v17828_v6 = vpop.permute.xlu0 %6945 }
 0x881   : > { %v7478_v46 = vor.u32 %v20049_v21, %v7475_v8  ;;  %v7480_v60 = vrot.slane %v7475_v8, 4  ;;  %v7725_v62 = vrot.slane %v20053_v63, 5  ;;  %v10996_v41 = vcombine.low %v9156_v0, %v9164_v3  ;;  %v20061_v21 = vld [vmem:[#allocation184_spill] sm:$0xff]  ;;  %9757 = vmatmul.mubr.bf16.gmra.mrb[72].mxu0 %v9481_v24 }
 0x882   : > { %v7487_v59 = vor.u32 %v20054_v44, %v7484_v56  ;;  %v7724_v19 = vrot.slane %v7723_v7, 4  ;;  %v7733_v20 = vrot.slane %v7731_v18, 5  ;;  %v8880_v48 = vshrl.u32 %v8635_v52, 16 }
 0x883   : > { %v7479_v2 = vsel %vm14069_vm0, %v10808_v57, %v7478_v46  ;;  %v7728_v4 = vor.u32 %v20055_v61, %v7725_v62  ;;  %v20057_v54 = vshrl.u32 %v20056_v42, 16  ;;  %v20058_v53 = vshrl.u32 %v20042_v38, 16  ;;  %11048 = vmatprep.mubr.msk.bf16.mxu0 %vm2565_vm1, %v10996_v41 }
 0x884   : > { %v7488_v27 = vsel %vm14069_vm0, %v7480_v60, %v7487_v59  ;;  %v7726_v0 = vsel %vm13341_vm13, %v7724_v19, %v7725_v62  ;;  %v10948_v50 = vrot.slane %v8880_v48, 11  ;;  %v20059_v57 = vshll.u32 %v20056_v42, 16  ;;  %v7155_v60 = vld [vmem:[#allocation3 + $0x144] sm:$0xf]  ;;  %v20063_v62 = vld [vmem:[#allocation171_spill] sm:$0xff] }
 0x885   : > { %v8887_v11 = vrot.slane %v20057_v54, 7  ;;  %v10824_v1 = vcombine.low %v7479_v2, %v7488_v27  ;;  %v7729_v23 = vrot.slane %v7728_v4, 4  ;;  %v8896_v8 = vrot.slane %v20058_v53, 7  ;;  %v9384_v2 = vpop.permute.xlu1 %9383  ;;  %v20065_v19 = vld [vmem:[#allocation185_spill] sm:$0xff]  ;;  %v20066_v27 = vld [vmem:[#allocation82_spill] sm:$0xff] }
 0x886   : > { %v9167_v46 = vor.u32 %v20061_v21, %v20060_v28  ;;  %v20062_v7 = vshll.u32 %v20042_v38, 16  ;;  %v20064_v12 = vshll.u32 %v20063_v62, 16  ;;  %v9175_v18 = vshll.u32 %v8642_v49, 16  ;;  %v8639_v48 = vld [vmem:[#allocation3 + $0x108] sm:$0xf] }
 0x887   : > { %v8890_v17 = vor.u32 %v20059_v57, %v8887_v11  ;;  %v8892_v56 = vrot.slane %v8887_v11, 4  ;;  %v8001_v39 = vsel %vm2565_vm1, %v10824_v1, %v17423_v55  ;;  %v7734_v36 = vsel %vm13341_vm13, %v7729_v23, %v7733_v20  ;;  %v17858_v57 = vpop.permute.xlu0 %6947 }
 0x888   : > { %v8899_v63 = vor.u32 %v20062_v7, %v8896_v8  ;;  %v9169_v52 = vrot.slane %v20064_v12, 5  ;;  %8297 = vmatmul.mubr.bf16.gmra.mrb[64].mxu1 %v8001_v39  ;;  %v10857_v3 = vcombine.low %v7726_v0, %v7734_v36  ;;  %v9168_v59 = vrot.slane %v9167_v46, 4  ;;  %v20071_v46 = vld [vmem:[#allocation167_spill] sm:$0xff] }
 0x889   : > { %v8891_v44 = vsel %vm14069_vm0, %v10948_v50, %v8890_v17  ;;  %v7490_v4 = vshrl.u32 %v7155_v60, 16  ;;  %v20067_v38 = vshrl.u32 %v20066_v27, 16  ;;  %v9177_v11 = vrot.slane %v9175_v18, 5 }
 0x88a   : > { %v8900_v55 = vsel %vm14069_vm0, %v8892_v56, %v8899_v63  ;;  %v9172_v61 = vor.u32 %v20065_v19, %v9169_v52  ;;  %10909 = vmatprep.mubr.msk.bf16.mxu1 %vm2565_vm1, %v10857_v3  ;;  %v9170_v54 = vsel %vm13341_vm13, %v9168_v59, %v9169_v52  ;;  %v20068_v1 = vshrl.u32 %v20052_v51, 16  ;;  %v8646_v52 = vld [vmem:[#allocation3 + $0x128] sm:$0x1]  ;;  %v20074_v3 = vld [vmem:[#allocation192_spill] sm:$0xff]  ;;  %v6162_v19 = vld [vmem:[#allocation3 + $0x10] sm:$0x1] }
 0x88b   : > { %v7497_v20 = vrot.slane %v20067_v38, 7  ;;  %v10964_v42 = vcombine.low %v8891_v44, %v8900_v55  ;;  %v10809_v53 = vrot.slane %v7490_v4, 11  ;;  %v20069_v8 = vshll.u32 %v20066_v27, 16  ;;  %v20075_v44 = vld [vmem:[#allocation193_spill] sm:$0xff] }
 0x88c   : > { %v7506_v0 = vrot.slane %v20068_v1, 7  ;;  %v9173_v23 = vrot.slane %v9172_v61, 4  ;;  %v20070_v56 = vshll.u32 %v20052_v51, 16  ;;  %v8902_v21 = vshrl.u32 %v8639_v48, 16  ;;  %v20080_v1 = vld [vmem:[#allocation29_spill] sm:$0xff] }
 0x88d   : > { %v7500_v49 = vor.u32 %v20069_v8, %v7497_v20  ;;  %v7502_v50 = vrot.slane %v7497_v20, 4  ;;  %v9485_v17 = vsel %vm2565_vm1, %v10964_v42, %v9384_v2  ;;  %v20072_v60 = vshrl.u32 %v20071_v46, 16  ;;  %v20078_v42 = vld [vmem:[#allocation181_spill] sm:$0xff] }
 0x88e   : > { %v7509_v28 = vor.u32 %v20070_v56, %v7506_v0  ;;  %v9178_v36 = vsel %vm13341_vm13, %v9173_v23, %v9177_v11  ;;  %v20073_v63 = vshrl.u32 %v20063_v62, 16  ;;  %v9181_v59 = vor.u32 %v20075_v44, %v20074_v3  ;;  %v20081_v0 = vld [vmem:[#allocation22_spill] sm:$0xff]  ;;  %v20085_v44 = vld [vmem:[#allocation69_spill] sm:$0xff]  ;;  %9765 = vmatmul.mubr.bf16.gmra.mrb[76].mxu0 %v9485_v17 }
 0x88f   : > { %v8909_v39 = vrot.slane %v20072_v60, 7  ;;  %v7501_v7 = vsel %vm14069_vm0, %v10809_v53, %v7500_v49  ;;  %v10997_v51 = vcombine.low %v9170_v54, %v9178_v36  ;;  %v10949_v24 = vrot.slane %v8902_v21, 11  ;;  %v9386_v53 = vpop.permute.xlu1 %9385  ;;  %v17892_v21 = vpop.permute.xlu0 %6949 }
 0x890   : > { %v8918_v12 = vrot.slane %v20073_v63, 7  ;;  %v7510_v18 = vsel %vm14069_vm0, %v7502_v50, %v7509_v28  ;;  %v20076_v2 = vshll.u32 %v20071_v46, 16  ;;  %v20077_v27 = vshll.u32 %v20063_v62, 16  ;;  %v6166_v28 = vld [vmem:[#allocation3 + $0x24] sm:$0x1] }
 0x891   : > { %v10825_v61 = vcombine.low %v7501_v7, %v7510_v18  ;;  %v8914_v4 = vrot.slane %v8909_v39, 4  ;;  %v9182_v20 = vrot.slane %v9181_v59, 4  ;;  %v20079_v41 = vshll.u32 %v20078_v42, 16  ;;  %v8643_v63 = vld [vmem:[#allocation3 + $0x11c] sm:$0xf]  ;;  %11049 = vmatprep.mubr.msk.bf16.mxu0 %vm2565_vm1, %v10997_v51 }
 0x892   : > { %v8912_v55 = vor.u32 %v20076_v2, %v8909_v39  ;;  %v8921_v38 = vor.u32 %v20077_v27, %v8918_v12  ;;  %v9189_v11 = vshll.u32 %v8646_v52, 16  ;;  %v6577_v23 = vor.u32 %v20081_v0, %v20080_v1  ;;  %v20083_v39 = vld [vmem:[#allocation194_spill] sm:$0xff]  ;;  %v20084_v12 = vld [vmem:[#allocation51_spill] sm:$0xff]  ;;  %v20090_v1 = vld [vmem:[#allocation177_spill] sm:$0xff] }
 0x893   : > { %v9183_v54 = vrot.slane %v20079_v41, 5  ;;  %v8005_v8 = vsel %vm2565_vm1, %v10825_v61, %v17415_v32  ;;  %v20082_v62 = vshll.u32 %v19667_v33, 16  ;;  %v6585_v56 = vshll.u32 %v6162_v19, 16  ;;  %v20086_v33 = vld [vmem:[#allocation68_spill] sm:$0xff]  ;;  %v20087_v2 = vld [vmem:[#allocation63_spill] sm:$0xff]  ;;  %v20089_v41 = vld [vmem:[#allocation66_spill] sm:$0xff]  ;;  %v17915_v51 = vpop.permute.xlu0 %6951 }
 0x894   : > { %v8913_v48 = vsel %vm14069_vm0, %v10949_v24, %v8912_v55  ;;  %v8922_v49 = vsel %vm14069_vm0, %v8914_v4, %v8921_v38  ;;  %8305 = vmatmul.mubr.bf16.gmra.mrb[68].mxu1 %v8005_v8  ;;  %v9191_v7 = vrot.slane %v9189_v11, 5  ;;  %v6578_v32 = vrot.slane %v6577_v23, 4 }
 0x895   : > { %v6579_v50 = vrot.slane %v20082_v62, 5  ;;  %v10965_v46 = vcombine.low %v8913_v48, %v8922_v49  ;;  %v9184_v60 = vsel %vm13341_vm13, %v9182_v20, %v9183_v54  ;;  %v9186_v36 = vor.u32 %v20083_v39, %v9183_v54 }
 0x896   : > { %v6587_v3 = vrot.slane %v6585_v56, 5  ;;  %v6591_v59 = vor.u32 %v20086_v33, %v20085_v44  ;;  %v20088_v55 = vshll.u32 %v20087_v2, 16  ;;  %v6599_v61 = vshll.u32 %v6166_v28, 16 }
 0x897   : > { %v6582_v52 = vor.u32 %v20084_v12, %v6579_v50  ;;  %v9489_v18 = vsel %vm2565_vm1, %v10965_v46, %v9386_v53  ;;  %v9187_v24 = vrot.slane %v9186_v36, 4  ;;  %v6580_v4 = vsel %vm13341_vm13, %v6578_v32, %v6579_v50  ;;  %v8650_v53 = vld [vmem:[#allocation3 + $0x13c] sm:$0x1]  ;;  %v6163_v50 = vld [vmem:[#allocation3 + $0x18] sm:$0xf]  ;;  %v20095_v32 = vld [vmem:[#allocation199_spill] sm:$0xff] }
 0x898   : > { %v6593_v19 = vrot.slane %v20088_v55, 5  ;;  %v6592_v38 = vrot.slane %v6591_v59, 4  ;;  %v8924_v20 = vshrl.u32 %v8643_v63, 16  ;;  %v6601_v11 = vrot.slane %v6599_v61, 5  ;;  %9773 = vmatmul.mubr.bf16.gmra.mrb[80].mxu0 %v9489_v18 }
 0x899   : > { %v6583_v27 = vrot.slane %v6582_v52, 4  ;;  %v9192_v48 = vsel %vm13341_vm13, %v9187_v24, %v9191_v7  ;;  %v20091_v0 = vshrl.u32 %v20090_v1, 16  ;;  %v20092_v46 = vshll.u32 %v20090_v1, 16  ;;  %v20096_v52 = vld [vmem:[#allocation191_spill] sm:$0xff] }
 0x89a   : > { %v6596_v54 = vor.u32 %v20089_v41, %v6593_v19  ;;  %v10998_v8 = vcombine.low %v9184_v60, %v9192_v48  ;;  %v6594_v49 = vsel %vm13341_vm13, %v6592_v38, %v6593_v19  ;;  %v10950_v62 = vrot.slane %v8924_v20, 11  ;;  %v20094_v60 = vld [vmem:[#allocation198_spill] sm:$0xff]  ;;  %v20098_v19 = vld [vmem:[#allocation61_spill] sm:$0xff]  ;;  %v20101_v41 = vld [vmem:[#allocation200_spill] sm:$0xff] }
 0x89b   : > { %v8931_v23 = vrot.slane %v20091_v0, 7  ;;  %v6588_v17 = vsel %vm13341_vm13, %v6583_v27, %v6587_v3  ;;  %v20093_v7 = vshrl.u32 %v20078_v42, 16  ;;  %v9195_v12 = vor.u32 %v20095_v32, %v20094_v60  ;;  %v8647_v1 = vld [vmem:[#allocation3 + $0x130] sm:$0xf] }
 0x89c   : > { %v10778_v56 = vcombine.low %v6580_v4, %v6588_v17  ;;  %v6597_v28 = vrot.slane %v6596_v54, 4  ;;  %v20097_v3 = vshll.u32 %v20096_v52, 16  ;;  %v9203_v33 = vshll.u32 %v8650_v53, 16  ;;  %11050 = vmatprep.mubr.msk.bf16.mxu0 %vm2565_vm1, %v10998_v8  ;;  %v20105_v60 = vld [vmem:[#allocation47_spill] sm:$0xff] }
 0x89d   : > { %v8934_v39 = vor.u32 %v20092_v46, %v8931_v23  ;;  %v8936_v36 = vrot.slane %v8931_v23, 4  ;;  %v8940_v63 = vrot.slane %v20093_v7, 7  ;;  %v6246_v55 = vshrl.u32 %v6163_v50, 16 }
 0x89e   : > { %v9197_v44 = vrot.slane %v20097_v3, 5  ;;  %10922 = vmatprep.mubr.msk.bf16.mxu1 %vm2565_vm1, %v10778_v56  ;;  %v6602_v59 = vsel %vm13341_vm13, %v6597_v28, %v6601_v11  ;;  %v20099_v61 = vshrl.u32 %v20098_v19, 16  ;;  %v20100_v38 = vshll.u32 %v20078_v42, 16  ;;  %v12032_v11 = vld [vmem:[%s18905_s13] sm:$0xff]  }
 0x89f   : > { %v8935_v24 = vsel %vm14069_vm0, %v10950_v62, %v8934_v39  ;;  %8466 = vmatmul.mubr.bf16.vlgmr.msra.gmra.mrb[72].mxu1 %v17452_v16  ;;  %v10779_v27 = vcombine.low %v6594_v49, %v6602_v59  ;;  %v9196_v48 = vrot.slane %v9195_v12, 4  ;;  %v9205_v0 = vrot.slane %v9203_v33, 5  ;;  %v6170_v16 = vld [vmem:[#allocation3 + $0x38] sm:$0x1]  ;;  %v9388_v49 = vpop.permute.xlu1 %9387  ;;  %v17948_v39 = vpop.permute.xlu0 %6953 }
 0x8a0   : > { %v6253_v4 = vrot.slane %v20099_v61, 7  ;;  %v8943_v20 = vor.u32 %v20100_v38, %v8940_v63  ;;  %v9200_v54 = vor.u32 %v20101_v41, %v9197_v44  ;;  %11505 = vmatpush3.bf16.msra.mxu1 %v12032_v11  ;;  %v10731_v23 = vrot.slane %v6246_v55, 11  ;;  %v20104_v63 = vld [vmem:[#allocation67_spill] sm:$0xff]  ;;  %v20106_v12 = vld [vmem:[#allocation64_spill] sm:$0xff] }
 0x8a1   : > { %v20102_v53 = vshll.u32 %v20098_v19, 16  ;;  %10923 = vmatprep.mubr.msk.bf16.mxu1 %vm2565_vm1, %v10779_v27  ;;  %v9198_v50 = vsel %vm13341_vm13, %v9196_v48, %v9197_v44  ;;  %v20103_v28 = vshrl.u32 %v20087_v2, 16  ;;  %v6605_v32 = vor.u32 %v20105_v60, %v20104_v63  ;;  %11504 = vmatprep.subr.bf16.mxu1 %v17472_v58  ;;  %v20110_v41 = vld [vmem:[#allocation187_spill] sm:$0xff] }
 0x8a2   : > { %v6258_v62 = vrot.slane %v6253_v4, 4  ;;  %v8944_v42 = vsel %vm14069_vm0, %v8936_v36, %v8943_v20  ;;  %v9201_v56 = vrot.slane %v9200_v54, 4  ;;  %v20107_v36 = vshll.u32 %v20106_v12, 16 }
 0x8a3   : > { %v6256_v17 = vor.u32 %v20102_v53, %v6253_v4  ;;  %v6262_v46 = vrot.slane %v20103_v28, 7  ;;  %v10966_v7 = vcombine.low %v8935_v24, %v8944_v42  ;;  %v20108_v33 = vshll.u32 %v20087_v2, 16  ;;  %v20109_v4 = vld [vmem:[#allocation46_spill] sm:$0xff]  ;;  %v8654_v2 = vld [vmem:[#allocation3 + $0x150] sm:$0x1]  ;;  %v20114_v42 = vld [vmem:[#allocation201_spill] sm:$0xff]  ;;  %v17979_v63 = vpop.permute.xlu0 %6955 }
 0x8a4   : > { %v6607_v3 = vrot.slane %v20107_v36, 5  ;;  %v9206_v44 = vsel %vm13341_vm13, %v9201_v56, %v9205_v0  ;;  %v6613_v55 = vshll.u32 %v6170_v16, 16  ;;  %v8946_v8 = vshrl.u32 %v8647_v1, 16  ;;  %11506 = vmatpush3.bf16.msra.mxu1 %v17472_v58  ;;  %v20116_v56 = vld [vmem:[#allocation196_spill] sm:$0xff] }
 0x8a5   : > { %v6257_v18 = vsel %vm14069_vm0, %v10731_v23, %v6256_v17  ;;  %v6265_v59 = vor.u32 %v20108_v33, %v6262_v46  ;;  %v9493_v24 = vsel %vm2565_vm1, %v10966_v7, %v9388_v49  ;;  %v10999_v19 = vcombine.low %v9198_v50, %v9206_v44  ;;  %v6167_v7 = vld [vmem:[#allocation3 + $0x2c] sm:$0xf] }
 0x8a6   : > { %v6606_v61 = vrot.slane %v6605_v32, 4  ;;  %v6610_v27 = vor.u32 %v20109_v4, %v6607_v3  ;;  %v6615_v20 = vrot.slane %v6613_v55, 5  ;;  %v10951_v48 = vrot.slane %v8946_v8, 11  ;;  %9781 = vmatmul.mubr.bf16.gmra.mrb[84].mxu0 %v9493_v24  ;;  %v20119_v55 = vld [vmem:[#allocation52_spill] sm:$0xff] }
 0x8a7   : > { %v6266_v38 = vsel %vm14069_vm0, %v6258_v62, %v6265_v59  ;;  %v20111_v54 = vshrl.u32 %v20110_v41, 16  ;;  %v20112_v53 = vshrl.u32 %v20096_v52, 16  ;;  %v20113_v16 = vshll.u32 %v20110_v41, 16  ;;  %v20115_v62 = vld [vmem:[#allocation53_spill] sm:$0xff]  ;;  %11051 = vmatprep.mubr.msk.bf16.mxu0 %vm2565_vm1, %v10999_v19 }
 0x8a8   : > { %v10747_v0 = vcombine.low %v6257_v18, %v6266_v38  ;;  %v6608_v1 = vsel %vm13341_vm13, %v6606_v61, %v6607_v3  ;;  %v6611_v23 = vrot.slane %v6610_v27, 4  ;;  %v9209_v50 = vor.u32 %v20115_v62, %v20114_v42  ;;  %v9390_v61 = vpop.permute.xlu1 %9389 }
 0x8a9   : > { %v8953_v11 = vrot.slane %v20111_v54, 7  ;;  %v8962_v17 = vrot.slane %v20112_v53, 7  ;;  %v20117_v28 = vshll.u32 %v20116_v56, 16  ;;  %v20118_v32 = vshll.u32 %v20096_v52, 16  ;;  %v20120_v52 = vld [vmem:[#allocation65_spill] sm:$0xff]  ;;  %v20124_v53 = vld [vmem:[#allocation87_spill] sm:$0xff] }
 0x8aa   : > { %v7013_v18 = vsel %vm2565_vm1, %v10747_v0, %v17436_v34  ;;  %v6616_v60 = vsel %vm13341_vm13, %v6611_v23, %v6615_v20  ;;  %v9217_v3 = vshll.u32 %v8654_v2, 16  ;;  %v9210_v59 = vrot.slane %v9209_v50, 4  ;;  %v6174_v2 = vld [vmem:[#allocation3 + $0x4c] sm:$0x1] }
 0x8ab   : > { %v8956_v58 = vor.u32 %v20113_v16, %v8953_v11  ;;  %v8958_v49 = vrot.slane %v8953_v11, 4  ;;  %v9211_v46 = vrot.slane %v20117_v28, 5  ;;  %v8965_v36 = vor.u32 %v20118_v32, %v8962_v17  ;;  %8474 = vmatmul.mubr.bf16.gmra.mrb[76].mxu1 %v7013_v18  ;;  %v20125_v17 = vld [vmem:[#allocation88_spill] sm:$0xff]  ;;  %v20127_v28 = vld [vmem:[#allocation23_spill] sm:$0xff]  ;;  %v18011_v18 = vpop.permute.xlu0 %6957 }
 0x8ac   : > { %v10780_v44 = vcombine.low %v6608_v1, %v6616_v60  ;;  %v9219_v4 = vrot.slane %v9217_v3, 5  ;;  %v6268_v27 = vshrl.u32 %v6167_v7, 16  ;;  %v20121_v38 = vshrl.u32 %v20120_v52, 16 }
 0x8ad   : > { %v8957_v33 = vsel %vm14069_vm0, %v10951_v48, %v8956_v58  ;;  %v9214_v8 = vor.u32 %v20119_v55, %v9211_v46  ;;  %v8966_v34 = vsel %vm14069_vm0, %v8958_v49, %v8965_v36  ;;  %v9212_v48 = vsel %vm13341_vm13, %v9210_v59, %v9211_v46  ;;  %v8651_v58 = vld [vmem:[#allocation3 + $0x144] sm:$0xf] }
 0x8ae   : > { %v6275_v20 = vrot.slane %v20121_v38, 7  ;;  %10924 = vmatprep.mubr.msk.bf16.mxu1 %vm2565_vm1, %v10780_v44  ;;  %v10967_v24 = vcombine.low %v8957_v33, %v8966_v34  ;;  %v20122_v54 = vshrl.u32 %v20106_v12, 16  ;;  %v10732_v19 = vrot.slane %v6268_v27, 11  ;;  %v20129_v33 = vld [vmem:[#allocation89_spill] sm:$0xff] }
 0x8af   : > { %v9215_v41 = vrot.slane %v9214_v8, 4  ;;  %v20123_v0 = vshll.u32 %v20120_v52, 16  ;;  %v6619_v16 = vor.u32 %v20125_v17, %v20124_v53  ;;  %v20126_v62 = vshll.u32 %v20106_v12, 16  ;;  %v20130_v8 = vld [vmem:[#allocation195_spill] sm:$0xff]  ;;  %v6171_v34 = vld [vmem:[#allocation3 + $0x40] sm:$0xf] }
 0x8b0   : > { %v6284_v11 = vrot.slane %v20122_v54, 7  ;;  %v6280_v23 = vrot.slane %v6275_v20, 4  ;;  %v9497_v49 = vsel %vm2565_vm1, %v10967_v24, %v9390_v61  ;;  %v20128_v46 = vshll.u32 %v20127_v28, 16 }
 0x8b1   : > { %v6278_v1 = vor.u32 %v20123_v0, %v6275_v20  ;;  %v9220_v42 = vsel %vm13341_vm13, %v9215_v41, %v9219_v4  ;;  %v6620_v36 = vrot.slane %v6619_v16, 4  ;;  %v6627_v3 = vshll.u32 %v6174_v2, 16  ;;  %9789 = vmatmul.mubr.bf16.gmra.mrb[88].mxu0 %v9497_v49 }
 0x8b2   : > { %v6287_v50 = vor.u32 %v20126_v62, %v6284_v11  ;;  %v6621_v7 = vrot.slane %v20128_v46, 5  ;;  %v11000_v60 = vcombine.low %v9212_v48, %v9220_v42  ;;  %v8968_v55 = vshrl.u32 %v8651_v58, 16  ;;  %v6178_v62 = vld [vmem:[#allocation3 + $0x60] sm:$0x1] }
 0x8b3   : > { %v6279_v32 = vsel %vm14069_vm0, %v10732_v19, %v6278_v1  ;;  %v20131_v12 = vshrl.u32 %v20130_v8, 16  ;;  %v6629_v52 = vrot.slane %v6627_v3, 5  ;;  %v20132_v38 = vshrl.u32 %v20116_v56, 16 }
 0x8b4   : > { %v6288_v44 = vsel %vm14069_vm0, %v6280_v23, %v6287_v50  ;;  %v6624_v59 = vor.u32 %v20129_v33, %v6621_v7  ;;  %v6622_v27 = vsel %vm13341_vm13, %v6620_v36, %v6621_v7  ;;  %v10952_v48 = vrot.slane %v8968_v55, 11  ;;  %11052 = vmatprep.mubr.msk.bf16.mxu0 %vm2565_vm1, %v11000_v60  ;;  %v20135_v23 = vld [vmem:[#allocation18_spill] sm:$0xff]  ;;  %v20138_v50 = vld [vmem:[#allocation91_spill] sm:$0xff] }
 0x8b5   : > { %v8975_v61 = vrot.slane %v20131_v12, 7  ;;  %v10748_v4 = vcombine.low %v6279_v32, %v6288_v44  ;;  %v8984_v20 = vrot.slane %v20132_v38, 7  ;;  %v20133_v41 = vshll.u32 %v20130_v8, 16  ;;  %v8658_v44 = vld [vmem:[#allocation3 + $0x164] sm:$0x1] }
 0x8b6   : > { %v6625_v24 = vrot.slane %v6624_v59, 4  ;;  %v20134_v19 = vshll.u32 %v20116_v56, 16  ;;  %v6290_v1 = vshrl.u32 %v6171_v34, 16  ;;  %v20136_v53 = vshrl.u32 %v20135_v23, 16  ;;  %v9392_v56 = vpop.permute.xlu0 %9391  ;;  %v20142_v34 = vld [vmem:[#allocation50_spill] sm:$0xff] }
 0x8b7   : > { %v8978_v54 = vor.u32 %v20133_v41, %v8975_v61  ;;  %v8980_v11 = vrot.slane %v8975_v61, 4  ;;  %v7017_v2 = vsel %vm2565_vm1, %v10748_v4, %v17602_v35  ;;  %v20137_v49 = vshrl.u32 %v20127_v28, 16  ;;  %v20139_v35 = vld [vmem:[#allocation92_spill] sm:$0xff] }
 0x8b8   : > { %v8987_v0 = vor.u32 %v20134_v19, %v8984_v20  ;;  %v6297_v17 = vrot.slane %v20136_v53, 7  ;;  %8482 = vmatmul.mubr.bf16.gmra.mrb[80].mxu1 %v7017_v2  ;;  %v6630_v16 = vsel %vm13341_vm13, %v6625_v24, %v6629_v52  ;;  %v6633_v46 = vor.u32 %v20139_v35, %v20138_v50  ;;  %v8655_v20 = vld [vmem:[#allocation3 + $0x158] sm:$0xf]  ;;  %v20144_v2 = vld [vmem:[#allocation93_spill] sm:$0xff] }
 0x8b9   : > { %v8979_v58 = vsel %vm14069_vm0, %v10952_v48, %v8978_v54  ;;  %v6306_v42 = vrot.slane %v20137_v49, 7  ;;  %v10781_v7 = vcombine.low %v6622_v27, %v6630_v16  ;;  %v10733_v32 = vrot.slane %v6290_v1, 11  ;;  %v6175_v1 = vld [vmem:[#allocation3 + $0x54] sm:$0xf] }
 0x8ba   : > { %v8988_v60 = vsel %vm14069_vm0, %v8980_v11, %v8987_v0  ;;  %v20140_v36 = vshll.u32 %v20135_v23, 16  ;;  %v6302_v59 = vrot.slane %v6297_v17, 4  ;;  %v20141_v55 = vshll.u32 %v20127_v28, 16 }
 0x8bb   : > { %v10968_v33 = vcombine.low %v8979_v58, %v8988_v60  ;;  %v6634_v12 = vrot.slane %v6633_v46, 4  ;;  %10925 = vmatprep.mubr.msk.bf16.mxu1 %vm2565_vm1, %v10781_v7  ;;  %v20143_v4 = vshll.u32 %v20142_v34, 16  ;;  %v6641_v52 = vshll.u32 %v6178_v62, 16  ;;  %v20145_v60 = vld [vmem:[#allocation48_spill] sm:$0xff] }
 0x8bc   : > { %v6300_v3 = vor.u32 %v20140_v36, %v6297_v17  ;;  %v6309_v8 = vor.u32 %v20141_v55, %v6306_v42  ;;  %v9223_v38 = vor.u32 %v17262_v9, %v17258_v29  ;;  %v9225_v48 = vrot.slane %v9007_v31, 5 }
 0x8bd   : > { %v6635_v27 = vrot.slane %v20143_v4, 5  ;;  %v9501_v24 = vsel %vm2565_vm1, %v10968_v33, %v9392_v56  ;;  %v9231_v41 = vshll.u32 %v8658_v44, 16  ;;  %v6643_v0 = vrot.slane %v6641_v52, 5  ;;  %v9394_v44 = vpop.permute.xlu1 %9393  ;;  %v20150_v4 = vld [vmem:[#allocation99_spill] sm:$0xff]  ;;  %v6179_v52 = vld [vmem:[#allocation3 + $0x68] sm:$0xf] }
 0x8be   : > { %v6301_v61 = vsel %vm14069_vm0, %v10733_v32, %v6300_v3  ;;  %v6310_v28 = vsel %vm14069_vm0, %v6302_v59, %v6309_v8  ;;  %9797 = vmatmul.mubr.bf16.gmra.mrb[92].mxu0 %v9501_v24  ;;  %v9224_v29 = vrot.slane %v9223_v38, 4  ;;  %v9228_v9 = vor.u32 %v17269_v43, %v9225_v48  ;;  %v6182_v3 = vld [vmem:[#allocation3 + $0x74] sm:$0x1]  ;;  %v20152_v24 = vld [vmem:[#allocation13_spill] sm:$0xff] }
 0x8bf   : > { %v10749_v54 = vcombine.low %v6301_v61, %v6310_v28  ;;  %v6636_v11 = vsel %vm13341_vm13, %v6634_v12, %v6635_v27  ;;  %v6638_v19 = vor.u32 %v20144_v2, %v6635_v27  ;;  %v9233_v23 = vrot.slane %v9231_v41, 5  ;;  %v20149_v61 = vld [vmem:[#allocation98_spill] sm:$0xff] }
 0x8c0   : > { %v8990_v53 = vshrl.u32 %v8655_v20, 16  ;;  %v8997_v58 = vrot.slane %v8995_v40, 7  ;;  %v9006_v49 = vrot.slane %v9004_v22, 7  ;;  %v9226_v42 = vsel %vm13341_vm13, %v9224_v29, %v9225_v48  ;;  %v12035_v29 = vld [vmem:[%s12275_s27 + $0x10] sm:$0xff] }
 0x8c1   : > { %v7021_v17 = vsel %vm2565_vm1, %v10749_v54, %v17633_v30  ;;  %v6639_v16 = vrot.slane %v6638_v19, 4  ;;  %v9229_v62 = vrot.slane %v9228_v9, 4  ;;  %v6312_v35 = vshrl.u32 %v6175_v1, 16  ;;  %v12033_v54 = vld [vmem:[%s12275_s27] sm:$0xff]  ;;  %v12036_v9 = vld [vmem:[%s12275_s27 + $0x18] sm:$0xff] }
 0x8c2   : > { %8490 = vmatmul.mubr.bf16.gmra.mrb[84].mxu1 %v7021_v17  ;;  %v10953_v50 = vrot.slane %v8990_v53, 11  ;;  %v9000_v30 = vor.u32 %v8998_v47, %v8997_v58  ;;  %v9002_v46 = vrot.slane %v8997_v58, 4  ;;  %v9009_v40 = vor.u32 %v9007_v31, %v9006_v49  ;;  %v20154_v53 = vld [vmem:[#allocation100_spill] sm:$0xff] }
 0x8c3   : > { %v6644_v43 = vsel %vm13341_vm13, %v6639_v16, %v6643_v0  ;;  %v9234_v22 = vsel %vm13341_vm13, %v9229_v62, %v9233_v23  ;;  %v10734_v7 = vrot.slane %v6312_v35, 11  ;;  %v20146_v32 = vshrl.u32 %v20145_v60, 16  ;;  %v20155_v62 = vld [vmem:[#allocation21_spill] sm:$0xff] }
 0x8c4   : > { %v10782_v56 = vcombine.low %v6636_v11, %v6644_v43  ;;  %v11001_v33 = vcombine.low %v9226_v42, %v9234_v22  ;;  %v9001_v5 = vsel %vm14069_vm0, %v10953_v50, %v9000_v30  ;;  %v9010_v10 = vsel %vm14069_vm0, %v9002_v46, %v9009_v40  ;;  %v12034_v11 = vld [vmem:[%s12275_s27 + $0x8] sm:$0xff]  ;;  %v6186_v46 = vld [vmem:[#allocation3 + $0x88] sm:$0x1]  ;;  %v20158_v22 = vld [vmem:[#allocation108_spill] sm:$0xff] }
 0x8c5   : > { %v6319_v36 = vrot.slane %v20146_v32, 7  ;;  %v20147_v47 = vshrl.u32 %v20142_v34, 16  ;;  %v10969_v59 = vcombine.low %v9001_v5, %v9010_v10  ;;  %v20148_v55 = vshll.u32 %v20145_v60, 16  ;;  %v20160_v32 = vld [vmem:[#allocation96_spill] sm:$0xff] }
 0x8c6   : > { %10926 = vmatprep.mubr.msk.bf16.mxu1 %vm2565_vm1, %v10782_v56  ;;  %v6647_v27 = vor.u32 %v20150_v4, %v20149_v61  ;;  %11053 = vmatprep.mubr.msk.bf16.mxu0 %vm2565_vm1, %v11001_v33  ;;  %v20151_v38 = vshll.u32 %v20142_v34, 16  ;;  %v20153_v28 = vshll.u32 %v20152_v24, 16  ;;  %v6655_v41 = vshll.u32 %v6182_v3, 16  ;;  %v6183_v4 = vld [vmem:[#allocation3 + $0x7c] sm:$0xf] }
 0x8c7   : > { %v6328_v31 = vrot.slane %v20147_v47, 7  ;;  %v6322_v8 = vor.u32 %v20148_v55, %v6319_v36  ;;  %v6324_v12 = vrot.slane %v6319_v36, 4  ;;  %v9883_v2 = vpack.c.bf16 %v12034_v11, %v12033_v54  ;;  %v12039_v11 = vld [vmem:[%s12275_s27 + $0x30] sm:$0xff] }
 0x8c8   : > { %v6649_v48 = vrot.slane %v20153_v28, 5  ;;  %v9505_v19 = vsel %vm2565_vm1, %v10969_v59, %v9394_v44  ;;  %v6648_v1 = vrot.slane %v6647_v27, 4  ;;  %v9884_v23 = vpack.c.bf16 %v12036_v9, %v12035_v29 }
 0x8c9   : > { %v6331_v20 = vor.u32 %v20151_v38, %v6328_v31  ;;  %v6323_v0 = vsel %vm14069_vm0, %v10734_v7, %v6322_v8  ;;  %9805 = vmatmul.mubr.bf16.gmra.mrb[96].mxu0 %v9505_v19  ;;  %v6657_v16 = vrot.slane %v6655_v41, 5  ;;  %v6334_v58 = vshrl.u32 %v6179_v52, 16  ;;  %v20159_v7 = vld [vmem:[#allocation109_spill] sm:$0xff]  ;;  %v20164_v8 = vld [vmem:[#allocation110_spill] sm:$0xff]  ;;  %v12037_v38 = vld [vmem:[%s12275_s27 + $0x20] sm:$0xff] }
 0x8ca   : > { %v6652_v17 = vor.u32 %v20154_v53, %v6649_v48  ;;  %v6650_v42 = vsel %vm13341_vm13, %v6648_v1, %v6649_v48  ;;  %11441 = vmatprep.mubr.msk.bf16.mxu0 %vm799_vm8, %v9883_v2  ;;  %v20156_v50 = vshrl.u32 %v20155_v62, 16  ;;  %v20157_v43 = vshrl.u32 %v20152_v24, 16  ;;  %v12040_v2 = vld [vmem:[%s12275_s27 + $0x38] sm:$0xff] }
 0x8cb   : > { %v6332_v34 = vsel %vm14069_vm0, %v6324_v12, %v6331_v20  ;;  %v10735_v56 = vrot.slane %v6334_v58, 11  ;;  %v6661_v60 = vor.u32 %v20159_v7, %v20158_v22  ;;  %v20161_v36 = vshll.u32 %v20160_v32, 16  ;;  %v12038_v20 = vld [vmem:[%s12275_s27 + $0x28] sm:$0xff]  ;;  %v20165_v1 = vld [vmem:[#allocation95_spill] sm:$0xff] }
 0x8cc   : > { %v10750_v49 = vcombine.low %v6323_v0, %v6332_v34  ;;  %v6341_v35 = vrot.slane %v20156_v50, 7  ;;  %v6350_v30 = vrot.slane %v20157_v43, 7  ;;  %v6653_v40 = vrot.slane %v6652_v17, 4  ;;  %v6190_v17 = vld [vmem:[#allocation3 + $0x9c] sm:$0x1]  ;;  %v20170_v50 = vld [vmem:[#allocation106_spill] sm:$0xff] }
 0x8cd   : > { %v6663_v3 = vrot.slane %v20161_v36, 5  ;;  %v20162_v33 = vshll.u32 %v20155_v62, 16  ;;  %v20163_v47 = vmov %v20153_v28  ;;  %v6662_v55 = vrot.slane %v6661_v60, 4 }
 0x8ce   : > { %v7025_v44 = vsel %vm2565_vm1, %v10750_v49, %v17670_v25  ;;  %v6346_v10 = vrot.slane %v6341_v35, 4  ;;  %v6353_v31 = vor.u32 %v20163_v47, %v6350_v30  ;;  %v6658_v59 = vsel %vm13341_vm13, %v6653_v40, %v6657_v16  ;;  %v20168_v49 = vld [vmem:[#allocation118_spill] sm:$0xff]  ;;  %v6187_v30 = vld [vmem:[#allocation3 + $0x90] sm:$0xf] }
 0x8cf   : > { %v6344_v5 = vor.u32 %v20162_v33, %v6341_v35  ;;  %8498 = vmatmul.mubr.bf16.gmra.mrb[88].mxu1 %v7025_v44  ;;  %v6666_v12 = vor.u32 %v20164_v8, %v6663_v3  ;;  %v6669_v61 = vshll.u32 %v6186_v46, 16  ;;  %v10783_v27 = vcombine.low %v6650_v42, %v6658_v59  ;;  %v20169_v42 = vld [vmem:[#allocation119_spill] sm:$0xff] }
 0x8d0   : > { %v6354_v52 = vsel %vm14069_vm0, %v6346_v10, %v6353_v31  ;;  %v9885_v24 = vpack.c.bf16 %v12038_v20, %v12037_v38  ;;  %v6664_v48 = vsel %vm13341_vm13, %v6662_v55, %v6663_v3  ;;  %v9886_v19 = vpack.c.bf16 %v12040_v2, %v12039_v11  ;;  %v12042_v10 = vld [vmem:[%s12275_s27 + $0x48] sm:$0xff]  ;;  %v18162_v31 = vld [vmem:[%s12275_s27 + $0x50] sm:$0xff]  ;;  %v18165_v59 = vld [vmem:[%s12275_s27 + $0x58] sm:$0xff] }
 0x8d1   : > { %v6345_v25 = vsel %vm14069_vm0, %v10735_v56, %v6344_v5  ;;  %v6667_v41 = vrot.slane %v6666_v12, 4  ;;  %v6671_v54 = vrot.slane %v6669_v61, 5  ;;  %10927 = vmatprep.mubr.msk.bf16.mxu1 %vm2565_vm1, %v10783_v27  ;;  %v6356_v0 = vshrl.u32 %v6183_v4, 16  ;;  %11442 = vmatmul.mubr.msk.bf16.vlgmr.msra.gmra.mrb[100].mxu0 %vm799_vm8, %v9884_v23  ;;  %v12041_v5 = vld [vmem:[%s12275_s27 + $0x40] sm:$0xff]  ;;  %v20175_v38 = vld [vmem:[#allocation103_spill] sm:$0xff]  ;;  %v20179_v11 = vld [vmem:[#allocation129_spill] sm:$0xff] }
 0x8d2   : > { %v10751_v28 = vcombine.low %v6345_v25, %v6354_v52  ;;  %v20166_v29 = vshrl.u32 %v20165_v1, 16  ;;  %v20167_v34 = vshrl.u32 %v20160_v32, 16  ;;  %v6675_v62 = vor.u32 %v20169_v42, %v20168_v49  ;;  %11445 = vmatprep.mubr.msk.bf16.mxu0 %vm799_vm8, %v9885_v24  ;;  %v6194_v32 = vld [vmem:[#allocation3 + $0xb0] sm:$0x1] }
 0x8d3   : > { %v6672_v58 = vsel %vm13341_vm13, %v6667_v41, %v6671_v54  ;;  %v20171_v35 = vshll.u32 %v20170_v50, 16  ;;  %v10736_v23 = vrot.slane %v6356_v0, 11  ;;  %v20172_v40 = vshll.u32 %v20165_v1, 16  ;;  %v20178_v54 = vld [vmem:[#allocation128_spill] sm:$0xff] }
 0x8d4   : > { %v6363_v9 = vrot.slane %v20166_v29, 7  ;;  %v6372_v53 = vrot.slane %v20167_v34, 7  ;;  %v7029_v16 = vsel %vm2565_vm1, %v10751_v28, %v17702_v15  ;;  %v10784_v46 = vcombine.low %v6664_v48, %v6672_v58  ;;  %v20180_v0 = vld [vmem:[#allocation116_spill] sm:$0xff]  ;;  %v6191_v34 = vld [vmem:[#allocation3 + $0xa4] sm:$0xf] }
 0x8d5   : > { %v6677_v43 = vrot.slane %v20171_v35, 5  ;;  %v20173_v22 = vmov %v20161_v36  ;;  %v6676_v60 = vrot.slane %v6675_v62, 4  ;;  %v20174_v36 = vld [vmem:[#allocation120_spill] sm:$0xff]  ;;  %v6683_v44 = vshll.u32 %v6190_v17, 16 }
 0x8d6   : > { %v6366_v15 = vor.u32 %v20172_v40, %v6363_v9  ;;  %v6368_v56 = vrot.slane %v6363_v9, 4  ;;  %v6375_v7 = vor.u32 %v20173_v22, %v6372_v53  ;;  %v9887_v47 = vpack.c.bf16 %v12042_v10, %v12041_v5  ;;  %v20185_v40 = vld [vmem:[#allocation113_spill] sm:$0xff] }
 0x8d7   : > { %v6680_v3 = vor.u32 %v20174_v36, %v6677_v43  ;;  %v9888_v55 = vpack.c.bf16 %v18165_v59, %v18162_v31  ;;  %v6378_v8 = vshrl.u32 %v6187_v30, 16  ;;  %8506 = vmatmul.mubr.bf16.gmra.mrb[92].mxu1 %v7029_v16  ;;  %v6678_v61 = vsel %vm13341_vm13, %v6676_v60, %v6677_v43  ;;  %v20184_v43 = vld [vmem:[#allocation130_spill] sm:$0xff]  ;;  %v6198_v36 = vld [vmem:[#allocation3 + $0xc4] sm:$0x1] }
 0x8d8   : > { %v6367_v33 = vsel %vm14069_vm0, %v10736_v23, %v6366_v15  ;;  %v6376_v12 = vsel %vm14069_vm0, %v6368_v56, %v6375_v7  ;;  %v6685_v27 = vrot.slane %v6683_v44, 5  ;;  %10928 = vmatprep.mubr.msk.bf16.mxu1 %vm2565_vm1, %v10784_v46  ;;  %v20176_v20 = vshrl.u32 %v20175_v38, 16  ;;  %v20189_v44 = vld [vmem:[#allocation139_spill] sm:$0xff] }
 0x8d9   : > { %v6681_v4 = vrot.slane %v6680_v3, 4  ;;  %v10752_v25 = vcombine.low %v6367_v33, %v6376_v12  ;;  %v10737_v52 = vrot.slane %v6378_v8, 11  ;;  %v20177_v28 = vshrl.u32 %v20170_v50, 16  ;;  %11446 = vmatmul.mubr.msk.bf16.gmra.mrb[104].mxu0 %vm799_vm8, %v9886_v19  ;;  %v20188_v3 = vld [vmem:[#allocation138_spill] sm:$0xff]  ;;  %v6195_v8 = vld [vmem:[#allocation3 + $0xb8] sm:$0xf] }
 0x8da   : > { %v6385_v24 = vrot.slane %v20176_v20, 7  ;;  %v6689_v2 = vor.u32 %v20179_v11, %v20178_v54  ;;  %v20181_v1 = vshll.u32 %v20180_v0, 16  ;;  %v6697_v9 = vshll.u32 %v6194_v32, 16  ;;  %11449 = vmatprep.mubr.msk.bf16.mxu0 %vm799_vm8, %v9887_v47 }
 0x8db   : > { %v6394_v48 = vrot.slane %v20177_v28, 7  ;;  %v6686_v41 = vsel %vm13341_vm13, %v6681_v4, %v6685_v27  ;;  %v7033_v53 = vsel %vm2565_vm1, %v10752_v25, %v17733_v26  ;;  %v20182_v16 = vshll.u32 %v20175_v38, 16  ;;  %v20192_v27 = vld [vmem:[#allocation126_spill] sm:$0xff]  ;;  %v20194_v38 = vld [vmem:[#allocation183_spill] sm:$0xff] }
 0x8dc   : > { %v6691_v29 = vrot.slane %v20181_v1, 5  ;;  %v10785_v17 = vcombine.low %v6678_v61, %v6686_v41  ;;  %v6390_v49 = vrot.slane %v6385_v24, 4  ;;  %v20183_v42 = vmov %v20171_v35 }
 0x8dd   : > { %v6388_v58 = vor.u32 %v20182_v16, %v6385_v24  ;;  %v6397_v62 = vor.u32 %v20183_v42, %v6394_v48  ;;  %v6690_v35 = vrot.slane %v6689_v2, 4  ;;  %v6699_v46 = vrot.slane %v6697_v9, 5  ;;  %v20196_v2 = vld [vmem:[#allocation140_spill] sm:$0xff] }
 0x8de   : > { %v6694_v30 = vor.u32 %v20184_v43, %v6691_v29  ;;  %v6400_v26 = vshrl.u32 %v6191_v34, 16  ;;  %v20186_v15 = vshrl.u32 %v20185_v40, 16  ;;  %v20187_v22 = vshrl.u32 %v20180_v0, 16  ;;  %v20197_v34 = vld [vmem:[#allocation123_spill] sm:$0xff]  ;;  %v20201_v43 = vld [vmem:[#allocation149_spill] sm:$0xff] }
 0x8df   : > { %v6389_v23 = vsel %vm14069_vm0, %v10737_v52, %v6388_v58  ;;  %v6398_v19 = vsel %vm14069_vm0, %v6390_v49, %v6397_v62  ;;  %v6692_v50 = vsel %vm13341_vm13, %v6690_v35, %v6691_v29  ;;  %v6703_v33 = vor.u32 %v20189_v44, %v20188_v3  ;;  %8514 = vmatmul.mubr.bf16.gmra.mrb[96].mxu1 %v7033_v53  ;;  %v6202_v49 = vld [vmem:[#allocation3 + $0xd8] sm:$0x1] }
 0x8e0   : > { %v6407_v56 = vrot.slane %v20186_v15, 7  ;;  %v6416_v7 = vrot.slane %v20187_v22, 7  ;;  %v6695_v60 = vrot.slane %v6694_v30, 4  ;;  %v10753_v5 = vcombine.low %v6389_v23, %v6398_v19  ;;  %10929 = vmatprep.mubr.msk.bf16.mxu1 %vm2565_vm1, %v10785_v17  ;;  %v20200_v35 = vld [vmem:[#allocation148_spill] sm:$0xff] }
 0x8e1   : > { %v10738_v10 = vrot.slane %v6400_v26, 11  ;;  %v20190_v47 = vshll.u32 %v20185_v40, 16  ;;  %v20191_v12 = vmov %v20181_v1  ;;  %v6704_v4 = vrot.slane %v6703_v33, 4  ;;  %11450 = vmatmul.mubr.msk.bf16.gmra.mrb[108].mxu0 %vm799_vm8, %v9888_v55  ;;  %v6199_v40 = vld [vmem:[#allocation3 + $0xcc] sm:$0xf] }
 0x8e2   : > { %v6412_v59 = vrot.slane %v6407_v56, 4  ;;  %v6700_v32 = vsel %vm13341_vm13, %v6695_v60, %v6699_v46  ;;  %v6419_v61 = vor.u32 %v20191_v12, %v6416_v7  ;;  %v20193_v25 = vshll.u32 %v20192_v27, 16  ;;  %v20202_v46 = vld [vmem:[#allocation136_spill] sm:$0xff] }
 0x8e3   : > { %v6410_v31 = vor.u32 %v20190_v47, %v6407_v56  ;;  %v20195_v20 = vshll.u32 %v20194_v38, 16  ;;  %v10786_v28 = vcombine.low %v6692_v50, %v6700_v32  ;;  %v6711_v41 = vshll.u32 %v6198_v36, 16  ;;  %v20206_v36 = vld [vmem:[#allocation150_spill] sm:$0xff] }
 0x8e4   : > { %v6705_v52 = vrot.slane %v20193_v25, 5  ;;  %v6420_v54 = vsel %vm14069_vm0, %v6412_v59, %v6419_v61  ;;  %v6422_v1 = vshrl.u32 %v6195_v8, 16  ;;  %v20198_v53 = vshrl.u32 %v20197_v34, 16  ;;  %v6206_v47 = vld [vmem:[#allocation3 + $0xec] sm:$0x1]  ;;  %v20207_v61 = vld [vmem:[#allocation133_spill] sm:$0xff] }
 0x8e5   : > { %v18215_v24 = vrot.slane %v20195_v20, 5  ;;  %v6411_v48 = vsel %vm14069_vm0, %v10738_v10, %v6410_v31  ;;  %v6713_v9 = vrot.slane %v6711_v41, 5  ;;  %v20199_v17 = vshrl.u32 %v20192_v27, 16  ;;  %v20210_v20 = vld [vmem:[#allocation158_spill] sm:$0xff] }
 0x8e6   : > { %v6706_v11 = vsel %vm13341_vm13, %v6704_v4, %v6705_v52  ;;  %v6708_v0 = vor.u32 %v20196_v2, %v6705_v52  ;;  %v10754_v29 = vcombine.low %v6411_v48, %v6420_v54  ;;  %v6429_v16 = vrot.slane %v20198_v53, 7  ;;  %v20211_v48 = vld [vmem:[#allocation159_spill] sm:$0xff]  ;;  %v18258_v54 = vpop.f32.mrb[8].mxu1 }
 0x8e7   : > { %v6438_v58 = vrot.slane %v20199_v17, 7  ;;  %v10739_v62 = vrot.slane %v6422_v1, 11  ;;  %v6717_v30 = vor.u32 %v20201_v43, %v20200_v35  ;;  %v20203_v23 = vshll.u32 %v20202_v46, 16  ;;  %v8188_v53 = vpop.f32.mrb[9].mxu1 }
 0x8e8   : > { %v6709_v42 = vrot.slane %v6708_v0, 4  ;;  %v7037_v15 = vsel %vm2565_vm1, %v10753_v5, %v17768_v45  ;;  %v20204_v56 = vshll.u32 %v20197_v34, 16  ;;  %v6434_v7 = vrot.slane %v6429_v16, 4  ;;  %v18272_v35 = vpop.f32.mrb[10].mxu1 }
 0x8e9   : > { %v6719_v26 = vrot.slane %v20203_v23, 5  ;;  %v20205_v19 = vmov %v20193_v25  ;;  %v6718_v60 = vrot.slane %v6717_v30, 4  ;;  %v6725_v44 = vshll.u32 %v6202_v49, 16  ;;  %8522 = vmatmul.mubr.bf16.gmra.mrb[100].mxu1 %v7037_v15 }
 0x8ea   : > { %v6432_v22 = vor.u32 %v20204_v56, %v6429_v16  ;;  %v6441_v50 = vor.u32 %v20205_v19, %v6438_v58  ;;  %v6714_v55 = vsel %vm13341_vm13, %v6709_v42, %v6713_v9  ;;  %v6444_v5 = vshrl.u32 %v6199_v40, 16  ;;  %10930 = vmatprep.mubr.msk.bf16.mxu1 %vm2565_vm1, %v10786_v28  ;;  %v20212_v28 = vld [vmem:[#allocation146_spill] sm:$0xff]  ;;  %v20217_v56 = vld [vmem:[#allocation143_spill] sm:$0xff] }
 0x8eb   : > { %v6722_v3 = vor.u32 %v20206_v36, %v6719_v26  ;;  %v10787_v33 = vcombine.low %v6706_v11, %v6714_v55  ;;  %v6720_v59 = vsel %vm13341_vm13, %v6718_v60, %v6719_v26  ;;  %v6727_v32 = vrot.slane %v6725_v44, 5  ;;  %v6203_v11 = vld [vmem:[#allocation3 + $0xe0] sm:$0xf] }
 0x8ec   : > { %v6433_v10 = vsel %vm14069_vm0, %v10739_v62, %v6432_v22  ;;  %v6442_v45 = vsel %vm14069_vm0, %v6434_v7, %v6441_v50  ;;  %v10740_v12 = vrot.slane %v6444_v5, 11  ;;  %v20208_v4 = vshrl.u32 %v20207_v61, 16  ;;  %v6210_v50 = vld [vmem:[#allocation3 + $0x100] sm:$0x1] }
 0x8ed   : > { %v18247_v31 = vcombine.low %v6433_v10, %v6442_v45  ;;  %v6723_v8 = vrot.slane %v6722_v3, 4  ;;  %v20209_v25 = vshrl.u32 %v20202_v46, 16  ;;  %v6731_v41 = vor.u32 %v20211_v48, %v20210_v20 }
 0x8ee   : > { %v6451_v27 = vrot.slane %v20208_v4, 7  ;;  %v7041_v2 = vsel %vm2565_vm1, %v10754_v29, %v17800_v13  ;;  %v20213_v1 = vshll.u32 %v20212_v28, 16  ;;  %v6739_v34 = vshll.u32 %v6206_v47, 16  ;;  %v20216_v29 = vld [vmem:[#allocation160_spill] sm:$0xff] }
 0x8ef   : > { %v6460_v52 = vrot.slane %v20209_v25, 7  ;;  %v6728_v0 = vsel %vm13341_vm13, %v6723_v8, %v6727_v32  ;;  %v20214_v17 = vshll.u32 %v20207_v61, 16  ;;  %v20215_v42 = vmov %v20203_v23  ;;  %v8191_v23 = vpop.f32.mrb[11].mxu1  ;;  %v20223_v8 = vld [vmem:[#allocation169_spill] sm:$0xff]  ;;  %v20224_v61 = vld [vmem:[#allocation186_spill] sm:$0xff] }
 0x8f0   : > { %v6733_v9 = vrot.slane %v20213_v1, 5  ;;  %v18266_v16 = vcombine.low %v6720_v59, %v6728_v0  ;;  %v6456_v49 = vrot.slane %v6451_v27, 4  ;;  %v6732_v13 = vrot.slane %v6731_v41, 4  ;;  %v20222_v59 = vld [vmem:[#allocation168_spill] sm:$0xff] }
 0x8f1   : > { %v6454_v58 = vor.u32 %v20214_v17, %v6451_v27  ;;  %v6463_v62 = vor.u32 %v20215_v42, %v6460_v52  ;;  %v6741_v30 = vrot.slane %v6739_v34, 5  ;;  %v6466_v26 = vshrl.u32 %v6203_v11, 16  ;;  %8530 = vmatmul.mubr.bf16.gmra.mrb[104].mxu1 %v7041_v2  ;;  %v20226_v52 = vld [vmem:[#allocation156_spill] sm:$0xff]  ;;  %v20228_v34 = vld [vmem:[#allocation170_spill] sm:$0xff] }
 0x8f2   : > { %v6736_v43 = vor.u32 %v20216_v29, %v6733_v9  ;;  %v20218_v22 = vshrl.u32 %v20217_v56, 16  ;;  %v20219_v46 = vshrl.u32 %v20212_v28, 16  ;;  %v6734_v60 = vsel %vm13341_vm13, %v6732_v13, %v6733_v9  ;;  %10931 = vmatprep.mubr.msk.bf16.mxu1 %vm2565_vm1, %v10787_v33  ;;  %v18306_v9 = vpop.f32.mrb[12].mxu1  ;;  %v6211_v42 = vld [vmem:[#allocation3 + $0x108] sm:$0xf]  ;;  %v20229_v13 = vld [vmem:[#allocation153_spill] sm:$0xff] }
 0x8f3   : > { %v6455_v40 = vsel %vm14069_vm0, %v10740_v12, %v6454_v58  ;;  %v6464_v15 = vsel %vm14069_vm0, %v6456_v49, %v6463_v62  ;;  %v10741_v3 = vrot.slane %v6466_v26, 11  ;;  %v20220_v44 = vshll.u32 %v20217_v56, 16  ;;  %v6207_v12 = vld [vmem:[#allocation3 + $0xf4] sm:$0xf]  ;;  %v8196_v58 = vpop.f32.mrb[13].mxu1 }
 0x8f4   : > { %v6473_v7 = vrot.slane %v20218_v22, 7  ;;  %v6482_v19 = vrot.slane %v20219_v46, 7  ;;  %v10756_v55 = vcombine.low %v6455_v40, %v6464_v15  ;;  %v6737_v36 = vrot.slane %v6736_v43, 4  ;;  %v18313_v62 = vpop.f32.mrb[14].mxu1  ;;  %v6214_v26 = vld [vmem:[#allocation3 + $0x114] sm:$0x1] }
 0x8f5   : > { %v20221_v5 = vmov %v20213_v1  ;;  %v6745_v32 = vor.u32 %v20223_v8, %v20222_v59  ;;  %v20225_v4 = vshrl.u32 %v20224_v61, 16  ;;  %v20227_v20 = vshll.u32 %v20226_v52, 16  ;;  %v20232_v40 = vld [vmem:[#allocation178_spill] sm:$0xff]  ;;  %v20233_v15 = vld [vmem:[#allocation179_spill] sm:$0xff]  ;;  %v8199_v46 = vpop.f32.mrb[15].mxu1  ;;  %v20238_v8 = vld [vmem:[#allocation180_spill] sm:$0xff] }
 0x8f6   : > { %v6476_v10 = vor.u32 %v20220_v44, %v6473_v7  ;;  %v6478_v45 = vrot.slane %v6473_v7, 4  ;;  %v6485_v47 = vor.u32 %v20221_v5, %v6482_v19  ;;  %v6742_v25 = vsel %vm13341_vm13, %v6737_v36, %v6741_v30 }
 0x8f7   : > { %v18293_v27 = vrot.slane %v20225_v4, 4  ;;  %v6747_v48 = vrot.slane %v20227_v20, 5  ;;  %v6753_v41 = vshll.u32 %v6210_v50, 16  ;;  %v18300_v11 = vcombine.low %v6734_v60, %v6742_v25  ;;  %v20234_v50 = vld [vmem:[#allocation166_spill] sm:$0xff] }
 0x8f8   : > { %v6477_v0 = vsel %vm14069_vm0, %v10741_v3, %v6476_v10  ;;  %v6486_v28 = vsel %vm14069_vm0, %v6478_v45, %v6485_v47  ;;  %v6746_v1 = vrot.slane %v6745_v32, 4  ;;  %v6488_v49 = vshrl.u32 %v6207_v12, 16 }
 0x8f9   : > { %v18308_v2 = vcombine.low %v6477_v0, %v6486_v28  ;;  %v6750_v53 = vor.u32 %v20228_v34, %v6747_v48  ;;  %v6755_v17 = vrot.slane %v6753_v41, 5  ;;  %v20230_v29 = vshrl.u32 %v20229_v13, 16  ;;  %v20239_v34 = vld [vmem:[#allocation163_spill] sm:$0xff] }
 0x8fa   : > { %v6748_v33 = vsel %vm13341_vm13, %v6746_v1, %v6747_v48  ;;  %v20231_v30 = vshrl.u32 %v20226_v52, 16  ;;  %v6759_v56 = vor.u32 %v20233_v15, %v20232_v40  ;;  %v7045_v22 = vsel %vm2565_vm1, %v18247_v31, %v17828_v6  ;;  %v6215_v48 = vld [vmem:[#allocation3 + $0x11c] sm:$0xf]  ;;  %v18357_v40 = vpop.f32.mrb[16].mxu1 }
 0x8fb   : > { %v6495_v43 = vrot.slane %v20230_v29, 7  ;;  %v6751_v7 = vrot.slane %v6750_v53, 4  ;;  %v10742_v19 = vrot.slane %v6488_v49, 11  ;;  %v20235_v60 = vshll.u32 %v20234_v50, 16  ;;  %8538 = vmatmul.mubr.bf16.gmra.mrb[108].mxu1 %v7045_v22  ;;  %v20244_v29 = vld [vmem:[#allocation176_spill] sm:$0xff]  ;;  %v8204_v22 = vpop.f32.mrb[17].mxu1 }
 0x8fc   : > { %v6504_v23 = vrot.slane %v20231_v30, 7  ;;  %v20236_v3 = vshll.u32 %v20229_v13, 16  ;;  %v20237_v45 = vmov %v20227_v20  ;;  %v6760_v47 = vrot.slane %v6759_v56, 4  ;;  %v6218_v20 = vld [vmem:[#allocation3 + $0x128] sm:$0x1]  ;;  %10932 = vmatprep.mubr.msk.bf16.mxu1 %vm2565_vm1, %v18266_v16 }
 0x8fd   : > { %v6761_v36 = vrot.slane %v20235_v60, 5  ;;  %v6500_v10 = vrot.slane %v6495_v43, 4  ;;  %v6756_v59 = vsel %vm13341_vm13, %v6751_v7, %v6755_v17  ;;  %v6767_v6 = vshll.u32 %v6214_v26, 16 }
 0x8fe   : > { %v6498_v44 = vor.u32 %v20236_v3, %v6495_v43  ;;  %v6507_v5 = vor.u32 %v20237_v45, %v6504_v23  ;;  %v6510_v31 = vshrl.u32 %v6211_v42, 16  ;;  %v18333_v12 = vcombine.low %v6748_v33, %v6756_v59  ;;  %v20242_v42 = vld [vmem:[#allocation188_spill] sm:$0xff]  ;;  %v20243_v33 = vld [vmem:[#allocation189_spill] sm:$0xff]  ;;  %v18365_v3 = vpop.f32.mrb[18].mxu1 }
 0x8ff   : > { %v6764_v32 = vor.u32 %v20238_v8, %v6761_v36  ;;  %v6762_v52 = vsel %vm13341_vm13, %v6760_v47, %v6761_v36  ;;  %v6769_v28 = vrot.slane %v6767_v6, 5  ;;  %v20240_v53 = vshrl.u32 %v20239_v34, 16  ;;  %v20248_v8 = vld [vmem:[#allocation173_spill] sm:$0xff] }
 0x900   : > { %v6499_v4 = vsel %vm14069_vm0, %v10742_v19, %v6498_v44  ;;  %v6508_v25 = vsel %vm14069_vm0, %v6500_v10, %v6507_v5  ;;  %v10743_v1 = vrot.slane %v6510_v31, 11  ;;  %v20241_v58 = vshrl.u32 %v20234_v50, 16  ;;  %v8207_v5 = vpop.f32.mrb[19].mxu1 }
 0x901   : > { %v18341_v41 = vcombine.low %v6499_v4, %v6508_v25  ;;  %v6765_v0 = vrot.slane %v6764_v32, 4  ;;  %v6517_v17 = vrot.slane %v20240_v53, 7  ;;  %v6773_v13 = vor.u32 %v20243_v33, %v20242_v42  ;;  %v6222_v4 = vld [vmem:[#allocation3 + $0x13c] sm:$0x1]  ;;  %v6219_v42 = vld [vmem:[#allocation3 + $0x130] sm:$0xf] }
 0x902   : > { %v6526_v49 = vrot.slane %v20241_v58, 7  ;;  %v20245_v43 = vshll.u32 %v20244_v29, 16  ;;  %v7049_v23 = vsel %vm2565_vm1, %v10756_v55, %v17858_v57  ;;  %v6781_v16 = vshll.u32 %v6218_v20, 16  ;;  %v20247_v55 = vld [vmem:[#allocation190_spill] sm:$0xff] }
 0x903   : > { %v6770_v26 = vsel %vm13341_vm13, %v6765_v0, %v6769_v28  ;;  %v6532_v15 = vshrl.u32 %v6215_v48, 16  ;;  %v20246_v7 = vshll.u32 %v20239_v34, 16  ;;  %v6522_v19 = vrot.slane %v6517_v17, 4  ;;  %v20251_v48 = vld [vmem:[#allocation197_spill] sm:$0xff]  ;;  %8546 = vmatmul.mubr.bf16.gmra.mrb[112].mxu1 %v7049_v23 }
 0x904   : > { %v6775_v30 = vrot.slane %v20245_v43, 5  ;;  %v18359_v56 = vcombine.low %v6762_v52, %v6770_v26  ;;  %v6529_v36 = vor.u32 %v20235_v60, %v6526_v49  ;;  %v6774_v57 = vrot.slane %v6773_v13, 4  ;;  %10933 = vmatprep.mubr.msk.bf16.mxu1 %vm2565_vm1, %v18300_v11 }
 0x905   : > { %v6520_v46 = vor.u32 %v20246_v7, %v6517_v17  ;;  %v6783_v10 = vrot.slane %v6781_v16, 5  ;;  %v10744_v45 = vrot.slane %v6532_v15, 11  ;;  %v20249_v32 = vshrl.u32 %v20248_v8, 16  ;;  %v18395_v16 = vpop.f32.mrb[20].mxu1 }
 0x906   : > { %v6778_v44 = vor.u32 %v20247_v55, %v6775_v30  ;;  %v6530_v59 = vsel %vm14069_vm0, %v6522_v19, %v6529_v36  ;;  %v20250_v50 = vshrl.u32 %v20244_v29, 16  ;;  %v6776_v52 = vsel %vm13341_vm13, %v6774_v57, %v6775_v30 }
 0x907   : > { %v6521_v47 = vsel %vm14069_vm0, %v10743_v1, %v6520_v46  ;;  %v6539_v6 = vrot.slane %v20249_v32, 7  ;;  %v6787_v0 = vor.u32 %v18215_v24, %v20251_v48  ;;  %v20252_v28 = vshll.u32 %v20248_v8, 16  ;;  %v8212_v46 = vpop.f32.mrb[21].mxu1 }
 0x908   : > { %v6548_v31 = vrot.slane %v20250_v50, 7  ;;  %v10759_v25 = vcombine.low %v6521_v47, %v6530_v59  ;;  %v6779_v20 = vrot.slane %v6778_v44, 4  ;;  %v20253_v53 = vmov %v20245_v43  ;;  %v18403_v55 = vpop.f32.mrb[22].mxu1 }
 0x909   : > { %v6542_v1 = vor.u32 %v20252_v28, %v6539_v6  ;;  %v6544_v34 = vrot.slane %v6539_v6, 4  ;;  %v20254_v58 = vshll.u32 %v20224_v61, 16  ;;  %v6788_v13 = vrot.slane %v6787_v0, 4 }
 0x90a   : > { %v6551_v17 = vor.u32 %v20253_v53, %v6548_v31  ;;  %v6784_v33 = vsel %vm13341_vm13, %v6779_v20, %v6783_v10  ;;  %v6795_v43 = vshll.u32 %v6222_v4, 16  ;;  %v6554_v7 = vshrl.u32 %v6219_v42, 16  ;;  %v12046_v53 = vld [vmem:[%s12275_s27 + $0x68] sm:$0xff] }
 0x90b   : > { %v6789_v49 = vrot.slane %v20254_v58, 5  ;;  %v10792_v24 = vcombine.low %v6776_v52, %v6784_v33  ;;  %v6543_v30 = vsel %vm14069_vm0, %v10744_v45, %v6542_v1  ;;  %v20255_v11 = vshrl.u32 %v20194_v38, 16 }
 0x90c   : > { %v6552_v29 = vsel %vm14069_vm0, %v6544_v34, %v6551_v17  ;;  %v6797_v22 = vrot.slane %v6795_v43, 5  ;;  %v20256_v36 = vshrl.u32 %v20224_v61, 16  ;;  %v10745_v44 = vrot.slane %v6554_v7, 11 }
 0x90d   : > { %v6792_v26 = vor.u32 %v18293_v27, %v6789_v49  ;;  %v10760_v23 = vcombine.low %v6543_v30, %v6552_v29  ;;  %v6790_v15 = vsel %vm13341_vm13, %v6788_v13, %v6789_v49  ;;  %v6561_v60 = vrot.slane %v20255_v11, 7  ;;  %v8215_v27 = vpop.f32.mrb[23].mxu1  ;;  %v18449_v49 = vpop.f32.mrb[36].mxu0  ;;  %v12047_v30 = vld [vmem:[%s12275_s27 + $0x70] sm:$0xff]  ;;  %v12048_v29 = vld [vmem:[%s12275_s27 + $0x78] sm:$0xff] }
 0x90e   : > { %v6570_v57 = vrot.slane %v20256_v36, 7  ;;  %v20257_v45 = vshll.u32 %v20194_v38, 16  ;;  %v20258_v59 = vmov %v20254_v58  ;;  %v7053_v6 = vsel %vm2565_vm1, %v18308_v2, %v17892_v21  ;;  %v18420_v38 = vpop.f32.mrb[24].mxu1  ;;  %v9688_v42 = vpop.f32.mrb[37].mxu0  ;;  %v12051_v36 = vld [vmem:[%s12275_s27 + $0x90] sm:$0xff] }
 0x90f   : > { %v6793_v19 = vrot.slane %v6792_v26, 4  ;;  %v6566_v47 = vrot.slane %v6561_v60, 4  ;;  %8554 = vmatmul.mubr.bf16.gmra.mrb[116].mxu1 %v7053_v6  ;;  %v8220_v61 = vpop.f32.mrb[25].mxu1  ;;  %v7057_v21 = vsel %vm2565_vm1, %v18341_v41, %v17915_v51  ;;  %v7061_v48 = vsel %vm2565_vm1, %v10759_v25, %v17948_v39  ;;  %v12045_v25 = vld [vmem:[%s12275_s27 + $0x60] sm:$0xff]  ;;  %v18453_v33 = vpop.f32.mrb[38].mxu0 }
 0x910   : > { %v6564_v5 = vor.u32 %v20257_v45, %v6561_v60  ;;  %v6573_v8 = vor.u32 %v20258_v59, %v6570_v57  ;;  %10934 = vmatprep.mubr.msk.bf16.mxu1 %vm2565_vm1, %v18333_v12  ;;  %v18422_v4 = vpop.f32.mrb[26].mxu1  ;;  %v7065_v28 = vsel %vm2565_vm1, %v10760_v23, %v17979_v63  ;;  %v9889_v17 = vpack.c.bf16 %v12046_v53, %v12045_v25  ;;  %v9691_v13 = vpop.f32.mrb[39].mxu0  ;;  %v12052_v57 = vld [vmem:[%s12275_s27 + $0x98] sm:$0xff]  ;;  %v12054_v45 = vld [vmem:[%s12275_s27 + $0xa8] sm:$0xff] }
 0x911   : > { %v6798_v10 = vsel %vm13341_vm13, %v6793_v19, %v6797_v22  ;;  %v8223_v52 = vpop.f32.mrb[27].mxu1  ;;  %v9890_v26 = vpack.c.bf16 %v12048_v29, %v12047_v30  ;;  %v18464_v46 = vpop.f32.mrb[40].mxu0  ;;  %v12056_v61 = vld [vmem:[%s12275_s27 + $0xb8] sm:$0xff]  ;;  %v12061_v13 = vld [vmem:[%s12275_s27 + $0xe0] sm:$0xff] }
 0x912   : > { %v10793_v32 = vcombine.low %v6790_v15, %v6798_v10  ;;  %v6565_v50 = vsel %vm14069_vm0, %v10745_v44, %v6564_v5  ;;  %v6574_v31 = vsel %vm14069_vm0, %v6566_v47, %v6573_v8  ;;  %v18429_v14 = vpop.f32.mrb[28].mxu1  ;;  %v12050_v15 = vld [vmem:[%s12275_s27 + $0x88] sm:$0xff]  ;;  %v9696_v19 = vpop.f32.mrb[41].mxu0  ;;  %v9892_v44 = vpack.c.bf16 %v12052_v57, %v12051_v36  ;;  %v12053_v10 = vld [vmem:[%s12275_s27 + $0xa0] sm:$0xff]  ;;  %v12064_v36 = vld [vmem:[%s12275_s27 + $0xf8] sm:$0xff] }
 0x913   : > { %v10761_v37 = vcombine.low %v6565_v50, %v6574_v31  ;;  %v8228_v2 = vpop.f32.mrb[29].mxu1  ;;  %v18467_v11 = vpop.f32.mrb[42].mxu0  ;;  %v9893_v5 = vpack.c.bf16 %v12054_v45, %v12053_v10 }
 0x914   : > { %v18431_v20 = vpop.f32.mrb[30].mxu1  ;;  %v9699_v60 = vpop.f32.mrb[43].mxu0  ;;  %v12058_v2 = vld [vmem:[%s12275_s27 + $0xc8] sm:$0xff] }
 0x915   : > { %v8231_v12 = vpop.f32.mrb[31].mxu1  ;;  %v7069_v63 = vsel %vm2565_vm1, %v10761_v37, %v18011_v18  ;;  %v12049_v18 = vld [vmem:[%s12275_s27 + $0x80] sm:$0xff]  ;;  %v12055_v37 = vld [vmem:[%s12275_s27 + $0xb0] sm:$0xff] }
 0x916   : > { %v18436_v0 = vpop.f32.mrb[32].mxu1  ;;  %v9891_v22 = vpack.c.bf16 %v12050_v15, %v12049_v18  ;;  %v9894_v52 = vpack.c.bf16 %v12056_v61, %v12055_v37  ;;  %v12063_v60 = vld [vmem:[%s12275_s27 + $0xf0] sm:$0xff] }
 0x917   : > { %8562 = vmatmul.mubr.bf16.gmra.mrb[120].mxu1 %v7057_v21  ;;  %v8236_v51 = vpop.f32.mrb[33].mxu1  ;;  %v18476_v59 = vpop.f32.mrb[44].mxu0  ;;  %v12057_v21 = vld [vmem:[%s12275_s27 + $0xc0] sm:$0xff]  ;;  %v9898_v57 = vpack.c.bf16 %v12064_v36, %v12063_v60 }
 0x918   : > { %10935 = vmatprep.mubr.msk.bf16.mxu1 %vm2565_vm1, %v18359_v56  ;;  %v18438_v41 = vpop.f32.mrb[34].mxu1  ;;  %v9895_v12 = vpack.c.bf16 %v12058_v2, %v12057_v21 }
 0x919   : > { %v8239_v56 = vpop.f32.mrb[35].mxu1 }
 0x91a   : > { %v18443_v1 = vpop.f32.mrb[36].mxu1 }
 0x91b   : > { %v8244_v34 = vpop.f32.mrb[37].mxu1 }
 0x91c   : > { %v18445_v39 = vpop.f32.mrb[38].mxu1 }
 0x91d   : > { %v8247_v58 = vpop.f32.mrb[39].mxu1 }
 0x91e   : > { %v18456_v43 = vpop.f32.mrb[40].mxu1  ;;  %v12059_v58 = vld [vmem:[%s12275_s27 + $0xd0] sm:$0xff] }
 0x91f   : > { %8570 = vmatmul.mubr.bf16.gmra.mrb[124].mxu1 %v7061_v48 }
 0x920   : > { %10936 = vmatprep.mubr.msk.bf16.mxu1 %vm2565_vm1, %v10792_v24  ;;  %v8252_v24 = vpop.f32.mrb[41].mxu1 }
 0x921   : > { %v18460_v23 = vpop.f32.mrb[42].mxu1  ;;  %v12062_v24 = vld [vmem:[%s12275_s27 + $0xe8] sm:$0xff] }
 0x922   : > { %v8255_v7 = vpop.f32.mrb[43].mxu1  ;;  %v9897_v30 = vpack.c.bf16 %v12062_v24, %v12061_v13 }
 0x923   : > { %v18472_v27 = vpop.f32.mrb[44].mxu1 }
 0x924   : > { %v8260_v47 = vpop.f32.mrb[45].mxu1 }
 0x925   : > { %v18478_v8 = vpop.f32.mrb[46].mxu1 }
 0x926   : > { %v8263_v6 = vpop.f32.mrb[47].mxu1 }
 0x927   : > { %8578 = vmatmul.mubr.bf16.gmra.mrb[128].mxu1 %v7065_v28  ;;  %v18490_v56 = vpop.f32.mrb[48].mxu1 }
 0x928   : > { %10937 = vmatprep.mubr.msk.bf16.mxu1 %vm2565_vm1, %v10793_v32  ;;  %v9704_v32 = vpop.f32.mrb[45].mxu0  ;;  %v8268_v34 = vpop.f32.mrb[49].mxu1 }
 0x929   : > { %v18481_v50 = vpop.f32.mrb[46].mxu0  ;;  %v18496_v53 = vpop.f32.mrb[50].mxu1 }
 0x92a   : > { %v9707_v31 = vpop.f32.mrb[47].mxu0 }
 0x92b   : > { %v18488_v48 = vpop.f32.mrb[48].mxu0 }
 0x92c   : > { %v9712_v51 = vpop.f32.mrb[49].mxu0 }
 0x92d   : > { %v18493_v28 = vpop.f32.mrb[50].mxu0 }
 0x92e   : > { %v9715_v25 = vpop.f32.mrb[51].mxu0 }
 0x92f   : > { %8586 = vmatmul.mubr.bf16.gmra.mrb[132].mxu1 %v7069_v63  ;;  %v12060_v63 = vld [vmem:[%s12275_s27 + $0xd8] sm:$0xff]  ;;  %v18502_v29 = vpop.f32.mrb[52].mxu0  ;;  %s12065_s27 = scalar_lea.vmem %s18840_s16, 4096 }
 0x930   : > { %11453 = vmatprep.mubr.msk.bf16.mxu1 %vm799_vm8, %v9889_v17  ;;  %v8271_v17 = vpop.f32.mrb[51].mxu1  ;;  %v9896_v42 = vpack.c.bf16 %v12060_v63, %v12059_v58  ;;  %p12066_p12 = scmp.ne.s32.totalorder %s18840_s16, %s12065_s27  ;;  %p12073_p2 = scmp.lt.s32.totalorder %s12071_s24, %s12065_s27 }
 0x932   : > { %p12067_p13 = pnand %p12066_p12, %p12257_p5  ;;  %p12074_p3 = por %p12073_p2, %p12072_p1 }
 0x934   : > { %p12068_p0 = pneg %p12067_p13 }
 0x936   : > { %p12075_p4 = pnand %p12074_p3, %p12068_p0 }
 0x937   : > { %11454 = vmatmul.mubr.msk.bf16.vlgmr.msra.gmra.mrb[136].mxu1 %vm799_vm8, %v9890_v26  ;;  %v9720_v26 = vpop.f32.mrb[53].mxu0 }
 0x938   : > { %11457 = vmatprep.mubr.msk.bf16.mxu1 %vm799_vm8, %v9891_v22  ;;  %v18505_v18 = vpop.f32.mrb[54].mxu0  ;;  %v18508_v22 = vpop.f32.mrb[52].mxu1 }
 0x939   : > { %v9723_v15 = vpop.f32.mrb[55].mxu0  ;;  %v8276_v7 = vpop.f32.mrb[53].mxu1 }
 0x93a   : > { %v18510_v19 = vpop.f32.mrb[54].mxu1  ;;  %v18514_v10 = vpop.f32.mrb[56].mxu0 }
 0x93b   : > { %v9728_v45 = vpop.f32.mrb[57].mxu0 }
 0x93f   : > { %11458 = vmatmul.mubr.msk.bf16.gmra.mrb[140].mxu1 %vm799_vm8, %v9892_v44  ;;  %v8279_v44 = vpop.f32.mrb[55].mxu1 }
 0x940   : > { %11461 = vmatprep.mubr.msk.bf16.mxu1 %vm799_vm8, %v9893_v5  ;;  %v18517_v5 = vpop.f32.mrb[58].mxu0 }
 0x941   : > { %v9731_v47 = vpop.f32.mrb[59].mxu0  ;;  %v18519_v32 = vpop.f32.mrb[56].mxu1 }
 0x942   : > { %v8284_v6 = vpop.f32.mrb[57].mxu1  ;;  %v18521_v31 = vpop.f32.mrb[60].mxu0 }
 0x943   : > { %v18523_v37 = vpop.f32.mrb[58].mxu1  ;;  %v9736_v61 = vpop.f32.mrb[61].mxu0 }
 0x944   : > { %v18525_v21 = vpop.f32.mrb[62].mxu0 }
 0x945   : > { %v9739_v2 = vpop.f32.mrb[63].mxu0 }
 0x947   : > { %11462 = vmatmul.mubr.msk.bf16.gmra.mrb[144].mxu1 %vm799_vm8, %v9894_v52  ;;  %v8287_v52 = vpop.f32.mrb[59].mxu1 }
 0x948   : > { %11465 = vmatprep.mubr.msk.bf16.mxu1 %vm799_vm8, %v9895_v12  ;;  %v18527_v12 = vpop.f32.mrb[64].mxu0 }
 0x949   : > { %v9744_v34 = vpop.f32.mrb[65].mxu0 }
 0x94a   : > { %v18531_v17 = vpop.f32.mrb[66].mxu0 }
 0x94b   : > { %v9747_v63 = vpop.f32.mrb[67].mxu0 }
 0x94c   : > { %v18535_v13 = vpop.f32.mrb[68].mxu0 }
 0x94d   : > { %v18529_v51 = vpop.f32.mrb[60].mxu1  ;;  %v9752_v24 = vpop.f32.mrb[69].mxu0 }
 0x94e   : > { %20259 = vst [vmem:[#allocation57_spill] sm:$0xff] %v18529_v51  ;;  %v8292_v25 = vpop.f32.mrb[61].mxu1 }
 0x94f   : > { %11466 = vmatmul.mubr.msk.bf16.gmra.mrb[148].mxu1 %vm799_vm8, %v9896_v42  ;;  %v18533_v58 = vpop.f32.mrb[62].mxu1 }
 0x950   : > { %11469 = vmatprep.mubr.msk.bf16.mxu1 %vm799_vm8, %v9897_v30  ;;  %20260 = vst [vmem:[#allocation54_spill] sm:$0xff] %v18533_v58  ;;  %v8295_v42 = vpop.f32.mrb[63].mxu1  ;;  %v18537_v30 = vpop.f32.mrb[70].mxu0 }
 0x951   : > { %v9755_v26 = vpop.f32.mrb[71].mxu0 }
 0x957   : > { %11470 = vmatmul.mubr.msk.bf16.gmra.mrb[152].mxu1 %vm799_vm8, %v9898_v57  ;;  %v18543_v57 = vpop.f32.mrb[72].mxu0 }
 0x958   : > { %v9760_v44 = vpop.f32.mrb[73].mxu0 }
 0x959   : > { %v18545_v45 = vpop.f32.mrb[74].mxu0 }
 0x95a   : > { %v9763_v47 = vpop.f32.mrb[75].mxu0 }
 0x95b   : > { %v18539_v15 = vpop.f32.mrb[64].mxu1 }
 0x95c   : > { %20261 = vst [vmem:[#allocation70_spill] sm:$0xff] %v18539_v15  ;;  %v8300_v7 = vpop.f32.mrb[65].mxu1 }
 0x95d   : > { %v18541_v60 = vpop.f32.mrb[66].mxu1 }
 0x95e   : > { %20262 = vst [vmem:[#allocation49_spill] sm:$0xff] %v18541_v60  ;;  %v8303_v36 = vpop.f32.mrb[67].mxu1 }
 0x961   : > { %v18551_v2 = vpop.f32.mrb[76].mxu0 }
 0x962   : > { %v9768_v25 = vpop.f32.mrb[77].mxu0 }
 0x963   : > { %v18553_v63 = vpop.f32.mrb[78].mxu0 }
 0x964   : > { %v9771_v42 = vpop.f32.mrb[79].mxu0 }
 0x967   : > { %v18547_v6 = vpop.f32.mrb[68].mxu1 }
 0x968   : > { %20263 = vst [vmem:[#allocation62_spill] sm:$0xff] %v18547_v6  ;;  %v8308_v61 = vpop.f32.mrb[69].mxu1 }
 0x969   : > { %v18549_v52 = vpop.f32.mrb[70].mxu1 }
 0x96a   : > { %20264 = vst [vmem:[#allocation56_spill] sm:$0xff] %v18549_v52  ;;  %v8311_v34 = vpop.f32.mrb[71].mxu1 }
 0x96b   : > { %v18556_v36 = vpop.f32.mrb[80].mxu0 }
 0x96c   : > { %v9776_v47 = vpop.f32.mrb[81].mxu0 }
 0x96d   : > { %v18560_v60 = vpop.f32.mrb[82].mxu0 }
 0x96e   : > { %v9779_v34 = vpop.f32.mrb[83].mxu0 }
 0x972   : > { %v8467_v24 = vpop.f32.mrb[72].mxu1 }
 0x973   : > { %v8468_v26 = vadd.f32 %v8467_v24, %v18258_v54  ;;  %v8469_v7 = vpop.f32.mrb[73].mxu1 }
 0x974   : > { %v8470_v44 = vpop.f32.mrb[74].mxu1 }
 0x975   : > { %v9813_v6 = vadd.f32 %v18449_v49, %v8468_v26  ;;  %v8471_v61 = vadd.f32 %v8470_v44, %v18272_v35  ;;  %v8472_v52 = vpop.f32.mrb[75].mxu1 }
 0x977   : > { %v9814_v25 = vadd.f32 %v18453_v33, %v8471_v61 }
 0x979   : > { %v18563_v15 = vpop.f32.mrb[84].mxu0 }
 0x97a   : > { %v9784_v58 = vpop.f32.mrb[85].mxu0 }
 0x97b   : > { %v18566_v7 = vpop.f32.mrb[86].mxu0 }
 0x97c   : > { %v9787_v51 = vpop.f32.mrb[87].mxu0 }
 0x97e   : > { %v8475_v42 = vpop.f32.mrb[76].mxu1 }
 0x97f   : > { %v8476_v54 = vadd.f32 %v8475_v42, %v18306_v9  ;;  %v8477_v24 = vpop.f32.mrb[77].mxu1 }
 0x980   : > { %v8478_v47 = vpop.f32.mrb[78].mxu1 }
 0x981   : > { %v9815_v49 = vadd.f32 %v18464_v46, %v8476_v54  ;;  %v8479_v35 = vadd.f32 %v8478_v47, %v18313_v62  ;;  %v8480_v52 = vpop.f32.mrb[79].mxu1 }
 0x983   : > { %v9816_v26 = vadd.f32 %v18467_v11, %v8479_v35 }
 0x984   : > { %v18571_v44 = vpop.f32.mrb[88].mxu0 }
 0x985   : > { %v9792_v33 = vpop.f32.mrb[89].mxu0 }
 0x986   : > { %v18573_v61 = vpop.f32.mrb[90].mxu0 }
 0x987   : > { %v9795_v34 = vpop.f32.mrb[91].mxu0 }
 0x98b   : > { %v8483_v58 = vpop.f32.mrb[80].mxu1 }
 0x98c   : > { %v8484_v9 = vadd.f32 %v8483_v58, %v18357_v40  ;;  %v8485_v42 = vpop.f32.mrb[81].mxu1 }
 0x98d   : > { %v8486_v24 = vpop.f32.mrb[82].mxu1 }
 0x98e   : > { %v9817_v51 = vadd.f32 %v18476_v59, %v8484_v9  ;;  %v8487_v46 = vadd.f32 %v8486_v24, %v18365_v3  ;;  %v8488_v54 = vpop.f32.mrb[83].mxu1 }
 0x990   : > { %v18579_v62 = vadd.f32 %v18481_v50, %v8487_v46 }
 0x991   : > { %v18581_v11 = vpop.f32.mrb[92].mxu0 }
 0x992   : > { %v9800_v47 = vpop.f32.mrb[93].mxu0 }
 0x993   : > { %v18583_v35 = vpop.f32.mrb[94].mxu0 }
 0x994   : > { %20265 = vst [vmem:[#allocation55_spill] sm:$0xff] %v18583_v35  ;;  %v9803_v33 = vpop.f32.mrb[95].mxu0 }
 0x995   : > { %v8491_v52 = vpop.f32.mrb[84].mxu1 }
 0x996   : > { %v8492_v34 = vadd.f32 %v8491_v52, %v18395_v16  ;;  %v8493_v40 = vpop.f32.mrb[85].mxu1  ;;  %v18597_v16 = vld [vmem:[%s18904_s12] ss:$0 sm:$0xff] }
 0x997   : > { %v8494_v58 = vpop.f32.mrb[86].mxu1 }
 0x998   : > { %v9819_v42 = vadd.f32 %v18488_v48, %v8492_v34  ;;  %v8495_v59 = vadd.f32 %v8494_v58, %v18403_v55  ;;  %v8496_v3 = vpop.f32.mrb[87].mxu1  ;;  %v9853_v34 = vadd.f32 %v18597_v16, %v9815_v49  ;;  %v9852_v49 = vadd.f32 %v18597_v16, %v9814_v25 }
 0x99a   : > { %v9820_v9 = vadd.f32 %v18493_v28, %v8495_v59 }
 0x99c   : > { %v18589_v50 = vpop.f32.mrb[96].mxu0 }
 0x99d   : > { %v9808_v24 = vpop.f32.mrb[97].mxu0 }
 0x99e   : > { %v18591_v46 = vpop.f32.mrb[98].mxu0 }
 0x99f   : > { %v9811_v54 = vpop.f32.mrb[99].mxu0 }
 0x9a2   : > { %v8499_v47 = vpop.f32.mrb[88].mxu1 }
 0x9a3   : > { %v8500_v33 = vadd.f32 %v8499_v47, %v18420_v38  ;;  %v8501_v35 = vpop.f32.mrb[89].mxu1  ;;  %v18605_v38 = vld [vmem:[%s18906_s14] ss:$0 sm:$0xff] }
 0x9a4   : > { %v8502_v48 = vpop.f32.mrb[90].mxu1  ;;  %v11443_v40 = vpop.f32.mrb[100].mxu0  ;;  %v9851_v35 = vadd.f32 %v18597_v16, %v9813_v6 }
 0x9a5   : > { %v9821_v55 = vadd.f32 %v18502_v29, %v8500_v33  ;;  %v8503_v28 = vadd.f32 %v8502_v48, %v18422_v4  ;;  %v8504_v52 = vpop.f32.mrb[91].mxu1  ;;  %v10126_v59 = vadd.f32 %v11443_v40, %v9853_v34  ;;  %v9997_v3 = vpop.f32.mrb[101].mxu0  ;;  %v9854_v29 = vadd.f32 %v18597_v16, %v9816_v26 }
 0x9a6   : > { %v10124_v4 = vadd.f32 %v9997_v3, %v9851_v35  ;;  %v11444_v24 = vpop.f32.mrb[102].mxu0  ;;  %v9857_v3 = vadd.f32 %v18597_v16, %v9819_v42 }
 0x9a7   : > { %v9822_v58 = vadd.f32 %v18505_v18, %v8503_v28  ;;  %v10165_v54 = vadd.f32 %v18605_v38, %v10126_v59  ;;  %v10127_v47 = vadd.f32 %v11444_v24, %v9854_v29  ;;  %v10000_v33 = vpop.f32.mrb[103].mxu0 }
 0x9a8   : > { %v10163_v48 = vadd.f32 %v18605_v38, %v10124_v4  ;;  %v10125_v6 = vadd.f32 %v10000_v33, %v9852_v49 }
 0x9a9   : > { %10197 = vst.msk [vmem:[%s12277_s20 + $0x10] sm:$0xff] %vm2565_vm1, %v10165_v54  ;;  %v10166_v18 = vadd.f32 %v18605_v38, %v10127_v47  ;;  %v9858_v54 = vadd.f32 %v18597_v16, %v9820_v9 }
 0x9aa   : > { %v8507_v52 = vpop.f32.mrb[92].mxu1  ;;  %10195 = vst.msk [vmem:[%s12277_s20] sm:$0xff] %vm2565_vm1, %v10163_v48  ;;  %v10164_v25 = vadd.f32 %v18605_v38, %v10125_v6 }
 0x9ab   : > { %v8508_v26 = vadd.f32 %v8507_v52, %v18429_v14  ;;  %v8509_v28 = vpop.f32.mrb[93].mxu1  ;;  %10198 = vst.msk [vmem:[%s12277_s20 + $0x18] sm:$0xff] %vm2565_vm1, %v10166_v18  ;;  %v9855_v14 = vadd.f32 %v18597_v16, %v9817_v51 }
 0x9ac   : > { %v8510_v34 = vpop.f32.mrb[94].mxu1  ;;  %10196 = vst.msk [vmem:[%s12277_s20 + $0x8] sm:$0xff] %vm2565_vm1, %v10164_v25  ;;  %v11447_v29 = vpop.f32.mrb[104].mxu0 }
 0x9ad   : > { %v9823_v40 = vadd.f32 %v18514_v10, %v8508_v26  ;;  %v8511_v35 = vadd.f32 %v8510_v34, %v18431_v20  ;;  %v8512_v59 = vpop.f32.mrb[95].mxu1  ;;  %v10130_v24 = vadd.f32 %v11447_v29, %v9857_v3  ;;  %v10013_v49 = vpop.f32.mrb[105].mxu0  ;;  %v9856_v20 = vadd.f32 %v18597_v16, %v18579_v62 }
 0x9ae   : > { %v10128_v47 = vadd.f32 %v10013_v49, %v9855_v14  ;;  %v11448_v10 = vpop.f32.mrb[106].mxu0  ;;  %v9859_v59 = vadd.f32 %v18597_v16, %v9821_v55  ;;  %v9860_v49 = vadd.f32 %v18597_v16, %v9822_v58 }
 0x9af   : > { %v9824_v4 = vadd.f32 %v18517_v5, %v8511_v35  ;;  %v10169_v42 = vadd.f32 %v18605_v38, %v10130_v24  ;;  %v10131_v33 = vadd.f32 %v11448_v10, %v9858_v54  ;;  %v10016_v48 = vpop.f32.mrb[107].mxu0  ;;  %v9861_v35 = vadd.f32 %v18597_v16, %v9823_v40 }
 0x9b0   : > { %v10167_v51 = vadd.f32 %v18605_v38, %v10128_v47  ;;  %v10129_v6 = vadd.f32 %v10016_v48, %v9856_v20 }
 0x9b1   : > { %10201 = vst.msk [vmem:[%s12277_s20 + $0x30] sm:$0xff] %vm2565_vm1, %v10169_v42  ;;  %v10170_v52 = vadd.f32 %v18605_v38, %v10131_v33 }
 0x9b2   : > { %v8515_v5 = vpop.f32.mrb[96].mxu1  ;;  %10199 = vst.msk [vmem:[%s12277_s20 + $0x20] sm:$0xff] %vm2565_vm1, %v10167_v51  ;;  %v10168_v62 = vadd.f32 %v18605_v38, %v10129_v6 }
 0x9b3   : > { %v8516_v9 = vadd.f32 %v8515_v5, %v18436_v0  ;;  %v8517_v18 = vpop.f32.mrb[97].mxu1  ;;  %10202 = vst.msk [vmem:[%s12277_s20 + $0x38] sm:$0xff] %vm2565_vm1, %v10170_v52 }
 0x9b4   : > { %v8518_v26 = vpop.f32.mrb[98].mxu1  ;;  %10200 = vst.msk [vmem:[%s12277_s20 + $0x28] sm:$0xff] %vm2565_vm1, %v10168_v62  ;;  %v11451_v0 = vpop.f32.mrb[108].mxu0 }
 0x9b5   : > { %v18644_v28 = vadd.f32 %v18521_v31, %v8516_v9  ;;  %v8519_v25 = vadd.f32 %v8518_v26, %v18438_v41  ;;  %v8520_v34 = vpop.f32.mrb[99].mxu1  ;;  %v10134_v29 = vadd.f32 %v11451_v0, %v9861_v35  ;;  %v10029_v14 = vpop.f32.mrb[109].mxu0  ;;  %v9862_v31 = vadd.f32 %v18597_v16, %v9824_v4 }
 0x9b6   : > { %v10132_v24 = vadd.f32 %v10029_v14, %v9859_v59  ;;  %v11452_v41 = vpop.f32.mrb[110].mxu0 }
 0x9b7   : > { %v18652_v3 = vadd.f32 %v18525_v21, %v8519_v25  ;;  %v10173_v40 = vadd.f32 %v18605_v38, %v10134_v29  ;;  %v10135_v54 = vadd.f32 %v11452_v41, %v9862_v31  ;;  %v10032_v47 = vpop.f32.mrb[111].mxu0 }
 0x9b8   : > { %v10171_v55 = vadd.f32 %v18605_v38, %v10132_v24  ;;  %v10133_v10 = vadd.f32 %v10032_v47, %v9860_v49 }
 0x9b9   : > { %10205 = vst.msk [vmem:[%s12277_s20 + $0x50] sm:$0xff] %vm2565_vm1, %v10173_v40  ;;  %v10174_v20 = vadd.f32 %v18605_v38, %v10135_v54 }
 0x9ba   : > { %10203 = vst.msk [vmem:[%s12277_s20 + $0x40] sm:$0xff] %vm2565_vm1, %v10171_v55  ;;  %v10172_v58 = vadd.f32 %v18605_v38, %v10133_v10 }
 0x9bb   : > { %10206 = vst.msk [vmem:[%s12277_s20 + $0x58] sm:$0xff] %vm2565_vm1, %v10174_v20 }
 0x9bc   : > { %v8523_v21 = vpop.f32.mrb[100].mxu1  ;;  %10204 = vst.msk [vmem:[%s12277_s20 + $0x48] sm:$0xff] %vm2565_vm1, %v10172_v58 }
 0x9bd   : > { %v8524_v4 = vadd.f32 %v8523_v21, %v18443_v1  ;;  %v8525_v42 = vpop.f32.mrb[101].mxu1 }
 0x9be   : > { %v8526_v33 = vpop.f32.mrb[102].mxu1 }
 0x9bf   : > { %v18668_v48 = vadd.f32 %v18527_v12, %v8524_v4  ;;  %v8527_v51 = vadd.f32 %v8526_v33, %v18445_v39  ;;  %v8528_v6 = vpop.f32.mrb[103].mxu1 }
 0x9c1   : > { %v18674_v5 = vadd.f32 %v18531_v17, %v8527_v51 }
 0x9c4   : > { %v8531_v1 = vpop.f32.mrb[104].mxu1 }
 0x9c5   : > { %v8532_v52 = vadd.f32 %v8531_v1, %v18456_v43  ;;  %v8533_v9 = vpop.f32.mrb[105].mxu1 }
 0x9c6   : > { %v8534_v18 = vpop.f32.mrb[106].mxu1 }
 0x9c7   : > { %v18678_v62 = vadd.f32 %v18535_v13, %v8532_v52  ;;  %v8535_v26 = vadd.f32 %v8534_v18, %v18460_v23  ;;  %v8536_v12 = vpop.f32.mrb[107].mxu1  ;;  %v20269_v18 = vld [vmem:[#allocation49_spill] sm:$0xff] }
 0x9c9   : > { %v18682_v25 = vadd.f32 %v18537_v30, %v8535_v26 }
 0x9ce   : > { %v8539_v39 = vpop.f32.mrb[108].mxu1 }
 0x9cf   : > { %v8540_v34 = vadd.f32 %v8539_v39, %v18472_v27  ;;  %v8541_v35 = vpop.f32.mrb[109].mxu1  ;;  %v20270_v39 = vld [vmem:[#allocation55_spill] sm:$0xff] }
 0x9d0   : > { %v8542_v17 = vpop.f32.mrb[110].mxu1  ;;  %v20271_v35 = vld [vmem:[#allocation62_spill] sm:$0xff] }
 0x9d1   : > { %v18686_v0 = vadd.f32 %v18543_v57, %v8540_v34  ;;  %v8543_v43 = vadd.f32 %v8542_v17, %v18478_v8  ;;  %v8544_v59 = vpop.f32.mrb[111].mxu1 }
 0x9d3   : > { %v18690_v13 = vadd.f32 %v18545_v45, %v8543_v43 }
 0x9d6   : > { %v8547_v29 = vpop.f32.mrb[112].mxu1 }
 0x9d7   : > { %v8548_v23 = vadd.f32 %v8547_v29, %v18490_v56  ;;  %v8549_v14 = vpop.f32.mrb[113].mxu1  ;;  %v20272_v29 = vld [vmem:[#allocation56_spill] sm:$0xff] }
 0x9d8   : > { %v8550_v30 = vpop.f32.mrb[114].mxu1 }
 0x9d9   : > { %v18694_v31 = vadd.f32 %v18551_v2, %v8548_v23  ;;  %v8551_v27 = vadd.f32 %v8550_v30, %v18496_v53  ;;  %v8552_v24 = vpop.f32.mrb[115].mxu1  ;;  %v9865_v30 = vadd.f32 %v18597_v16, %v18668_v48 }
 0x9da   : > { %v9863_v24 = vadd.f32 %v18597_v16, %v18644_v28 }
 0x9db   : > { %v18698_v57 = vadd.f32 %v18553_v63, %v8551_v27 }
 0x9e2   : > { %v8555_v41 = vpop.f32.mrb[116].mxu1 }
 0x9e3   : > { %v8556_v8 = vadd.f32 %v8555_v41, %v18508_v22  ;;  %v8557_v49 = vpop.f32.mrb[117].mxu1 }
 0x9e4   : > { %v8558_v45 = vpop.f32.mrb[118].mxu1 }
 0x9e5   : > { %v18702_v40 = vadd.f32 %v18556_v36, %v8556_v8  ;;  %v8559_v56 = vadd.f32 %v8558_v45, %v18510_v19  ;;  %v8560_v54 = vpop.f32.mrb[119].mxu1  ;;  %v20266_v19 = vld [vmem:[#allocation57_spill] sm:$0xff] }
 0x9e7   : > { %v18706_v2 = vadd.f32 %v18560_v60, %v8559_v56 }
 0x9ea   : > { %v8563_v47 = vpop.f32.mrb[120].mxu1 }
 0x9eb   : > { %v8564_v53 = vadd.f32 %v8563_v47, %v18519_v32  ;;  %v8565_v55 = vpop.f32.mrb[121].mxu1  ;;  %v20267_v32 = vld [vmem:[#allocation54_spill] sm:$0xff] }
 0x9ec   : > { %v8566_v63 = vpop.f32.mrb[122].mxu1 }
 0x9ed   : > { %v18710_v10 = vadd.f32 %v18563_v15, %v8564_v53  ;;  %v8567_v22 = vadd.f32 %v8566_v63, %v18523_v37  ;;  %v8568_v21 = vpop.f32.mrb[123].mxu1  ;;  %v20268_v37 = vld [vmem:[#allocation70_spill] sm:$0xff]  ;;  %v9867_v63 = vadd.f32 %v18597_v16, %v18678_v62 }
 0x9ef   : > { %v18714_v36 = vadd.f32 %v18566_v7, %v8567_v22 }
 0x9f2   : > { %v8571_v20 = vpop.f32.mrb[124].mxu1 }
 0x9f3   : > { %v8572_v4 = vadd.f32 %v8571_v20, %v20266_v19  ;;  %v8573_v42 = vpop.f32.mrb[125].mxu1  ;;  %v9870_v20 = vadd.f32 %v18597_v16, %v18690_v13 }
 0x9f4   : > { %v8574_v60 = vpop.f32.mrb[126].mxu1  ;;  %v9868_v42 = vadd.f32 %v18597_v16, %v18682_v25  ;;  %v9873_v25 = vadd.f32 %v18597_v16, %v18702_v40 }
 0x9f5   : > { %v18718_v58 = vadd.f32 %v18571_v44, %v8572_v4  ;;  %v8575_v33 = vadd.f32 %v8574_v60, %v20267_v32  ;;  %v8576_v51 = vpop.f32.mrb[127].mxu1 }
 0x9f7   : > { %v18722_v15 = vadd.f32 %v18573_v61, %v8575_v33 }
 0x9fa   : > { %v8579_v6 = vpop.f32.mrb[128].mxu1 }
 0x9fb   : > { %v8580_v1 = vadd.f32 %v8579_v6, %v20268_v37  ;;  %v8581_v52 = vpop.f32.mrb[129].mxu1  ;;  %v9871_v37 = vadd.f32 %v18597_v16, %v18694_v31 }
 0x9fc   : > { %v8582_v7 = vpop.f32.mrb[130].mxu1 }
 0x9fd   : > { %v18726_v9 = vadd.f32 %v18581_v11, %v8580_v1  ;;  %v8583_v26 = vadd.f32 %v8582_v7, %v20269_v18  ;;  %v8584_v12 = vpop.f32.mrb[131].mxu1  ;;  %v9874_v7 = vadd.f32 %v18597_v16, %v18706_v2 }
 0x9fe   : > { %v9872_v12 = vadd.f32 %v18597_v16, %v18698_v57  ;;  %v9877_v57 = vadd.f32 %v18597_v16, %v18718_v58 }
 0x9ff   : > { %v18730_v44 = vadd.f32 %v20270_v39, %v8583_v26 }
 0xa02   : > { %v8587_v34 = vpop.f32.mrb[132].mxu1 }
 0xa03   : > { %v8588_v17 = vadd.f32 %v8587_v34, %v20271_v35  ;;  %v8589_v43 = vpop.f32.mrb[133].mxu1 }
 0xa04   : > { %v8590_v61 = vpop.f32.mrb[134].mxu1 }
 0xa05   : > { %v18734_v59 = vadd.f32 %v18589_v50, %v8588_v17  ;;  %v8591_v23 = vadd.f32 %v8590_v61, %v20272_v29  ;;  %v8592_v14 = vpop.f32.mrb[135].mxu1  ;;  %v9866_v50 = vadd.f32 %v18597_v16, %v18674_v5  ;;  %v9875_v61 = vadd.f32 %v18597_v16, %v18710_v10 }
 0xa06   : > { %v9878_v14 = vadd.f32 %v18597_v16, %v18722_v15 }
 0xa07   : > { %v18738_v11 = vadd.f32 %v18591_v46, %v8591_v23  ;;  %v9864_v46 = vadd.f32 %v18597_v16, %v18652_v3  ;;  %v9869_v3 = vadd.f32 %v18597_v16, %v18686_v0 }
 0xa0a   : > { %v11455_v27 = vpop.f32.mrb[136].mxu1 }
 0xa0b   : > { %v10138_v41 = vadd.f32 %v11455_v27, %v9865_v30  ;;  %v10045_v8 = vpop.f32.mrb[137].mxu1 }
 0xa0c   : > { %v10136_v49 = vadd.f32 %v10045_v8, %v9863_v24  ;;  %v11456_v45 = vpop.f32.mrb[138].mxu1  ;;  %v9876_v24 = vadd.f32 %v18597_v16, %v18714_v36  ;;  %v9881_v36 = vadd.f32 %v18597_v16, %v18734_v59  ;;  %v9880_v59 = vadd.f32 %v18597_v16, %v18730_v44 }
 0xa0d   : > { %v10177_v56 = vadd.f32 %v18605_v38, %v10138_v41  ;;  %v10139_v48 = vadd.f32 %v11456_v45, %v9866_v50  ;;  %v10048_v54 = vpop.f32.mrb[139].mxu1 }
 0xa0e   : > { %v10175_v47 = vadd.f32 %v18605_v38, %v10136_v49  ;;  %v10137_v53 = vadd.f32 %v10048_v54, %v9864_v46  ;;  %v9879_v46 = vadd.f32 %v18597_v16, %v18726_v9  ;;  %v9882_v54 = vadd.f32 %v18597_v16, %v18738_v11 }
 0xa0f   : > { %10209 = vst.msk [vmem:[%s12277_s20 + $0x70] sm:$0xff] %vm2565_vm1, %v10177_v56  ;;  %v10178_v28 = vadd.f32 %v18605_v38, %v10139_v48 }
 0xa10   : > { %10207 = vst.msk [vmem:[%s12277_s20 + $0x60] sm:$0xff] %vm2565_vm1, %v10175_v47  ;;  %v10176_v5 = vadd.f32 %v18605_v38, %v10137_v53 }
 0xa11   : > { %10210 = vst.msk [vmem:[%s12277_s20 + $0x78] sm:$0xff] %vm2565_vm1, %v10178_v28 }
 0xa12   : > { %10208 = vst.msk [vmem:[%s12277_s20 + $0x68] sm:$0xff] %vm2565_vm1, %v10176_v5  ;;  %v11459_v55 = vpop.f32.mrb[140].mxu1 }
 0xa13   : > { %v10142_v22 = vadd.f32 %v11459_v55, %v9869_v3  ;;  %v10061_v21 = vpop.f32.mrb[141].mxu1 }
 0xa14   : > { %v10140_v19 = vadd.f32 %v10061_v21, %v9867_v63  ;;  %v11460_v4 = vpop.f32.mrb[142].mxu1 }
 0xa15   : > { %v10181_v0 = vadd.f32 %v18605_v38, %v10142_v22  ;;  %v10143_v60 = vadd.f32 %v11460_v4, %v9870_v20  ;;  %v10064_v32 = vpop.f32.mrb[143].mxu1 }
 0xa16   : > { %v10179_v33 = vadd.f32 %v18605_v38, %v10140_v19  ;;  %v10141_v51 = vadd.f32 %v10064_v32, %v9868_v42 }
 0xa17   : > { %10213 = vst.msk [vmem:[%s12277_s20 + $0x90] sm:$0xff] %vm2565_vm1, %v10181_v0  ;;  %v10182_v62 = vadd.f32 %v18605_v38, %v10143_v60 }
 0xa18   : > { %10211 = vst.msk [vmem:[%s12277_s20 + $0x80] sm:$0xff] %vm2565_vm1, %v10179_v33  ;;  %v10180_v13 = vadd.f32 %v18605_v38, %v10141_v51 }
 0xa19   : > { %10214 = vst.msk [vmem:[%s12277_s20 + $0x98] sm:$0xff] %vm2565_vm1, %v10182_v62 }
 0xa1a   : > { %10212 = vst.msk [vmem:[%s12277_s20 + $0x88] sm:$0xff] %vm2565_vm1, %v10180_v13  ;;  %v11463_v6 = vpop.f32.mrb[144].mxu1 }
 0xa1b   : > { %v10146_v1 = vadd.f32 %v11463_v6, %v9873_v25  ;;  %v10077_v52 = vpop.f32.mrb[145].mxu1 }
 0xa1c   : > { %v10144_v18 = vadd.f32 %v10077_v52, %v9871_v37  ;;  %v11464_v26 = vpop.f32.mrb[146].mxu1 }
 0xa1d   : > { %v10185_v40 = vadd.f32 %v18605_v38, %v10146_v1  ;;  %v10147_v39 = vadd.f32 %v11464_v26, %v9874_v7  ;;  %v10080_v34 = vpop.f32.mrb[147].mxu1 }
 0xa1e   : > { %v10183_v35 = vadd.f32 %v18605_v38, %v10144_v18  ;;  %v10145_v17 = vadd.f32 %v10080_v34, %v9872_v12 }
 0xa1f   : > { %10217 = vst.msk [vmem:[%s12277_s20 + $0xb0] sm:$0xff] %vm2565_vm1, %v10185_v40  ;;  %v10186_v31 = vadd.f32 %v18605_v38, %v10147_v39 }
 0xa20   : > { %10215 = vst.msk [vmem:[%s12277_s20 + $0xa0] sm:$0xff] %vm2565_vm1, %v10183_v35  ;;  %v10184_v2 = vadd.f32 %v18605_v38, %v10145_v17 }
 0xa21   : > { %10218 = vst.msk [vmem:[%s12277_s20 + $0xb8] sm:$0xff] %vm2565_vm1, %v10186_v31 }
 0xa22   : > { %10216 = vst.msk [vmem:[%s12277_s20 + $0xa8] sm:$0xff] %vm2565_vm1, %v10184_v2  ;;  %v11467_v43 = vpop.f32.mrb[148].mxu1 }
 0xa23   : > { %v10150_v29 = vadd.f32 %v11467_v43, %v9877_v57  ;;  %v10093_v23 = vpop.f32.mrb[149].mxu1 }
 0xa24   : > { %v10148_v30 = vadd.f32 %v10093_v23, %v9875_v61  ;;  %v11468_v27 = vpop.f32.mrb[150].mxu1 }
 0xa25   : > { %v10189_v58 = vadd.f32 %v18605_v38, %v10150_v29  ;;  %v10151_v41 = vadd.f32 %v11468_v27, %v9878_v14  ;;  %v10096_v8 = vpop.f32.mrb[151].mxu1 }
 0xa26   : > { %v10187_v50 = vadd.f32 %v18605_v38, %v10148_v30  ;;  %v10149_v49 = vadd.f32 %v10096_v8, %v9876_v24 }
 0xa27   : > { %10221 = vst.msk [vmem:[%s12277_s20 + $0xd0] sm:$0xff] %vm2565_vm1, %v10189_v58  ;;  %v10190_v10 = vadd.f32 %v18605_v38, %v10151_v41 }
 0xa28   : > { %10219 = vst.msk [vmem:[%s12277_s20 + $0xc0] sm:$0xff] %vm2565_vm1, %v10187_v50  ;;  %v10188_v15 = vadd.f32 %v18605_v38, %v10149_v49 }
 0xa29   : > { %10222 = vst.msk [vmem:[%s12277_s20 + $0xd8] sm:$0xff] %vm2565_vm1, %v10190_v10 }
 0xa2a   : > { %10220 = vst.msk [vmem:[%s12277_s20 + $0xc8] sm:$0xff] %vm2565_vm1, %v10188_v15  ;;  %v11471_v45 = vpop.f32.mrb[152].mxu1 }
 0xa2b   : > { %v10154_v56 = vadd.f32 %v11471_v45, %v9881_v36  ;;  %v10109_v48 = vpop.f32.mrb[153].mxu1 }
 0xa2c   : > { %v10152_v47 = vadd.f32 %v10109_v48, %v9879_v46  ;;  %v11472_v53 = vpop.f32.mrb[154].mxu1 }
 0xa2d   : > { %v10193_v28 = vadd.f32 %v18605_v38, %v10154_v56  ;;  %v10155_v9 = vadd.f32 %v11472_v53, %v9882_v54  ;;  %v10112_v5 = vpop.f32.mrb[155].mxu1 }
 0xa2e   : > { %v10191_v3 = vadd.f32 %v18605_v38, %v10152_v47  ;;  %v10153_v55 = vadd.f32 %v10112_v5, %v9880_v59 }
 0xa2f   : > { %10225 = vst.msk [vmem:[%s12277_s20 + $0xf0] sm:$0xff] %vm2565_vm1, %v10193_v28  ;;  %v10194_v11 = vadd.f32 %v18605_v38, %v10155_v9 }
 0xa30   : > { %10223 = vst.msk [vmem:[%s12277_s20 + $0xe0] sm:$0xff] %vm2565_vm1, %v10191_v3  ;;  %v10192_v16 = vadd.f32 %v18605_v38, %v10153_v55 }
 0xa31   : > { %10226 = vst.msk [vmem:[%s12277_s20 + $0xf8] sm:$0xff] %vm2565_vm1, %v10194_v11 }
 0xa32   : > { %10224 = vst.msk [vmem:[%s12277_s20 + $0xe8] sm:$0xff] %vm2565_vm1, %v10192_v16 }
 0xa33   : > { %12078 = shalt.err (!%p12075_p4)
}
 0xa34   : > { %s12079_s20 = scalar_lea.hbm %s18838_s23, 4096  ;;  %s12083_s25 = scalar_lea.hbm %s18907_s15, 8192 }
 0xa35   : > { %p12080_p7 = scmp.ne.s32.totalorder %s18838_s23, %s12079_s20  ;;  %p12084_p10 = scmp.lt.u32.totalorder %s18838_s23, %s18907_s15 }
 0xa36   : > { %p12085_p11 = scmp.lt.u32.totalorder %s12083_s25, %s12079_s20  ;;  %p12087_p13 = scmp.lt.u32.totalorder %s12079_s20, %s18838_s23 }
 0xa37   : > { %p12081_p8 = pnand %p12080_p7, %p12257_p5 }
 0xa38   : > { %p12086_p12 = por %p12085_p11, %p12084_p10 }
 0xa39   : > { %p12082_p9 = pneg %p12081_p8 }
 0xa3a   : > { %p12088_p0 = por %p12087_p13, %p12086_p12 }
 0xa3c   : > { %p12089_p1 = pnand %p12088_p0, %p12082_p9 }
 0xa3e   : > { %12092 = shalt.err (!%p12089_p1)
}
 0xa3f   : > { %s12137_s27 = smov 128   ;;  %s12138_s1 = smov 8  }
 0xa40   : > { %11571 = dma.vmem_to_hbm [thread:$0]  (%p12257_p5), %s18840_s16, 4096, %s18838_s23, %s18851_s0, %s12137_s27, %s12137_s27, %s12138_s1  }
 0xa41 PF: > { %p11577_p2 = scmp.ge.s32.totalorder %s12127_s21, 2  ;;  %s10256_s24 = sand.u32 1, %s12115_s18  }
 0xa42   : > { %s10257_s20 = scalar_lea.sflag [#allocation5], %s10256_s24 }
 0xa43   : > { %p11574_p3 = pnand %p11577_p2, %p12261_p6 }
 0xa45   : > { %12110 = dma.done.wait (!%p11574_p3), %s10257_s20, 4096  }
 0xa46   : > { %12112 = vsyncadd (!%p11574_p3), %s10257_s20, 4294963200  ;;  %s20274_s21 = sld [smem:[#allocation8_spill]]  ;;  %s20275_s30 = sld [smem:[#allocation7_spill]] }
 0xa47   : > { %s20276_s20 = sld [smem:[#allocation9_spill]]  ;;  %s20277_s18 = smov %s12119_s19 }
 0xa4c   : > { %p25_p4 = scmp.ge.s32.totalorder %s20274_s21, 4   ;;  %s20278_s19 = smov %s20275_s30 }
 0xa4e   :  { %27 = sbr.rel (!%p25_p4) target bundleno = 6 (0x6), region = 127 }
 0xa55   :  { %10262 = vsyncpa [#allocation5], 1 }
 0xa56   :  { %10264 = vsyncpa [#allocation5 + $0x1], 1 }

</bundles_post_ra>
